<compile_context>
chip_gen: v5e
topology: v5e:2x2
jax: 0.10.0
libtpu: 0.0.40
codegen_flags: <defaults>
</compile_context>

<pallas_src>
import functools

import jax
import jax.numpy as jnp
from jax.experimental import pallas as pl
from jax.experimental.pallas import tpu as pltpu


# ------------------------------ fused kernel --------------------------------


def _fused_encoder_kernel(x_ref, w1_ref, b1_ref, g1_ref, be1_ref,
                          w2_ref, b2_ref, g2_ref, be2_ref, gmat_ref,
                          o_ref, col_ref, pad_ref,
                          *, cg, eps, neg_slope):
    Hp = x_ref.shape[1]          # H + 2 (pre-padded in the wrapper)
    Wp = x_ref.shape[2]          # W + 2
    C = x_ref.shape[3]           # lane-padded channel count (128)
    H, W = Hp - 2, Wp - 2
    HW = H * W
    count = float(HW * cg)       # elements per GroupNorm group

    def build_im2col(slice_fn):
        # 9 lane-aligned copies into the im2col scratch (col offset = t*C,
        # a multiple of 128), cast to bf16 at store time.
        for dh in range(3):
            for dw in range(3):
                t = dh * 3 + dw
                patch = slice_fn(dh, dw).reshape(HW, C)
                col_ref[:, t * C:(t + 1) * C] = patch.astype(col_ref.dtype)

    def conv_gn_lrelu(w_ref, b_ref, g_ref, be_ref):
        # single K = 9*C bf16 matmul on the MXU, f32 accumulation
        acc = jnp.dot(col_ref[...], w_ref[...],
                      preferred_element_type=jnp.float32)
        acc = acc + b_ref[...]                                   # (HW, C)
        # two-pass GroupNorm statistics via a group-aggregation matmul
        s = jnp.sum(acc, axis=0, keepdims=True)                  # (1, C)
        mean = jnp.dot(s, gmat_ref[...],
                       preferred_element_type=jnp.float32) / count
        cent = acc - mean
        ss = jnp.sum(cent * cent, axis=0, keepdims=True)         # (1, C)
        var = jnp.dot(ss, gmat_ref[...],
                      preferred_element_type=jnp.float32) / count
        inv = jax.lax.rsqrt(var + eps)                           # EUP
        y = cent * (inv * g_ref[...]) + be_ref[...]
        return jnp.where(y >= 0, y, neg_slope * y)               # (HW, C) f32

    # ---- layer 1: im2col straight from the pre-padded input tile ----
    build_im2col(lambda dh, dw: x_ref[0, dh:dh + H, dw:dw + W, :])
    h1 = conv_gn_lrelu(w1_ref, b1_ref, g1_ref, be1_ref)

    # ---- layer 2: h1 stays in VMEM; pad spatially, rebuild im2col ----
    # Zero the whole pad buffer every step (cheap, and safe under megacore
    # partitioning where program_id==0 may never run on the second core).
    pad_ref[...] = jnp.zeros_like(pad_ref)
    pad_ref[1:H + 1, 1:W + 1, :] = h1.reshape(H, W, C)
    build_im2col(lambda dh, dw: pad_ref[dh:dh + H, dw:dw + W, :])
    h2 = conv_gn_lrelu(w2_ref, b2_ref, g2_ref, be2_ref)

    # lane-dense (C = 128) store of the full output tile
    o_ref[...] = h2.reshape(1, H, W, C).astype(o_ref.dtype)


# -------------------------------- wrapper ------------------------------------


def _round_up(v, m):
    return (v + m - 1) // m * m


def encoder_specific_forward(x_nchw, params, *, groups=16, eps=1e-5,
                             neg_slope=0.2):
    """encoder_specific.forward: c2(c1(x)), both dcgan_conv blocks fused."""
    N, Cin, H, W = x_nchw.shape
    w1, b1, g1, be1 = params["c1"]
    w2, b2, g2, be2 = params["c2"]
    Cout = int(w1.shape[0])
    assert Cout % groups == 0
    cg = Cout // groups
    Cp = _round_up(max(Cin, Cout), 128)     # lane-dense channel padding

    # NCHW -> NHWC, spatial pad for the 3x3/pad-1 conv, channel pad to Cp.
    x = jnp.transpose(x_nchw, (0, 2, 3, 1)).astype(jnp.float32)
    x = jnp.pad(x, ((0, 0), (1, 1), (1, 1), (0, Cp - Cin)))

    def prep_w(w_oihw, cin_real):
        w = jnp.transpose(w_oihw, (2, 3, 1, 0))             # OIHW -> HWIO
        w = jnp.pad(w, ((0, 0), (0, 0), (0, Cp - cin_real), (0, Cp - Cout)))
        return w.reshape(9 * Cp, Cp).astype(jnp.bfloat16)   # im2col weights

    def prep_vec(v):
        return jnp.pad(v, (0, Cp - Cout)).reshape(1, Cp).astype(jnp.float32)

    w1p, w2p = prep_w(w1, Cin), prep_w(w2, Cout)
    b1p, g1p, be1p = prep_vec(b1), prep_vec(g1), prep_vec(be1)
    b2p, g2p, be2p = prep_vec(b2), prep_vec(g2), prep_vec(be2)

    # Group-aggregation matrix: 1 where channels share a GroupNorm group and
    # both are real (< Cout); padded channels stay exactly zero end-to-end.
    ids = jnp.arange(Cp) // cg
    valid = jnp.arange(Cp) < Cout
    gmat = ((ids[:, None] == ids[None, :])
            & valid[:, None] & valid[None, :]).astype(jnp.float32)

    kernel = functools.partial(_fused_encoder_kernel, cg=cg, eps=eps,
                               neg_slope=neg_slope)

    vec_spec = pl.BlockSpec((1, Cp), lambda n: (0, 0))
    w_spec = pl.BlockSpec((9 * Cp, Cp), lambda n: (0, 0))

    out = pl.pallas_call(
        kernel,
        out_shape=jax.ShapeDtypeStruct((N, H, W, Cp), jnp.float32),
        grid_spec=pltpu.PrefetchScalarGridSpec(
            num_scalar_prefetch=0,
            grid=(N,),   # one image per step; batch axis stays parallel
            in_specs=[
                pl.BlockSpec((1, H + 2, W + 2, Cp), lambda n: (n, 0, 0, 0)),
                w_spec, vec_spec, vec_spec, vec_spec,
                w_spec, vec_spec, vec_spec, vec_spec,
                pl.BlockSpec((Cp, Cp), lambda n: (0, 0)),
            ],
            out_specs=pl.BlockSpec((1, H, W, Cp), lambda n: (n, 0, 0, 0)),
            scratch_shapes=[
                pltpu.VMEM((H * W, 9 * Cp), jnp.bfloat16),    # im2col buffer
                pltpu.VMEM((H + 2, W + 2, Cp), jnp.float32),  # padded h1
            ],
        ),
        compiler_params=pltpu.CompilerParams(
            dimension_semantics=("parallel",)),
    )(x, w1p, b1p, g1p, be1p, w2p, b2p, g2p, be2p, gmat)

    out = out[:, :, :, :Cout]                 # drop zero-padded channels
    return jnp.transpose(out, (0, 3, 1, 2))   # NHWC -> NCHW


# --------------------------- parameter init ---------------------------------


def init_params(key, nc=64, nf=64):
    def conv_block(key, cin, cout):
        k1, k2, k3, k4 = jax.random.split(key, 4)
        bound = 1.0 / jnp.sqrt(cin * 9.0)   # PyTorch conv default fan-in bound
        w = jax.random.uniform(k1, (cout, cin, 3, 3), jnp.float32,
                               -bound, bound)
        b = jax.random.uniform(k2, (cout,), jnp.float32, -bound, bound)
        gamma = 1.0 + 0.1 * jax.random.normal(k3, (cout,), jnp.float32)
        beta = 0.1 * jax.random.normal(k4, (cout,), jnp.float32)
        return (w, b, gamma, beta)

    k1, k2 = jax.random.split(key)
    return {"c1": conv_block(k1, nc, nf), "c2": conv_block(k2, nf, nf)}


# ------------------------- pure-JAX reference --------------------------------


def _ref_dcgan_conv(x_nchw, w_oihw, b, gamma, beta, groups=16, eps=1e-5,
                    neg_slope=0.2, quantize=False):
    if quantize:  # mimic the kernel's bf16 matmul inputs (f32 accumulation)
        x_nchw = x_nchw.astype(jnp.bfloat16).astype(jnp.float32)
        w_oihw = w_oihw.astype(jnp.bfloat16).astype(jnp.float32)
    y = jax.lax.conv_general_dilated(
        x_nchw, w_oihw, window_strides=(1, 1), padding=((1, 1), (1, 1)),
        dimension_numbers=("NCHW", "OIHW", "NCHW"),
        precision=jax.lax.Precision.HIGHEST)
    y = y + b[None, :, None, None]
    N, C, H, W = y.shape
    yr = y.reshape(N, groups, C // groups, H, W)
    mean = yr.mean(axis=(2, 3, 4), keepdims=True)
    var = ((yr - mean) ** 2).mean(axis=(2, 3, 4), keepdims=True)
    yn = ((yr - mean) / jnp.sqrt(var + eps)).reshape(N, C, H, W)
    yn = yn * gamma[None, :, None, None] + beta[None, :, None, None]
    return jnp.where(yn >= 0, yn, neg_slope * yn)


def _ref_forward(x_nchw, params, quantize=False):
    h = x_nchw
    for layer in ("c1", "c2"):
        w, b, g, be = params[layer]
        h = _ref_dcgan_conv(h, w, b, g, be, quantize=quantize)
    return h


# --------------------------------- main --------------------------------------

if __name__ == "__main__":
    key = jax.random.PRNGKey(0)
    kx, kp = jax.random.split(key)

    # module-consistent shapes: nc = nf = 64 (GroupNorm(16) needs 16 | C)
    N, C, H, W = 2, 64, 16, 16
    x = jax.random.normal(kx, (N, C, H, W), jnp.float32)
    params = init_params(kp, nc=C, nf=C)

    out = jax.block_until_ready(encoder_specific_forward(x, params))
    assert out.shape == (N, C, H, W), out.shape

    # Kernel-correctness check against a reference that applies the same bf16
    # quantisation of matmul inputs (isolates accumulation-order differences).
    ref_q = jax.block_until_ready(_ref_forward(x, params, quantize=True))
    err_q = float(jnp.max(jnp.abs(out - ref_q)))
    assert err_q < 5e-3, f"max abs error vs bf16-quantised reference: {err_q}"

    # Fidelity sanity check against the full-f32 module semantics.
    ref_f = jax.block_until_ready(_ref_forward(x, params, quantize=False))
    err_f = float(jnp.max(jnp.abs(out - ref_f)))
    assert err_f < 1e-1, f"max abs error vs f32 reference: {err_f}"

    print("KERNEL_OK")
</pallas_src>

<mosaic_0001>
module attributes {stable_mosaic.version = 11 : i64} {
  func.func @_fused_encoder_kernel(%arg0: i32, %arg1: memref<1x18x18x128xf32, #tpu.memory_space<vmem>>, %arg2: memref<1152x128xbf16, #tpu.memory_space<vmem>>, %arg3: memref<1x128xf32, #tpu.memory_space<vmem>>, %arg4: memref<1x128xf32, #tpu.memory_space<vmem>>, %arg5: memref<1x128xf32, #tpu.memory_space<vmem>>, %arg6: memref<1152x128xbf16, #tpu.memory_space<vmem>>, %arg7: memref<1x128xf32, #tpu.memory_space<vmem>>, %arg8: memref<1x128xf32, #tpu.memory_space<vmem>>, %arg9: memref<1x128xf32, #tpu.memory_space<vmem>>, %arg10: memref<128x128xf32, #tpu.memory_space<vmem>>, %arg11: memref<1x16x16x128xf32, #tpu.memory_space<vmem>>, %arg12: memref<256x1152xbf16, #tpu.memory_space<vmem>>, %arg13: memref<18x18x128xf32, #tpu.memory_space<vmem>>) attributes {dimension_semantics = [#tpu.dimension_semantics<parallel>], iteration_bounds = array<i64: 2>, scalar_prefetch = 0 : i64, scratch_operands = 2 : i64, tpu.core_type = #tpu.core_type<tc>, window_params = [{transform_indices = @transform_0, window_bounds = array<i64: 1, 18, 18, 128>}, {pipeline_mode = #tpu.pipeline_mode<synchronous>, transform_indices = @transform_1, window_bounds = array<i64: 1152, 128>}, {pipeline_mode = #tpu.pipeline_mode<synchronous>, transform_indices = @transform_2, window_bounds = array<i64: 1, 128>}, {pipeline_mode = #tpu.pipeline_mode<synchronous>, transform_indices = @transform_3, window_bounds = array<i64: 1, 128>}, {pipeline_mode = #tpu.pipeline_mode<synchronous>, transform_indices = @transform_4, window_bounds = array<i64: 1, 128>}, {pipeline_mode = #tpu.pipeline_mode<synchronous>, transform_indices = @transform_5, window_bounds = array<i64: 1152, 128>}, {pipeline_mode = #tpu.pipeline_mode<synchronous>, transform_indices = @transform_6, window_bounds = array<i64: 1, 128>}, {pipeline_mode = #tpu.pipeline_mode<synchronous>, transform_indices = @transform_7, window_bounds = array<i64: 1, 128>}, {pipeline_mode = #tpu.pipeline_mode<synchronous>, transform_indices = @transform_8, window_bounds = array<i64: 1, 128>}, {pipeline_mode = #tpu.pipeline_mode<synchronous>, transform_indices = @transform_9, window_bounds = array<i64: 128, 128>}, {transform_indices = @transform_10, window_bounds = array<i64: 1, 16, 16, 128>}]} {
    %c0 = arith.constant 0 : index
    %c0_0 = arith.constant 0 : index
    %c0_1 = arith.constant 0 : index
    %c0_2 = arith.constant 0 : index
    %0 = vector.load %arg1[%c0, %c0_0, %c0_1, %c0_2] : memref<1x18x18x128xf32, #tpu.memory_space<vmem>>, vector<1x16x16x128xf32>
    %1 = vector.shape_cast %0 : vector<1x16x16x128xf32> to vector<16x16x128xf32>
    %2 = vector.shape_cast %1 : vector<16x16x128xf32> to vector<256x128xf32>
    %3 = arith.truncf %2 : vector<256x128xf32> to vector<256x128xbf16>
    %c0_3 = arith.constant 0 : index
    %c0_4 = arith.constant 0 : index
    %4 = vector.load %arg12[%c0_3, %c0_4] : memref<256x1152xbf16, #tpu.memory_space<vmem>>, vector<256x128xbf16>
    tpu.vector_store %arg12[%c0_3, %c0_4], %3 {strides = array<i32>} : memref<256x1152xbf16, #tpu.memory_space<vmem>>, vector<256x128xbf16>,
    %c0_5 = arith.constant 0 : index
    %c0_6 = arith.constant 0 : index
    %c1 = arith.constant 1 : index
    %c0_7 = arith.constant 0 : index
    %5 = vector.load %arg1[%c0_5, %c0_6, %c1, %c0_7] : memref<1x18x18x128xf32, #tpu.memory_space<vmem>>, vector<1x16x16x128xf32>
    %6 = vector.shape_cast %5 : vector<1x16x16x128xf32> to vector<16x16x128xf32>
    %7 = vector.shape_cast %6 : vector<16x16x128xf32> to vector<256x128xf32>
    %8 = arith.truncf %7 : vector<256x128xf32> to vector<256x128xbf16>
    %c0_8 = arith.constant 0 : index
    %c128 = arith.constant 128 : index
    %9 = vector.load %arg12[%c0_8, %c128] : memref<256x1152xbf16, #tpu.memory_space<vmem>>, vector<256x128xbf16>
    tpu.vector_store %arg12[%c0_8, %c128], %8 {strides = array<i32>} : memref<256x1152xbf16, #tpu.memory_space<vmem>>, vector<256x128xbf16>,
    %c0_9 = arith.constant 0 : index
    %c0_10 = arith.constant 0 : index
    %c2 = arith.constant 2 : index
    %c0_11 = arith.constant 0 : index
    %10 = vector.load %arg1[%c0_9, %c0_10, %c2, %c0_11] : memref<1x18x18x128xf32, #tpu.memory_space<vmem>>, vector<1x16x16x128xf32>
    %11 = vector.shape_cast %10 : vector<1x16x16x128xf32> to vector<16x16x128xf32>
    %12 = vector.shape_cast %11 : vector<16x16x128xf32> to vector<256x128xf32>
    %13 = arith.truncf %12 : vector<256x128xf32> to vector<256x128xbf16>
    %c0_12 = arith.constant 0 : index
    %c256 = arith.constant 256 : index
    %14 = vector.load %arg12[%c0_12, %c256] : memref<256x1152xbf16, #tpu.memory_space<vmem>>, vector<256x128xbf16>
    tpu.vector_store %arg12[%c0_12, %c256], %13 {strides = array<i32>} : memref<256x1152xbf16, #tpu.memory_space<vmem>>, vector<256x128xbf16>,
    %c0_13 = arith.constant 0 : index
    %c1_14 = arith.constant 1 : index
    %c0_15 = arith.constant 0 : index
    %c0_16 = arith.constant 0 : index
    %15 = vector.load %arg1[%c0_13, %c1_14, %c0_15, %c0_16] : memref<1x18x18x128xf32, #tpu.memory_space<vmem>>, vector<1x16x16x128xf32>
    %16 = vector.shape_cast %15 : vector<1x16x16x128xf32> to vector<16x16x128xf32>
    %17 = vector.shape_cast %16 : vector<16x16x128xf32> to vector<256x128xf32>
    %18 = arith.truncf %17 : vector<256x128xf32> to vector<256x128xbf16>
    %c0_17 = arith.constant 0 : index
    %c384 = arith.constant 384 : index
    %19 = vector.load %arg12[%c0_17, %c384] : memref<256x1152xbf16, #tpu.memory_space<vmem>>, vector<256x128xbf16>
    tpu.vector_store %arg12[%c0_17, %c384], %18 {strides = array<i32>} : memref<256x1152xbf16, #tpu.memory_space<vmem>>, vector<256x128xbf16>,
    %c0_18 = arith.constant 0 : index
    %c1_19 = arith.constant 1 : index
    %c1_20 = arith.constant 1 : index
    %c0_21 = arith.constant 0 : index
    %20 = vector.load %arg1[%c0_18, %c1_19, %c1_20, %c0_21] : memref<1x18x18x128xf32, #tpu.memory_space<vmem>>, vector<1x16x16x128xf32>
    %21 = vector.shape_cast %20 : vector<1x16x16x128xf32> to vector<16x16x128xf32>
    %22 = vector.shape_cast %21 : vector<16x16x128xf32> to vector<256x128xf32>
    %23 = arith.truncf %22 : vector<256x128xf32> to vector<256x128xbf16>
    %c0_22 = arith.constant 0 : index
    %c512 = arith.constant 512 : index
    %24 = vector.load %arg12[%c0_22, %c512] : memref<256x1152xbf16, #tpu.memory_space<vmem>>, vector<256x128xbf16>
    tpu.vector_store %arg12[%c0_22, %c512], %23 {strides = array<i32>} : memref<256x1152xbf16, #tpu.memory_space<vmem>>, vector<256x128xbf16>,
    %c0_23 = arith.constant 0 : index
    %c1_24 = arith.constant 1 : index
    %c2_25 = arith.constant 2 : index
    %c0_26 = arith.constant 0 : index
    %25 = vector.load %arg1[%c0_23, %c1_24, %c2_25, %c0_26] : memref<1x18x18x128xf32, #tpu.memory_space<vmem>>, vector<1x16x16x128xf32>
    %26 = vector.shape_cast %25 : vector<1x16x16x128xf32> to vector<16x16x128xf32>
    %27 = vector.shape_cast %26 : vector<16x16x128xf32> to vector<256x128xf32>
    %28 = arith.truncf %27 : vector<256x128xf32> to vector<256x128xbf16>
    %c0_27 = arith.constant 0 : index
    %c640 = arith.constant 640 : index
    %29 = vector.load %arg12[%c0_27, %c640] : memref<256x1152xbf16, #tpu.memory_space<vmem>>, vector<256x128xbf16>
    tpu.vector_store %arg12[%c0_27, %c640], %28 {strides = array<i32>} : memref<256x1152xbf16, #tpu.memory_space<vmem>>, vector<256x128xbf16>,
    %c0_28 = arith.constant 0 : index
    %c2_29 = arith.constant 2 : index
    %c0_30 = arith.constant 0 : index
    %c0_31 = arith.constant 0 : index
    %30 = vector.load %arg1[%c0_28, %c2_29, %c0_30, %c0_31] : memref<1x18x18x128xf32, #tpu.memory_space<vmem>>, vector<1x16x16x128xf32>
    %31 = vector.shape_cast %30 : vector<1x16x16x128xf32> to vector<16x16x128xf32>
    %32 = vector.shape_cast %31 : vector<16x16x128xf32> to vector<256x128xf32>
    %33 = arith.truncf %32 : vector<256x128xf32> to vector<256x128xbf16>
    %c0_32 = arith.constant 0 : index
    %c768 = arith.constant 768 : index
    %34 = vector.load %arg12[%c0_32, %c768] : memref<256x1152xbf16, #tpu.memory_space<vmem>>, vector<256x128xbf16>
    tpu.vector_store %arg12[%c0_32, %c768], %33 {strides = array<i32>} : memref<256x1152xbf16, #tpu.memory_space<vmem>>, vector<256x128xbf16>,
    %c0_33 = arith.constant 0 : index
    %c2_34 = arith.constant 2 : index
    %c1_35 = arith.constant 1 : index
    %c0_36 = arith.constant 0 : index
    %35 = vector.load %arg1[%c0_33, %c2_34, %c1_35, %c0_36] : memref<1x18x18x128xf32, #tpu.memory_space<vmem>>, vector<1x16x16x128xf32>
    %36 = vector.shape_cast %35 : vector<1x16x16x128xf32> to vector<16x16x128xf32>
    %37 = vector.shape_cast %36 : vector<16x16x128xf32> to vector<256x128xf32>
    %38 = arith.truncf %37 : vector<256x128xf32> to vector<256x128xbf16>
    %c0_37 = arith.constant 0 : index
    %c896 = arith.constant 896 : index
    %39 = vector.load %arg12[%c0_37, %c896] : memref<256x1152xbf16, #tpu.memory_space<vmem>>, vector<256x128xbf16>
    tpu.vector_store %arg12[%c0_37, %c896], %38 {strides = array<i32>} : memref<256x1152xbf16, #tpu.memory_space<vmem>>, vector<256x128xbf16>,
    %c0_38 = arith.constant 0 : index
    %c2_39 = arith.constant 2 : index
    %c2_40 = arith.constant 2 : index
    %c0_41 = arith.constant 0 : index
    %40 = vector.load %arg1[%c0_38, %c2_39, %c2_40, %c0_41] : memref<1x18x18x128xf32, #tpu.memory_space<vmem>>, vector<1x16x16x128xf32>
    %41 = vector.shape_cast %40 : vector<1x16x16x128xf32> to vector<16x16x128xf32>
    %42 = vector.shape_cast %41 : vector<16x16x128xf32> to vector<256x128xf32>
    %43 = arith.truncf %42 : vector<256x128xf32> to vector<256x128xbf16>
    %c0_42 = arith.constant 0 : index
    %c1024 = arith.constant 1024 : index
    %44 = vector.load %arg12[%c0_42, %c1024] : memref<256x1152xbf16, #tpu.memory_space<vmem>>, vector<256x128xbf16>
    tpu.vector_store %arg12[%c0_42, %c1024], %43 {strides = array<i32>} : memref<256x1152xbf16, #tpu.memory_space<vmem>>, vector<256x128xbf16>,
    %c0_43 = arith.constant 0 : index
    %c0_44 = arith.constant 0 : index
    %45 = vector.load %arg12[%c0_43, %c0_44] : memref<256x1152xbf16, #tpu.memory_space<vmem>>, vector<256x1152xbf16>
    %c0_45 = arith.constant 0 : index
    %c0_46 = arith.constant 0 : index
    %46 = vector.load %arg2[%c0_45, %c0_46] : memref<1152x128xbf16, #tpu.memory_space<vmem>>, vector<1152x128xbf16>
    %cst = arith.constant dense<0.000000e+00> : vector<256x128xf32>
    %47 = tpu.matmul %45, %46, %cst {dimension_numbers = #tpu.dot_dimension_numbers<[1], [0], [0], [1], [0, 0, 1, 1], [], []>} : vector<256x1152xbf16>, vector<1152x128xbf16>, vector<256x128xf32> -> vector<256x128xf32>
    %c0_47 = arith.constant 0 : index
    %c0_48 = arith.constant 0 : index
    %48 = vector.load %arg3[%c0_47, %c0_48] : memref<1x128xf32, #tpu.memory_space<vmem>>, vector<1x128xf32>
    %49 = vector.broadcast %48 : vector<1x128xf32> to vector<256x128xf32>
    %50 = arith.addf %47, %49 : vector<256x128xf32>
    %cst_49 = arith.constant dense<0.000000e+00> : vector<128xf32>
    %51 = vector.multi_reduction <add>, %50, %cst_49 [0] : vector<256x128xf32> to vector<128xf32>
    %52 = vector.shape_cast %51 : vector<128xf32> to vector<1x128xf32>
    %c0_50 = arith.constant 0 : index
    %c0_51 = arith.constant 0 : index
    %53 = vector.load %arg10[%c0_50, %c0_51] : memref<128x128xf32, #tpu.memory_space<vmem>>, vector<128x128xf32>
    %cst_52 = arith.constant dense<0.000000e+00> : vector<1x128xf32>
    %54 = tpu.matmul %52, %53, %cst_52 {dimension_numbers = #tpu.dot_dimension_numbers<[1], [0], [0], [1], [0, 0, 1, 1], [], []>} : vector<1x128xf32>, vector<128x128xf32>, vector<1x128xf32> -> vector<1x128xf32>
    %cst_53 = arith.constant 1.024000e+03 : f32
    %55 = vector.broadcast %cst_53 : f32 to vector<1x128xf32>
    %56 = arith.divf %54, %55 : vector<1x128xf32>
    %57 = vector.broadcast %56 : vector<1x128xf32> to vector<256x128xf32>
    %58 = arith.subf %50, %57 : vector<256x128xf32>
    %59 = arith.mulf %58, %58 : vector<256x128xf32>
    %cst_54 = arith.constant dense<0.000000e+00> : vector<128xf32>
    %60 = vector.multi_reduction <add>, %59, %cst_54 [0] : vector<256x128xf32> to vector<128xf32>
    %61 = vector.shape_cast %60 : vector<128xf32> to vector<1x128xf32>
    %c0_55 = arith.constant 0 : index
    %c0_56 = arith.constant 0 : index
    %62 = vector.load %arg10[%c0_55, %c0_56] : memref<128x128xf32, #tpu.memory_space<vmem>>, vector<128x128xf32>
    %cst_57 = arith.constant dense<0.000000e+00> : vector<1x128xf32>
    %63 = tpu.matmul %61, %62, %cst_57 {dimension_numbers = #tpu.dot_dimension_numbers<[1], [0], [0], [1], [0, 0, 1, 1], [], []>} : vector<1x128xf32>, vector<128x128xf32>, vector<1x128xf32> -> vector<1x128xf32>
    %cst_58 = arith.constant 1.024000e+03 : f32
    %64 = vector.broadcast %cst_58 : f32 to vector<1x128xf32>
    %65 = arith.divf %63, %64 : vector<1x128xf32>
    %cst_59 = arith.constant 9.99999974E-6 : f32
    %66 = vector.broadcast %cst_59 : f32 to vector<1x128xf32>
    %67 = arith.addf %65, %66 : vector<1x128xf32>
    %68 = math.rsqrt %67 : vector<1x128xf32>
    %c0_60 = arith.constant 0 : index
    %c0_61 = arith.constant 0 : index
    %69 = vector.load %arg4[%c0_60, %c0_61] : memref<1x128xf32, #tpu.memory_space<vmem>>, vector<1x128xf32>
    %70 = arith.mulf %68, %69 : vector<1x128xf32>
    %71 = vector.broadcast %70 : vector<1x128xf32> to vector<256x128xf32>
    %72 = arith.mulf %58, %71 : vector<256x128xf32>
    %c0_62 = arith.constant 0 : index
    %c0_63 = arith.constant 0 : index
    %73 = vector.load %arg5[%c0_62, %c0_63] : memref<1x128xf32, #tpu.memory_space<vmem>>, vector<1x128xf32>
    %74 = vector.broadcast %73 : vector<1x128xf32> to vector<256x128xf32>
    %75 = arith.addf %72, %74 : vector<256x128xf32>
    %cst_64 = arith.constant 0.000000e+00 : f32
    %76 = vector.broadcast %cst_64 : f32 to vector<256x128xf32>
    %77 = arith.cmpf oge, %75, %76 : vector<256x128xf32>
    %cst_65 = arith.constant 2.000000e-01 : f32
    %78 = vector.broadcast %cst_65 : f32 to vector<256x128xf32>
    %79 = arith.mulf %78, %75 : vector<256x128xf32>
    %80 = arith.select %77, %75, %79 : vector<256x128xi1>, vector<256x128xf32>
    %cst_66 = arith.constant 0.000000e+00 : f32
    %81 = vector.broadcast %cst_66 : f32 to vector<18x18x128xf32>
    %c0_67 = arith.constant 0 : index
    %c0_68 = arith.constant 0 : index
    %c0_69 = arith.constant 0 : index
    %82 = vector.load %arg13[%c0_67, %c0_68, %c0_69] : memref<18x18x128xf32, #tpu.memory_space<vmem>>, vector<18x18x128xf32>
    tpu.vector_store %arg13[%c0_67, %c0_68, %c0_69], %81 {strides = array<i32>} : memref<18x18x128xf32, #tpu.memory_space<vmem>>, vector<18x18x128xf32>,
    %83 = vector.shape_cast %80 : vector<256x128xf32> to vector<16x16x128xf32>
    %c1_70 = arith.constant 1 : index
    %c1_71 = arith.constant 1 : index
    %c0_72 = arith.constant 0 : index
    %84 = vector.load %arg13[%c1_70, %c1_71, %c0_72] : memref<18x18x128xf32, #tpu.memory_space<vmem>>, vector<16x16x128xf32>
    tpu.vector_store %arg13[%c1_70, %c1_71, %c0_72], %83 {strides = array<i32>} : memref<18x18x128xf32, #tpu.memory_space<vmem>>, vector<16x16x128xf32>,
    %c0_73 = arith.constant 0 : index
    %c0_74 = arith.constant 0 : index
    %c0_75 = arith.constant 0 : index
    %85 = vector.load %arg13[%c0_73, %c0_74, %c0_75] : memref<18x18x128xf32, #tpu.memory_space<vmem>>, vector<16x16x128xf32>
    %86 = vector.shape_cast %85 : vector<16x16x128xf32> to vector<256x128xf32>
    %87 = arith.truncf %86 : vector<256x128xf32> to vector<256x128xbf16>
    %c0_76 = arith.constant 0 : index
    %c0_77 = arith.constant 0 : index
    %88 = vector.load %arg12[%c0_76, %c0_77] : memref<256x1152xbf16, #tpu.memory_space<vmem>>, vector<256x128xbf16>
    tpu.vector_store %arg12[%c0_76, %c0_77], %87 {strides = array<i32>} : memref<256x1152xbf16, #tpu.memory_space<vmem>>, vector<256x128xbf16>,
    %c0_78 = arith.constant 0 : index
    %c1_79 = arith.constant 1 : index
    %c0_80 = arith.constant 0 : index
    %89 = vector.load %arg13[%c0_78, %c1_79, %c0_80] : memref<18x18x128xf32, #tpu.memory_space<vmem>>, vector<16x16x128xf32>
    %90 = vector.shape_cast %89 : vector<16x16x128xf32> to vector<256x128xf32>
    %91 = arith.truncf %90 : vector<256x128xf32> to vector<256x128xbf16>
    %c0_81 = arith.constant 0 : index
    %c128_82 = arith.constant 128 : index
    %92 = vector.load %arg12[%c0_81, %c128_82] : memref<256x1152xbf16, #tpu.memory_space<vmem>>, vector<256x128xbf16>
    tpu.vector_store %arg12[%c0_81, %c128_82], %91 {strides = array<i32>} : memref<256x1152xbf16, #tpu.memory_space<vmem>>, vector<256x128xbf16>,
    %c0_83 = arith.constant 0 : index
    %c2_84 = arith.constant 2 : index
    %c0_85 = arith.constant 0 : index
    %93 = vector.load %arg13[%c0_83, %c2_84, %c0_85] : memref<18x18x128xf32, #tpu.memory_space<vmem>>, vector<16x16x128xf32>
    %94 = vector.shape_cast %93 : vector<16x16x128xf32> to vector<256x128xf32>
    %95 = arith.truncf %94 : vector<256x128xf32> to vector<256x128xbf16>
    %c0_86 = arith.constant 0 : index
    %c256_87 = arith.constant 256 : index
    %96 = vector.load %arg12[%c0_86, %c256_87] : memref<256x1152xbf16, #tpu.memory_space<vmem>>, vector<256x128xbf16>
    tpu.vector_store %arg12[%c0_86, %c256_87], %95 {strides = array<i32>} : memref<256x1152xbf16, #tpu.memory_space<vmem>>, vector<256x128xbf16>,
    %c1_88 = arith.constant 1 : index
    %c0_89 = arith.constant 0 : index
    %c0_90 = arith.constant 0 : index
    %97 = vector.load %arg13[%c1_88, %c0_89, %c0_90] : memref<18x18x128xf32, #tpu.memory_space<vmem>>, vector<16x16x128xf32>
    %98 = vector.shape_cast %97 : vector<16x16x128xf32> to vector<256x128xf32>
    %99 = arith.truncf %98 : vector<256x128xf32> to vector<256x128xbf16>
    %c0_91 = arith.constant 0 : index
    %c384_92 = arith.constant 384 : index
    %100 = vector.load %arg12[%c0_91, %c384_92] : memref<256x1152xbf16, #tpu.memory_space<vmem>>, vector<256x128xbf16>
    tpu.vector_store %arg12[%c0_91, %c384_92], %99 {strides = array<i32>} : memref<256x1152xbf16, #tpu.memory_space<vmem>>, vector<256x128xbf16>,
    %c1_93 = arith.constant 1 : index
    %c1_94 = arith.constant 1 : index
    %c0_95 = arith.constant 0 : index
    %101 = vector.load %arg13[%c1_93, %c1_94, %c0_95] : memref<18x18x128xf32, #tpu.memory_space<vmem>>, vector<16x16x128xf32>
    %102 = vector.shape_cast %101 : vector<16x16x128xf32> to vector<256x128xf32>
    %103 = arith.truncf %102 : vector<256x128xf32> to vector<256x128xbf16>
    %c0_96 = arith.constant 0 : index
    %c512_97 = arith.constant 512 : index
    %104 = vector.load %arg12[%c0_96, %c512_97] : memref<256x1152xbf16, #tpu.memory_space<vmem>>, vector<256x128xbf16>
    tpu.vector_store %arg12[%c0_96, %c512_97], %103 {strides = array<i32>} : memref<256x1152xbf16, #tpu.memory_space<vmem>>, vector<256x128xbf16>,
    %c1_98 = arith.constant 1 : index
    %c2_99 = arith.constant 2 : index
    %c0_100 = arith.constant 0 : index
    %105 = vector.load %arg13[%c1_98, %c2_99, %c0_100] : memref<18x18x128xf32, #tpu.memory_space<vmem>>, vector<16x16x128xf32>
    %106 = vector.shape_cast %105 : vector<16x16x128xf32> to vector<256x128xf32>
    %107 = arith.truncf %106 : vector<256x128xf32> to vector<256x128xbf16>
    %c0_101 = arith.constant 0 : index
    %c640_102 = arith.constant 640 : index
    %108 = vector.load %arg12[%c0_101, %c640_102] : memref<256x1152xbf16, #tpu.memory_space<vmem>>, vector<256x128xbf16>
    tpu.vector_store %arg12[%c0_101, %c640_102], %107 {strides = array<i32>} : memref<256x1152xbf16, #tpu.memory_space<vmem>>, vector<256x128xbf16>,
    %c2_103 = arith.constant 2 : index
    %c0_104 = arith.constant 0 : index
    %c0_105 = arith.constant 0 : index
    %109 = vector.load %arg13[%c2_103, %c0_104, %c0_105] : memref<18x18x128xf32, #tpu.memory_space<vmem>>, vector<16x16x128xf32>
    %110 = vector.shape_cast %109 : vector<16x16x128xf32> to vector<256x128xf32>
    %111 = arith.truncf %110 : vector<256x128xf32> to vector<256x128xbf16>
    %c0_106 = arith.constant 0 : index
    %c768_107 = arith.constant 768 : index
    %112 = vector.load %arg12[%c0_106, %c768_107] : memref<256x1152xbf16, #tpu.memory_space<vmem>>, vector<256x128xbf16>
    tpu.vector_store %arg12[%c0_106, %c768_107], %111 {strides = array<i32>} : memref<256x1152xbf16, #tpu.memory_space<vmem>>, vector<256x128xbf16>,
    %c2_108 = arith.constant 2 : index
    %c1_109 = arith.constant 1 : index
    %c0_110 = arith.constant 0 : index
    %113 = vector.load %arg13[%c2_108, %c1_109, %c0_110] : memref<18x18x128xf32, #tpu.memory_space<vmem>>, vector<16x16x128xf32>
    %114 = vector.shape_cast %113 : vector<16x16x128xf32> to vector<256x128xf32>
    %115 = arith.truncf %114 : vector<256x128xf32> to vector<256x128xbf16>
    %c0_111 = arith.constant 0 : index
    %c896_112 = arith.constant 896 : index
    %116 = vector.load %arg12[%c0_111, %c896_112] : memref<256x1152xbf16, #tpu.memory_space<vmem>>, vector<256x128xbf16>
    tpu.vector_store %arg12[%c0_111, %c896_112], %115 {strides = array<i32>} : memref<256x1152xbf16, #tpu.memory_space<vmem>>, vector<256x128xbf16>,
    %c2_113 = arith.constant 2 : index
    %c2_114 = arith.constant 2 : index
    %c0_115 = arith.constant 0 : index
    %117 = vector.load %arg13[%c2_113, %c2_114, %c0_115] : memref<18x18x128xf32, #tpu.memory_space<vmem>>, vector<16x16x128xf32>
    %118 = vector.shape_cast %117 : vector<16x16x128xf32> to vector<256x128xf32>
    %119 = arith.truncf %118 : vector<256x128xf32> to vector<256x128xbf16>
    %c0_116 = arith.constant 0 : index
    %c1024_117 = arith.constant 1024 : index
    %120 = vector.load %arg12[%c0_116, %c1024_117] : memref<256x1152xbf16, #tpu.memory_space<vmem>>, vector<256x128xbf16>
    tpu.vector_store %arg12[%c0_116, %c1024_117], %119 {strides = array<i32>} : memref<256x1152xbf16, #tpu.memory_space<vmem>>, vector<256x128xbf16>,
    %c0_118 = arith.constant 0 : index
    %c0_119 = arith.constant 0 : index
    %121 = vector.load %arg12[%c0_118, %c0_119] : memref<256x1152xbf16, #tpu.memory_space<vmem>>, vector<256x1152xbf16>
    %c0_120 = arith.constant 0 : index
    %c0_121 = arith.constant 0 : index
    %122 = vector.load %arg6[%c0_120, %c0_121] : memref<1152x128xbf16, #tpu.memory_space<vmem>>, vector<1152x128xbf16>
    %cst_122 = arith.constant dense<0.000000e+00> : vector<256x128xf32>
    %123 = tpu.matmul %121, %122, %cst_122 {dimension_numbers = #tpu.dot_dimension_numbers<[1], [0], [0], [1], [0, 0, 1, 1], [], []>} : vector<256x1152xbf16>, vector<1152x128xbf16>, vector<256x128xf32> -> vector<256x128xf32>
    %c0_123 = arith.constant 0 : index
    %c0_124 = arith.constant 0 : index
    %124 = vector.load %arg7[%c0_123, %c0_124] : memref<1x128xf32, #tpu.memory_space<vmem>>, vector<1x128xf32>
    %125 = vector.broadcast %124 : vector<1x128xf32> to vector<256x128xf32>
    %126 = arith.addf %123, %125 : vector<256x128xf32>
    %cst_125 = arith.constant dense<0.000000e+00> : vector<128xf32>
    %127 = vector.multi_reduction <add>, %126, %cst_125 [0] : vector<256x128xf32> to vector<128xf32>
    %128 = vector.shape_cast %127 : vector<128xf32> to vector<1x128xf32>
    %c0_126 = arith.constant 0 : index
    %c0_127 = arith.constant 0 : index
    %129 = vector.load %arg10[%c0_126, %c0_127] : memref<128x128xf32, #tpu.memory_space<vmem>>, vector<128x128xf32>
    %cst_128 = arith.constant dense<0.000000e+00> : vector<1x128xf32>
    %130 = tpu.matmul %128, %129, %cst_128 {dimension_numbers = #tpu.dot_dimension_numbers<[1], [0], [0], [1], [0, 0, 1, 1], [], []>} : vector<1x128xf32>, vector<128x128xf32>, vector<1x128xf32> -> vector<1x128xf32>
    %cst_129 = arith.constant 1.024000e+03 : f32
    %131 = vector.broadcast %cst_129 : f32 to vector<1x128xf32>
    %132 = arith.divf %130, %131 : vector<1x128xf32>
    %133 = vector.broadcast %132 : vector<1x128xf32> to vector<256x128xf32>
    %134 = arith.subf %126, %133 : vector<256x128xf32>
    %135 = arith.mulf %134, %134 : vector<256x128xf32>
    %cst_130 = arith.constant dense<0.000000e+00> : vector<128xf32>
    %136 = vector.multi_reduction <add>, %135, %cst_130 [0] : vector<256x128xf32> to vector<128xf32>
    %137 = vector.shape_cast %136 : vector<128xf32> to vector<1x128xf32>
    %c0_131 = arith.constant 0 : index
    %c0_132 = arith.constant 0 : index
    %138 = vector.load %arg10[%c0_131, %c0_132] : memref<128x128xf32, #tpu.memory_space<vmem>>, vector<128x128xf32>
    %cst_133 = arith.constant dense<0.000000e+00> : vector<1x128xf32>
    %139 = tpu.matmul %137, %138, %cst_133 {dimension_numbers = #tpu.dot_dimension_numbers<[1], [0], [0], [1], [0, 0, 1, 1], [], []>} : vector<1x128xf32>, vector<128x128xf32>, vector<1x128xf32> -> vector<1x128xf32>
    %cst_134 = arith.constant 1.024000e+03 : f32
    %140 = vector.broadcast %cst_134 : f32 to vector<1x128xf32>
    %141 = arith.divf %139, %140 : vector<1x128xf32>
    %cst_135 = arith.constant 9.99999974E-6 : f32
    %142 = vector.broadcast %cst_135 : f32 to vector<1x128xf32>
    %143 = arith.addf %141, %142 : vector<1x128xf32>
    %144 = math.rsqrt %143 : vector<1x128xf32>
    %c0_136 = arith.constant 0 : index
    %c0_137 = arith.constant 0 : index
    %145 = vector.load %arg8[%c0_136, %c0_137] : memref<1x128xf32, #tpu.memory_space<vmem>>, vector<1x128xf32>
    %146 = arith.mulf %144, %145 : vector<1x128xf32>
    %147 = vector.broadcast %146 : vector<1x128xf32> to vector<256x128xf32>
    %148 = arith.mulf %134, %147 : vector<256x128xf32>
    %c0_138 = arith.constant 0 : index
    %c0_139 = arith.constant 0 : index
    %149 = vector.load %arg9[%c0_138, %c0_139] : memref<1x128xf32, #tpu.memory_space<vmem>>, vector<1x128xf32>
    %150 = vector.broadcast %149 : vector<1x128xf32> to vector<256x128xf32>
    %151 = arith.addf %148, %150 : vector<256x128xf32>
    %cst_140 = arith.constant 0.000000e+00 : f32
    %152 = vector.broadcast %cst_140 : f32 to vector<256x128xf32>
    %153 = arith.cmpf oge, %151, %152 : vector<256x128xf32>
    %cst_141 = arith.constant 2.000000e-01 : f32
    %154 = vector.broadcast %cst_141 : f32 to vector<256x128xf32>
    %155 = arith.mulf %154, %151 : vector<256x128xf32>
    %156 = arith.select %153, %151, %155 : vector<256x128xi1>, vector<256x128xf32>
    %157 = vector.shape_cast %156 : vector<256x128xf32> to vector<1x16x16x128xf32>
    %c0_142 = arith.constant 0 : index
    %c0_143 = arith.constant 0 : index
    %c0_144 = arith.constant 0 : index
    %c0_145 = arith.constant 0 : index
    %158 = vector.load %arg11[%c0_142, %c0_143, %c0_144, %c0_145] : memref<1x16x16x128xf32, #tpu.memory_space<vmem>>, vector<1x16x16x128xf32>
    tpu.vector_store %arg11[%c0_142, %c0_143, %c0_144, %c0_145], %157 {strides = array<i32>} : memref<1x16x16x128xf32, #tpu.memory_space<vmem>>, vector<1x16x16x128xf32>,
    return
  }
  func.func @transform_0(%arg0: i32) -> (i32, i32, i32, i32) {
    %c0_i32 = arith.constant 0 : i32
    %c0_i32_0 = arith.constant 0 : i32
    %c0_i32_1 = arith.constant 0 : i32
    %c0_i32_2 = arith.constant 0 : i32
    return %arg0, %c0_i32, %c0_i32_0, %c0_i32_1 : i32, i32, i32, i32
  }
  func.func @transform_1(%arg0: i32) -> (i32, i32) {
    %c0_i32 = arith.constant 0 : i32
    %c0_i32_0 = arith.constant 0 : i32
    %c0_i32_1 = arith.constant 0 : i32
    return %c0_i32, %c0_i32_0 : i32, i32
  }
  func.func @transform_2(%arg0: i32) -> (i32, i32) {
    %c0_i32 = arith.constant 0 : i32
    %c0_i32_0 = arith.constant 0 : i32
    %c0_i32_1 = arith.constant 0 : i32
    return %c0_i32, %c0_i32_0 : i32, i32
  }
  func.func @transform_3(%arg0: i32) -> (i32, i32) {
    %c0_i32 = arith.constant 0 : i32
    %c0_i32_0 = arith.constant 0 : i32
    %c0_i32_1 = arith.constant 0 : i32
    return %c0_i32, %c0_i32_0 : i32, i32
  }
  func.func @transform_4(%arg0: i32) -> (i32, i32) {
    %c0_i32 = arith.constant 0 : i32
    %c0_i32_0 = arith.constant 0 : i32
    %c0_i32_1 = arith.constant 0 : i32
    return %c0_i32, %c0_i32_0 : i32, i32
  }
  func.func @transform_5(%arg0: i32) -> (i32, i32) {
    %c0_i32 = arith.constant 0 : i32
    %c0_i32_0 = arith.constant 0 : i32
    %c0_i32_1 = arith.constant 0 : i32
    return %c0_i32, %c0_i32_0 : i32, i32
  }
  func.func @transform_6(%arg0: i32) -> (i32, i32) {
    %c0_i32 = arith.constant 0 : i32
    %c0_i32_0 = arith.constant 0 : i32
    %c0_i32_1 = arith.constant 0 : i32
    return %c0_i32, %c0_i32_0 : i32, i32
  }
  func.func @transform_7(%arg0: i32) -> (i32, i32) {
    %c0_i32 = arith.constant 0 : i32
    %c0_i32_0 = arith.constant 0 : i32
    %c0_i32_1 = arith.constant 0 : i32
    return %c0_i32, %c0_i32_0 : i32, i32
  }
  func.func @transform_8(%arg0: i32) -> (i32, i32) {
    %c0_i32 = arith.constant 0 : i32
    %c0_i32_0 = arith.constant 0 : i32
    %c0_i32_1 = arith.constant 0 : i32
    return %c0_i32, %c0_i32_0 : i32, i32
  }
  func.func @transform_9(%arg0: i32) -> (i32, i32) {
    %c0_i32 = arith.constant 0 : i32
    %c0_i32_0 = arith.constant 0 : i32
    %c0_i32_1 = arith.constant 0 : i32
    return %c0_i32, %c0_i32_0 : i32, i32
  }
  func.func @transform_10(%arg0: i32) -> (i32, i32, i32, i32) {
    %c0_i32 = arith.constant 0 : i32
    %c0_i32_0 = arith.constant 0 : i32
    %c0_i32_1 = arith.constant 0 : i32
    %c0_i32_2 = arith.constant 0 : i32
    return %arg0, %c0_i32, %c0_i32_0, %c0_i32_1 : i32, i32, i32, i32
  }
}

</mosaic_0001>

<bundles_post_ra>
// kernel: tpu_custom_call.1
= control target key start
LH: loop header
LB: loop body
LE: loop exit
PB: predicated region body
PF: predicated region fallthrough
CT: control target
= control target key end

     0   :  { %15 = vsyncpa [#allocation5], 0  ;;  %s13184_s0 = inlined_call_operand.vmem [shape: f32[2,18,18,128], index: 0, kind: input, shape index: {}]   ;;  %s13185_s1 = inlined_call_operand.vmem [shape: bf16[1152,128], index: 1, kind: input, shape index: {}]   ;;  %s13186_s2 = inlined_call_operand.vmem [shape: f32[1,128], index: 2, kind: input, shape index: {}]   ;;  %s13187_s3 = inlined_call_operand.vmem [shape: f32[1,128], index: 3, kind: input, shape index: {}]   ;;  %s13188_s4 = inlined_call_operand.vmem [shape: f32[1,128], index: 4, kind: input, shape index: {}]   ;;  %s13189_s5 = inlined_call_operand.vmem [shape: bf16[1152,128], index: 5, kind: input, shape index: {}]   ;;  %s13190_s6 = inlined_call_operand.vmem [shape: f32[1,128], index: 6, kind: input, shape index: {}]   ;;  %s13191_s7 = inlined_call_operand.vmem [shape: f32[1,128], index: 7, kind: input, shape index: {}]   ;;  %s13192_s8 = inlined_call_operand.vmem [shape: f32[1,128], index: 8, kind: input, shape index: {}]   ;;  %s13193_s9 = inlined_call_operand.vmem [shape: f32[128,128], index: 9, kind: input, shape index: {}]   ;;  %s13194_s10 = inlined_call_operand.hbm [shape: f32[2,16,16,128], index: 10, kind: output, shape index: {}]  }
   0x1   :  { %17 = vsyncpa [#allocation5 + $0x1], 0  ;;  %s10158_s13 = smov 0   ;;  %s10160_s14 = smov 0  }
   0x2   :  { %s10162_s15 = smov 0   ;;  %s10164_s16 = smov 0  }
   0x3 LB: > { %s10179_s17 = sadd.s32 4294967295, %s10096_s16   ;;  %s7597_s18 = sadd.s32 4294967294, %s10096_s16   ;;  %s10096_s16 = sphi %s10164_s16, %s13334_s16   ;;  %s10092_s15 = sphi %s10162_s15, %s13333_s15   ;;  %s10088_s14 = sphi %s10160_s14, %s13332_s14   ;;  %s10084_s13 = sphi %s10158_s13, %s13331_s13  }
   0x4   : > { %s10183_s19 = sadd.s32 1, %s10096_s16   ;;  %s245_s20 = sadd.s32 1, %s10092_s15 }
   0x5   : > { %s242_s21 = ssub.s32 %s10096_s16, %s10183_s19  ;;  %p255_p0 = scmp.ne.s32.totalorder %s10092_s15, %s10088_s14 }
   0x6   : > { %p243_p1 = scmp.eq.s32.totalorder %s242_s21, 0  ;;  %p256_p2 = scmp.eq.s32.totalorder %s10179_s17, 1 }
   0x7   : > { %p261_p3 = scmp.ne.s32.totalorder %s10088_s14, %s10084_s13  ;;  %p262_p4 = scmp.eq.s32.totalorder %s7597_s18, 1 }
   0x8   : > { %s10194_s22 = scalar_select %p243_p1, %s10092_s15, %s245_s20  }
   0x9   : > { %p10196_p5 = por %p256_p2, %p255_p0  ;;  %p10200_p6 = por %p262_p4, %p261_p3 }
   0xa   : > { %p7600_p7 = scmp.ge.s32.totalorder %s10096_s16, 1  ;;  %p315_p8 = scmp.lt.s32.totalorder %s10096_s16, 3 }
   0xc   : > { %p316_p9 = pnand %p7600_p7, %p315_p8 }
   0xe   : > { %319 = sbr.rel (%p316_p9) target bundleno = 2625 (0xa41), region = 60 }
  0x13   : > { %v9679_v0 = vld [vmem:[%s13185_s1 + $0x38] sm:$0xff]  ;;  %p353_p10 = scmp.lt.s32.totalorder %s10179_s17, 1  ;;  %v9678_v2 = vld [vmem:[%s13185_s1 + $0x30] sm:$0xff]  ;;  %v10098_v3 = vmov 0.0   ;;  %v9677_v5 = vld [vmem:[%s13185_s1 + $0x28] sm:$0xff]  ;;  %v10099_v18 = vmov 0.0|0.0  }
  0x14   : > { %v9695_v1 = vld [vmem:[%s13185_s1 + $0xb8] sm:$0xff]  ;;  %2700 = vmatpush.bf16.msra.mxu0 %v9679_v0  ;;  %9961 = vmatpush.bf16.msra.mxu1 %v9679_v0  ;;  %3883 = vst [vmem:[#allocation3] sm:$0xff] %v10098_v3  ;;  %v9694_v4 = vld [vmem:[%s13185_s1 + $0xb0] sm:$0xff]  ;;  %v9693_v6 = vld [vmem:[%s13185_s1 + $0xa8] sm:$0xff]  ;;  %s350_s27 = sand.u32 1, %s10088_s14  }
  0x15   : > { %s354_s11 = scalar_select %p353_p10, %s10179_s17, 1  ;;  %2878 = vmatpush.bf16.msra.mxu2 %v9695_v1  ;;  %3884 = vst [vmem:[#allocation3 + $0x8] sm:$0xff] %v10098_v3  ;;  %v9676_v11 = vld [vmem:[%s13185_s1 + $0x20] sm:$0xff]  ;;  %v9675_v13 = vld [vmem:[%s13185_s1 + $0x18] sm:$0xff]  ;;  %v9674_v16 = vld [vmem:[%s13185_s1 + $0x10] sm:$0xff] }
  0x16   : > { %3885 = vst [vmem:[#allocation3 + $0x10] sm:$0x3] %v10098_v3  ;;  %v9692_v12 = vld [vmem:[%s13185_s1 + $0xa0] sm:$0xff]  ;;  %v9691_v14 = vld [vmem:[%s13185_s1 + $0x98] sm:$0xff]  ;;  %v9690_v19 = vld [vmem:[%s13185_s1 + $0x90] sm:$0xff]  ;;  %s7601_s29 = sshll.u32 %s350_s27, 8 }
  0x17   : > { %s9977_s20 = smul.u32 432, %s354_s11  ;;  %3886 = vst [vmem:[#allocation3 + $0x18] sm:$0xff] %v10098_v3  ;;  %v9673_v20 = vld [vmem:[%s13185_s1 + $0x8] sm:$0xff]  ;;  %v9672_v22 = vld [vmem:[%s13185_s1] sm:$0xff]  ;;  %v9711_v25 = vld [vmem:[%s13185_s1 + $0x138] sm:$0xff]  ;;  %s13044_s30 = scalar_lea.vmem [#allocation4], %s7601_s29 }
  0x18   : > { %2701 = vmatpush.bf16.msra.mxu0 %v9678_v2  ;;  %9962 = vmatpush.bf16.msra.mxu1 %v9678_v2  ;;  %3887 = vst [vmem:[#allocation3 + $0x20] sm:$0xff] %v10098_v3  ;;  %v9689_v21 = vld [vmem:[%s13185_s1 + $0x88] sm:$0xff]  ;;  %v9688_v23 = vld [vmem:[%s13185_s1 + $0x80] sm:$0xff]  ;;  %v9710_v33 = vld [vmem:[%s13185_s1 + $0x130] sm:$0xff]  ;;  %s7532_s18 = sshll.u32 %s13044_s30, 4  ;;  %s7520_s21 = scalar_lea.sflag [#allocation5], %s350_s27  ;;  %s7533_s18 = int_to_ptr.vmem [resolvable:$true] %s7532_s18 }
  0x19   : > { %s10230_s28 = scalar_lea.vmem %s13184_s0, %s9977_s20  ;;  %2879 = vmatpush.bf16.msra.mxu2 %v9694_v4  ;;  %3888 = vst [vmem:[#allocation3 + $0x28] sm:$0x3] %v10098_v3 }
  0x1a   : > { %v358_v7 = vld [vmem:[%s10230_s28] sm:$0xff]  ;;  %v359_v8 = vld [vmem:[%s10230_s28 + $0x8] sm:$0xff]  ;;  %3889 = vst [vmem:[#allocation3 + $0x30] sm:$0xff] %v10098_v3  ;;  %v378_v26 = vld [vmem:[%s10230_s28 + $0xf0] sm:$0xff] }
  0x1b   : > { %v390_v9 = vpack.c.bf16 %v358_v7, %v358_v7  ;;  %v391_v10 = vpack.c.bf16 %v359_v8, %v359_v8  ;;  %3890 = vst [vmem:[#allocation3 + $0x38] sm:$0xff] %v10098_v3  ;;  %v379_v27 = vld [vmem:[%s10230_s28 + $0xf8] sm:$0xff]  ;;  %v550_v28 = vld [vmem:[%s10230_s28 + $0x2] sm:$0xff]  ;;  %v410_v29 = vpack.c.bf16 %v378_v26, %v378_v26  ;;  %v551_v30 = vld [vmem:[%s10230_s28 + $0xa] sm:$0xff] }
  0x1c   : > { %2702 = vmatpush.bf16.msra.mxu0 %v9677_v5  ;;  %9963 = vmatpush.bf16.msra.mxu1 %v9677_v5  ;;  %3891 = vst [vmem:[#allocation3 + $0x40] sm:$0x3] %v10098_v3  ;;  %v411_v31 = vpack.c.bf16 %v379_v27, %v379_v27  ;;  %v360_v32 = vld [vmem:[%s10230_s28 + $0x18] sm:$0xff]  ;;  %v582_v34 = vpack.c.bf16 %v550_v28, %v550_v28  ;;  %v361_v35 = vld [vmem:[%s10230_s28 + $0x20] sm:$0xff]  ;;  %v380_v37 = vld [vmem:[%s10230_s28 + $0x108] sm:$0xff] }
  0x1d   : > { %422 = vst [vmem:[#allocation2] sm:$0xf] %v390_v9  ;;  %2880 = vmatpush.bf16.msra.mxu2 %v9693_v6  ;;  %v583_v36 = vpack.c.bf16 %v551_v30, %v551_v30  ;;  %v392_v38 = vpack.c.bf16 %v360_v32, %v360_v32  ;;  %v381_v39 = vld [vmem:[%s10230_s28 + $0x110] sm:$0xff]  ;;  %v393_v40 = vpack.c.bf16 %v361_v35, %v361_v35  ;;  %v552_v41 = vld [vmem:[%s10230_s28 + $0x1a] sm:$0xff]  ;;  %v553_v43 = vld [vmem:[%s10230_s28 + $0x22] sm:$0xff] }
  0x1e   : > { %423 = vst [vmem:[#allocation2 + $0x24] sm:$0xf] %v391_v10  ;;  %v412_v42 = vpack.c.bf16 %v380_v37, %v380_v37  ;;  %v4162_v44 = vld [vmem:[#allocation3 + $0x2] sm:$0xff]  ;;  %v413_v45 = vpack.c.bf16 %v381_v39, %v381_v39  ;;  %v4163_v46 = vld [vmem:[#allocation3 + $0xa] sm:$0xff]  ;;  %v584_v47 = vpack.c.bf16 %v552_v41, %v552_v41  ;;  %v585_v48 = vpack.c.bf16 %v553_v43, %v553_v43  ;;  %v363_v51 = vld [vmem:[%s10230_s28 + $0x38] sm:$0xff] }
  0x1f   : > { %3892 = vst [vmem:[#allocation3 + $0x48] sm:$0xff] %v10098_v3  ;;  %v362_v49 = vld [vmem:[%s10230_s28 + $0x30] sm:$0xff]  ;;  %v4194_v50 = vpack.c.bf16 %v4162_v44, %v4162_v44  ;;  %v4195_v53 = vpack.c.bf16 %v4163_v46, %v4163_v46  ;;  %v382_v54 = vld [vmem:[%s10230_s28 + $0x120] sm:$0xff]  ;;  %v383_v57 = vld [vmem:[%s10230_s28 + $0x128] sm:$0xff]  ;;  %v395_v60 = vpack.c.bf16 %v363_v51, %v363_v51 }
  0x20   : > { %2703 = vmatpush.bf16.msra.mxu0 %v9676_v11  ;;  %9964 = vmatpush.bf16.msra.mxu1 %v9676_v11  ;;  %3893 = vst [vmem:[#allocation3 + $0x50] sm:$0xff] %v10098_v3  ;;  %v394_v56 = vpack.c.bf16 %v362_v49, %v362_v49  ;;  %v554_v61 = vld [vmem:[%s10230_s28 + $0x32] sm:$0xff]  ;;  %v414_v63 = vpack.c.bf16 %v382_v54, %v382_v54  ;;  %v555_v0 = vld [vmem:[%s10230_s28 + $0x3a] sm:$0xff]  ;;  %v9709_v8 = vld [vmem:[%s13185_s1 + $0x128] sm:$0xff] }
  0x21   : > { %2881 = vmatpush.bf16.msra.mxu2 %v9692_v12  ;;  %3894 = vst [vmem:[#allocation3 + $0x58] sm:$0x3] %v10098_v3  ;;  %v586_v5 = vpack.c.bf16 %v554_v61, %v554_v61  ;;  %v587_v7 = vpack.c.bf16 %v555_v0, %v555_v0  ;;  %v364_v9 = vld [vmem:[%s10230_s28 + $0x48] sm:$0xff]  ;;  %v365_v10 = vld [vmem:[%s10230_s28 + $0x50] sm:$0xff]  ;;  %v9703_v30 = vld [vmem:[%s13185_s1 + $0xf8] sm:$0xff] }
  0x22   : > { %3895 = vst [vmem:[#allocation3 + $0x60] sm:$0xff] %v10098_v3  ;;  %v396_v11 = vpack.c.bf16 %v364_v9, %v364_v9  ;;  %v397_v12 = vpack.c.bf16 %v365_v10, %v365_v10  ;;  %v9708_v32 = vld [vmem:[%s13185_s1 + $0x120] sm:$0xff]  ;;  %v387_v37 = vld [vmem:[%s10230_s28 + $0x158] sm:$0xff]  ;;  %9969 = vmatpush.bf16.msra.mxu3 %v9703_v30  ;;  %v9686_v54 = vld [vmem:[%s13185_s1 + $0x70] sm:$0xff] }
  0x23   : > { %3896 = vst [vmem:[#allocation3 + $0x68] sm:$0xff] %v10098_v3  ;;  %v558_v41 = vld [vmem:[%s10230_s28 + $0x62] sm:$0xff]  ;;  %v389_v61 = vld [vmem:[%s10230_s28 + $0x170] sm:$0xff]  ;;  %v560_v0 = vld [vmem:[%s10230_s28 + $0x7a] sm:$0xff] }
  0x24   : > { %v7797_v15 = vld [vmem:[#allocation2] sm:$0xf]  ;;  %2704 = vmatpush.bf16.msra.mxu0 %v9675_v13  ;;  %9965 = vmatpush.bf16.msra.mxu1 %v9675_v13  ;;  %3897 = vst [vmem:[#allocation3 + $0x70] sm:$0x3] %v10098_v3  ;;  %v384_v13 = vld [vmem:[%s10230_s28 + $0x138] sm:$0xff]  ;;  %v590_v43 = vpack.c.bf16 %v558_v41, %v558_v41 }
  0x25   : > { %v9532_v17 = vld [vmem:[#allocation2 + $0x20] sm:$0xf0]  ;;  %4034 = vst [vmem:[#allocation2] sm:$0xf] %v10099_v18  ;;  %2882 = vmatpush.bf16.msra.mxu2 %v9691_v14 }
  0x26   : > { %4035 = vst [vmem:[#allocation2 + $0x24] sm:$0xf] %v10099_v18  ;;  %v7798_v24 = vor.u32 %v9532_v17, %v7797_v15  ;;  %v385_v14 = vld [vmem:[%s10230_s28 + $0x140] sm:$0xff]  ;;  %v416_v15 = vpack.c.bf16 %v384_v13, %v384_v13  ;;  %v557_v17 = vld [vmem:[%s10230_s28 + $0x52] sm:$0xff] }
  0x27   : > { %3898 = vst [vmem:[#allocation3 + $0x78] sm:$0xff] %v10098_v3  ;;  %v417_v18 = vpack.c.bf16 %v385_v14, %v385_v14  ;;  %v9683_v14 = vld [vmem:[%s13185_s1 + $0x58] sm:$0xff]  ;;  %v4066_v41 = vld [vmem:[#allocation3 + $0x1] sm:$0xff] }
  0x28   : > { %2705 = vmatpush.bf16.msra.mxu0 %v9674_v16  ;;  %9966 = vmatpush.bf16.msra.mxu1 %v9674_v16  ;;  %3899 = vst [vmem:[#allocation3 + $0x80] sm:$0xff] %v10098_v3  ;;  %v556_v16 = vld [vmem:[%s10230_s28 + $0x4a] sm:$0xff] }
  0x29   : > { %2883 = vmatpush.bf16.msra.mxu2 %v9690_v19  ;;  %3900 = vst [vmem:[#allocation3 + $0x88] sm:$0x3] %v10098_v3  ;;  %v588_v19 = vpack.c.bf16 %v556_v16, %v556_v16  ;;  %v9682_v16 = vld [vmem:[%s13185_s1 + $0x50] sm:$0xff] }
  0x2a   : > { %3901 = vst [vmem:[#allocation3 + $0x90] sm:$0xff] %v10098_v3 }
  0x2b   : > { %3902 = vst [vmem:[#allocation3 + $0x98] sm:$0xff] %v10098_v3 }
  0x2c   : > { %2706 = vmatpush.bf16.msra.mxu0 %v9673_v20  ;;  %9967 = vmatpush.bf16.msra.mxu1 %v9673_v20  ;;  %3903 = vst [vmem:[#allocation3 + $0xa0] sm:$0x3] %v10098_v3  ;;  %v589_v20 = vpack.c.bf16 %v557_v17, %v557_v17  ;;  %v9702_v17 = vld [vmem:[%s13185_s1 + $0xf0] sm:$0xff] }
  0x2d   : > { %2884 = vmatpush.bf16.msra.mxu2 %v9689_v21  ;;  %3904 = vst [vmem:[#allocation3 + $0xa8] sm:$0xff] %v10098_v3  ;;  %9970 = vmatpush.bf16.msra.mxu3 %v9702_v17 }
  0x2e   : > { %3905 = vst [vmem:[#allocation3 + $0xb0] sm:$0xff] %v10098_v3 }
  0x2f   : > { %3906 = vst [vmem:[#allocation3 + $0xb8] sm:$0x3] %v10098_v3 }
  0x30   : > { %2707 = vmatpush.bf16.msra.mxu0 %v9672_v22  ;;  %9968 = vmatpush.bf16.msra.mxu1 %v9672_v22  ;;  %3907 = vst [vmem:[#allocation3 + $0xc0] sm:$0xff] %v10098_v3 }
  0x31   : > { %2885 = vmatpush.bf16.msra.mxu2 %v9688_v23  ;;  %3908 = vst [vmem:[#allocation3 + $0xc8] sm:$0xff] %v10098_v3 }
  0x32   : > { %3909 = vst [vmem:[#allocation3 + $0xd0] sm:$0x3] %v10098_v3 }
  0x33   : > { %2708 = vmatmul.bf16.vlgmr.msra.gmra.mxu0 %v7798_v24  ;;  %3910 = vst [vmem:[#allocation3 + $0xd8] sm:$0xff] %v10098_v3 }
  0x34   : > { %3911 = vst [vmem:[#allocation3 + $0xe0] sm:$0xff] %v10098_v3  ;;  %3056 = vmatpush.bf16.msrb.mxu0 %v9711_v25 }
  0x35   : > { %3912 = vst [vmem:[#allocation3 + $0xe8] sm:$0x3] %v10098_v3  ;;  %2967 = vmatpush.bf16.msrb.mxu2 %v9703_v30 }
  0x36   : > { %3913 = vst [vmem:[#allocation3 + $0xf0] sm:$0xff] %v10098_v3 }
  0x37   : > { %3914 = vst [vmem:[#allocation3 + $0xf8] sm:$0xff] %v10098_v3 }
  0x38   : > { %3915 = vst [vmem:[#allocation3 + $0x100] sm:$0x3] %v10098_v3  ;;  %3057 = vmatpush.bf16.msrb.mxu0 %v9710_v33  ;;  %v366_v33 = vld [vmem:[%s10230_s28 + $0x60] sm:$0xff] }
  0x39   : > { %3916 = vst [vmem:[#allocation3 + $0x108] sm:$0xff] %v10098_v3  ;;  %v398_v35 = vpack.c.bf16 %v366_v33, %v366_v33  ;;  %2968 = vmatpush.bf16.msrb.mxu2 %v9702_v17 }
  0x3a   : > { %3917 = vst [vmem:[#allocation3 + $0x110] sm:$0xff] %v10098_v3 }
  0x3b   : > { %3918 = vst [vmem:[#allocation3 + $0x118] sm:$0x3] %v10098_v3 }
  0x3c   : > { %3919 = vst [vmem:[#allocation3 + $0x120] sm:$0xff] %v10098_v3  ;;  %3058 = vmatpush.bf16.msrb.mxu0 %v9709_v8 }
  0x3d   : > { %3920 = vst [vmem:[#allocation3 + $0x128] sm:$0xff] %v10098_v3 }
  0x3e   : > { %3921 = vst [vmem:[#allocation3 + $0x130] sm:$0x3] %v10098_v3 }
  0x3f   : > { %3922 = vst [vmem:[#allocation3 + $0x138] sm:$0xff] %v10098_v3 }
  0x40   : > { %3923 = vst [vmem:[#allocation3 + $0x140] sm:$0xff] %v10098_v3  ;;  %3059 = vmatpush.bf16.msrb.mxu0 %v9708_v32 }
  0x41   : > { %3924 = vst [vmem:[#allocation3 + $0x148] sm:$0x3] %v10098_v3 }
  0x42   : > { %3925 = vst [vmem:[#allocation3 + $0x150] sm:$0xff] %v10098_v3 }
  0x43   : > { %3926 = vst [vmem:[#allocation3 + $0x158] sm:$0xff] %v10098_v3 }
  0x44   : > { %3927 = vst [vmem:[#allocation3 + $0x160] sm:$0x3] %v10098_v3 }
  0x45   : > { %3928 = vst [vmem:[#allocation3 + $0x168] sm:$0xff] %v10098_v3 }
  0x46   : > { %3929 = vst [vmem:[#allocation3 + $0x170] sm:$0xff] %v10098_v3 }
  0x47   : > { %3930 = vst [vmem:[#allocation3 + $0x178] sm:$0x3] %v10098_v3 }
  0x48   : > { %3931 = vst [vmem:[#allocation3 + $0x180] sm:$0xff] %v10098_v3 }
  0x49   : > { %3932 = vst [vmem:[#allocation3 + $0x188] sm:$0xff] %v10098_v3 }
  0x4a   : > { %3933 = vst [vmem:[#allocation3 + $0x190] sm:$0x3] %v10098_v3 }
  0x4b   : > { %3934 = vst [vmem:[#allocation3 + $0x198] sm:$0xff] %v10098_v3 }
  0x4c   : > { %3935 = vst [vmem:[#allocation3 + $0x1a0] sm:$0xff] %v10098_v3 }
  0x4d   : > { %3936 = vst [vmem:[#allocation3 + $0x1a8] sm:$0x3] %v10098_v3  ;;  %v415_v3 = vpack.c.bf16 %v383_v57, %v383_v57  ;;  %v9685_v57 = vld [vmem:[%s13185_s1 + $0x68] sm:$0xff] }
  0x4e   : > { %442 = vst [vmem:[#allocation2 + $0x2d0] sm:$0xf] %v410_v29 }
  0x4f   : > { %443 = vst [vmem:[#allocation2 + $0x2f4] sm:$0xf] %v411_v31  ;;  %v9687_v31 = vld [vmem:[%s13185_s1 + $0x78] sm:$0xff] }
  0x50   : > { %614 = vst [vmem:[#allocation2 + $0x8] sm:$0xf] %v582_v34  ;;  %v367_v34 = vld [vmem:[%s10230_s28 + $0x68] sm:$0xff]  ;;  %2789 = vmatpush.bf16.msrb.mxu1 %v9687_v31 }
  0x51   : > { %615 = vst [vmem:[#allocation2 + $0x2c] sm:$0xf] %v583_v36  ;;  %v386_v36 = vld [vmem:[%s10230_s28 + $0x150] sm:$0xff] }
  0x52   : > { %424 = vst [vmem:[#allocation2 + $0x48] sm:$0xf] %v392_v38  ;;  %v399_v38 = vpack.c.bf16 %v367_v34, %v367_v34  ;;  %v418_v39 = vpack.c.bf16 %v386_v36, %v386_v36 }
  0x53   : > { %425 = vst [vmem:[#allocation2 + $0x6c] sm:$0xf] %v393_v40  ;;  %v419_v40 = vpack.c.bf16 %v387_v37, %v387_v37 }
  0x54   : > { %444 = vst [vmem:[#allocation2 + $0x318] sm:$0xf] %v412_v42  ;;  %v559_v42 = vld [vmem:[%s10230_s28 + $0x6a] sm:$0xff]  ;;  %2790 = vmatpush.bf16.msrb.mxu1 %v9686_v54 }
  0x55   : > { %v8157_v52 = vld [vmem:[#allocation2 + $0x2d0] sm:$0xf]  ;;  %445 = vst [vmem:[#allocation2 + $0x33c] sm:$0xf] %v413_v45  ;;  %v591_v44 = vpack.c.bf16 %v559_v42, %v559_v42 }
  0x56   : > { %v9622_v55 = vld [vmem:[#allocation2 + $0x2f0] sm:$0xf0]  ;;  %616 = vst [vmem:[#allocation2 + $0x50] sm:$0xf] %v584_v47  ;;  %v4067_v42 = vld [vmem:[#allocation3 + $0x9] sm:$0xff] }
  0x57   : > { %v8158_v58 = vor.u32 %v9622_v55, %v8157_v52  ;;  %v7805_v59 = vld [vmem:[#allocation2 + $0x8] sm:$0xf]  ;;  %617 = vst [vmem:[#allocation2 + $0x74] sm:$0xf] %v585_v48  ;;  %v368_v55 = vld [vmem:[%s10230_s28 + $0x78] sm:$0xff] }
  0x58   : > { %v9533_v62 = vld [vmem:[#allocation2 + $0x28] sm:$0xf0]  ;;  %4226 = vst [vmem:[#allocation2 + $0x8] sm:$0xf] %v4194_v50  ;;  %2791 = vmatpush.bf16.msrb.mxu1 %v9685_v57  ;;  %v565_v57 = vld [vmem:[%s10230_s28 + $0xb2] sm:$0xff] }
  0x59   : > { %2758 = vmatmul.bf16.vlgmr.msra.gmra.mxu1 %v8158_v58  ;;  %v7806_v1 = vor.u32 %v9533_v62, %v7805_v59  ;;  %4227 = vst [vmem:[#allocation2 + $0x2c] sm:$0xf] %v4195_v53  ;;  %v7833_v2 = vld [vmem:[#allocation2 + $0x48] sm:$0xf]  ;;  %v400_v58 = vpack.c.bf16 %v368_v55, %v368_v55 }
  0x5a   : > { %v9541_v4 = vld [vmem:[#allocation2 + $0x68] sm:$0xf0]  ;;  %426 = vst [vmem:[#allocation2 + $0x90] sm:$0xf] %v394_v56  ;;  %v369_v56 = vld [vmem:[%s10230_s28 + $0x80] sm:$0xff] }
  0x5b   : > { %2886 = vmatmul.bf16.vlgmr.msra.gmra.mxu2 %v7806_v1  ;;  %v7834_v6 = vor.u32 %v9541_v4, %v7833_v2  ;;  %427 = vst [vmem:[#allocation2 + $0xb4] sm:$0xf] %v395_v60  ;;  %v8193_v21 = vld [vmem:[#allocation2 + $0x318] sm:$0xf]  ;;  %v401_v59 = vpack.c.bf16 %v369_v56, %v369_v56  ;;  %v388_v60 = vld [vmem:[%s10230_s28 + $0x168] sm:$0xff]  ;;  %v592_v2 = vpack.c.bf16 %v560_v0, %v560_v0  ;;  %v9684_v4 = vld [vmem:[%s13185_s1 + $0x60] sm:$0xff] }
  0x5c   : > { %446 = vst [vmem:[#allocation2 + $0x360] sm:$0xf] %v414_v63  ;;  %v9631_v22 = vld [vmem:[#allocation2 + $0x338] sm:$0xf0]  ;;  %v420_v62 = vpack.c.bf16 %v388_v60, %v388_v60  ;;  %v421_v63 = vpack.c.bf16 %v389_v61, %v389_v61  ;;  %v561_v1 = vld [vmem:[%s10230_s28 + $0x82] sm:$0xff]  ;;  %2792 = vmatpush.bf16.msrb.mxu1 %v9684_v4  ;;  %v564_v56 = vld [vmem:[%s10230_s28 + $0xaa] sm:$0xff] }
  0x5d   : > { %2713 = vmatmul.bf16.gmra.mxu0 %v7834_v6  ;;  %447 = vst [vmem:[#allocation2 + $0x384] sm:$0xf] %v415_v3  ;;  %v7841_v23 = vld [vmem:[#allocation2 + $0x50] sm:$0xf]  ;;  %v8194_v25 = vor.u32 %v9631_v22, %v8193_v21  ;;  %v593_v3 = vpack.c.bf16 %v561_v1, %v561_v1 }
  0x5e   : > { %618 = vst [vmem:[#allocation2 + $0x98] sm:$0xf] %v586_v5  ;;  %v9542_v24 = vld [vmem:[#allocation2 + $0x70] sm:$0xf0] }
  0x5f   : > { %619 = vst [vmem:[#allocation2 + $0xbc] sm:$0xf] %v587_v7  ;;  %v7842_v28 = vor.u32 %v9542_v24, %v7841_v23  ;;  %v455_v23 = vld [vmem:[%s10230_s28 + $0x9] sm:$0xff] }
  0x60   : > { %428 = vst [vmem:[#allocation2 + $0xd8] sm:$0xf] %v396_v11  ;;  %2793 = vmatpush.bf16.msrb.mxu1 %v9683_v14  ;;  %v566_v14 = vld [vmem:[%s10230_s28 + $0xc2] sm:$0xff] }
  0x61   : > { %429 = vst [vmem:[#allocation2 + $0xfc] sm:$0xf] %v397_v12  ;;  %v7869_v26 = vld [vmem:[#allocation2 + $0x90] sm:$0xf]  ;;  %v598_v17 = vpack.c.bf16 %v566_v14, %v566_v14 }
  0x62   : > { %448 = vst [vmem:[#allocation2 + $0x3a8] sm:$0xf] %v416_v15  ;;  %v9550_v27 = vld [vmem:[#allocation2 + $0xb0] sm:$0xf0]  ;;  %v9707_v15 = vld [vmem:[%s13185_s1 + $0x118] sm:$0xff] }
  0x63   : > { %449 = vst [vmem:[#allocation2 + $0x3cc] sm:$0xf] %v417_v18  ;;  %v7870_v29 = vor.u32 %v9550_v27, %v7869_v26  ;;  %v8229_v45 = vld [vmem:[#allocation2 + $0x360] sm:$0xf]  ;;  %v370_v18 = vld [vmem:[%s10230_s28 + $0x90] sm:$0xff]  ;;  %3060 = vmatpush.bf16.msrb.mxu0 %v9707_v15  ;;  %v487_v27 = vpack.c.bf16 %v455_v23, %v455_v23 }
  0x64   : > { %620 = vst [vmem:[#allocation2 + $0xe0] sm:$0xf] %v588_v19  ;;  %v9640_v46 = vld [vmem:[#allocation2 + $0x380] sm:$0xf0]  ;;  %v371_v19 = vld [vmem:[%s10230_s28 + $0x98] sm:$0xff]  ;;  %v402_v21 = vpack.c.bf16 %v370_v18, %v370_v18  ;;  %2794 = vmatpush.bf16.msrb.mxu1 %v9682_v16  ;;  %v567_v15 = vld [vmem:[%s10230_s28 + $0xca] sm:$0xff] }
  0x65   : > { %621 = vst [vmem:[#allocation2 + $0x104] sm:$0xf] %v589_v20  ;;  %v7877_v47 = vld [vmem:[#allocation2 + $0x98] sm:$0xf]  ;;  %v8230_v49 = vor.u32 %v9640_v46, %v8229_v45  ;;  %v454_v20 = vld [vmem:[%s10230_s28 + $0x1] sm:$0xff]  ;;  %v403_v22 = vpack.c.bf16 %v371_v19, %v371_v19  ;;  %v9706_v46 = vld [vmem:[%s13185_s1 + $0x110] sm:$0xff]  ;;  %v599_v18 = vpack.c.bf16 %v567_v15, %v567_v15 }
  0x66   : > { %430 = vst [vmem:[#allocation2 + $0x120] sm:$0xf] %v398_v35  ;;  %v9551_v48 = vld [vmem:[#allocation2 + $0xb8] sm:$0xf0]  ;;  %v486_v24 = vpack.c.bf16 %v454_v20, %v454_v20  ;;  %v9680_v35 = vld [vmem:[%s13185_s1 + $0x40] sm:$0xff]  ;;  %v573_v15 = vld [vmem:[%s10230_s28 + $0x112] sm:$0xff] }
  0x67   : > { %431 = vst [vmem:[#allocation2 + $0x144] sm:$0xf] %v399_v38  ;;  %v7905_v50 = vld [vmem:[#allocation2 + $0xd8] sm:$0xf]  ;;  %v7878_v52 = vor.u32 %v9551_v48, %v7877_v47  ;;  %v372_v47 = vld [vmem:[%s10230_s28 + $0xa8] sm:$0xff]  ;;  %3061 = vmatpush.bf16.msrb.mxu0 %v9706_v46  ;;  %v9704_v46 = vld [vmem:[%s13185_s1 + $0x100] sm:$0xff] }
  0x68   : > { %450 = vst [vmem:[#allocation2 + $0x3f0] sm:$0xf] %v418_v39  ;;  %v9559_v51 = vld [vmem:[#allocation2 + $0xf8] sm:$0xf0] }
  0x69   : > { %2763 = vmatmul.bf16.gmra.mxu1 %v8194_v25  ;;  %451 = vst [vmem:[#allocation2 + $0x414] sm:$0xf] %v419_v40  ;;  %v7906_v53 = vor.u32 %v9559_v51, %v7905_v50  ;;  %v8265_v5 = vld [vmem:[#allocation2 + $0x3a8] sm:$0xf]  ;;  %v562_v25 = vld [vmem:[%s10230_s28 + $0x92] sm:$0xff]  ;;  %v563_v26 = vld [vmem:[%s10230_s28 + $0x9a] sm:$0xff]  ;;  %v404_v50 = vpack.c.bf16 %v372_v47, %v372_v47 }
  0x6a   : > { %622 = vst [vmem:[#allocation2 + $0x128] sm:$0xf] %v590_v43  ;;  %v9649_v6 = vld [vmem:[#allocation2 + $0x3c8] sm:$0xf0]  ;;  %v595_v30 = vpack.c.bf16 %v563_v26, %v563_v26  ;;  %v4098_v43 = vpack.c.bf16 %v4066_v41, %v4066_v41  ;;  %v376_v26 = vld [vmem:[%s10230_s28 + $0xd8] sm:$0xff] }
  0x6b   : > { %2891 = vmatmul.bf16.gmra.mxu2 %v7842_v28  ;;  %623 = vst [vmem:[#allocation2 + $0x14c] sm:$0xf] %v591_v44  ;;  %v7913_v7 = vld [vmem:[#allocation2 + $0xe0] sm:$0xf]  ;;  %v8266_v9 = vor.u32 %v9649_v6, %v8265_v5  ;;  %v9681_v28 = vld [vmem:[%s13185_s1 + $0x48] sm:$0xff]  ;;  %v4099_v44 = vpack.c.bf16 %v4067_v42, %v4067_v42 }
  0x6c   : > { %432 = vst [vmem:[#allocation2 + $0x168] sm:$0xf] %v400_v58  ;;  %v9560_v8 = vld [vmem:[#allocation2 + $0x100] sm:$0xf0]  ;;  %2795 = vmatpush.bf16.msrb.mxu1 %v9681_v28  ;;  %v596_v58 = vpack.c.bf16 %v564_v56, %v564_v56  ;;  %v9701_v5 = vld [vmem:[%s13185_s1 + $0xe8] sm:$0xff]  ;;  %v571_v56 = vld [vmem:[%s10230_s28 + $0xfa] sm:$0xff] }
  0x6d   : > { %2718 = vmatmul.bf16.gmra.mxu0 %v7870_v29  ;;  %433 = vst [vmem:[#allocation2 + $0x18c] sm:$0xf] %v401_v59  ;;  %v7941_v10 = vld [vmem:[#allocation2 + $0x120] sm:$0xf]  ;;  %v7914_v12 = vor.u32 %v9560_v8, %v7913_v7  ;;  %v594_v29 = vpack.c.bf16 %v562_v25, %v562_v25  ;;  %v597_v59 = vpack.c.bf16 %v565_v57, %v565_v57  ;;  %v9705_v6 = vld [vmem:[%s13185_s1 + $0x108] sm:$0xff] }
  0x6e   : > { %452 = vst [vmem:[#allocation2 + $0x438] sm:$0xf] %v420_v62  ;;  %v9568_v11 = vld [vmem:[#allocation2 + $0x140] sm:$0xf0]  ;;  %2969 = vmatpush.bf16.msrb.mxu2 %v9701_v5  ;;  %3062 = vmatpush.bf16.msrb.mxu0 %v9705_v6  ;;  %v375_v8 = vld [vmem:[%s10230_s28 + $0xc8] sm:$0xff] }
  0x6f   : > { %453 = vst [vmem:[#allocation2 + $0x45c] sm:$0xf] %v421_v63  ;;  %v7942_v13 = vor.u32 %v9568_v11, %v7941_v10  ;;  %v8301_v31 = vld [vmem:[#allocation2 + $0x3f0] sm:$0xf]  ;;  %v374_v7 = vld [vmem:[%s10230_s28 + $0xc0] sm:$0xff]  ;;  %9971 = vmatpush.bf16.msra.mxu3 %v9701_v5  ;;  %v407_v11 = vpack.c.bf16 %v375_v8, %v375_v8 }
  0x70   : > { %624 = vst [vmem:[#allocation2 + $0x170] sm:$0xf] %v592_v2  ;;  %v9658_v32 = vld [vmem:[#allocation2 + $0x410] sm:$0xf0]  ;;  %2796 = vmatpush.bf16.msrb.mxu1 %v9680_v35  ;;  %v406_v10 = vpack.c.bf16 %v374_v7, %v374_v7  ;;  %v460_v28 = vld [vmem:[%s10230_s28 + $0x49] sm:$0xff]  ;;  %v9743_v7 = vld [vmem:[%s13185_s1 + $0x238] sm:$0xff] }
  0x71   : > { %625 = vst [vmem:[#allocation2 + $0x194] sm:$0xf] %v593_v3  ;;  %v7949_v33 = vld [vmem:[#allocation2 + $0x128] sm:$0xf]  ;;  %v8302_v36 = vor.u32 %v9658_v32, %v8301_v31  ;;  %v461_v31 = vld [vmem:[%s10230_s28 + $0x51] sm:$0xff]  ;;  %v492_v32 = vpack.c.bf16 %v460_v28, %v460_v28 }
  0x72   : > { %434 = vst [vmem:[#allocation2 + $0x1b0] sm:$0xf] %v402_v21  ;;  %v9569_v34 = vld [vmem:[#allocation2 + $0x148] sm:$0xf0]  ;;  %v493_v35 = vpack.c.bf16 %v461_v31, %v461_v31  ;;  %3063 = vmatpush.bf16.msrb.mxu0 %v9704_v46 }
  0x73   : > { %435 = vst [vmem:[#allocation2 + $0x1d4] sm:$0xf] %v403_v22  ;;  %v7977_v37 = vld [vmem:[#allocation2 + $0x168] sm:$0xf]  ;;  %v7950_v39 = vor.u32 %v9569_v34, %v7949_v33  ;;  %v568_v33 = vld [vmem:[%s10230_s28 + $0xda] sm:$0xff] }
  0x74   : > { %518 = vst [vmem:[#allocation2 + $0x4] sm:$0xf] %v486_v24  ;;  %v9577_v38 = vld [vmem:[#allocation2 + $0x188] sm:$0xf0]  ;;  %v569_v34 = vld [vmem:[%s10230_s28 + $0xe2] sm:$0xff] }
  0x75   : > { %519 = vst [vmem:[#allocation2 + $0x28] sm:$0xf] %v487_v27  ;;  %v7978_v40 = vor.u32 %v9577_v38, %v7977_v37  ;;  %v8337_v60 = vld [vmem:[#allocation2 + $0x438] sm:$0xf]  ;;  %v377_v27 = vld [vmem:[%s10230_s28 + $0xe0] sm:$0xff] }
  0x76   : > { %626 = vst [vmem:[#allocation2 + $0x1b8] sm:$0xf] %v594_v29  ;;  %v9667_v61 = vld [vmem:[#allocation2 + $0x458] sm:$0xf0]  ;;  %v408_v29 = vpack.c.bf16 %v376_v26, %v376_v26  ;;  %3412 = vmatpush.bf16.msra.mxu0 %v9743_v7 }
  0x77   : > { %627 = vst [vmem:[#allocation2 + $0x1dc] sm:$0xf] %v595_v30  ;;  %v7985_v62 = vld [vmem:[#allocation2 + $0x170] sm:$0xf]  ;;  %v8338_v0 = vor.u32 %v9667_v61, %v8337_v60  ;;  %v409_v30 = vpack.c.bf16 %v377_v27, %v377_v27  ;;  %v576_v7 = vld [vmem:[%s10230_s28 + $0x13a] sm:$0xff] }
  0x78   : > { %436 = vst [vmem:[#allocation2 + $0x1f8] sm:$0xf] %v404_v50  ;;  %v9578_v63 = vld [vmem:[#allocation2 + $0x190] sm:$0xf0] }
  0x79   : > { %2768 = vmatmul.bf16.gmra.mxu1 %v8230_v49  ;;  %v373_v49 = vld [vmem:[%s10230_s28 + $0xb0] sm:$0xff]  ;;  %628 = vst [vmem:[#allocation2 + $0x200] sm:$0xf] %v596_v58  ;;  %v7986_v3 = vor.u32 %v9578_v63, %v7985_v62 }
  0x7a   : > { %v405_v51 = vpack.c.bf16 %v373_v49, %v373_v49  ;;  %629 = vst [vmem:[#allocation2 + $0x224] sm:$0xf] %v597_v59  ;;  %v8013_v1 = vld [vmem:[#allocation2 + $0x1b0] sm:$0xf]  ;;  %v9586_v2 = vld [vmem:[#allocation2 + $0x1d0] sm:$0xf0]  ;;  %v603_v59 = vpack.c.bf16 %v571_v56, %v571_v56 }
  0x7b   : > { %2896 = vmatmul.bf16.gmra.mxu2 %v7878_v52  ;;  %v10402_v45 = vld [vmem:[#allocation2 + $0x4] sm:$0xf]  ;;  %v456_v52 = vld [vmem:[%s10230_s28 + $0x19] sm:$0xff]  ;;  %723 = vst [vmem:[#allocation2 + $0x1bc] sm:$0xf] %v404_v50  ;;  %v8014_v4 = vor.u32 %v9586_v2, %v8013_v1  ;;  %v463_v50 = vld [vmem:[%s10230_s28 + $0x69] sm:$0xff] }
  0x7c   : > { %v10408_v48 = vld [vmem:[#allocation2 + $0x24] sm:$0xf0]  ;;  %4130 = vst [vmem:[#allocation2 + $0x4] sm:$0xf] %v4098_v43  ;;  %v488_v54 = vpack.c.bf16 %v456_v52, %v456_v52  ;;  %v9700_v52 = vld [vmem:[%s13185_s1 + $0xe0] sm:$0xff] }
  0x7d   : > { %2723 = vmatmul.bf16.gmra.mxu0 %v7906_v53  ;;  %4131 = vst [vmem:[#allocation2 + $0x28] sm:$0xf] %v4099_v44  ;;  %v457_v53 = vld [vmem:[%s10230_s28 + $0x21] sm:$0xff]  ;;  %v8021_v19 = vld [vmem:[#allocation2 + $0x1b8] sm:$0xf]  ;;  %v7802_v21 = vor.u32 %v10402_v45, %v10408_v48  ;;  %2970 = vmatpush.bf16.msrb.mxu2 %v9700_v52 }
  0x7e   : > { %v489_v55 = vpack.c.bf16 %v457_v53, %v457_v53  ;;  %437 = vst [vmem:[#allocation2 + $0x21c] sm:$0xf] %v405_v51  ;;  %v9587_v20 = vld [vmem:[#allocation2 + $0x1d8] sm:$0xf0]  ;;  %v462_v49 = vld [vmem:[%s10230_s28 + $0x61] sm:$0xff]  ;;  %9972 = vmatpush.bf16.msra.mxu3 %v9700_v52 }
  0x7f   : > { %520 = vst [vmem:[#allocation2 + $0x4c] sm:$0xf] %v488_v54  ;;  %v8049_v22 = vld [vmem:[#allocation2 + $0x1f8] sm:$0xf]  ;;  %v8022_v24 = vor.u32 %v9587_v20, %v8021_v19 }
  0x80   : > { %521 = vst [vmem:[#allocation2 + $0x70] sm:$0xf] %v489_v55  ;;  %v9719_v53 = vld [vmem:[%s13185_s1 + $0x178] sm:$0xff] }
  0x81   : > { %807 = vst [vmem:[#allocation2 + $0x10] sm:$0xf] %v488_v54  ;;  %v9596_v41 = vld [vmem:[#allocation2 + $0x220] sm:$0xf0]  ;;  %v494_v54 = vpack.c.bf16 %v462_v49, %v462_v49  ;;  %3145 = vmatpush.bf16.msra.mxu1 %v9719_v53 }
  0x82   : > { %808 = vst [vmem:[#allocation2 + $0x34] sm:$0xf] %v489_v55  ;;  %v495_v55 = vpack.c.bf16 %v463_v50, %v463_v50 }
  0x83   : > { %724 = vst [vmem:[#allocation2 + $0x1e0] sm:$0xf] %v405_v51  ;;  %v570_v51 = vld [vmem:[%s10230_s28 + $0xf2] sm:$0xff] }
  0x84   : > { %438 = vst [vmem:[#allocation2 + $0x240] sm:$0xf] %v406_v10  ;;  %v602_v57 = vpack.c.bf16 %v570_v51, %v570_v51  ;;  %v9696_v51 = vld [vmem:[%s13185_s1 + $0xc0] sm:$0xff] }
  0x85   : > { %439 = vst [vmem:[#allocation2 + $0x264] sm:$0xf] %v407_v11  ;;  %v9595_v23 = vld [vmem:[#allocation2 + $0x218] sm:$0xf0] }
  0x86   : > { %630 = vst [vmem:[#allocation2 + $0x248] sm:$0xf] %v598_v17  ;;  %v8050_v25 = vor.u32 %v9595_v23, %v8049_v22  ;;  %v9537_v37 = vld [vmem:[#allocation2 + $0x4c] sm:$0xf]  ;;  %v605_v17 = vpack.c.bf16 %v573_v15, %v573_v15 }
  0x87   : > { %631 = vst [vmem:[#allocation2 + $0x26c] sm:$0xf] %v599_v18  ;;  %v7835_v38 = vld [vmem:[#allocation2 + $0x6c] sm:$0xf0] }
  0x88   : > { %725 = vst [vmem:[#allocation2 + $0x204] sm:$0xf] %v406_v10  ;;  %v7838_v42 = vor.u32 %v9537_v37, %v7835_v38  ;;  %v464_v10 = vld [vmem:[%s10230_s28 + $0x79] sm:$0xff]  ;;  %v7813_v26 = vld [vmem:[#allocation2 + $0x10] sm:$0xf]  ;;  %v574_v37 = vld [vmem:[%s10230_s28 + $0x122] sm:$0xff] }
  0x89   : > { %2773 = vmatmul.bf16.gmra.mxu1 %v8266_v9  ;;  %v458_v9 = vld [vmem:[%s10230_s28 + $0x31] sm:$0xff]  ;;  %726 = vst [vmem:[#allocation2 + $0x228] sm:$0xf] %v407_v11  ;;  %v465_v11 = vld [vmem:[%s10230_s28 + $0x81] sm:$0xff] }
  0x8a   : > { %440 = vst [vmem:[#allocation2 + $0x288] sm:$0xf] %v408_v29  ;;  %v497_v14 = vpack.c.bf16 %v465_v11, %v465_v11  ;;  %v9534_v27 = vld [vmem:[#allocation2 + $0x30] sm:$0xf0]  ;;  %v9697_v38 = vld [vmem:[%s13185_s1 + $0xc8] sm:$0xff] }
  0x8b   : > { %2901 = vmatmul.bf16.gmra.mxu2 %v7914_v12  ;;  %v459_v12 = vld [vmem:[%s10230_s28 + $0x39] sm:$0xff]  ;;  %441 = vst [vmem:[#allocation2 + $0x2ac] sm:$0xf] %v409_v30 }
  0x8c   : > { %v491_v16 = vpack.c.bf16 %v459_v12, %v459_v12  ;;  %524 = vst [vmem:[#allocation2 + $0xdc] sm:$0xf] %v492_v32  ;;  %v8085_v43 = vld [vmem:[#allocation2 + $0x240] sm:$0xf]  ;;  %v9604_v45 = vld [vmem:[#allocation2 + $0x260] sm:$0xf0] }
  0x8d   : > { %2728 = vmatmul.bf16.gmra.mxu0 %v7942_v13  ;;  %v490_v13 = vpack.c.bf16 %v458_v9, %v458_v9  ;;  %525 = vst [vmem:[#allocation2 + $0x100] sm:$0xf] %v493_v35  ;;  %v8086_v48 = vor.u32 %v9604_v45, %v8085_v43  ;;  %v8093_v62 = vld [vmem:[#allocation2 + $0x248] sm:$0xf]  ;;  %v606_v43 = vpack.c.bf16 %v574_v37, %v574_v37 }
  0x8e   : > { %523 = vst [vmem:[#allocation2 + $0xb8] sm:$0xf] %v491_v16  ;;  %v9605_v63 = vld [vmem:[#allocation2 + $0x268] sm:$0xf0] }
  0x8f   : > { %522 = vst [vmem:[#allocation2 + $0x94] sm:$0xf] %v490_v13  ;;  %v572_v12 = vld [vmem:[%s10230_s28 + $0x10a] sm:$0xff] }
  0x90   : > { %809 = vst [vmem:[#allocation2 + $0x58] sm:$0xf] %v490_v13  ;;  %v496_v13 = vpack.c.bf16 %v464_v10, %v464_v10 }
  0x91   : > { %810 = vst [vmem:[#allocation2 + $0x7c] sm:$0xf] %v491_v16  ;;  %v8121_v2 = vld [vmem:[#allocation2 + $0x288] sm:$0xf]  ;;  %v604_v16 = vpack.c.bf16 %v572_v12, %v572_v12 }
  0x92   : > { %811 = vst [vmem:[#allocation2 + $0xa0] sm:$0xf] %v492_v32  ;;  %v9698_v32 = vld [vmem:[%s13185_s1 + $0xd0] sm:$0xff]  ;;  %v577_v12 = vld [vmem:[%s10230_s28 + $0x142] sm:$0xff] }
  0x93   : > { %812 = vst [vmem:[#allocation2 + $0xc4] sm:$0xf] %v493_v35  ;;  %v9555_v18 = vld [vmem:[#allocation2 + $0xdc] sm:$0xf]  ;;  %v466_v35 = vld [vmem:[%s10230_s28 + $0x91] sm:$0xff] }
  0x94   : > { %727 = vst [vmem:[#allocation2 + $0x24c] sm:$0xf] %v408_v29  ;;  %v7907_v19 = vld [vmem:[#allocation2 + $0xfc] sm:$0xf0]  ;;  %v9699_v29 = vld [vmem:[%s13185_s1 + $0xd8] sm:$0xff] }
  0x95   : > { %728 = vst [vmem:[#allocation2 + $0x270] sm:$0xf] %v409_v30  ;;  %v7871_v61 = vld [vmem:[#allocation2 + $0xb4] sm:$0xf0]  ;;  %v7910_v23 = vor.u32 %v9555_v18, %v7907_v19  ;;  %v7814_v30 = vor.u32 %v9534_v27, %v7813_v26  ;;  %9973 = vmatpush.bf16.msra.mxu3 %v9699_v29  ;;  %2971 = vmatpush.bf16.msrb.mxu2 %v9699_v29  ;;  %v8059_v29 = vld [vmem:[#allocation2 + $0x224] sm:$0xf0] }
  0x96   : > { %526 = vst [vmem:[#allocation2 + $0x124] sm:$0xf] %v494_v54  ;;  %v9546_v60 = vld [vmem:[#allocation2 + $0x94] sm:$0xf] }
  0x97   : > { %527 = vst [vmem:[#allocation2 + $0x148] sm:$0xf] %v495_v55  ;;  %v7849_v53 = vld [vmem:[#allocation2 + $0x58] sm:$0xf] }
  0x98   : > { %634 = vst [vmem:[#allocation2 + $0x2d8] sm:$0xf] %v602_v57  ;;  %v9583_v57 = vld [vmem:[#allocation2 + $0x1bc] sm:$0xf] }
  0x99   : > { %2778 = vmatmul.bf16.gmra.mxu1 %v8302_v36  ;;  %v600_v36 = vpack.c.bf16 %v568_v33, %v568_v33  ;;  %635 = vst [vmem:[#allocation2 + $0x2fc] sm:$0xf] %v603_v59  ;;  %9974 = vmatpush.bf16.msra.mxu3 %v9698_v32  ;;  %v8023_v59 = vld [vmem:[#allocation2 + $0x1dc] sm:$0xf0] }
  0x9a   : > { %813 = vst [vmem:[#allocation2 + $0xe8] sm:$0xf] %v494_v54  ;;  %2972 = vmatpush.bf16.msrb.mxu2 %v9698_v32  ;;  %v9543_v54 = vld [vmem:[#allocation2 + $0x78] sm:$0xf0] }
  0x9b   : > { %2906 = vmatmul.bf16.gmra.mxu2 %v7950_v39  ;;  %v601_v39 = vpack.c.bf16 %v569_v34, %v569_v34  ;;  %632 = vst [vmem:[#allocation2 + $0x290] sm:$0xf] %v600_v36  ;;  %v467_v36 = vld [vmem:[%s10230_s28 + $0x99] sm:$0xff] }
  0x9c   : > { %814 = vst [vmem:[#allocation2 + $0x10c] sm:$0xf] %v495_v55 }
  0x9d   : > { %2733 = vmatmul.bf16.gmra.mxu0 %v7978_v40  ;;  %v8057_v40 = vld [vmem:[#allocation2 + $0x200] sm:$0xf]  ;;  %633 = vst [vmem:[#allocation2 + $0x2b4] sm:$0xf] %v601_v39  ;;  %v9718_v39 = vld [vmem:[%s13185_s1 + $0x170] sm:$0xff]  ;;  %9975 = vmatpush.bf16.msra.mxu3 %v9697_v38 }
  0x9e   : > { %v8058_v47 = vor.u32 %v9596_v41, %v8057_v40  ;;  %528 = vst [vmem:[#allocation2 + $0x16c] sm:$0xf] %v496_v13  ;;  %v498_v40 = vpack.c.bf16 %v466_v35, %v466_v35  ;;  %v499_v41 = vpack.c.bf16 %v467_v36, %v467_v36  ;;  %3146 = vmatpush.bf16.msra.mxu1 %v9718_v39  ;;  %v9564_v46 = vld [vmem:[#allocation2 + $0x124] sm:$0xf] }
  0x9f   : > { %529 = vst [vmem:[#allocation2 + $0x190] sm:$0xf] %v497_v14  ;;  %2973 = vmatpush.bf16.msrb.mxu2 %v9697_v38  ;;  %v8165_v49 = vld [vmem:[#allocation2 + $0x2d8] sm:$0xf]  ;;  %v470_v39 = vld [vmem:[%s10230_s28 + $0xc1] sm:$0xff] }
  0xa0   : > { %636 = vst [vmem:[#allocation2 + $0x320] sm:$0xf] %v604_v16  ;;  %v9623_v50 = vld [vmem:[#allocation2 + $0x2f8] sm:$0xf0] }
  0xa1   : > { %637 = vst [vmem:[#allocation2 + $0x344] sm:$0xf] %v605_v17  ;;  %9976 = vmatpush.bf16.msra.mxu3 %v9696_v51 }
  0xa2   : > { %815 = vst [vmem:[#allocation2 + $0x130] sm:$0xf] %v496_v13  ;;  %v608_v13 = vpack.c.bf16 %v576_v7, %v576_v7 }
  0xa3   : > { %816 = vst [vmem:[#allocation2 + $0x154] sm:$0xf] %v497_v14  ;;  %2974 = vmatpush.bf16.msrb.mxu2 %v9696_v51  ;;  %v609_v14 = vpack.c.bf16 %v577_v12, %v577_v12  ;;  %v9741_v12 = vld [vmem:[%s13185_s1 + $0x228] sm:$0xff] }
  0xa4   : > { %v9614_v22 = vld [vmem:[#allocation2 + $0x2b0] sm:$0xf0]  ;;  %530 = vst [vmem:[#allocation2 + $0x1b4] sm:$0xf] %v498_v40 }
  0xa5   : > { %531 = vst [vmem:[#allocation2 + $0x1d8] sm:$0xf] %v499_v41  ;;  %v9573_v15 = vld [vmem:[#allocation2 + $0x16c] sm:$0xf] }
  0xa6   : > { %638 = vst [vmem:[#allocation2 + $0x368] sm:$0xf] %v606_v43  ;;  %v7979_v16 = vld [vmem:[#allocation2 + $0x18c] sm:$0xf0]  ;;  %v502_v43 = vpack.c.bf16 %v470_v39, %v470_v39 }
  0xa7   : > { %817 = vst [vmem:[#allocation2 + $0x178] sm:$0xf] %v498_v40  ;;  %v8201_v18 = vld [vmem:[#allocation2 + $0x320] sm:$0xf]  ;;  %v471_v40 = vld [vmem:[%s10230_s28 + $0xc9] sm:$0xff] }
  0xa8   : > { %818 = vst [vmem:[#allocation2 + $0x19c] sm:$0xf] %v499_v41  ;;  %v9632_v19 = vld [vmem:[#allocation2 + $0x340] sm:$0xf0]  ;;  %v578_v41 = vld [vmem:[%s10230_s28 + $0x152] sm:$0xff] }
  0xa9   : > { %2783 = vmatmul.bf16.gmra.mxu1 %v8338_v0  ;;  %v7874_v0 = vor.u32 %v9546_v60, %v7871_v61  ;;  %v8166_v60 = vor.u32 %v9623_v50, %v8165_v49  ;;  %v8026_v61 = vor.u32 %v9583_v57, %v8023_v59  ;;  %640 = vst [vmem:[#allocation2 + $0x3b0] sm:$0xf] %v608_v13  ;;  %v7921_v59 = vld [vmem:[#allocation2 + $0xe8] sm:$0xf]  ;;  %v7621_v13 = vld [vmem:[%s10230_s28 + $0xf0] sm:$0xff] }
  0xaa   : > { %641 = vst [vmem:[#allocation2 + $0x3d4] sm:$0xf] %v609_v14  ;;  %v7622_v14 = vld [vmem:[%s10230_s28 + $0xf8] sm:$0xff] }
  0xab   : > { %2911 = vmatmul.bf16.gmra.mxu2 %v7986_v3  ;;  %v9613_v3 = vld [vmem:[#allocation2 + $0x2a8] sm:$0xf0]  ;;  %3005 = vmatmul.bf16.vlgmr.msra.gmra.mxu3 %v8026_v61  ;;  %534 = vst [vmem:[#allocation2 + $0x244] sm:$0xf] %v502_v43  ;;  %v9582_v50 = vld [vmem:[#allocation2 + $0x1b4] sm:$0xf] }
  0xac   : > { %v8122_v5 = vor.u32 %v9613_v3, %v8121_v2  ;;  %v8015_v51 = vld [vmem:[#allocation2 + $0x1d4] sm:$0xf0]  ;;  %821 = vst [vmem:[#allocation2 + $0x208] sm:$0xf] %v502_v43 }
  0xad   : > { %2738 = vmatmul.bf16.gmra.mxu0 %v8014_v4  ;;  %v8094_v4 = vor.u32 %v9605_v63, %v8093_v62  ;;  %v7850_v62 = vor.u32 %v9543_v54, %v7849_v53  ;;  %v8237_v53 = vld [vmem:[#allocation2 + $0x368] sm:$0xf]  ;;  %v8018_v57 = vor.u32 %v9582_v50, %v8015_v51  ;;  %v9570_v50 = vld [vmem:[#allocation2 + $0x150] sm:$0xf0] }
  0xb0   : > { %v10435_v44 = vpop.f32.mrf.mxu0 }
  0xb1   : > { %v9650_v43 = vld [vmem:[#allocation2 + $0x3d0] sm:$0xf0] }
  0xb8   : > { %v10450_v58 = vpop.f32.mrf.mxu0 }
  0xb9   : > { %2797 = vmatmul.bf16.vlgmr.msrb.gmra.mxu1 %v7802_v21  ;;  %v8129_v21 = vld [vmem:[#allocation2 + $0x290] sm:$0xf] }
  0xba   : > { %v8130_v28 = vor.u32 %v9614_v22, %v8129_v21  ;;  %v7982_v21 = vor.u32 %v9573_v15, %v7979_v16  ;;  %v7885_v22 = vld [vmem:[#allocation2 + $0xa0] sm:$0xf]  ;;  %v697_v15 = vpack.c.bf16 %v7621_v13, %v7621_v13  ;;  %v698_v16 = vpack.c.bf16 %v7622_v14, %v7622_v14  ;;  %v474_v13 = vld [vmem:[%s10230_s28 + $0xf1] sm:$0xff] }
  0xbb   : > { %2916 = vmatmul.bf16.gmra.mxu2 %v8022_v24  ;;  %v475_v14 = vld [vmem:[%s10230_s28 + $0xf9] sm:$0xff] }
  0xbc   : > { %729 = vst [vmem:[#allocation2 + $0x294] sm:$0xf] %v697_v15  ;;  %v7603_v15 = vld [vmem:[%s10230_s28 + $0x18] sm:$0xff] }
  0xbd   : > { %2743 = vmatmul.bf16.gmra.mxu0 %v8050_v25  ;;  %730 = vst [vmem:[#allocation2 + $0x2b8] sm:$0xf] %v698_v16  ;;  %v9735_v16 = vld [vmem:[%s13185_s1 + $0x1f8] sm:$0xff] }
  0xbe   : > { %3323 = vmatpush.bf16.msrb.mxu3 %v9735_v16 }
  0xc3   : > { %v9610_v51 = vld [vmem:[#allocation2 + $0x294] sm:$0xf] }
  0xc9   : > { %2802 = vmatmul.bf16.gmra.mxu1 %v7838_v42  ;;  %v575_v42 = vld [vmem:[%s10230_s28 + $0x12a] sm:$0xff] }
  0xca   : > { %v607_v45 = vpack.c.bf16 %v575_v42, %v575_v42  ;;  %v9717_v42 = vld [vmem:[%s13185_s1 + $0x168] sm:$0xff] }
  0xcb   : > { %2921 = vmatmul.bf16.gmra.mxu2 %v8058_v47  ;;  %v7943_v47 = vld [vmem:[#allocation2 + $0x144] sm:$0xf0]  ;;  %3147 = vmatpush.bf16.msra.mxu1 %v9717_v42  ;;  %v8273_v42 = vld [vmem:[#allocation2 + $0x3b0] sm:$0xf] }
  0xcc   : > { %639 = vst [vmem:[#allocation2 + $0x38c] sm:$0xf] %v607_v45  ;;  %v7946_v52 = vor.u32 %v9564_v46, %v7943_v47  ;;  %v503_v45 = vpack.c.bf16 %v471_v40, %v471_v40  ;;  %v579_v46 = vld [vmem:[%s10230_s28 + $0x15a] sm:$0xff]  ;;  %v610_v47 = vpack.c.bf16 %v578_v41, %v578_v41 }
  0xcd   : > { %2748 = vmatmul.bf16.gmra.mxu0 %v8086_v48  ;;  %v611_v49 = vpack.c.bf16 %v579_v46, %v579_v46  ;;  %v7957_v46 = vld [vmem:[#allocation2 + $0x130] sm:$0xf] }
  0xce   : > { %535 = vst [vmem:[#allocation2 + $0x268] sm:$0xf] %v503_v45 }
  0xcf   : > { %642 = vst [vmem:[#allocation2 + $0x3f8] sm:$0xf] %v610_v47 }
  0xd0   : > { %643 = vst [vmem:[#allocation2 + $0x41c] sm:$0xf] %v611_v49 }
  0xd1   : > { %822 = vst [vmem:[#allocation2 + $0x22c] sm:$0xf] %v503_v45 }
  0xd3   : > { %v9641_v54 = vld [vmem:[#allocation2 + $0x388] sm:$0xf0] }
  0xd6   : > { %v10452_v1 = vpop.f32.mrf.mxu1 }
  0xd9   : > { %2807 = vmatmul.bf16.gmra.mxu1 %v7874_v0  ;;  %v9742_v0 = vld [vmem:[%s13185_s1 + $0x230] sm:$0xff] }
  0xda   : > { %v10454_v6 = vpop.f32.mrf.mxu0  ;;  %3413 = vmatpush.bf16.msra.mxu0 %v9742_v0  ;;  %v9601_v0 = vld [vmem:[#allocation2 + $0x24c] sm:$0xf] }
  0xdb   : > { %2926 = vmatmul.bf16.gmra.mxu2 %v8094_v4  ;;  %v468_v4 = vld [vmem:[%s10230_s28 + $0xa9] sm:$0xff] }
  0xdc   : > { %v500_v10 = vpack.c.bf16 %v468_v4, %v468_v4  ;;  %v8095_v4 = vld [vmem:[#allocation2 + $0x26c] sm:$0xf0] }
  0xdd   : > { %2753 = vmatmul.bf16.gmra.mxu0 %v8122_v5  ;;  %v469_v5 = vld [vmem:[%s10230_s28 + $0xb1] sm:$0xff]  ;;  %v8098_v7 = vor.u32 %v9601_v0, %v8095_v4  ;;  %v7623_v0 = vld [vmem:[%s10230_s28 + $0x108] sm:$0xff] }
  0xde   : > { %v10459_v8 = vpop.f32.mrf.mxu2  ;;  %v10461_v9 = vpop.f32.mrf.mxu1  ;;  %v501_v11 = vpack.c.bf16 %v469_v5, %v469_v5  ;;  %532 = vst [vmem:[#allocation2 + $0x1fc] sm:$0xf] %v500_v10  ;;  %v8238_v5 = vor.u32 %v9641_v54, %v8237_v53  ;;  %3414 = vmatpush.bf16.msra.mxu0 %v9741_v12  ;;  %v8274_v53 = vor.u32 %v9650_v43, %v8273_v42  ;;  %v8131_v54 = vld [vmem:[#allocation2 + $0x2b4] sm:$0xf0]  ;;  %v7624_v4 = vld [vmem:[%s10230_s28 + $0x110] sm:$0xff] }
  0xdf   : > { %819 = vst [vmem:[#allocation2 + $0x1c0] sm:$0xf] %v500_v10  ;;  %v8309_v42 = vld [vmem:[#allocation2 + $0x3f8] sm:$0xf]  ;;  %v9659_v43 = vld [vmem:[#allocation2 + $0x418] sm:$0xf0] }
  0xe0   : > { %533 = vst [vmem:[#allocation2 + $0x220] sm:$0xf] %v501_v11 }
  0xe1   : > { %820 = vst [vmem:[#allocation2 + $0x1e4] sm:$0xf] %v501_v11 }
  0xe2   : > { %v10467_v20 = vpop.f32.mrf.mxu0 }
  0xe5   : > { %v9591_v39 = vld [vmem:[#allocation2 + $0x1fc] sm:$0xf] }
  0xe6   : > { %v10469_v24 = vpop.f32.mrf.mxu2  ;;  %v10471_v25 = vpop.f32.mrf.mxu1 }
  0xe7   : > { %v8051_v40 = vld [vmem:[#allocation2 + $0x21c] sm:$0xf0] }
  0xe8   : > { %v8054_v45 = vor.u32 %v9591_v39, %v8051_v40  ;;  %v8087_v39 = vld [vmem:[#allocation2 + $0x264] sm:$0xf0] }
  0xe9   : > { %2812 = vmatmul.bf16.gmra.mxu1 %v7910_v23  ;;  %v9552_v23 = vld [vmem:[#allocation2 + $0xc0] sm:$0xf0] }
  0xea   : > { %v10476_v31 = vpop.f32.mrf.mxu0  ;;  %v7886_v35 = vor.u32 %v9552_v23, %v7885_v22  ;;  %v473_v22 = vld [vmem:[%s10230_s28 + $0xe1] sm:$0xff]  ;;  %v580_v23 = vld [vmem:[%s10230_s28 + $0x16a] sm:$0xff] }
  0xeb   : > { %2931 = vmatmul.bf16.gmra.mxu2 %v8130_v28  ;;  %v9592_v28 = vld [vmem:[#allocation2 + $0x204] sm:$0xf] }
  0xec   : > { %v8062_v32 = vor.u32 %v9592_v28, %v8059_v29  ;;  %v505_v29 = vpack.c.bf16 %v473_v22, %v473_v22  ;;  %v506_v22 = vpack.c.bf16 %v474_v13, %v474_v13  ;;  %v9740_v13 = vld [vmem:[%s13185_s1 + $0x220] sm:$0xff] }
  0xed   : > { %3064 = vmatmul.bf16.vlgmr.msrb.gmra.mxu0 %v7814_v30  ;;  %v8202_v30 = vor.u32 %v9632_v19, %v8201_v18 }
  0xee   : > { %v10481_v33 = vpop.f32.mrf.mxu2  ;;  %v10483_v34 = vpop.f32.mrf.mxu1  ;;  %3010 = vmatmul.bf16.gmra.mxu3 %v8062_v32  ;;  %v612_v32 = vpack.c.bf16 %v580_v23, %v580_v23  ;;  %537 = vst [vmem:[#allocation2 + $0x2b0] sm:$0xf] %v505_v29  ;;  %v507_v23 = vpack.c.bf16 %v475_v14, %v475_v14  ;;  %v7625_v14 = vld [vmem:[%s10230_s28 + $0x120] sm:$0xff]  ;;  %3415 = vmatpush.bf16.msra.mxu0 %v9740_v13 }
  0xef   : > { %824 = vst [vmem:[#allocation2 + $0x274] sm:$0xf] %v505_v29  ;;  %v679_v29 = vpack.c.bf16 %v7603_v15, %v7603_v15  ;;  %v7626_v15 = vld [vmem:[%s10230_s28 + $0x128] sm:$0xff]  ;;  %v701_v16 = vpack.c.bf16 %v7625_v14, %v7625_v14 }
  0xf0   : > { %644 = vst [vmem:[#allocation2 + $0x440] sm:$0xf] %v612_v32  ;;  %v10584_v32 = vld [vmem:[%s13186_s2] ss:$0 sm:$0xff] }
  0xf1   : > { %538 = vst [vmem:[#allocation2 + $0x2d4] sm:$0xf] %v506_v22 }
  0xf2   : > { %v10495_v48 = vpop.f32.mrf.mxu0  ;;  %539 = vst [vmem:[#allocation2 + $0x2f8] sm:$0xf] %v507_v23 }
  0xf3   : > { %711 = vst [vmem:[#allocation2 + $0xc] sm:$0xf] %v679_v29  ;;  %v477_v29 = vld [vmem:[%s10230_s28 + $0x111] sm:$0xff] }
  0xf4   : > { %825 = vst [vmem:[#allocation2 + $0x298] sm:$0xf] %v506_v22 }
  0xf5   : > { %826 = vst [vmem:[#allocation2 + $0x2bc] sm:$0xf] %v507_v23 }
  0xf6   : > { %v10500_v55 = vpop.f32.mrf.mxu2  ;;  %v10502_v56 = vpop.f32.mrf.mxu1  ;;  %733 = vst [vmem:[#allocation2 + $0x324] sm:$0xf] %v701_v16 }
  0xf9   : > { %2817 = vmatmul.bf16.gmra.mxu1 %v7946_v52 }
  0xfa   : > { %v10504_v63 = vpop.f32.mrf.mxu0 }
  0xfb   : > { %2936 = vmatmul.bf16.gmra.mxu2 %v8166_v60  ;;  %v9561_v60 = vld [vmem:[#allocation2 + $0x108] sm:$0xf0] }
  0xfc   : > { %v7922_v10 = vor.u32 %v9561_v60, %v7921_v59  ;;  %v7958_v59 = vor.u32 %v9570_v50, %v7957_v46  ;;  %v7993_v50 = vld [vmem:[#allocation2 + $0x178] sm:$0xf] }
  0xfd   : > { %3069 = vmatmul.bf16.gmra.mxu0 %v7850_v62  ;;  %v9628_v16 = vld [vmem:[#allocation2 + $0x324] sm:$0xf] }
  0xfe   : > { %v10509_v2 = vpop.f32.mrf.mxu2  ;;  %v10511_v3 = vpop.f32.mrf.mxu1  ;;  %3015 = vmatmul.bf16.gmra.mxu3 %v8098_v7  ;;  %v700_v7 = vpack.c.bf16 %v7624_v4, %v7624_v4 }
 0x100   : > { %732 = vst [vmem:[#allocation2 + $0x300] sm:$0xf] %v700_v7 }
 0x102   : > { %v10517_v17 = vpop.f32.mrf.mxu0 }
 0x106   : > { %v10519_v26 = vpop.f32.mrf.mxu2  ;;  %v10521_v27 = vpop.f32.mrf.mxu1 }
 0x107   : > { %v8167_v4 = vld [vmem:[#allocation2 + $0x2fc] sm:$0xf0] }
 0x109   : > { %2822 = vmatmul.bf16.gmra.mxu1 %v7982_v21  ;;  %v472_v21 = vld [vmem:[%s10230_s28 + $0xd9] sm:$0xff] }
 0x10a   : > { %v10523_v36 = vpop.f32.mrf.mxu0  ;;  %v504_v28 = vpack.c.bf16 %v472_v21, %v472_v21  ;;  %v9716_v21 = vld [vmem:[%s13185_s1 + $0x160] sm:$0xff] }
 0x10b   : > { %2941 = vmatmul.bf16.gmra.mxu2 %v8202_v30  ;;  %v581_v30 = vld [vmem:[%s10230_s28 + $0x172] sm:$0xff]  ;;  %3148 = vmatpush.bf16.msra.mxu1 %v9716_v21  ;;  %v702_v21 = vpack.c.bf16 %v7626_v15, %v7626_v15 }
 0x10c   : > { %536 = vst [vmem:[#allocation2 + $0x28c] sm:$0xf] %v504_v28  ;;  %v9734_v15 = vld [vmem:[%s13185_s1 + $0x1f0] sm:$0xff] }
 0x10d   : > { %3074 = vmatmul.bf16.gmra.mxu0 %v7886_v35  ;;  %v613_v35 = vpack.c.bf16 %v581_v30, %v581_v30  ;;  %823 = vst [vmem:[#allocation2 + $0x250] sm:$0xf] %v504_v28  ;;  %v7604_v28 = vld [vmem:[%s10230_s28 + $0x20] sm:$0xff]  ;;  %3324 = vmatpush.bf16.msrb.mxu3 %v9734_v15 }
 0x10e   : > { %v10525_v37 = vpop.f32.mrf.mxu2  ;;  %v10527_v38 = vpop.f32.mrf.mxu1  ;;  %v680_v30 = vpack.c.bf16 %v7604_v28, %v7604_v28  ;;  %v476_v28 = vld [vmem:[%s10230_s28 + $0x109] sm:$0xff]  ;;  %734 = vst [vmem:[#allocation2 + $0x348] sm:$0xf] %v702_v21 }
 0x10f   : > { %13217 = vst [vmem:[#allocation7_spill] sm:$0xff] %v10525_v37 }
 0x110   : > { %645 = vst [vmem:[#allocation2 + $0x464] sm:$0xf] %v613_v35  ;;  %v9600_v35 = vld [vmem:[#allocation2 + $0x244] sm:$0xf] }
 0x111   : > { %712 = vst [vmem:[#allocation2 + $0x30] sm:$0xf] %v680_v30  ;;  %v8090_v46 = vor.u32 %v9600_v35, %v8087_v39  ;;  %v7605_v30 = vld [vmem:[%s10230_s28 + $0x30] sm:$0xff]  ;;  %v508_v35 = vpack.c.bf16 %v476_v28, %v476_v28  ;;  %v509_v39 = vpack.c.bf16 %v477_v29, %v477_v29 }
 0x112   : > { %v10536_v52 = vpop.f32.mrf.mxu0 }
 0x113   : > { %540 = vst [vmem:[#allocation2 + $0x31c] sm:$0xf] %v508_v35 }
 0x114   : > { %541 = vst [vmem:[#allocation2 + $0x340] sm:$0xf] %v509_v39 }
 0x115   : > { %827 = vst [vmem:[#allocation2 + $0x2e0] sm:$0xf] %v508_v35  ;;  %v8203_v29 = vld [vmem:[#allocation2 + $0x344] sm:$0xf0] }
 0x116   : > { %v10538_v61 = vpop.f32.mrf.mxu2  ;;  %v10540_v62 = vpop.f32.mrf.mxu1  ;;  %828 = vst [vmem:[#allocation2 + $0x304] sm:$0xf] %v509_v39  ;;  %v7628_v39 = vld [vmem:[%s10230_s28 + $0x140] sm:$0xff] }
 0x117   : > { %13218 = vst [vmem:[#allocation8_spill] sm:$0xff] %v10538_v61 }
 0x118   : > { %13219 = vst [vmem:[#allocation9_spill] sm:$0xff] %v10540_v62 }
 0x119   : > { %2827 = vmatmul.bf16.gmra.mxu1 %v8018_v57  ;;  %v8134_v57 = vor.u32 %v9610_v51, %v8131_v54  ;;  %v9579_v54 = vld [vmem:[#allocation2 + $0x198] sm:$0xf0] }
 0x11a   : > { %v10542_v11 = vpop.f32.mrf.mxu0 }
 0x11b   : > { %2946 = vmatmul.bf16.gmra.mxu2 %v8238_v5  ;;  %3020 = vmatmul.bf16.gmra.mxu3 %v8134_v57  ;;  %v699_v5 = vpack.c.bf16 %v7623_v0, %v7623_v0  ;;  %v8310_v0 = vor.u32 %v9659_v43, %v8309_v42  ;;  %v7606_v42 = vld [vmem:[%s10230_s28 + $0x38] sm:$0xff]  ;;  %v681_v43 = vpack.c.bf16 %v7605_v30, %v7605_v30 }
 0x11d   : > { %3079 = vmatmul.bf16.gmra.mxu0 %v7922_v10  ;;  %731 = vst [vmem:[#allocation2 + $0x2dc] sm:$0xf] %v699_v5 }
 0x11e   : > { %v10549_v18 = vpop.f32.mrf.mxu2  ;;  %v10551_v19 = vpop.f32.mrf.mxu1  ;;  %713 = vst [vmem:[#allocation2 + $0x54] sm:$0xf] %v681_v43 }
 0x11f   : > { %13220 = vst [vmem:[#allocation10_spill] sm:$0xff] %v10549_v18 }
 0x120   : > { %13221 = vst [vmem:[#allocation11_spill] sm:$0xff] %v10551_v19 }
 0x121   : > { %1000 = vst [vmem:[#allocation2 + $0x18] sm:$0xf] %v681_v43 }
 0x122   : > { %v10557_v41 = vpop.f32.mrf.mxu0 }
 0x124   : > { %v9619_v57 = vld [vmem:[#allocation2 + $0x2dc] sm:$0xf] }
 0x125   : > { %v8170_v5 = vor.u32 %v9619_v57, %v8167_v4  ;;  %v9668_v57 = vld [vmem:[#allocation2 + $0x460] sm:$0xf0] }
 0x126   : > { %v10559_v47 = vpop.f32.mrf.mxu2  ;;  %v10561_v49 = vpop.f32.mrf.mxu1 }
 0x127   : > { %13222 = vst [vmem:[#allocation12_spill] sm:$0xff] %v10559_v47 }
 0x128   : > { %13223 = vst [vmem:[#allocation13_spill] sm:$0xff] %v10561_v49 }
 0x129   : > { %2832 = vmatmul.bf16.gmra.mxu1 %v8054_v45  ;;  %v2710_v45 = vadd.f32 %v10584_v32, %v10435_v44  ;;  %v7994_v44 = vor.u32 %v9579_v54, %v7993_v50  ;;  %v8123_v50 = vld [vmem:[#allocation2 + $0x2ac] sm:$0xf0]  ;;  %v8345_v54 = vld [vmem:[#allocation2 + $0x440] sm:$0xf] }
 0x12a   : > { %v10563_v60 = vpop.f32.mrf.mxu0  ;;  %v8346_v28 = vor.u32 %v9668_v57, %v8345_v54 }
 0x12b   : > { %2951 = vmatmul.bf16.gmra.mxu2 %v8274_v53  ;;  %3025 = vmatmul.bf16.gmra.mxu3 %v8170_v5  ;;  %v8029_v5 = vld [vmem:[#allocation2 + $0x1c0] sm:$0xf] }
 0x12d   : > { %3084 = vmatmul.bf16.gmra.mxu0 %v7958_v59 }
 0x12e   : > { %v10567_v10 = vpop.f32.mrf.mxu2  ;;  %v10569_v12 = vpop.f32.mrf.mxu1 }
 0x12f   : > { %13224 = vst [vmem:[#allocation14_spill] sm:$0xff] %v10567_v10 }
 0x130   : > { %13225 = vst [vmem:[#allocation15_spill] sm:$0xff] %v10569_v12 }
 0x132   : > { %v10586_v40 = vpop.f32.mrf.mxu0 }
 0x136   : > { %v10590_v51 = vpop.f32.mrf.mxu2  ;;  %v2798_v53 = vpop.f32.mrf.mxu1 }
 0x137   : > { %13226 = vst [vmem:[#allocation16_spill] sm:$0xff] %v10590_v51  ;;  %v10592_v59 = vadd.f32 %v2798_v53, %v2710_v45  ;;  %v682_v45 = vpack.c.bf16 %v7606_v42, %v7606_v42  ;;  %v7627_v42 = vld [vmem:[%s10230_s28 + $0x138] sm:$0xff] }
 0x138   : > { %v703_v43 = vpack.c.bf16 %v7627_v42, %v7627_v42  ;;  %v9529_v42 = vld [vmem:[#allocation2 + $0xc] sm:$0xf] }
 0x139   : > { %2837 = vmatmul.bf16.gmra.mxu1 %v8090_v46  ;;  %v9609_v46 = vld [vmem:[#allocation2 + $0x28c] sm:$0xf]  ;;  %714 = vst [vmem:[#allocation2 + $0x78] sm:$0xf] %v682_v45 }
 0x13a   : > { %v10594_v7 = vpop.f32.mrf.mxu0  ;;  %v8126_v4 = vor.u32 %v9609_v46, %v8123_v50  ;;  %1001 = vst [vmem:[#allocation2 + $0x3c] sm:$0xf] %v682_v45  ;;  %v2717_v46 = vadd.f32 %v10584_v32, %v10467_v20  ;;  %v704_v50 = vpack.c.bf16 %v7628_v39, %v7628_v39  ;;  %v7807_v39 = vld [vmem:[#allocation2 + $0x2c] sm:$0xf0] }
 0x13b   : > { %2956 = vmatmul.bf16.gmra.mxu2 %v8310_v0  ;;  %v2715_v0 = vadd.f32 %v10584_v32, %v10454_v6  ;;  %v8206_v6 = vor.u32 %v9628_v16, %v8203_v29  ;;  %735 = vst [vmem:[#allocation2 + $0x36c] sm:$0xf] %v703_v43  ;;  %v7608_v16 = vld [vmem:[%s10230_s28 + $0x50] sm:$0xff] }
 0x13c   : > { %736 = vst [vmem:[#allocation2 + $0x390] sm:$0xf] %v704_v50  ;;  %v9618_v29 = vld [vmem:[#allocation2 + $0x2d4] sm:$0xf] }
 0x13d   : > { %3089 = vmatmul.bf16.gmra.mxu0 %v7994_v44  ;;  %v9588_v44 = vld [vmem:[#allocation2 + $0x1e0] sm:$0xf0]  ;;  %3030 = vmatmul.bf16.gmra.mxu3 %v8206_v6  ;;  %v8159_v6 = vld [vmem:[#allocation2 + $0x2f4] sm:$0xf0] }
 0x13e   : > { %v10601_v22 = vpop.f32.mrf.mxu2  ;;  %v10603_v23 = vpop.f32.mrf.mxu1  ;;  %v8030_v30 = vor.u32 %v9588_v44, %v8029_v5  ;;  %v7607_v5 = vld [vmem:[%s10230_s28 + $0x48] sm:$0xff]  ;;  %v9715_v44 = vld [vmem:[%s13185_s1 + $0x158] sm:$0xff]  ;;  %v8162_v43 = vor.u32 %v9618_v29, %v8159_v6 }
 0x13f   : > { %v683_v20 = vpack.c.bf16 %v7607_v5, %v7607_v5  ;;  %3149 = vmatpush.bf16.msra.mxu1 %v9715_v44 }
 0x141   : > { %715 = vst [vmem:[#allocation2 + $0x9c] sm:$0xf] %v683_v20 }
 0x142   : > { %v10609_v53 = vpop.f32.mrf.mxu0  ;;  %v9637_v5 = vld [vmem:[#allocation2 + $0x36c] sm:$0xf]  ;;  %1002 = vst [vmem:[#allocation2 + $0x60] sm:$0xf] %v683_v20  ;;  %v7629_v20 = vld [vmem:[%s10230_s28 + $0x150] sm:$0xff] }
 0x143   : > { %v8239_v51 = vld [vmem:[#allocation2 + $0x38c] sm:$0xf0]  ;;  %v705_v29 = vpack.c.bf16 %v7629_v20, %v7629_v20 }
 0x144   : > { %v8242_v10 = vor.u32 %v9637_v5, %v8239_v51  ;;  %v7630_v51 = vld [vmem:[%s10230_s28 + $0x158] sm:$0xff]  ;;  %v7610_v5 = vld [vmem:[%s10230_s28 + $0x68] sm:$0xff] }
 0x145   : > { %737 = vst [vmem:[#allocation2 + $0x3b4] sm:$0xf] %v705_v29 }
 0x146   : > { %v10613_v13 = vpop.f32.mrf.mxu2  ;;  %v2803_v14 = vpop.f32.mrf.mxu1 }
 0x147   : > { %v10618_v21 = vadd.f32 %v2803_v14, %v2715_v0  ;;  %v478_v0 = vld [vmem:[%s10230_s28 + $0x121] sm:$0xff] }
 0x148   : > { %v510_v14 = vpack.c.bf16 %v478_v0, %v478_v0 }
 0x149   : > { %2842 = vmatmul.bf16.gmra.mxu1 %v8126_v4  ;;  %v479_v4 = vld [vmem:[%s10230_s28 + $0x129] sm:$0xff] }
 0x14a   : > { %v10620_v35 = vpop.f32.mrf.mxu0  ;;  %v511_v15 = vpack.c.bf16 %v479_v4, %v479_v4  ;;  %542 = vst [vmem:[#allocation2 + $0x364] sm:$0xf] %v510_v14  ;;  %v9597_v4 = vld [vmem:[#allocation2 + $0x228] sm:$0xf0] }
 0x14b   : > { %2961 = vmatmul.bf16.gmra.mxu2 %v8346_v28  ;;  %v684_v28 = vpack.c.bf16 %v7608_v16, %v7608_v16  ;;  %829 = vst [vmem:[#allocation2 + $0x328] sm:$0xf] %v510_v14  ;;  %v7810_v16 = vor.u32 %v9529_v42, %v7807_v39  ;;  %v9733_v14 = vld [vmem:[%s13185_s1 + $0x1e8] sm:$0xff]  ;;  %v480_v39 = vld [vmem:[%s10230_s28 + $0x139] sm:$0xff] }
 0x14c   : > { %543 = vst [vmem:[#allocation2 + $0x388] sm:$0xf] %v511_v15  ;;  %3325 = vmatpush.bf16.msrb.mxu3 %v9733_v14  ;;  %v8195_v14 = vld [vmem:[#allocation2 + $0x33c] sm:$0xf0] }
 0x14d   : > { %3094 = vmatmul.bf16.gmra.mxu0 %v8030_v30  ;;  %716 = vst [vmem:[#allocation2 + $0xc0] sm:$0xf] %v684_v28  ;;  %3035 = vmatmul.bf16.gmra.mxu3 %v8242_v10  ;;  %v706_v10 = vpack.c.bf16 %v7630_v51, %v7630_v51  ;;  %v7843_v51 = vld [vmem:[#allocation2 + $0x74] sm:$0xf0] }
 0x14e   : > { %v10626_v54 = vpop.f32.mrf.mxu2  ;;  %v2805_v57 = vpop.f32.mrf.mxu1  ;;  %830 = vst [vmem:[#allocation2 + $0x34c] sm:$0xf] %v511_v15  ;;  %v9739_v15 = vld [vmem:[%s13185_s1 + $0x218] sm:$0xff] }
 0x14f   : > { %v10631_v45 = vadd.f32 %v2805_v57, %v2717_v46  ;;  %v2720_v46 = vadd.f32 %v10584_v32, %v10476_v31  ;;  %v8065_v57 = vld [vmem:[#allocation2 + $0x208] sm:$0xf]  ;;  %1003 = vst [vmem:[#allocation2 + $0x84] sm:$0xf] %v684_v28  ;;  %v2722_v28 = vadd.f32 %v10584_v32, %v10495_v48  ;;  %3416 = vmatpush.bf16.msra.mxu0 %v9739_v15  ;;  %v9538_v15 = vld [vmem:[#allocation2 + $0x54] sm:$0xf] }
 0x150   : > { %v8066_v12 = vor.u32 %v9597_v4, %v8065_v57  ;;  %738 = vst [vmem:[#allocation2 + $0x3d8] sm:$0xf] %v706_v10  ;;  %v686_v48 = vpack.c.bf16 %v7610_v5, %v7610_v5  ;;  %v7846_v47 = vor.u32 %v9538_v15, %v7843_v51 }
 0x152   : > { %v10637_v30 = vpop.f32.mrf.mxu0  ;;  %718 = vst [vmem:[#allocation2 + $0x108] sm:$0xf] %v686_v48 }
 0x153   : > { %1005 = vst [vmem:[#allocation2 + $0xcc] sm:$0xf] %v686_v48  ;;  %v9732_v48 = vld [vmem:[%s13185_s1 + $0x1e0] sm:$0xff] }
 0x154   : > { %3326 = vmatpush.bf16.msrb.mxu3 %v9732_v48  ;;  %v7879_v19 = vld [vmem:[#allocation2 + $0xbc] sm:$0xf0] }
 0x156   : > { %v10641_v0 = vpop.f32.mrf.mxu2  ;;  %v2808_v50 = vpop.f32.mrf.mxu1 }
 0x157   : > { %v10643_v44 = vadd.f32 %v2808_v50, %v2720_v46  ;;  %v481_v46 = vld [vmem:[%s10230_s28 + $0x141] sm:$0xff]  ;;  %v512_v50 = vpack.c.bf16 %v480_v39, %v480_v39  ;;  %v8275_v49 = vld [vmem:[#allocation2 + $0x3d4] sm:$0xf0] }
 0x158   : > { %v513_v4 = vpack.c.bf16 %v481_v46, %v481_v46  ;;  %v9606_v46 = vld [vmem:[#allocation2 + $0x270] sm:$0xf0] }
 0x159   : > { %2847 = vmatmul.bf16.gmra.mxu1 %v8162_v43  ;;  %v7609_v43 = vld [vmem:[%s10230_s28 + $0x60] sm:$0xff]  ;;  %544 = vst [vmem:[#allocation2 + $0x3ac] sm:$0xf] %v512_v50 }
 0x15a   : > { %v10645_v31 = vpop.f32.mrf.mxu0  ;;  %545 = vst [vmem:[#allocation2 + $0x3d0] sm:$0xf] %v513_v4 }
 0x15b   : > { %2975 = vmatmul.bf16.vlgmr.msrb.gmra.mxu2 %v7810_v16  ;;  %v685_v16 = vpack.c.bf16 %v7609_v43, %v7609_v43  ;;  %831 = vst [vmem:[#allocation2 + $0x370] sm:$0xf] %v512_v50  ;;  %v9646_v43 = vld [vmem:[#allocation2 + $0x3b4] sm:$0xf] }
 0x15c   : > { %832 = vst [vmem:[#allocation2 + $0x394] sm:$0xf] %v513_v4  ;;  %v8278_v18 = vor.u32 %v9646_v43, %v8275_v49  ;;  %v2727_v4 = vadd.f32 %v10584_v32, %v10517_v17  ;;  %v9714_v17 = vld [vmem:[%s13185_s1 + $0x150] sm:$0xff]  ;;  %v7612_v43 = vld [vmem:[%s10230_s28 + $0x80] sm:$0xff] }
 0x15d   : > { %3099 = vmatmul.bf16.gmra.mxu0 %v8066_v12  ;;  %v9627_v12 = vld [vmem:[#allocation2 + $0x31c] sm:$0xf]  ;;  %717 = vst [vmem:[#allocation2 + $0xe4] sm:$0xf] %v685_v16  ;;  %3150 = vmatpush.bf16.msra.mxu1 %v9714_v17 }
 0x15e   : > { %v10657_v6 = vpop.f32.mrf.mxu2  ;;  %v2810_v42 = vpop.f32.mrf.mxu1  ;;  %v8198_v29 = vor.u32 %v9627_v12, %v8195_v14  ;;  %1004 = vst [vmem:[#allocation2 + $0xa8] sm:$0xf] %v685_v16  ;;  %3040 = vmatmul.bf16.gmra.mxu3 %v8278_v18  ;;  %v7631_v12 = vld [vmem:[%s10230_s28 + $0x168] sm:$0xff]  ;;  %v7632_v14 = vld [vmem:[%s10230_s28 + $0x170] sm:$0xff]  ;;  %v483_v18 = vld [vmem:[%s10230_s28 + $0x159] sm:$0xff] }
 0x15f   : > { %v10662_v57 = vadd.f32 %v2810_v42, %v2722_v28  ;;  %v2725_v28 = vadd.f32 %v10584_v32, %v10504_v63  ;;  %v8101_v42 = vld [vmem:[#allocation2 + $0x250] sm:$0xf]  ;;  %v707_v15 = vpack.c.bf16 %v7631_v12, %v7631_v12  ;;  %v708_v16 = vpack.c.bf16 %v7632_v14, %v7632_v14  ;;  %v9636_v14 = vld [vmem:[#allocation2 + $0x364] sm:$0xf] }
 0x160   : > { %v8102_v63 = vor.u32 %v9606_v46, %v8101_v42  ;;  %v7611_v46 = vld [vmem:[%s10230_s28 + $0x78] sm:$0xff]  ;;  %v688_v12 = vpack.c.bf16 %v7612_v43, %v7612_v43 }
 0x161   : > { %739 = vst [vmem:[#allocation2 + $0x3fc] sm:$0xf] %v707_v15  ;;  %v2730_v15 = vadd.f32 %v10584_v32, %v10523_v36 }
 0x162   : > { %v10665_v20 = vpop.f32.mrf.mxu0  ;;  %740 = vst [vmem:[#allocation2 + $0x420] sm:$0xf] %v708_v16  ;;  %v8137_v16 = vld [vmem:[#allocation2 + $0x298] sm:$0xf] }
 0x163   : > { %720 = vst [vmem:[#allocation2 + $0x150] sm:$0xf] %v688_v12 }
 0x164   : > { %1007 = vst [vmem:[#allocation2 + $0x114] sm:$0xf] %v688_v12  ;;  %v2732_v12 = vadd.f32 %v10584_v32, %v10536_v52 }
 0x166   : > { %v10669_v39 = vpop.f32.mrf.mxu2  ;;  %v2813_v10 = vpop.f32.mrf.mxu1 }
 0x167   : > { %v10671_v5 = vadd.f32 %v2813_v10, %v2725_v28  ;;  %v482_v28 = vld [vmem:[%s10230_s28 + $0x151] sm:$0xff]  ;;  %v515_v10 = vpack.c.bf16 %v483_v18, %v483_v18 }
 0x168   : > { %v514_v42 = vpack.c.bf16 %v482_v28, %v482_v28  ;;  %v9655_v17 = vld [vmem:[#allocation2 + $0x3fc] sm:$0xf] }
 0x169   : > { %2852 = vmatmul.bf16.gmra.mxu1 %v8198_v29  ;;  %v9727_v29 = vld [vmem:[%s13185_s1 + $0x1b8] sm:$0xff]  ;;  %547 = vst [vmem:[#allocation2 + $0x418] sm:$0xf] %v515_v10 }
 0x16a   : > { %v10673_v50 = vpop.f32.mrf.mxu0  ;;  %3234 = vmatpush.bf16.msra.mxu2 %v9727_v29  ;;  %546 = vst [vmem:[#allocation2 + $0x3f4] sm:$0xf] %v514_v42  ;;  %v9615_v29 = vld [vmem:[#allocation2 + $0x2b8] sm:$0xf0] }
 0x16b   : > { %13227 = vst [vmem:[#allocation17_spill] sm:$0xff] %v10673_v50  ;;  %2980 = vmatmul.bf16.gmra.mxu2 %v7846_v47  ;;  %v9547_v50 = vld [vmem:[#allocation2 + $0x9c] sm:$0xf] }
 0x16c   : > { %833 = vst [vmem:[#allocation2 + $0x3b8] sm:$0xf] %v514_v42  ;;  %v7882_v43 = vor.u32 %v9547_v50, %v7879_v19  ;;  %v9738_v42 = vld [vmem:[%s13185_s1 + $0x210] sm:$0xff]  ;;  %v10712_v50 = vpop.f32.mrf.mxu3 }
 0x16d   : > { %3104 = vmatmul.bf16.gmra.mxu0 %v8102_v63  ;;  %v687_v63 = vpack.c.bf16 %v7611_v46, %v7611_v46  ;;  %834 = vst [vmem:[#allocation2 + $0x3dc] sm:$0xf] %v515_v10  ;;  %v9726_v19 = vld [vmem:[%s13185_s1 + $0x1b0] sm:$0xff]  ;;  %v7633_v10 = vld [vmem:[%s10230_s28 + $0x180] sm:$0xff] }
 0x16e   : > { %v10679_v49 = vpop.f32.mrf.mxu2  ;;  %v2815_v51 = vpop.f32.mrf.mxu1  ;;  %3235 = vmatpush.bf16.msra.mxu2 %v9726_v19  ;;  %3417 = vmatpush.bf16.msra.mxu0 %v9738_v42  ;;  %v8267_v42 = vld [vmem:[#allocation2 + $0x3cc] sm:$0xf0] }
 0x16f   : > { %v10686_v47 = vadd.f32 %v2815_v51, %v2727_v4  ;;  %v8231_v4 = vld [vmem:[#allocation2 + $0x384] sm:$0xf0]  ;;  %719 = vst [vmem:[#allocation2 + $0x12c] sm:$0xf] %v687_v63 }
 0x170   : > { %v8234_v48 = vor.u32 %v9636_v14, %v8231_v4  ;;  %1006 = vst [vmem:[#allocation2 + $0xf0] sm:$0xf] %v687_v63  ;;  %v7634_v63 = vld [vmem:[%s10230_s28 + $0x188] sm:$0xff] }
 0x171   : > { %13228 = vst [vmem:[#allocation18_spill] sm:$0xff] %v10686_v47  ;;  %v8138_v47 = vor.u32 %v9615_v29, %v8137_v16  ;;  %v710_v14 = vpack.c.bf16 %v7634_v63, %v7634_v63  ;;  %v7613_v16 = vld [vmem:[%s10230_s28 + $0x90] sm:$0xff]  ;;  %v9731_v29 = vld [vmem:[%s13185_s1 + $0x1d8] sm:$0xff] }
 0x172   : > { %v10696_v51 = vpop.f32.mrf.mxu0  ;;  %3327 = vmatpush.bf16.msrb.mxu3 %v9731_v29  ;;  %v9624_v29 = vld [vmem:[#allocation2 + $0x300] sm:$0xf0] }
 0x173   : > { %13229 = vst [vmem:[#allocation19_spill] sm:$0xff] %v10696_v51  ;;  %v8311_v51 = vld [vmem:[#allocation2 + $0x41c] sm:$0xf0] }
 0x174   : > { %v8314_v61 = vor.u32 %v9655_v17, %v8311_v51  ;;  %742 = vst [vmem:[#allocation2 + $0x468] sm:$0xf] %v710_v14  ;;  %v2735_v14 = vadd.f32 %v10584_v32, %v10542_v11 }
 0x176   : > { %v10700_v28 = vpop.f32.mrf.mxu2  ;;  %v2818_v18 = vpop.f32.mrf.mxu1  ;;  %3045 = vmatmul.bf16.gmra.mxu3 %v8314_v61  ;;  %v709_v61 = vpack.c.bf16 %v7633_v10, %v7633_v10  ;;  %v9645_v10 = vld [vmem:[#allocation2 + $0x3ac] sm:$0xf] }
 0x177   : > { %v10702_v46 = vadd.f32 %v2818_v18, %v2730_v15  ;;  %v484_v15 = vld [vmem:[%s10230_s28 + $0x169] sm:$0xff] }
 0x178   : > { %741 = vst [vmem:[#allocation2 + $0x444] sm:$0xf] %v709_v61  ;;  %v516_v52 = vpack.c.bf16 %v484_v15, %v484_v15  ;;  %v7915_v61 = vld [vmem:[#allocation2 + $0x104] sm:$0xf0]  ;;  %v10734_v15 = vpop.f32.mrf.mxu3 }
 0x179   : > { %13230 = vst [vmem:[#allocation20_spill] sm:$0xff] %v10702_v46  ;;  %2857 = vmatmul.bf16.gmra.mxu1 %v8234_v48  ;;  %v485_v48 = vld [vmem:[%s10230_s28 + $0x171] sm:$0xff] }
 0x17a   : > { %v10704_v36 = vpop.f32.mrf.mxu0  ;;  %v517_v17 = vpack.c.bf16 %v485_v48, %v485_v48  ;;  %548 = vst [vmem:[#allocation2 + $0x43c] sm:$0xf] %v516_v52  ;;  %v8270_v48 = vor.u32 %v9645_v10, %v8267_v42  ;;  %v9723_v42 = vld [vmem:[%s13185_s1 + $0x198] sm:$0xff] }
 0x17b   : > { %13231 = vst [vmem:[#allocation21_spill] sm:$0xff] %v10704_v36  ;;  %2985 = vmatmul.bf16.gmra.mxu2 %v7882_v43  ;;  %v689_v43 = vpack.c.bf16 %v7613_v16, %v7613_v16  ;;  %v8173_v16 = vld [vmem:[#allocation2 + $0x2e0] sm:$0xf]  ;;  %v8347_v62 = vld [vmem:[#allocation2 + $0x464] sm:$0xf0] }
 0x17c   : > { %549 = vst [vmem:[#allocation2 + $0x460] sm:$0xf] %v517_v17  ;;  %v9724_v36 = vld [vmem:[%s13185_s1 + $0x1a0] sm:$0xff] }
 0x17d   : > { %3109 = vmatmul.bf16.gmra.mxu0 %v8138_v47  ;;  %v7614_v47 = vld [vmem:[%s10230_s28 + $0x98] sm:$0xff]  ;;  %721 = vst [vmem:[#allocation2 + $0x174] sm:$0xf] %v689_v43 }
 0x17e   : > { %v10718_v4 = vpop.f32.mrf.mxu2  ;;  %v2820_v51 = vpop.f32.mrf.mxu1  ;;  %v690_v19 = vpack.c.bf16 %v7614_v47, %v7614_v47  ;;  %835 = vst [vmem:[#allocation2 + $0x400] sm:$0xf] %v516_v52  ;;  %v8174_v52 = vor.u32 %v9624_v29, %v8173_v16  ;;  %v7732_v16 = vld [vmem:[%s10230_s28 + $0x39] sm:$0xff]  ;;  %v9654_v29 = vld [vmem:[#allocation2 + $0x3f4] sm:$0xf] }
 0x17f   : > { %v10723_v18 = vadd.f32 %v2820_v51, %v2732_v12  ;;  %v9725_v12 = vld [vmem:[%s13185_s1 + $0x1a8] sm:$0xff]  ;;  %v9556_v51 = vld [vmem:[#allocation2 + $0xe4] sm:$0xf]  ;;  %836 = vst [vmem:[#allocation2 + $0x424] sm:$0xf] %v517_v17 }
 0x180   : > { %3236 = vmatpush.bf16.msra.mxu2 %v9725_v12  ;;  %722 = vst [vmem:[#allocation2 + $0x198] sm:$0xf] %v690_v19  ;;  %v7918_v12 = vor.u32 %v9556_v51, %v7915_v61  ;;  %v10750_v17 = vpop.f32.mrf.mxu3  ;;  %v9730_v61 = vld [vmem:[%s13185_s1 + $0x1d0] sm:$0xff] }
 0x181   : > { %13232 = vst [vmem:[#allocation22_spill] sm:$0xff] %v10723_v18  ;;  %v9664_v18 = vld [vmem:[#allocation2 + $0x444] sm:$0xf]  ;;  %3328 = vmatpush.bf16.msrb.mxu3 %v9730_v61  ;;  %v9729_v61 = vld [vmem:[%s13185_s1 + $0x1c8] sm:$0xff] }
 0x182   : > { %v10729_v63 = vpop.f32.mrf.mxu0  ;;  %1008 = vst [vmem:[#allocation2 + $0x138] sm:$0xf] %v689_v43  ;;  %v8350_v11 = vor.u32 %v9664_v18, %v8347_v62  ;;  %v2737_v62 = vadd.f32 %v10584_v32, %v10557_v41  ;;  %v9722_v43 = vld [vmem:[%s13185_s1 + $0x190] sm:$0xff] }
 0x183   : > { %13233 = vst [vmem:[#allocation23_spill] sm:$0xff] %v10729_v63  ;;  %v7731_v41 = vld [vmem:[%s10230_s28 + $0x31] sm:$0xff] }
 0x184   : > { %3237 = vmatpush.bf16.msra.mxu2 %v9724_v36  ;;  %1009 = vst [vmem:[#allocation2 + $0x15c] sm:$0xf] %v690_v19  ;;  %v7667_v19 = vld [vmem:[%s10230_s28 + $0x1a] sm:$0xff] }
 0x185   : > { %3329 = vmatpush.bf16.msrb.mxu3 %v9729_v61 }
 0x186   : > { %v10738_v47 = vpop.f32.mrf.mxu2  ;;  %v2823_v63 = vpop.f32.mrf.mxu1  ;;  %3050 = vmatmul.bf16.gmra.mxu3 %v8350_v11  ;;  %v1065_v11 = vpack.c.bf16 %v7732_v16, %v7732_v16  ;;  %v8209_v16 = vld [vmem:[#allocation2 + $0x328] sm:$0xf] }
 0x187   : > { %v10743_v46 = vadd.f32 %v2823_v63, %v2735_v14  ;;  %v7668_v63 = vld [vmem:[%s10230_s28 + $0x22] sm:$0xff]  ;;  %v871_v14 = vpack.c.bf16 %v7667_v19, %v7667_v19  ;;  %v7951_v19 = vld [vmem:[#allocation2 + $0x14c] sm:$0xf0] }
 0x188   : > { %3238 = vmatpush.bf16.msra.mxu2 %v9723_v42  ;;  %1097 = vst [vmem:[#allocation2 + $0x40] sm:$0xf] %v1065_v11 }
 0x189   : > { %13234 = vst [vmem:[#allocation24_spill] sm:$0xff] %v10743_v46  ;;  %2862 = vmatmul.bf16.gmra.mxu1 %v8270_v48  ;;  %v872_v48 = vpack.c.bf16 %v7668_v63, %v7668_v63  ;;  %v10776_v63 = vpop.f32.mrf.mxu3  ;;  %v9663_v46 = vld [vmem:[#allocation2 + $0x43c] sm:$0xf] }
 0x18a   : > { %v10745_v10 = vpop.f32.mrf.mxu0  ;;  %903 = vst [vmem:[#allocation2 + $0x14] sm:$0xf] %v871_v14  ;;  %v2740_v14 = vadd.f32 %v10584_v32, %v10563_v60  ;;  %v9728_v60 = vld [vmem:[%s13185_s1 + $0x1c0] sm:$0xff] }
 0x18b   : > { %13235 = vst [vmem:[#allocation25_spill] sm:$0xff] %v10745_v10  ;;  %2990 = vmatmul.bf16.gmra.mxu2 %v7918_v12  ;;  %v1064_v12 = vpack.c.bf16 %v7731_v41, %v7731_v41  ;;  %v9633_v10 = vld [vmem:[#allocation2 + $0x348] sm:$0xf0]  ;;  %3330 = vmatpush.bf16.msrb.mxu3 %v9728_v60 }
 0x18c   : > { %3239 = vmatpush.bf16.msra.mxu2 %v9722_v43  ;;  %904 = vst [vmem:[#allocation2 + $0x38] sm:$0xf] %v872_v48  ;;  %v9565_v43 = vld [vmem:[#allocation2 + $0x12c] sm:$0xf] }
 0x18d   : > { %3114 = vmatmul.bf16.gmra.mxu0 %v8174_v52  ;;  %v8303_v52 = vld [vmem:[#allocation2 + $0x414] sm:$0xf0]  ;;  %1096 = vst [vmem:[#allocation2 + $0x1c] sm:$0xf] %v1064_v12  ;;  %v9712_v12 = vld [vmem:[%s13185_s1 + $0x140] sm:$0xff]  ;;  %v7954_v11 = vor.u32 %v9565_v43, %v7951_v19  ;;  %v9737_v43 = vld [vmem:[%s13185_s1 + $0x208] sm:$0xff] }
 0x18e   : > { %v10754_v36 = vpop.f32.mrf.mxu2  ;;  %v2825_v18 = vpop.f32.mrf.mxu1  ;;  %v8306_v41 = vor.u32 %v9654_v29, %v8303_v52  ;;  %v8210_v52 = vor.u32 %v9633_v10, %v8209_v16  ;;  %v2742_v10 = vadd.f32 %v10584_v32, %v10586_v40  ;;  %3418 = vmatpush.bf16.msra.mxu0 %v9737_v43  ;;  %v7733_v60 = vld [vmem:[%s10230_s28 + $0x49] sm:$0xff]  ;;  %v8339_v40 = vld [vmem:[#allocation2 + $0x45c] sm:$0xf0] }
 0x18f   : > { %v10761_v51 = vadd.f32 %v2825_v18, %v2737_v62  ;;  %v9713_v62 = vld [vmem:[%s13185_s1 + $0x148] sm:$0xff]  ;;  %v7823_v19 = vld [vmem:[#allocation2 + $0x3c] sm:$0xf0] }
 0x190   : > { %v9721_v18 = vld [vmem:[%s13185_s1 + $0x188] sm:$0xff]  ;;  %3151 = vmatpush.bf16.msra.mxu1 %v9713_v62  ;;  %v9720_v62 = vld [vmem:[%s13185_s1 + $0x180] sm:$0xff] }
 0x191   : > { %13236 = vst [vmem:[#allocation26_spill] sm:$0xff] %v10761_v51  ;;  %3240 = vmatpush.bf16.msra.mxu2 %v9721_v18 }
 0x192   : > { %v10768_v42 = vpop.f32.mrf.mxu0 }
 0x193   : > { %13237 = vst [vmem:[#allocation27_spill] sm:$0xff] %v10768_v42 }
 0x194   : > { %3152 = vmatpush.bf16.msra.mxu1 %v9712_v12  ;;  %v9531_v51 = vld [vmem:[#allocation2 + $0x1c] sm:$0xf] }
 0x195   : > { %3241 = vmatpush.bf16.msra.mxu2 %v9720_v62  ;;  %v7670_v12 = vld [vmem:[%s10230_s28 + $0x3a] sm:$0xff] }
 0x196   : > { %v10783_v42 = vpop.f32.mrf.mxu2  ;;  %v2828_v48 = vpop.f32.mrf.mxu1 }
 0x197   : > { %v2829_v18 = vadd.f32 %v2828_v48, %v2740_v14 }
 0x199   : > { %2867 = vmatmul.bf16.gmra.mxu1 %v8306_v41  ;;  %v2918_v29 = vadd.f32 %v10601_v22, %v2829_v18  ;;  %v10803_v41 = vpop.f32.mrf.mxu3  ;;  %v7826_v22 = vor.u32 %v9531_v51, %v7823_v19  ;;  %v1066_v51 = vpack.c.bf16 %v7733_v60, %v7733_v60  ;;  %v8245_v60 = vld [vmem:[#allocation2 + $0x370] sm:$0xf] }
 0x19a   : > { %v10795_v61 = vpop.f32.mrf.mxu0 }
 0x19b   : > { %13238 = vst [vmem:[#allocation28_spill] sm:$0xff] %v10795_v61  ;;  %2995 = vmatmul.bf16.gmra.mxu2 %v7954_v11  ;;  %v10798_v14 = vadd.f32 %v10712_v50, %v2918_v29  ;;  %3331 = vmatmul.bf16.vlgmr.msrb.gmra.mxu3 %v7826_v22  ;;  %v7669_v50 = vld [vmem:[%s10230_s28 + $0x32] sm:$0xff]  ;;  %v874_v11 = vpack.c.bf16 %v7670_v12, %v7670_v12 }
 0x19c   : > { %v873_v18 = vpack.c.bf16 %v7669_v50, %v7669_v50  ;;  %v7734_v29 = vld [vmem:[%s10230_s28 + $0x51] sm:$0xff]  ;;  %1098 = vst [vmem:[#allocation2 + $0x64] sm:$0xf] %v1066_v51  ;;  %v8342_v50 = vor.u32 %v9663_v46, %v8339_v40 }
 0x19d   : > { %3119 = vmatmul.bf16.gmra.mxu0 %v8210_v52  ;;  %v1067_v19 = vpack.c.bf16 %v7734_v29, %v7734_v29  ;;  %906 = vst [vmem:[#allocation2 + $0x80] sm:$0xf] %v874_v11  ;;  %v9574_v22 = vld [vmem:[#allocation2 + $0x174] sm:$0xf] }
 0x19e   : > { %v10807_v16 = vpop.f32.mrf.mxu2  ;;  %v2830_v48 = vpop.f32.mrf.mxu1  ;;  %905 = vst [vmem:[#allocation2 + $0x5c] sm:$0xf] %v873_v18  ;;  %v9642_v29 = vld [vmem:[#allocation2 + $0x390] sm:$0xf0] }
 0x19f   : > { %v2831_v62 = vadd.f32 %v2830_v48, %v2742_v10  ;;  %v7987_v10 = vld [vmem:[#allocation2 + $0x194] sm:$0xf0]  ;;  %1099 = vst [vmem:[#allocation2 + $0x88] sm:$0xf] %v1067_v19  ;;  %v8246_v51 = vor.u32 %v9642_v29, %v8245_v60  ;;  %v7735_v60 = vld [vmem:[%s10230_s28 + $0x61] sm:$0xff] }
 0x1a0   : > { %1192 = vst [vmem:[#allocation2 + $0x20] sm:$0xf] %v873_v18 }
 0x1a1   : > { %v2920_v61 = vadd.f32 %v10613_v13, %v2831_v62  ;;  %v10819_v48 = vpop.f32.mrf.mxu3  ;;  %v2745_v13 = vadd.f32 %v10584_v32, %v10594_v7  ;;  %1193 = vst [vmem:[#allocation2 + $0x44] sm:$0xf] %v874_v11  ;;  %v2747_v11 = vadd.f32 %v10584_v32, %v10609_v53  ;;  %v9530_v53 = vld [vmem:[#allocation2 + $0x14] sm:$0xf] }
 0x1a2   : > { %v10814_v52 = vpop.f32.mrf.mxu0 }
 0x1a3   : > { %13239 = vst [vmem:[#allocation29_spill] sm:$0xff] %v10814_v52  ;;  %v10817_v43 = vadd.f32 %v10734_v15, %v2920_v61  ;;  %v7990_v15 = vor.u32 %v9574_v22, %v7987_v10  ;;  %v9540_v37 = vld [vmem:[#allocation2 + $0x64] sm:$0xf]  ;;  %v7672_v10 = vld [vmem:[%s10230_s28 + $0x52] sm:$0xff] }
 0x1a6   : > { %v10823_v12 = vpop.f32.mrf.mxu2  ;;  %v2833_v62 = vpop.f32.mrf.mxu1  ;;  %v7859_v46 = vld [vmem:[#allocation2 + $0x84] sm:$0xf0] }
 0x1a7   : > { %v2834_v52 = vadd.f32 %v2833_v62, %v2745_v13  ;;  %v7862_v18 = vor.u32 %v9540_v37, %v7859_v46  ;;  %v876_v62 = vpack.c.bf16 %v7672_v10, %v7672_v10  ;;  %v1068_v37 = vpack.c.bf16 %v7735_v60, %v7735_v60  ;;  %v8281_v60 = vld [vmem:[#allocation2 + $0x3b8] sm:$0xf] }
 0x1a9   : > { %2872 = vmatmul.bf16.gmra.mxu1 %v8342_v50  ;;  %v2923_v61 = vadd.f32 %v10626_v54, %v2834_v52  ;;  %v10833_v40 = vpop.f32.mrf.mxu3  ;;  %v7671_v52 = vld [vmem:[%s10230_s28 + $0x4a] sm:$0xff]  ;;  %908 = vst [vmem:[#allocation2 + $0xc8] sm:$0xf] %v876_v62 }
 0x1aa   : > { %v10826_v19 = vpop.f32.mrf.mxu0  ;;  %v875_v50 = vpack.c.bf16 %v7671_v52, %v7671_v52  ;;  %1100 = vst [vmem:[#allocation2 + $0xac] sm:$0xf] %v1068_v37 }
 0x1ab   : > { %13240 = vst [vmem:[#allocation30_spill] sm:$0xff] %v10826_v19  ;;  %3000 = vmatmul.bf16.gmra.mxu2 %v7990_v15  ;;  %v10829_v7 = vadd.f32 %v10750_v17, %v2923_v61  ;;  %3336 = vmatmul.bf16.gmra.mxu3 %v7862_v18  ;;  %v7736_v17 = vld [vmem:[%s10230_s28 + $0x69] sm:$0xff]  ;;  %v7815_v61 = vld [vmem:[#allocation2 + $0x34] sm:$0xf0]  ;;  %v9539_v19 = vld [vmem:[#allocation2 + $0x5c] sm:$0xf] }
 0x1ac   : > { %907 = vst [vmem:[#allocation2 + $0xa4] sm:$0xf] %v875_v50  ;;  %v1069_v15 = vpack.c.bf16 %v7736_v17, %v7736_v17  ;;  %v7821_v18 = vld [vmem:[#allocation2 + $0x18] sm:$0xf]  ;;  %v7818_v52 = vor.u32 %v9530_v53, %v7815_v61  ;;  %v9651_v17 = vld [vmem:[#allocation2 + $0x3d8] sm:$0xf0] }
 0x1ad   : > { %3124 = vmatmul.bf16.gmra.mxu0 %v8246_v51  ;;  %1194 = vst [vmem:[#allocation2 + $0x68] sm:$0xf] %v875_v50  ;;  %v8282_v37 = vor.u32 %v9651_v17, %v8281_v60 }
 0x1ae   : > { %v10835_v22 = vpop.f32.mrf.mxu2  ;;  %v2835_v54 = vpop.f32.mrf.mxu1  ;;  %1101 = vst [vmem:[#allocation2 + $0xd0] sm:$0xf] %v1069_v15 }
 0x1af   : > { %v2836_v13 = vadd.f32 %v2835_v54, %v2747_v11  ;;  %v9535_v11 = vld [vmem:[#allocation2 + $0x38] sm:$0xf0]  ;;  %v2750_v54 = vadd.f32 %v10584_v32, %v10620_v35  ;;  %1195 = vst [vmem:[#allocation2 + $0x8c] sm:$0xf] %v876_v62  ;;  %v9736_v62 = vld [vmem:[%s13185_s1 + $0x200] sm:$0xff] }
 0x1b0   : > { %3419 = vmatpush.bf16.msra.mxu0 %v9736_v62 }
 0x1b1   : > { %v2925_v29 = vadd.f32 %v10641_v0, %v2836_v13  ;;  %v10849_v0 = vpop.f32.mrf.mxu3  ;;  %v9549_v35 = vld [vmem:[#allocation2 + $0xac] sm:$0xf] }
 0x1b2   : > { %v10842_v51 = vpop.f32.mrf.mxu0 }
 0x1b3   : > { %13241 = vst [vmem:[#allocation31_spill] sm:$0xff] %v10842_v51  ;;  %v10845_v46 = vadd.f32 %v10776_v63, %v2925_v29  ;;  %v7822_v63 = vor.u32 %v9535_v11, %v7821_v18 }
 0x1b5   : > { %v7895_v53 = vld [vmem:[#allocation2 + $0xcc] sm:$0xf0] }
 0x1b6   : > { %v10851_v10 = vpop.f32.mrf.mxu2  ;;  %v2838_v13 = vpop.f32.mrf.mxu1  ;;  %v7898_v61 = vor.u32 %v9549_v35, %v7895_v53  ;;  %v7738_v53 = vld [vmem:[%s10230_s28 + $0x81] sm:$0xff] }
 0x1b7   : > { %13242 = vst [vmem:[#allocation32_spill] sm:$0xff] %v10851_v10  ;;  %v2839_v51 = vadd.f32 %v2838_v13, %v2750_v54  ;;  %v7666_v54 = vld [vmem:[%s10230_s28 + $0x189] sm:$0xff]  ;;  %v1071_v62 = vpack.c.bf16 %v7738_v53, %v7738_v53 }
 0x1b8   : > { %v806_v17 = vpack.c.bf16 %v7666_v54, %v7666_v54 }
 0x1b9   : > { %3153 = vmatmul.bf16.vlgmr.msra.gmra.mxu1 %v7818_v52  ;;  %v2928_v29 = vadd.f32 %v10657_v6, %v2839_v51  ;;  %v2752_v6 = vadd.f32 %v10584_v32, %v10637_v30  ;;  %v10864_v51 = vpop.f32.mrf.mxu3  ;;  %v7673_v52 = vld [vmem:[%s10230_s28 + $0x62] sm:$0xff]  ;;  %v7737_v30 = vld [vmem:[%s10230_s28 + $0x79] sm:$0xff]  ;;  %1103 = vst [vmem:[#allocation2 + $0x118] sm:$0xf] %v1071_v62 }
 0x1ba   : > { %v10854_v15 = vpop.f32.mrf.mxu0  ;;  %838 = vst [vmem:[#allocation2 + $0x46c] sm:$0xf] %v806_v17  ;;  %v9660_v17 = vld [vmem:[#allocation2 + $0x420] sm:$0xf0] }
 0x1bb   : > { %13243 = vst [vmem:[#allocation33_spill] sm:$0xff] %v10854_v15  ;;  %3242 = vmatmul.bf16.vlgmr.msra.gmra.mxu2 %v7822_v63  ;;  %v10857_v50 = vadd.f32 %v10803_v41, %v2928_v29  ;;  %3341 = vmatmul.bf16.gmra.mxu3 %v7898_v61  ;;  %v7665_v41 = vld [vmem:[%s10230_s28 + $0x181] sm:$0xff]  ;;  %v7674_v63 = vld [vmem:[%s10230_s28 + $0x6a] sm:$0xff]  ;;  %v877_v29 = vpack.c.bf16 %v7673_v52, %v7673_v52 }
 0x1bc   : > { %v805_v60 = vpack.c.bf16 %v7665_v41, %v7665_v41  ;;  %v878_v35 = vpack.c.bf16 %v7674_v63, %v7674_v63  ;;  %v1070_v15 = vpack.c.bf16 %v7737_v30, %v7737_v30  ;;  %v2755_v41 = vadd.f32 %v10584_v32, %v10645_v31 }
 0x1bd   : > { %3129 = vmatmul.bf16.gmra.mxu0 %v8282_v37  ;;  %909 = vst [vmem:[#allocation2 + $0xec] sm:$0xf] %v877_v29 }
 0x1be   : > { %v10866_v18 = vpop.f32.mrf.mxu2  ;;  %v2840_v11 = vpop.f32.mrf.mxu1  ;;  %837 = vst [vmem:[#allocation2 + $0x448] sm:$0xf] %v805_v60  ;;  %v8317_v60 = vld [vmem:[#allocation2 + $0x400] sm:$0xf] }
 0x1bf   : > { %13244 = vst [vmem:[#allocation34_spill] sm:$0xff] %v10866_v18  ;;  %v2841_v13 = vadd.f32 %v2840_v11, %v2752_v6  ;;  %v7851_v18 = vld [vmem:[#allocation2 + $0x7c] sm:$0xf0]  ;;  %v9544_v11 = vld [vmem:[#allocation2 + $0x80] sm:$0xf0]  ;;  %v8318_v53 = vor.u32 %v9660_v17, %v8317_v60 }
 0x1c0   : > { %v7857_v6 = vld [vmem:[#allocation2 + $0x60] sm:$0xf]  ;;  %910 = vst [vmem:[#allocation2 + $0x110] sm:$0xf] %v878_v35  ;;  %v7854_v54 = vor.u32 %v9539_v19, %v7851_v18 }
 0x1c1   : > { %v2930_v37 = vadd.f32 %v10669_v39, %v2841_v13  ;;  %v10882_v39 = vpop.f32.mrf.mxu3  ;;  %1102 = vst [vmem:[#allocation2 + $0xf4] sm:$0xf] %v1070_v15  ;;  %v7740_v60 = vld [vmem:[%s10230_s28 + $0x99] sm:$0xff] }
 0x1c2   : > { %v10875_v10 = vpop.f32.mrf.mxu0  ;;  %1196 = vst [vmem:[#allocation2 + $0xb0] sm:$0xf] %v877_v29  ;;  %v2757_v29 = vadd.f32 %v10584_v32, %v10665_v20  ;;  %v1073_v20 = vpack.c.bf16 %v7740_v60, %v7740_v60 }
 0x1c3   : > { %v10878_v61 = vadd.f32 %v10819_v48, %v2930_v37  ;;  %v7858_v48 = vor.u32 %v9544_v11, %v7857_v6  ;;  %1197 = vst [vmem:[#allocation2 + $0xd4] sm:$0xf] %v878_v35  ;;  %v7675_v11 = vld [vmem:[%s10230_s28 + $0x7a] sm:$0xff] }
 0x1c4   : > { %1105 = vst [vmem:[#allocation2 + $0x160] sm:$0xf] %v1073_v20 }
 0x1c6   : > { %v10884_v52 = vpop.f32.mrf.mxu2  ;;  %v2843_v13 = vpop.f32.mrf.mxu1 }
 0x1c7   : > { %v2844_v63 = vadd.f32 %v2843_v13, %v2755_v41 }
 0x1c8   : > { %v9558_v18 = vld [vmem:[#allocation2 + $0xf4] sm:$0xf] }
 0x1c9   : > { %3158 = vmatmul.bf16.gmra.mxu1 %v7854_v54  ;;  %v2933_v30 = vadd.f32 %v10679_v49, %v2844_v63  ;;  %v10895_v37 = vpop.f32.mrf.mxu3  ;;  %v7931_v49 = vld [vmem:[#allocation2 + $0x114] sm:$0xf0]  ;;  %v879_v54 = vpack.c.bf16 %v7675_v11, %v7675_v11  ;;  %v9548_v63 = vld [vmem:[#allocation2 + $0xa4] sm:$0xf]  ;;  %v8353_v11 = vld [vmem:[#allocation2 + $0x448] sm:$0xf] }
 0x1ca   : > { %v3095_v31 = vpop.f32.mrf.mxu0  ;;  %v7934_v6 = vor.u32 %v9558_v18, %v7931_v49  ;;  %v7893_v18 = vld [vmem:[#allocation2 + $0xa8] sm:$0xf] }
 0x1cb   : > { %3247 = vmatmul.bf16.gmra.mxu2 %v7858_v48  ;;  %v10888_v19 = vadd.f32 %v10833_v40, %v2933_v30  ;;  %v10891_v15 = vadd.f32 %v3095_v31, %v10798_v14  ;;  %v7676_v40 = vld [vmem:[%s10230_s28 + $0x82] sm:$0xff]  ;;  %v7739_v14 = vld [vmem:[%s10230_s28 + $0x91] sm:$0xff]  ;;  %911 = vst [vmem:[#allocation2 + $0x134] sm:$0xf] %v879_v54 }
 0x1cc   : > { %v880_v13 = vpack.c.bf16 %v7676_v40, %v7676_v40  ;;  %3346 = vmatmul.bf16.gmra.mxu3 %v7934_v6  ;;  %v1072_v32 = vpack.c.bf16 %v7739_v14, %v7739_v14  ;;  %v7887_v48 = vld [vmem:[#allocation2 + $0xc4] sm:$0xf0]  ;;  %1198 = vst [vmem:[#allocation2 + $0xf8] sm:$0xf] %v879_v54  ;;  %v9669_v40 = vld [vmem:[#allocation2 + $0x468] sm:$0xf0] }
 0x1cd   : > { %3134 = vmatmul.bf16.gmra.mxu0 %v8318_v53 }
 0x1ce   : > { %v10897_v62 = vpop.f32.mrf.mxu2  ;;  %v2845_v35 = vpop.f32.mrf.mxu1  ;;  %912 = vst [vmem:[#allocation2 + $0x158] sm:$0xf] %v880_v13 }
 0x1cf   : > { %v2846_v41 = vadd.f32 %v2845_v35, %v2757_v29  ;;  %1104 = vst [vmem:[#allocation2 + $0x13c] sm:$0xf] %v1072_v32  ;;  %v9553_v29 = vld [vmem:[#allocation2 + $0xc8] sm:$0xf0]  ;;  %v7890_v35 = vor.u32 %v9548_v63, %v7887_v48  ;;  %v7967_v63 = vld [vmem:[#allocation2 + $0x15c] sm:$0xf0] }
 0x1d0   : > { %1199 = vst [vmem:[#allocation2 + $0x11c] sm:$0xf] %v880_v13  ;;  %v7894_v14 = vor.u32 %v9553_v29, %v7893_v18  ;;  %v7677_v29 = vld [vmem:[%s10230_s28 + $0x92] sm:$0xff] }
 0x1d1   : > { %v2935_v17 = vadd.f32 %v10700_v28, %v2846_v41  ;;  %v10913_v28 = vld [vmem:[%s13186_s2] ss:$0 sm:$0xff]  ;;  %v10917_v6 = vpop.f32.mrf.mxu3 }
 0x1d2   : > { %v3097_v30 = vpop.f32.mrf.mxu0  ;;  %v2760_v49 = vadd.f32 %v10913_v28, %v10452_v1  ;;  %v2762_v48 = vadd.f32 %v10913_v28, %v10461_v9  ;;  %v881_v9 = vpack.c.bf16 %v7677_v29, %v7677_v29 }
 0x1d3   : > { %v10905_v53 = vadd.f32 %v10849_v0, %v2935_v17  ;;  %v10908_v31 = vadd.f32 %v3097_v30, %v10817_v43  ;;  %v8354_v17 = vor.u32 %v9669_v40, %v8353_v11 }
 0x1d4   : > { %913 = vst [vmem:[#allocation2 + $0x17c] sm:$0xf] %v881_v9 }
 0x1d5   : > { %1200 = vst [vmem:[#allocation2 + $0x140] sm:$0xf] %v881_v9  ;;  %v2767_v9 = vadd.f32 %v10913_v28, %v10483_v34 }
 0x1d6   : > { %v10919_v0 = vpop.f32.mrf.mxu2  ;;  %v2848_v43 = vpop.f32.mrf.mxu1  ;;  %v9567_v1 = vld [vmem:[#allocation2 + $0x13c] sm:$0xf] }
 0x1d7   : > { %v2849_v41 = vadd.f32 %v2848_v43, %v2760_v49  ;;  %v7970_v13 = vor.u32 %v9567_v1, %v7967_v63  ;;  %v7678_v49 = vld [vmem:[%s10230_s28 + $0x9a] sm:$0xff]  ;;  %v9557_v1 = vld [vmem:[#allocation2 + $0xec] sm:$0xf]  ;;  %v7923_v63 = vld [vmem:[#allocation2 + $0x10c] sm:$0xf0] }
 0x1d8   : > { %v882_v40 = vpack.c.bf16 %v7678_v49, %v7678_v49 }
 0x1d9   : > { %3163 = vmatmul.bf16.gmra.mxu1 %v7890_v35  ;;  %v2938_v60 = vadd.f32 %v10718_v4, %v2849_v41  ;;  %v2888_v4 = vadd.f32 %v10459_v8, %v10592_v59  ;;  %v10932_v30 = vpop.f32.mrf.mxu3  ;;  %v7709_v35 = vld [vmem:[%s10230_s28 + $0xa8] sm:$0xff]  ;;  %v7710_v41 = vld [vmem:[%s10230_s28 + $0xb0] sm:$0xff] }
 0x1da   : > { %v3100_v32 = vpop.f32.mrf.mxu0  ;;  %v978_v8 = vpack.c.bf16 %v7709_v35, %v7709_v35  ;;  %v979_v59 = vpack.c.bf16 %v7710_v41, %v7710_v41  ;;  %914 = vst [vmem:[#allocation2 + $0x1a0] sm:$0xf] %v882_v40 }
 0x1db   : > { %3252 = vmatmul.bf16.gmra.mxu2 %v7894_v14  ;;  %v10923_v54 = vadd.f32 %v10864_v51, %v2938_v60  ;;  %v10926_v20 = vadd.f32 %v3100_v32, %v10829_v7  ;;  %v2712_v51 = vadd.f32 %v10913_v28, %v10450_v58  ;;  %v7741_v14 = vld [vmem:[%s10230_s28 + $0xa9] sm:$0xff]  ;;  %v7742_v60 = vld [vmem:[%s10230_s28 + $0xb1] sm:$0xff]  ;;  %1201 = vst [vmem:[#allocation2 + $0x164] sm:$0xf] %v882_v40 }
 0x1dc   : > { %3351 = vmatmul.bf16.gmra.mxu3 %v7970_v13  ;;  %v1074_v32 = vpack.c.bf16 %v7741_v14, %v7741_v14  ;;  %1010 = vst [vmem:[#allocation2 + $0x180] sm:$0xf] %v978_v8 }
 0x1dd   : > { %13245 = vst [vmem:[#allocation35_spill] sm:$0xff] %v10926_v20  ;;  %3139 = vmatmul.bf16.gmra.mxu0 %v8354_v17  ;;  %v2801_v17 = vadd.f32 %v10603_v23, %v2712_v51  ;;  %v2765_v23 = vadd.f32 %v10913_v28, %v10471_v25  ;;  %v7926_v51 = vor.u32 %v9557_v1, %v7923_v63  ;;  %v7679_v1 = vld [vmem:[%s10230_s28 + $0xaa] sm:$0xff]  ;;  %v7711_v63 = vld [vmem:[%s10230_s28 + $0xc0] sm:$0xff] }
 0x1de   : > { %v2976_v18 = vpop.f32.mrf.mxu2  ;;  %v2850_v7 = vpop.f32.mrf.mxu1  ;;  %1011 = vst [vmem:[#allocation2 + $0x1a4] sm:$0xf] %v979_v59 }
 0x1df   : > { %v10939_v43 = vadd.f32 %v2976_v18, %v2888_v4  ;;  %v2851_v11 = vadd.f32 %v2850_v7, %v2762_v48  ;;  %v1075_v4 = vpack.c.bf16 %v7742_v60, %v7742_v60  ;;  %v7929_v18 = vld [vmem:[#allocation2 + $0xf0] sm:$0xf]  ;;  %v9562_v7 = vld [vmem:[#allocation2 + $0x110] sm:$0xf0]  ;;  %1106 = vst [vmem:[#allocation2 + $0x184] sm:$0xf] %v1074_v32 }
 0x1e0   : > { %v7930_v41 = vor.u32 %v9562_v7, %v7929_v18  ;;  %v883_v7 = vpack.c.bf16 %v7679_v1, %v7679_v1 }
 0x1e1   : > { %v2940_v58 = vadd.f32 %v10738_v47, %v2851_v11  ;;  %v2890_v47 = vadd.f32 %v10469_v24, %v2801_v17  ;;  %v10955_v29 = vpop.f32.mrf.mxu3  ;;  %v9536_v11 = vld [vmem:[#allocation2 + $0x40] sm:$0xf0]  ;;  %1107 = vst [vmem:[#allocation2 + $0x1a8] sm:$0xf] %v1075_v4 }
 0x1e2   : > { %v3102_v20 = vpop.f32.mrf.mxu0  ;;  %915 = vst [vmem:[#allocation2 + $0x1c4] sm:$0xf] %v883_v7 }
 0x1e3   : > { %v10947_v48 = vadd.f32 %v10882_v39, %v2940_v58  ;;  %v10950_v13 = vadd.f32 %v3102_v20, %v10845_v46  ;;  %v7829_v39 = vld [vmem:[#allocation2 + $0x20] sm:$0xf]  ;;  %1202 = vst [vmem:[#allocation2 + $0x188] sm:$0xf] %v883_v7  ;;  %v2772_v7 = vadd.f32 %v10913_v28, %v10511_v3 }
 0x1e4   : > { %v7830_v25 = vor.u32 %v9536_v11, %v7829_v39  ;;  %v9566_v39 = vld [vmem:[#allocation2 + $0x134] sm:$0xf]  ;;  %v7959_v11 = vld [vmem:[#allocation2 + $0x154] sm:$0xf0] }
 0x1e6   : > { %v2978_v49 = vpop.f32.mrf.mxu2  ;;  %v2853_v35 = vpop.f32.mrf.mxu1  ;;  %v9576_v60 = vld [vmem:[#allocation2 + $0x184] sm:$0xf] }
 0x1e7   : > { %v10957_v46 = vadd.f32 %v2978_v49, %v2890_v47  ;;  %v2854_v20 = vadd.f32 %v2853_v35, %v2765_v23  ;;  %v7712_v23 = vld [vmem:[%s10230_s28 + $0xc8] sm:$0xff] }
 0x1e8   : > { %v8003_v40 = vld [vmem:[#allocation2 + $0x1a4] sm:$0xf0] }
 0x1e9   : > { %3168 = vmatmul.bf16.gmra.mxu1 %v7926_v51  ;;  %v2943_v8 = vadd.f32 %v10754_v36, %v2854_v20  ;;  %v2893_v36 = vadd.f32 %v10481_v33, %v10618_v21  ;;  %v10970_v17 = vpop.f32.mrf.mxu3  ;;  %v8006_v32 = vor.u32 %v9576_v60, %v8003_v40  ;;  %v980_v33 = vpack.c.bf16 %v7711_v63, %v7711_v63  ;;  %v7743_v47 = vld [vmem:[%s10230_s28 + $0xc1] sm:$0xff]  ;;  %v7744_v51 = vld [vmem:[%s10230_s28 + $0xc9] sm:$0xff]  ;;  %v9571_v60 = vld [vmem:[#allocation2 + $0x158] sm:$0xf0] }
 0x1ea   : > { %v3105_v24 = vpop.f32.mrf.mxu0  ;;  %v981_v21 = vpack.c.bf16 %v7712_v23, %v7712_v23  ;;  %v1076_v35 = vpack.c.bf16 %v7743_v47, %v7743_v47 }
 0x1eb   : > { %3257 = vmatmul.bf16.gmra.mxu2 %v7930_v41  ;;  %v10961_v59 = vadd.f32 %v10895_v37, %v2943_v8  ;;  %v10964_v14 = vadd.f32 %v3105_v24, %v10857_v50  ;;  %v7680_v50 = vld [vmem:[%s10230_s28 + $0xb2] sm:$0xff]  ;;  %v1077_v41 = vpack.c.bf16 %v7744_v51, %v7744_v51  ;;  %1012 = vst [vmem:[#allocation2 + $0x1c8] sm:$0xf] %v980_v33  ;;  %v7681_v51 = vld [vmem:[%s10230_s28 + $0xc2] sm:$0xff] }
 0x1ec   : > { %v884_v34 = vpack.c.bf16 %v7680_v50, %v7680_v50  ;;  %3356 = vmatmul.bf16.gmra.mxu3 %v8006_v32  ;;  %v7965_v24 = vld [vmem:[#allocation2 + $0x138] sm:$0xf]  ;;  %1013 = vst [vmem:[#allocation2 + $0x1ec] sm:$0xf] %v981_v21  ;;  %v9545_v32 = vld [vmem:[#allocation2 + $0x88] sm:$0xf0] }
 0x1ed   : > { %3420 = vmatmul.bf16.vlgmr.msra.gmra.mxu0 %v7830_v25  ;;  %1108 = vst [vmem:[#allocation2 + $0x1cc] sm:$0xf] %v1076_v35  ;;  %v7966_v50 = vor.u32 %v9571_v60, %v7965_v24  ;;  %v7746_v24 = vld [vmem:[%s10230_s28 + $0xe1] sm:$0xff] }
 0x1ee   : > { %v2981_v58 = vpop.f32.mrf.mxu2  ;;  %v2855_v37 = vpop.f32.mrf.mxu1  ;;  %916 = vst [vmem:[#allocation2 + $0x1e8] sm:$0xf] %v884_v34 }
 0x1ef   : > { %v10975_v4 = vadd.f32 %v2981_v58, %v2893_v36  ;;  %v2856_v18 = vadd.f32 %v2855_v37, %v2767_v9  ;;  %v2895_v9 = vadd.f32 %v10500_v55, %v10631_v45  ;;  %v7962_v36 = vor.u32 %v9566_v39, %v7959_v11  ;;  %v7865_v37 = vld [vmem:[#allocation2 + $0x68] sm:$0xf]  ;;  %1109 = vst [vmem:[#allocation2 + $0x1f0] sm:$0xf] %v1077_v41  ;;  %v7745_v41 = vld [vmem:[%s10230_s28 + $0xd9] sm:$0xff] }
 0x1f0   : > { %v7866_v63 = vor.u32 %v9545_v32, %v7865_v37  ;;  %1203 = vst [vmem:[#allocation2 + $0x1ac] sm:$0xf] %v884_v34  ;;  %v885_v11 = vpack.c.bf16 %v7681_v51, %v7681_v51 }
 0x1f1   : > { %v2945_v49 = vadd.f32 %v10783_v42, %v2856_v18  ;;  %v2770_v42 = vadd.f32 %v10913_v28, %v10502_v56  ;;  %v10991_v40 = vpop.f32.mrf.mxu3 }
 0x1f2   : > { %v3107_v20 = vpop.f32.mrf.mxu0  ;;  %917 = vst [vmem:[#allocation2 + $0x20c] sm:$0xf] %v885_v11 }
 0x1f3   : > { %v10982_v8 = vadd.f32 %v10917_v6, %v2945_v49  ;;  %v10985_v25 = vadd.f32 %v3107_v20, %v10878_v61  ;;  %v7713_v49 = vld [vmem:[%s10230_s28 + $0xd8] sm:$0xff]  ;;  %v7714_v20 = vld [vmem:[%s10230_s28 + $0xe0] sm:$0xff]  ;;  %1204 = vst [vmem:[#allocation2 + $0x1d0] sm:$0xf] %v885_v11 }
 0x1f4   : > { %v9585_v23 = vld [vmem:[#allocation2 + $0x1cc] sm:$0xf] }
 0x1f6   : > { %v2983_v58 = vpop.f32.mrf.mxu2  ;;  %v2858_v6 = vpop.f32.mrf.mxu1  ;;  %v8039_v34 = vld [vmem:[#allocation2 + $0x1ec] sm:$0xf0] }
 0x1f7   : > { %v10993_v61 = vadd.f32 %v2983_v58, %v2895_v9  ;;  %v2859_v1 = vadd.f32 %v2858_v6, %v2770_v42  ;;  %v8042_v47 = vor.u32 %v9585_v23, %v8039_v34  ;;  %v1078_v42 = vpack.c.bf16 %v7745_v41, %v7745_v41  ;;  %v9575_v9 = vld [vmem:[#allocation2 + $0x17c] sm:$0xf] }
 0x1f8   : > { %v1079_v6 = vpack.c.bf16 %v7746_v24, %v7746_v24 }
 0x1f9   : > { %3173 = vmatmul.bf16.gmra.mxu1 %v7962_v36  ;;  %v2948_v56 = vadd.f32 %v10807_v16, %v2859_v1  ;;  %v2898_v16 = vadd.f32 %v10509_v2, %v10643_v44  ;;  %v11006_v33 = vpop.f32.mrf.mxu3  ;;  %v982_v2 = vpack.c.bf16 %v7713_v49, %v7713_v49  ;;  %v983_v44 = vpack.c.bf16 %v7714_v20, %v7714_v20  ;;  %v7995_v36 = vld [vmem:[#allocation2 + $0x19c] sm:$0xf0]  ;;  %v13246_v49 = vld [vmem:[#allocation7_spill] sm:$0xff] }
 0x1fa   : > { %v3110_v55 = vpop.f32.mrf.mxu0  ;;  %v8001_v1 = vld [vmem:[#allocation2 + $0x180] sm:$0xf]  ;;  %1110 = vst [vmem:[#allocation2 + $0x214] sm:$0xf] %v1078_v42  ;;  %v7716_v42 = vld [vmem:[%s10230_s28 + $0xf8] sm:$0xff] }
 0x1fb   : > { %3262 = vmatmul.bf16.gmra.mxu2 %v7966_v50  ;;  %v10997_v45 = vadd.f32 %v10932_v30, %v2948_v56  ;;  %v11000_v18 = vadd.f32 %v3110_v55, %v10888_v19  ;;  %v7682_v19 = vld [vmem:[%s10230_s28 + $0xca] sm:$0xff]  ;;  %1014 = vst [vmem:[#allocation2 + $0x210] sm:$0xf] %v982_v2  ;;  %v9580_v50 = vld [vmem:[#allocation2 + $0x1a0] sm:$0xf0]  ;;  %v2900_v56 = vadd.f32 %v10519_v26, %v10662_v57 }
 0x1fc   : > { %v886_v3 = vpack.c.bf16 %v7682_v19, %v7682_v19  ;;  %3361 = vmatmul.bf16.gmra.mxu3 %v8042_v47  ;;  %1015 = vst [vmem:[#allocation2 + $0x234] sm:$0xf] %v983_v44  ;;  %v2777_v19 = vadd.f32 %v10913_v28, %v10527_v38  ;;  %v7684_v2 = vld [vmem:[%s10230_s28 + $0xe2] sm:$0xff]  ;;  %v7715_v44 = vld [vmem:[%s10230_s28 + $0xf0] sm:$0xff] }
 0x1fd   : > { %3425 = vmatmul.bf16.gmra.mxu0 %v7866_v63  ;;  %v7998_v63 = vor.u32 %v9575_v9, %v7995_v36  ;;  %1111 = vst [vmem:[#allocation2 + $0x238] sm:$0xf] %v1079_v6  ;;  %v888_v38 = vpack.c.bf16 %v7684_v2, %v7684_v2  ;;  %v985_v9 = vpack.c.bf16 %v7716_v42, %v7716_v42  ;;  %v7747_v36 = vld [vmem:[%s10230_s28 + $0xf1] sm:$0xff] }
 0x1fe   : > { %v2986_v21 = vpop.f32.mrf.mxu2  ;;  %v2860_v30 = vpop.f32.mrf.mxu1  ;;  %918 = vst [vmem:[#allocation2 + $0x230] sm:$0xf] %v886_v3  ;;  %v13247_v6 = vld [vmem:[#allocation32_spill] sm:$0xff] }
 0x1ff   : > { %v11011_v35 = vadd.f32 %v2986_v21, %v2898_v16  ;;  %v2861_v39 = vadd.f32 %v2860_v30, %v2772_v7  ;;  %v7901_v7 = vld [vmem:[#allocation2 + $0xb0] sm:$0xf]  ;;  %v9554_v16 = vld [vmem:[#allocation2 + $0xd0] sm:$0xf0]  ;;  %v8002_v21 = vor.u32 %v9580_v50, %v8001_v1  ;;  %1205 = vst [vmem:[#allocation2 + $0x1f4] sm:$0xf] %v886_v3  ;;  %v1080_v50 = vpack.c.bf16 %v7747_v36, %v7747_v36 }
 0x200   : > { %v7902_v26 = vor.u32 %v9554_v16, %v7901_v7  ;;  %920 = vst [vmem:[#allocation2 + $0x278] sm:$0xf] %v888_v38  ;;  %v8037_v16 = vld [vmem:[#allocation2 + $0x1c8] sm:$0xf] }
 0x201   : > { %v2950_v60 = vadd.f32 %v10823_v12, %v2861_v39  ;;  %v2775_v12 = vadd.f32 %v10913_v28, %v10521_v27  ;;  %v11027_v55 = vpop.f32.mrf.mxu3  ;;  %v9594_v51 = vld [vmem:[#allocation2 + $0x214] sm:$0xf]  ;;  %1017 = vst [vmem:[#allocation2 + $0x27c] sm:$0xf] %v985_v9 }
 0x202   : > { %v3112_v58 = vpop.f32.mrf.mxu0  ;;  %1112 = vst [vmem:[#allocation2 + $0x25c] sm:$0xf] %v1080_v50  ;;  %v13252_v9 = vld [vmem:[#allocation11_spill] sm:$0xff] }
 0x203   : > { %v11018_v37 = vadd.f32 %v10955_v29, %v2950_v60  ;;  %v11021_v32 = vadd.f32 %v3112_v58, %v10905_v53  ;;  %v7748_v58 = vld [vmem:[%s10230_s28 + $0xf9] sm:$0xff]  ;;  %1207 = vst [vmem:[#allocation2 + $0x23c] sm:$0xf] %v888_v38  ;;  %v2782_v36 = vadd.f32 %v10913_v28, %v13252_v9 }
 0x204   : > { %v8075_v39 = vld [vmem:[#allocation2 + $0x234] sm:$0xf0] }
 0x205   : > { %v8078_v20 = vor.u32 %v9594_v51, %v8075_v39  ;;  %v7937_v39 = vld [vmem:[#allocation2 + $0xf8] sm:$0xf] }
 0x206   : > { %v2988_v23 = vpop.f32.mrf.mxu2  ;;  %v2863_v29 = vpop.f32.mrf.mxu1 }
 0x207   : > { %v11029_v53 = vadd.f32 %v2988_v23, %v2900_v56  ;;  %v2864_v34 = vadd.f32 %v2863_v29, %v2775_v12  ;;  %v9584_v12 = vld [vmem:[#allocation2 + $0x1c4] sm:$0xf]  ;;  %v8031_v56 = vld [vmem:[#allocation2 + $0x1e4] sm:$0xf0]  ;;  %v1081_v23 = vpack.c.bf16 %v7748_v58, %v7748_v58  ;;  %v13253_v58 = vld [vmem:[#allocation20_spill] sm:$0xff] }
 0x209   : > { %3178 = vmatmul.bf16.gmra.mxu1 %v7998_v63  ;;  %v2953_v27 = vadd.f32 %v10835_v22, %v2864_v34  ;;  %v2903_v22 = vadd.f32 %v13246_v49, %v10671_v5  ;;  %v11047_v24 = vpop.f32.mrf.mxu3  ;;  %v984_v5 = vpack.c.bf16 %v7715_v44, %v7715_v44  ;;  %v9589_v34 = vld [vmem:[#allocation2 + $0x1e8] sm:$0xf0]  ;;  %1113 = vst [vmem:[#allocation2 + $0x280] sm:$0xf] %v1081_v23 }
 0x20a   : > { %v3115_v57 = vpop.f32.mrf.mxu0  ;;  %v7717_v23 = vld [vmem:[%s10230_s28 + $0x108] sm:$0xff] }
 0x20b   : > { %3267 = vmatmul.bf16.gmra.mxu2 %v8002_v21  ;;  %v11033_v30 = vadd.f32 %v10970_v17, %v2953_v27  ;;  %v11036_v47 = vadd.f32 %v3115_v57, %v10923_v54  ;;  %v7683_v17 = vld [vmem:[%s10230_s28 + $0xda] sm:$0xff]  ;;  %1016 = vst [vmem:[#allocation2 + $0x258] sm:$0xf] %v984_v5 }
 0x20c   : > { %v887_v60 = vpack.c.bf16 %v7683_v17, %v7683_v17  ;;  %3366 = vmatmul.bf16.gmra.mxu3 %v8078_v20  ;;  %v13248_v21 = vld [vmem:[#allocation9_spill] sm:$0xff]  ;;  %v13250_v57 = vld [vmem:[#allocation8_spill] sm:$0xff]  ;;  %v13251_v20 = vld [vmem:[#allocation34_spill] sm:$0xff] }
 0x20d   : > { %3430 = vmatmul.bf16.gmra.mxu0 %v7902_v26  ;;  %v2780_v27 = vadd.f32 %v10913_v28, %v13248_v21  ;;  %v13249_v26 = vld [vmem:[#allocation18_spill] sm:$0xff] }
 0x20e   : > { %v2991_v11 = vpop.f32.mrf.mxu2  ;;  %v2865_v3 = vpop.f32.mrf.mxu1  ;;  %919 = vst [vmem:[#allocation2 + $0x254] sm:$0xf] %v887_v60  ;;  %v2905_v51 = vadd.f32 %v13250_v57, %v13249_v26  ;;  %v986_v26 = vpack.c.bf16 %v7717_v23, %v7717_v23 }
 0x20f   : > { %v11045_v54 = vadd.f32 %v2991_v11, %v2903_v22  ;;  %v2866_v41 = vadd.f32 %v2865_v3, %v2777_v19  ;;  %v8034_v19 = vor.u32 %v9584_v12, %v8031_v56  ;;  %v8038_v3 = vor.u32 %v9589_v34, %v8037_v16  ;;  %1206 = vst [vmem:[#allocation2 + $0x218] sm:$0xf] %v887_v60  ;;  %v9603_v60 = vld [vmem:[#allocation2 + $0x25c] sm:$0xf] }
 0x210   : > { %v8111_v50 = vld [vmem:[#allocation2 + $0x27c] sm:$0xf0]  ;;  %1018 = vst [vmem:[#allocation2 + $0x2a0] sm:$0xf] %v986_v26 }
 0x211   : > { %v2955_v1 = vadd.f32 %v13247_v6, %v2866_v41  ;;  %v11066_v44 = vpop.f32.mrf.mxu3  ;;  %v13254_v6 = vld [vmem:[#allocation10_spill] sm:$0xff]  ;;  %v8114_v56 = vor.u32 %v9603_v60, %v8111_v50  ;;  %v9598_v60 = vld [vmem:[#allocation2 + $0x230] sm:$0xf0] }
 0x212   : > { %v3117_v63 = vpop.f32.mrf.mxu0 }
 0x213   : > { %v11054_v29 = vadd.f32 %v10991_v40, %v2955_v1  ;;  %v11057_v7 = vadd.f32 %v3117_v63, %v10947_v48  ;;  %v9563_v40 = vld [vmem:[#allocation2 + $0x118] sm:$0xf0]  ;;  %v2908_v1 = vadd.f32 %v13254_v6, %v13253_v58 }
 0x214   : > { %v7938_v2 = vor.u32 %v9563_v40, %v7937_v39  ;;  %v7686_v63 = vld [vmem:[%s10230_s28 + $0xfa] sm:$0xff]  ;;  %v9593_v40 = vld [vmem:[#allocation2 + $0x20c] sm:$0xf] }
 0x215   : > { %v890_v21 = vpack.c.bf16 %v7686_v63, %v7686_v63  ;;  %v13257_v58 = vld [vmem:[#allocation12_spill] sm:$0xff] }
 0x216   : > { %v2993_v49 = vpop.f32.mrf.mxu2  ;;  %v2868_v22 = vpop.f32.mrf.mxu1 }
 0x217   : > { %v11063_v11 = vadd.f32 %v2993_v49, %v2905_v51  ;;  %v2869_v48 = vadd.f32 %v2868_v22, %v2780_v27  ;;  %v7718_v27 = vld [vmem:[%s10230_s28 + $0x110] sm:$0xff]  ;;  %922 = vst [vmem:[#allocation2 + $0x2c0] sm:$0xf] %v890_v21 }
 0x218   : > { %v987_v57 = vpack.c.bf16 %v7718_v27, %v7718_v27  ;;  %v7749_v51 = vld [vmem:[%s10230_s28 + $0x109] sm:$0xff]  ;;  %1209 = vst [vmem:[#allocation2 + $0x284] sm:$0xf] %v890_v21 }
 0x219   : > { %3183 = vmatmul.bf16.gmra.mxu1 %v8034_v19  ;;  %v2958_v17 = vadd.f32 %v13251_v20, %v2869_v48  ;;  %v7750_v19 = vld [vmem:[%s10230_s28 + $0x111] sm:$0xff]  ;;  %v1082_v39 = vpack.c.bf16 %v7749_v51, %v7749_v51 }
 0x21a   : > { %v3120_v41 = vpop.f32.mrf.mxu0  ;;  %v8067_v48 = vld [vmem:[#allocation2 + $0x22c] sm:$0xf0]  ;;  %v1083_v20 = vpack.c.bf16 %v7750_v19, %v7750_v19  ;;  %1019 = vst [vmem:[#allocation2 + $0x2c4] sm:$0xf] %v987_v57  ;;  %v13259_v19 = vld [vmem:[#allocation24_spill] sm:$0xff] }
 0x21b   : > { %3272 = vmatmul.bf16.gmra.mxu2 %v8038_v3  ;;  %v11069_v42 = vadd.f32 %v11006_v33, %v2958_v17  ;;  %v11072_v5 = vadd.f32 %v3120_v41, %v10961_v59  ;;  %v7685_v33 = vld [vmem:[%s10230_s28 + $0xf2] sm:$0xff]  ;;  %1114 = vst [vmem:[#allocation2 + $0x2a4] sm:$0xf] %v1082_v39 }
 0x21c   : > { %v889_v34 = vpack.c.bf16 %v7685_v33, %v7685_v33  ;;  %3371 = vmatmul.bf16.gmra.mxu3 %v8114_v56  ;;  %v8073_v41 = vld [vmem:[#allocation2 + $0x210] sm:$0xf]  ;;  %1115 = vst [vmem:[#allocation2 + $0x2c8] sm:$0xf] %v1083_v20 }
 0x21d   : > { %3435 = vmatmul.bf16.gmra.mxu0 %v7938_v2  ;;  %v8074_v33 = vor.u32 %v9598_v60, %v8073_v41  ;;  %v13258_v51 = vld [vmem:[#allocation15_spill] sm:$0xff]  ;;  %v7719_v41 = vld [vmem:[%s10230_s28 + $0x120] sm:$0xff] }
 0x21e   : > { %v2996_v38 = vpop.f32.mrf.mxu2  ;;  %v2870_v12 = vpop.f32.mrf.mxu1  ;;  %921 = vst [vmem:[#allocation2 + $0x29c] sm:$0xf] %v889_v34  ;;  %v7688_v20 = vld [vmem:[%s10230_s28 + $0x112] sm:$0xff] }
 0x21f   : > { %v11081_v59 = vadd.f32 %v2996_v38, %v2908_v1  ;;  %v2871_v16 = vadd.f32 %v2870_v12, %v2782_v36  ;;  %v11087_v22 = vpop.f32.mrf.mxu3  ;;  %v13256_v36 = vld [vmem:[#allocation22_spill] sm:$0xff]  ;;  %v8070_v1 = vor.u32 %v9593_v40, %v8067_v48  ;;  %v7973_v12 = vld [vmem:[#allocation2 + $0x140] sm:$0xf]  ;;  %1208 = vst [vmem:[#allocation2 + $0x260] sm:$0xf] %v889_v34 }
 0x220   : > { %v2910_v6 = vadd.f32 %v13257_v58, %v13256_v36  ;;  %v7720_v36 = vld [vmem:[%s10230_s28 + $0x128] sm:$0xff] }
 0x221   : > { %v2960_v49 = vadd.f32 %v10884_v52, %v2871_v16  ;;  %v13255_v52 = vld [vmem:[#allocation13_spill] sm:$0xff]  ;;  %v989_v58 = vpack.c.bf16 %v7720_v36, %v7720_v36 }
 0x222   : > { %v3122_v3 = vpop.f32.mrf.mxu0  ;;  %v2785_v9 = vadd.f32 %v10913_v28, %v13255_v52  ;;  %v9612_v34 = vld [vmem:[#allocation2 + $0x2a4] sm:$0xf] }
 0x223   : > { %v11090_v17 = vadd.f32 %v11027_v55, %v2960_v49  ;;  %v11093_v2 = vadd.f32 %v3122_v3, %v10982_v8  ;;  %v9572_v55 = vld [vmem:[#allocation2 + $0x160] sm:$0xf0]  ;;  %v13260_v49 = vld [vmem:[#allocation14_spill] sm:$0xff]  ;;  %1021 = vst [vmem:[#allocation2 + $0x30c] sm:$0xf] %v989_v58  ;;  %v13264_v58 = vld [vmem:[#allocation19_spill] sm:$0xff] }
 0x224   : > { %v7974_v23 = vor.u32 %v9572_v55, %v7973_v12  ;;  %v2913_v39 = vadd.f32 %v13260_v49, %v13259_v19  ;;  %v8147_v40 = vld [vmem:[#allocation2 + $0x2c4] sm:$0xf0]  ;;  %v9602_v55 = vld [vmem:[#allocation2 + $0x254] sm:$0xf]  ;;  %v13263_v49 = vld [vmem:[#allocation17_spill] sm:$0xff] }
 0x225   : > { %v8150_v3 = vor.u32 %v9612_v34, %v8147_v40  ;;  %v8109_v34 = vld [vmem:[#allocation2 + $0x258] sm:$0xf] }
 0x226   : > { %v2998_v50 = vpop.f32.mrf.mxu2  ;;  %v2873_v38 = vpop.f32.mrf.mxu1 }
 0x227   : > { %v11099_v56 = vadd.f32 %v2998_v50, %v2910_v6  ;;  %v2874_v8 = vadd.f32 %v2873_v38, %v2785_v9  ;;  %v11102_v16 = vpop.f32.mrf.mxu3  ;;  %v892_v9 = vpack.c.bf16 %v7688_v20, %v7688_v20  ;;  %v7751_v6 = vld [vmem:[%s10230_s28 + $0x121] sm:$0xff] }
 0x228   : > { %v1084_v12 = vpack.c.bf16 %v7751_v6, %v7751_v6  ;;  %v3068_v6 = vadd.f32 %v13264_v58, %v10957_v46  ;;  %v7754_v46 = vld [vmem:[%s10230_s28 + $0x141] sm:$0xff] }
 0x229   : > { %3188 = vmatmul.bf16.gmra.mxu1 %v8070_v1  ;;  %v2963_v63 = vadd.f32 %v10897_v62, %v2874_v8  ;;  %v2787_v62 = vadd.f32 %v10913_v28, %v13258_v51  ;;  %v988_v28 = vpack.c.bf16 %v7719_v41, %v7719_v41  ;;  %v7752_v1 = vld [vmem:[%s10230_s28 + $0x129] sm:$0xff]  ;;  %v8103_v8 = vld [vmem:[#allocation2 + $0x274] sm:$0xf0]  ;;  %924 = vst [vmem:[#allocation2 + $0x308] sm:$0xf] %v892_v9 }
 0x22a   : > { %v3125_v27 = vpop.f32.mrf.mxu0  ;;  %v9607_v51 = vld [vmem:[#allocation2 + $0x278] sm:$0xf0]  ;;  %v8106_v40 = vor.u32 %v9602_v55, %v8103_v8  ;;  %1116 = vst [vmem:[#allocation2 + $0x2ec] sm:$0xf] %v1084_v12  ;;  %v7689_v55 = vld [vmem:[%s10230_s28 + $0x122] sm:$0xff]  ;;  %v7690_v8 = vld [vmem:[%s10230_s28 + $0x12a] sm:$0xff] }
 0x22b   : > { %3277 = vmatmul.bf16.gmra.mxu2 %v8074_v33  ;;  %v11105_v26 = vadd.f32 %v11047_v24, %v2963_v63  ;;  %v11108_v57 = vadd.f32 %v3125_v27, %v10997_v45  ;;  %v7687_v24 = vld [vmem:[%s10230_s28 + $0x10a] sm:$0xff]  ;;  %v1085_v63 = vpack.c.bf16 %v7752_v1, %v7752_v1  ;;  %1020 = vst [vmem:[#allocation2 + $0x2e8] sm:$0xf] %v988_v28 }
 0x22c   : > { %v891_v52 = vpack.c.bf16 %v7687_v24, %v7687_v24  ;;  %3376 = vmatmul.bf16.gmra.mxu3 %v8150_v3  ;;  %v8009_v3 = vld [vmem:[#allocation2 + $0x188] sm:$0xf]  ;;  %v8110_v20 = vor.u32 %v9607_v51, %v8109_v34  ;;  %1211 = vst [vmem:[#allocation2 + $0x2cc] sm:$0xf] %v892_v9  ;;  %v7721_v9 = vld [vmem:[%s10230_s28 + $0x138] sm:$0xff]  ;;  %v893_v34 = vpack.c.bf16 %v7689_v55, %v7689_v55 }
 0x22d   : > { %3440 = vmatmul.bf16.gmra.mxu0 %v7974_v23  ;;  %1117 = vst [vmem:[#allocation2 + $0x310] sm:$0xf] %v1085_v63  ;;  %v894_v51 = vpack.c.bf16 %v7690_v8, %v7690_v8 }
 0x22e   : > { %v3001_v21 = vpop.f32.mrf.mxu2  ;;  %v2875_v48 = vpop.f32.mrf.mxu1  ;;  %923 = vst [vmem:[#allocation2 + $0x2e4] sm:$0xf] %v891_v52 }
 0x22f   : > { %v11117_v45 = vadd.f32 %v3001_v21, %v2913_v39  ;;  %v2876_v60 = vadd.f32 %v2875_v48, %v2787_v62  ;;  %v11123_v38 = vpop.f32.mrf.mxu3  ;;  %v13262_v62 = vld [vmem:[#allocation16_spill] sm:$0xff]  ;;  %v3066_v39 = vadd.f32 %v13263_v49, %v10939_v43  ;;  %1210 = vst [vmem:[#allocation2 + $0x2a8] sm:$0xf] %v891_v52 }
 0x230   : > { %925 = vst [vmem:[#allocation2 + $0x32c] sm:$0xf] %v893_v34 }
 0x231   : > { %v2965_v50 = vadd.f32 %v10919_v0, %v2876_v60  ;;  %v13261_v0 = vld [vmem:[#allocation26_spill] sm:$0xff]  ;;  %926 = vst [vmem:[#allocation2 + $0x350] sm:$0xf] %v894_v51 }
 0x232   : > { %v3127_v33 = vpop.f32.mrf.mxu0  ;;  %v2915_v19 = vadd.f32 %v13262_v62, %v13261_v0  ;;  %v9621_v28 = vld [vmem:[#allocation2 + $0x2ec] sm:$0xf]  ;;  %v990_v0 = vpack.c.bf16 %v7721_v9, %v7721_v9  ;;  %1212 = vst [vmem:[#allocation2 + $0x2f0] sm:$0xf] %v893_v34  ;;  %v13268_v34 = vld [vmem:[#allocation23_spill] sm:$0xff] }
 0x233   : > { %v11126_v23 = vadd.f32 %v11066_v44, %v2965_v50  ;;  %v11129_v27 = vadd.f32 %v3127_v33, %v11018_v37  ;;  %v9581_v44 = vld [vmem:[#allocation2 + $0x1a8] sm:$0xf0]  ;;  %1213 = vst [vmem:[#allocation2 + $0x314] sm:$0xf] %v894_v51  ;;  %v7723_v51 = vld [vmem:[%s10230_s28 + $0x150] sm:$0xff] }
 0x234   : > { %v8010_v41 = vor.u32 %v9581_v44, %v8009_v3  ;;  %v8183_v52 = vld [vmem:[#allocation2 + $0x30c] sm:$0xf0]  ;;  %v1087_v44 = vpack.c.bf16 %v7754_v46, %v7754_v46  ;;  %1022 = vst [vmem:[#allocation2 + $0x330] sm:$0xf] %v990_v0  ;;  %v7691_v46 = vld [vmem:[%s10230_s28 + $0x13a] sm:$0xff] }
 0x235   : > { %v8186_v12 = vor.u32 %v9621_v28, %v8183_v52  ;;  %v8045_v52 = vld [vmem:[#allocation2 + $0x1d0] sm:$0xf] }
 0x236   : > { %v3003_v21 = vpop.f32.mrf.mxu2  ;;  %v3154_v48 = vpop.f32.mrf.mxu1  ;;  %1119 = vst [vmem:[#allocation2 + $0x358] sm:$0xf] %v1087_v44 }
 0x237   : > { %v11135_v24 = vadd.f32 %v3003_v21, %v2915_v19  ;;  %v3155_v37 = vadd.f32 %v3154_v48, %v3066_v39  ;;  %v11137_v60 = vpop.f32.mrf.mxu3  ;;  %v7753_v19 = vld [vmem:[%s10230_s28 + $0x139] sm:$0xff] }
 0x238   : > { %v9611_v21 = vld [vmem:[#allocation2 + $0x29c] sm:$0xf]  ;;  %v8139_v48 = vld [vmem:[#allocation2 + $0x2bc] sm:$0xf0] }
 0x239   : > { %3193 = vmatmul.bf16.gmra.mxu1 %v8106_v40  ;;  %v1086_v40 = vpack.c.bf16 %v7753_v19, %v7753_v19  ;;  %v8142_v28 = vor.u32 %v9611_v21, %v8139_v48 }
 0x23a   : > { %v3130_v43 = vpop.f32.mrf.mxu0 }
 0x23b   : > { %3282 = vmatmul.bf16.gmra.mxu2 %v8110_v20  ;;  %v11140_v36 = vadd.f32 %v3130_v43, %v11033_v30  ;;  %v7722_v30 = vld [vmem:[%s10230_s28 + $0x140] sm:$0xff]  ;;  %1118 = vst [vmem:[#allocation2 + $0x334] sm:$0xf] %v1086_v40 }
 0x23c   : > { %3381 = vmatmul.bf16.gmra.mxu3 %v8186_v12  ;;  %v991_v62 = vpack.c.bf16 %v7722_v30, %v7722_v30  ;;  %v8145_v20 = vld [vmem:[#allocation2 + $0x2a0] sm:$0xf]  ;;  %v3073_v30 = vadd.f32 %v13268_v34, %v10993_v61 }
 0x23d   : > { %3445 = vmatmul.bf16.gmra.mxu0 %v8010_v41  ;;  %v9616_v41 = vld [vmem:[#allocation2 + $0x2c0] sm:$0xf0]  ;;  %v7756_v61 = vld [vmem:[%s10230_s28 + $0x159] sm:$0xff] }
 0x23e   : > { %v3243_v1 = vpop.f32.mrf.mxu2  ;;  %v3156_v50 = vpop.f32.mrf.mxu1  ;;  %1023 = vst [vmem:[#allocation2 + $0x354] sm:$0xf] %v991_v62  ;;  %v13266_v43 = vld [vmem:[#allocation21_spill] sm:$0xff]  ;;  %v8146_v55 = vor.u32 %v9616_v41, %v8145_v20  ;;  %v992_v20 = vpack.c.bf16 %v7723_v51, %v7723_v51 }
 0x23f   : > { %v3244_v33 = vadd.f32 %v3243_v1, %v3155_v37  ;;  %v3157_v63 = vadd.f32 %v3156_v50, %v3068_v6  ;;  %v11153_v39 = vpop.f32.mrf.mxu3  ;;  %v9590_v1 = vld [vmem:[#allocation2 + $0x1f0] sm:$0xf0]  ;;  %v7692_v40 = vld [vmem:[%s10230_s28 + $0x142] sm:$0xff] }
 0x240   : > { %v8046_v8 = vor.u32 %v9590_v1, %v8045_v52  ;;  %v896_v44 = vpack.c.bf16 %v7692_v40, %v7692_v40  ;;  %v1089_v1 = vpack.c.bf16 %v7756_v61, %v7756_v61  ;;  %1024 = vst [vmem:[#allocation2 + $0x378] sm:$0xf] %v992_v20  ;;  %v7694_v61 = vld [vmem:[%s10230_s28 + $0x15a] sm:$0xff] }
 0x241   : > { %v11151_v49 = vadd.f32 %v11087_v22, %v3244_v33  ;;  %v3071_v22 = vadd.f32 %v13266_v43, %v10975_v4  ;;  %v7755_v43 = vld [vmem:[%s10230_s28 + $0x151] sm:$0xff] }
 0x242   : > { %v3132_v3 = vpop.f32.mrf.mxu0  ;;  %928 = vst [vmem:[#allocation2 + $0x398] sm:$0xf] %v896_v44 }
 0x243   : > { %v11156_v37 = vadd.f32 %v3132_v3, %v11054_v29  ;;  %v895_v3 = vpack.c.bf16 %v7691_v46, %v7691_v46  ;;  %1121 = vst [vmem:[#allocation2 + $0x3a0] sm:$0xf] %v1089_v1  ;;  %v7726_v1 = vld [vmem:[%s10230_s28 + $0x170] sm:$0xff] }
 0x244   : > { %1215 = vst [vmem:[#allocation2 + $0x35c] sm:$0xf] %v896_v44  ;;  %v7693_v44 = vld [vmem:[%s10230_s28 + $0x152] sm:$0xff] }
 0x245   : > { %13265 = vst [vmem:[#allocation7_spill] sm:$0xff] %v11156_v37 }
 0x246   : > { %v3245_v58 = vpop.f32.mrf.mxu2  ;;  %v3159_v6 = vpop.f32.mrf.mxu1  ;;  %927 = vst [vmem:[#allocation2 + $0x374] sm:$0xf] %v895_v3 }
 0x247   : > { %v3246_v50 = vadd.f32 %v3245_v58, %v3157_v63  ;;  %v3160_v12 = vadd.f32 %v3159_v6, %v3071_v22  ;;  %v11163_v4 = vpop.f32.mrf.mxu3  ;;  %v9630_v63 = vld [vmem:[#allocation2 + $0x334] sm:$0xf]  ;;  %v9620_v58 = vld [vmem:[#allocation2 + $0x2e4] sm:$0xf]  ;;  %v8175_v6 = vld [vmem:[#allocation2 + $0x304] sm:$0xf0] }
 0x248   : > { %1214 = vst [vmem:[#allocation2 + $0x338] sm:$0xf] %v895_v3  ;;  %v13272_v3 = vld [vmem:[#allocation27_spill] sm:$0xff] }
 0x249   : > { %v11161_v29 = vadd.f32 %v11102_v16, %v3246_v50  ;;  %3198 = vmatmul.bf16.gmra.mxu1 %v8142_v28  ;;  %v8219_v16 = vld [vmem:[#allocation2 + $0x354] sm:$0xf0]  ;;  %v1088_v28 = vpack.c.bf16 %v7755_v43, %v7755_v43 }
 0x24a   : > { %v3135_v9 = vpop.f32.mrf.mxu0  ;;  %v8222_v19 = vor.u32 %v9630_v63, %v8219_v16  ;;  %v8178_v63 = vor.u32 %v9620_v58, %v8175_v6  ;;  %v8081_v16 = vld [vmem:[#allocation2 + $0x218] sm:$0xf]  ;;  %v897_v6 = vpack.c.bf16 %v7693_v44, %v7693_v44 }
 0x24b   : > { %3287 = vmatmul.bf16.gmra.mxu2 %v8146_v55  ;;  %v11166_v33 = vadd.f32 %v3135_v9, %v11069_v42  ;;  %v7724_v42 = vld [vmem:[%s10230_s28 + $0x158] sm:$0xff]  ;;  %v8181_v55 = vld [vmem:[#allocation2 + $0x2e8] sm:$0xf]  ;;  %v13270_v9 = vld [vmem:[#allocation25_spill] sm:$0xff]  ;;  %1120 = vst [vmem:[#allocation2 + $0x37c] sm:$0xf] %v1088_v28 }
 0x24c   : > { %3386 = vmatmul.bf16.gmra.mxu3 %v8222_v19  ;;  %v993_v41 = vpack.c.bf16 %v7724_v42, %v7724_v42  ;;  %v3078_v42 = vadd.f32 %v13272_v3, %v11029_v53  ;;  %v7725_v28 = vld [vmem:[%s10230_s28 + $0x168] sm:$0xff]  ;;  %v7758_v53 = vld [vmem:[%s10230_s28 + $0x171] sm:$0xff]  ;;  %929 = vst [vmem:[#allocation2 + $0x3bc] sm:$0xf] %v897_v6 }
 0x24d   : > { %13267 = vst [vmem:[#allocation32_spill] sm:$0xff] %v11166_v33  ;;  %3450 = vmatmul.bf16.gmra.mxu0 %v8046_v8  ;;  %v9625_v8 = vld [vmem:[#allocation2 + $0x308] sm:$0xf0] }
 0x24e   : > { %v3248_v0 = vpop.f32.mrf.mxu2  ;;  %v3161_v62 = vpop.f32.mrf.mxu1  ;;  %1025 = vst [vmem:[#allocation2 + $0x39c] sm:$0xf] %v993_v41 }
 0x24f   : > { %v3249_v21 = vadd.f32 %v3248_v0, %v3160_v12  ;;  %v3162_v48 = vadd.f32 %v3161_v62, %v3073_v30  ;;  %v11182_v12 = vpop.f32.mrf.mxu3  ;;  %v9599_v0 = vld [vmem:[#allocation2 + $0x238] sm:$0xf0]  ;;  %1216 = vst [vmem:[#allocation2 + $0x380] sm:$0xf] %v897_v6 }
 0x250   : > { %v8082_v40 = vor.u32 %v9599_v0, %v8081_v16  ;;  %v8211_v16 = vld [vmem:[#allocation2 + $0x34c] sm:$0xf0] }
 0x251   : > { %v11177_v22 = vadd.f32 %v11123_v38, %v3249_v21  ;;  %v3076_v38 = vadd.f32 %v13270_v9, %v11011_v35  ;;  %v7757_v9 = vld [vmem:[%s10230_s28 + $0x169] sm:$0xff] }
 0x252   : > { %v3137_v52 = vpop.f32.mrf.mxu0 }
 0x253   : > { %v11180_v50 = vadd.f32 %v3137_v52, %v11090_v17  ;;  %v8182_v17 = vor.u32 %v9625_v8, %v8181_v55  ;;  %v898_v52 = vpack.c.bf16 %v7694_v61, %v7694_v61  ;;  %v994_v55 = vpack.c.bf16 %v7725_v28, %v7725_v28 }
 0x254   : > { %v995_v8 = vpack.c.bf16 %v7726_v1, %v7726_v1 }
 0x255   : > { %13269 = vst [vmem:[#allocation9_spill] sm:$0xff] %v11180_v50 }
 0x256   : > { %v3250_v34 = vpop.f32.mrf.mxu2  ;;  %v3164_v30 = vpop.f32.mrf.mxu1  ;;  %930 = vst [vmem:[#allocation2 + $0x3e0] sm:$0xf] %v898_v52 }
 0x257   : > { %v3251_v62 = vadd.f32 %v3250_v34, %v3162_v48  ;;  %v3165_v19 = vadd.f32 %v3164_v30, %v3076_v38  ;;  %v11192_v21 = vpop.f32.mrf.mxu3  ;;  %v9639_v48 = vld [vmem:[#allocation2 + $0x37c] sm:$0xf]  ;;  %v1090_v34 = vpack.c.bf16 %v7757_v9, %v7757_v9  ;;  %v9629_v30 = vld [vmem:[#allocation2 + $0x32c] sm:$0xf]  ;;  %1026 = vst [vmem:[#allocation2 + $0x3c0] sm:$0xf] %v994_v55 }
 0x258   : > { %1027 = vst [vmem:[#allocation2 + $0x3e4] sm:$0xf] %v995_v8 }
 0x259   : > { %v11187_v46 = vadd.f32 %v11137_v60, %v3251_v62  ;;  %3203 = vmatmul.bf16.gmra.mxu1 %v8178_v63  ;;  %v8255_v60 = vld [vmem:[#allocation2 + $0x39c] sm:$0xf0]  ;;  %v3553_v63 = vld [vmem:[%s13193_s9 + $0x78] sm:$0xff]  ;;  %v1091_v62 = vpack.c.bf16 %v7758_v53, %v7758_v53  ;;  %1122 = vst [vmem:[#allocation2 + $0x3c4] sm:$0xf] %v1090_v34  ;;  %v7695_v53 = vld [vmem:[%s10230_s28 + $0x16a] sm:$0xff] }
 0x25a   : > { %v3140_v35 = vpop.f32.mrf.mxu0  ;;  %v8258_v43 = vor.u32 %v9639_v48, %v8255_v60  ;;  %3554 = vmatpush.msrb.mxu1 %v3553_v63  ;;  %3684 = vmatpush.msrb.mxu2 %v3553_v63  ;;  %v8214_v48 = vor.u32 %v9629_v30, %v8211_v16  ;;  %1217 = vst [vmem:[#allocation2 + $0x3a4] sm:$0xf] %v898_v52  ;;  %v7696_v63 = vld [vmem:[%s10230_s28 + $0x172] sm:$0xff]  ;;  %v7727_v52 = vld [vmem:[%s10230_s28 + $0x180] sm:$0xff] }
 0x25b   : > { %3292 = vmatmul.bf16.gmra.mxu2 %v8182_v17  ;;  %v11190_v51 = vadd.f32 %v3140_v35, %v11105_v26  ;;  %v8217_v17 = vld [vmem:[#allocation2 + $0x330] sm:$0xf]  ;;  %1123 = vst [vmem:[#allocation2 + $0x3e8] sm:$0xf] %v1091_v62  ;;  %v7728_v62 = vld [vmem:[%s10230_s28 + $0x188] sm:$0xff] }
 0x25c   : > { %3391 = vmatmul.bf16.gmra.mxu3 %v8258_v43 }
 0x25d   : > { %13271 = vst [vmem:[#allocation18_spill] sm:$0xff] %v11190_v51  ;;  %3455 = vmatmul.bf16.gmra.mxu0 %v8082_v40  ;;  %v13274_v40 = vld [vmem:[#allocation28_spill] sm:$0xff] }
 0x25e   : > { %v3253_v20 = vpop.f32.mrf.mxu2  ;;  %v3166_v41 = vpop.f32.mrf.mxu1  ;;  %v3081_v35 = vadd.f32 %v13274_v40, %v11045_v54  ;;  %v7760_v40 = vld [vmem:[%s10230_s28 + $0x189] sm:$0xff] }
 0x25f   : > { %v3254_v58 = vadd.f32 %v3253_v20, %v3165_v19  ;;  %v3167_v26 = vadd.f32 %v3166_v41, %v3078_v42  ;;  %v11213_v3 = vpop.f32.mrf.mxu3  ;;  %v8117_v20 = vld [vmem:[#allocation2 + $0x260] sm:$0xf]  ;;  %v9608_v41 = vld [vmem:[#allocation2 + $0x280] sm:$0xf0] }
 0x260   : > { %v8118_v54 = vor.u32 %v9608_v41, %v8117_v20  ;;  %v9648_v1 = vld [vmem:[#allocation2 + $0x3c4] sm:$0xf]  ;;  %v8247_v20 = vld [vmem:[#allocation2 + $0x394] sm:$0xf0] }
 0x261   : > { %v11203_v38 = vadd.f32 %v11153_v39, %v3254_v58  ;;  %v9634_v39 = vld [vmem:[#allocation2 + $0x350] sm:$0xf0] }
 0x262   : > { %v3142_v0 = vpop.f32.mrf.mxu0  ;;  %v8291_v6 = vld [vmem:[#allocation2 + $0x3e4] sm:$0xf0] }
 0x263   : > { %v11209_v19 = vadd.f32 %v3142_v0, %v11126_v23  ;;  %v8218_v23 = vor.u32 %v9634_v39, %v8217_v17  ;;  %v8294_v9 = vor.u32 %v9648_v1, %v8291_v6  ;;  %v900_v0 = vpack.c.bf16 %v7696_v63, %v7696_v63  ;;  %v7759_v39 = vld [vmem:[%s10230_s28 + $0x181] sm:$0xff] }
 0x264   : > { %v996_v17 = vpack.c.bf16 %v7727_v52, %v7727_v52  ;;  %v13278_v63 = vld [vmem:[#allocation30_spill] sm:$0xff] }
 0x265   : > { %13273 = vst [vmem:[#allocation8_spill] sm:$0xff] %v11209_v19  ;;  %v3086_v52 = vadd.f32 %v13278_v63, %v11081_v59  ;;  %v7729_v59 = vld [vmem:[%s10230_s28 + $0x198] sm:$0xff]  ;;  %v9652_v63 = vld [vmem:[#allocation2 + $0x3e0] sm:$0xf0] }
 0x266   : > { %v3255_v42 = vpop.f32.mrf.mxu2  ;;  %v3169_v60 = vpop.f32.mrf.mxu1  ;;  %932 = vst [vmem:[#allocation2 + $0x428] sm:$0xf] %v900_v0 }
 0x267   : > { %v3256_v43 = vadd.f32 %v3255_v42, %v3167_v26  ;;  %v3170_v44 = vadd.f32 %v3169_v60, %v3081_v35  ;;  %v13276_v26 = vld [vmem:[#allocation29_spill] sm:$0xff]  ;;  %v11226_v16 = vpop.f32.mrf.mxu3  ;;  %v1092_v42 = vpack.c.bf16 %v7759_v39, %v7759_v39  ;;  %v9638_v60 = vld [vmem:[#allocation2 + $0x374] sm:$0xf]  ;;  %1028 = vst [vmem:[#allocation2 + $0x408] sm:$0xf] %v996_v17 }
 0x268   : > { %v3083_v55 = vadd.f32 %v13276_v26, %v11063_v11  ;;  %v997_v11 = vpack.c.bf16 %v7728_v62, %v7728_v62  ;;  %v8153_v26 = vld [vmem:[#allocation2 + $0x2a8] sm:$0xf]  ;;  %1219 = vst [vmem:[#allocation2 + $0x3ec] sm:$0xf] %v900_v0 }
 0x269   : > { %v11216_v61 = vadd.f32 %v11163_v4, %v3256_v43  ;;  %3208 = vmatmul.bf16.gmra.mxu1 %v8214_v48  ;;  %v3552_v48 = vld [vmem:[%s13193_s9 + $0x70] sm:$0xff]  ;;  %v1093_v43 = vpack.c.bf16 %v7760_v40, %v7760_v40  ;;  %1124 = vst [vmem:[#allocation2 + $0x40c] sm:$0xf] %v1092_v42  ;;  %v7697_v40 = vld [vmem:[%s10230_s28 + $0x182] sm:$0xff] }
 0x26a   : > { %v3421_v28 = vpop.f32.mrf.mxu0  ;;  %3555 = vmatpush.msrb.mxu1 %v3552_v48  ;;  %3685 = vmatpush.msrb.mxu2 %v3552_v48  ;;  %1029 = vst [vmem:[#allocation2 + $0x42c] sm:$0xf] %v997_v11  ;;  %v7698_v48 = vld [vmem:[%s10230_s28 + $0x18a] sm:$0xff] }
 0x26b   : > { %3297 = vmatmul.bf16.gmra.mxu2 %v8218_v23  ;;  %v11219_v58 = vadd.f32 %v3421_v28, %v11151_v49  ;;  %v899_v49 = vpack.c.bf16 %v7695_v53, %v7695_v53  ;;  %v8253_v23 = vld [vmem:[#allocation2 + $0x378] sm:$0xf]  ;;  %1125 = vst [vmem:[#allocation2 + $0x430] sm:$0xf] %v1093_v43  ;;  %v998_v43 = vpack.c.bf16 %v7729_v59, %v7729_v59  ;;  %v10032_v59 = vld [vmem:[#allocation3] sm:$0xff] }
 0x26c   : > { %3396 = vmatmul.bf16.gmra.mxu3 %v8294_v9 }
 0x26d   : > { %13275 = vst [vmem:[#allocation34_spill] sm:$0xff] %v11219_v58  ;;  %3460 = vmatmul.bf16.gmra.mxu0 %v8118_v54  ;;  %v8250_v54 = vor.u32 %v9638_v60, %v8247_v20  ;;  %v902_v20 = vpack.c.bf16 %v7698_v48, %v7698_v48 }
 0x26e   : > { %v3258_v8 = vpop.f32.mrf.mxu2  ;;  %v3171_v4 = vpop.f32.mrf.mxu1  ;;  %931 = vst [vmem:[#allocation2 + $0x404] sm:$0xf] %v899_v49 }
 0x26f   : > { %v3259_v34 = vadd.f32 %v3258_v8, %v3170_v44  ;;  %v3172_v30 = vadd.f32 %v3171_v4, %v3083_v55  ;;  %v9617_v55 = vld [vmem:[#allocation2 + $0x2c8] sm:$0xf0]  ;;  %1218 = vst [vmem:[#allocation2 + $0x3c8] sm:$0xf] %v899_v49  ;;  %v11243_v9 = vpop.f32.mrf.mxu3  ;;  %v13280_v49 = vld [vmem:[#allocation31_spill] sm:$0xff] }
 0x270   : > { %v3088_v62 = vadd.f32 %v13280_v49, %v11099_v56  ;;  %v7762_v56 = vld [vmem:[%s10230_s28 + $0x1a1] sm:$0xff]  ;;  %934 = vst [vmem:[#allocation2 + $0x470] sm:$0xf] %v902_v20  ;;  %v8189_v49 = vld [vmem:[#allocation2 + $0x2f0] sm:$0xf] }
 0x271   : > { %v11232_v35 = vadd.f32 %v11182_v12, %v3259_v34  ;;  %v9643_v12 = vld [vmem:[#allocation2 + $0x398] sm:$0xf0]  ;;  %1030 = vst [vmem:[#allocation2 + $0x450] sm:$0xf] %v998_v43  ;;  %v4674_v43 = vld [vmem:[#allocation3 + $0x1a1] sm:$0xff] }
 0x272   : > { %v3423_v41 = vpop.f32.mrf.mxu0  ;;  %v8254_v8 = vor.u32 %v9643_v12, %v8253_v23  ;;  %v8327_v17 = vld [vmem:[#allocation2 + $0x42c] sm:$0xf0]  ;;  %v7761_v12 = vld [vmem:[%s10230_s28 + $0x199] sm:$0xff]  ;;  %1221 = vst [vmem:[#allocation2 + $0x434] sm:$0xf] %v902_v20  ;;  %v3093_v20 = vadd.f32 %v10875_v10, %v11135_v24 }
 0x273   : > { %v11238_v44 = vadd.f32 %v3423_v41, %v11161_v29  ;;  %v8154_v29 = vor.u32 %v9617_v55, %v8153_v26  ;;  %v7730_v41 = vld [vmem:[%s10230_s28 + $0x1a0] sm:$0xff]  ;;  %v9647_v26 = vld [vmem:[#allocation2 + $0x3bc] sm:$0xf] }
 0x274   : > { %v999_v23 = vpack.c.bf16 %v7730_v41, %v7730_v41  ;;  %v8283_v55 = vld [vmem:[#allocation2 + $0x3dc] sm:$0xf0] }
 0x275   : > { %13277 = vst [vmem:[#allocation11_spill] sm:$0xff] %v11238_v44  ;;  %v4673_v41 = vld [vmem:[#allocation3 + $0x199] sm:$0xff]  ;;  %v9656_v24 = vld [vmem:[#allocation2 + $0x404] sm:$0xf] }
 0x276   : > { %v3260_v28 = vpop.f32.mrf.mxu2  ;;  %v3174_v1 = vpop.f32.mrf.mxu1  ;;  %1031 = vst [vmem:[#allocation2 + $0x474] sm:$0xf] %v999_v23  ;;  %v3550_v10 = vld [vmem:[%s13193_s9 + $0x60] sm:$0xff] }
 0x277   : > { %v3261_v6 = vadd.f32 %v3260_v28, %v3172_v30  ;;  %v9657_v30 = vld [vmem:[#allocation2 + $0x40c] sm:$0xf] }
 0x278   : > { %v8330_v39 = vor.u32 %v9657_v30, %v8327_v17  ;;  %v3551_v28 = vld [vmem:[%s13193_s9 + $0x68] sm:$0xff]  ;;  %v11276_v23 = vld [vmem:[#allocation2 + $0x450] sm:$0xf] }
 0x279   : > { %v11241_v4 = vadd.f32 %v11192_v21, %v3261_v6  ;;  %3213 = vmatmul.bf16.gmra.mxu1 %v8250_v54  ;;  %v3175_v21 = vadd.f32 %v3174_v1, %v3086_v52  ;;  %v1094_v1 = vpack.c.bf16 %v7761_v12, %v7761_v12  ;;  %3686 = vmatpush.msrb.mxu2 %v3551_v28 }
 0x27a   : > { %v3426_v53 = vpop.f32.mrf.mxu0  ;;  %3556 = vmatpush.msrb.mxu1 %v3551_v28  ;;  %v8286_v52 = vor.u32 %v9647_v26, %v8283_v55  ;;  %v4705_v12 = vpack.c.bf16 %v4673_v41, %v4673_v41 }
 0x27b   : > { %3302 = vmatmul.bf16.gmra.mxu2 %v8254_v8  ;;  %v11248_v34 = vadd.f32 %v3426_v53, %v11177_v22  ;;  %v901_v22 = vpack.c.bf16 %v7697_v40, %v7697_v40  ;;  %v1095_v8 = vpack.c.bf16 %v7762_v56, %v7762_v56  ;;  %v11267_v53 = vpop.f32.mrf.mxu3  ;;  %1126 = vst [vmem:[#allocation2 + $0x454] sm:$0xf] %v1094_v1 }
 0x27c   : > { %3401 = vmatmul.bf16.gmra.mxu3 %v8330_v39  ;;  %v13281_v39 = vld [vmem:[#allocation33_spill] sm:$0xff]  ;;  %3557 = vmatpush.msrb.mxu1 %v3550_v10 }
 0x27d   : > { %13279 = vst [vmem:[#allocation20_spill] sm:$0xff] %v11248_v34  ;;  %3465 = vmatmul.bf16.gmra.mxu0 %v8154_v29  ;;  %v3091_v40 = vadd.f32 %v13281_v39, %v11117_v45  ;;  %v9670_v45 = vld [vmem:[#allocation2 + $0x470] sm:$0xf0]  ;;  %3687 = vmatpush.msrb.mxu2 %v3550_v10 }
 0x27e   : > { %v3263_v11 = vpop.f32.mrf.mxu2  ;;  %v3176_v0 = vpop.f32.mrf.mxu1  ;;  %933 = vst [vmem:[#allocation2 + $0x44c] sm:$0xf] %v901_v22 }
 0x27f   : > { %v3264_v42 = vadd.f32 %v3263_v11, %v3175_v21  ;;  %v3177_v60 = vadd.f32 %v3176_v0, %v3088_v62  ;;  %v9626_v62 = vld [vmem:[#allocation2 + $0x310] sm:$0xf0]  ;;  %1127 = vst [vmem:[#allocation2 + $0x478] sm:$0xf] %v1095_v8 }
 0x280   : > { %1220 = vst [vmem:[#allocation2 + $0x410] sm:$0xf] %v901_v22  ;;  %v4706_v22 = vpack.c.bf16 %v4674_v43, %v4674_v43 }
 0x281   : > { %v11259_v54 = vadd.f32 %v11213_v3, %v3264_v42  ;;  %v8289_v3 = vld [vmem:[#allocation2 + $0x3c0] sm:$0xf]  ;;  %v4609_v42 = vpack.c.bf16 %v10032_v59, %v10032_v59 }
 0x282   : > { %v3428_v6 = vpop.f32.mrf.mxu0  ;;  %v8290_v11 = vor.u32 %v9652_v63, %v8289_v3  ;;  %v8319_v63 = vld [vmem:[#allocation2 + $0x424] sm:$0xf0] }
 0x283   : > { %v11265_v29 = vadd.f32 %v3428_v6, %v11187_v46  ;;  %v8190_v46 = vor.u32 %v9626_v62, %v8189_v49  ;;  %v3362_v28 = vpop.f32.mrf.mxu3  ;;  %4641 = vst [vmem:[#allocation2 + $0x450] sm:$0xf] %v4609_v42  ;;  %v9661_v49 = vld [vmem:[#allocation2 + $0x428] sm:$0xf0]  ;;  %v8322_v62 = vor.u32 %v9656_v24, %v8319_v63  ;;  %v8261_v24 = vld [vmem:[#allocation2 + $0x380] sm:$0xf]  ;;  %v8362_v63 = vor.u32 %v9670_v45, %v11276_v23 }
 0x284   : > { %4642 = vst [vmem:[#allocation2 + $0x474] sm:$0xf] %v4609_v42  ;;  %v3548_v23 = vld [vmem:[%s13193_s9 + $0x50] sm:$0xff] }
 0x286   : > { %v3265_v30 = vpop.f32.mrf.mxu2  ;;  %v3179_v21 = vpop.f32.mrf.mxu1  ;;  %v8363_v1 = vld [vmem:[#allocation2 + $0x474] sm:$0xf0] }
 0x287   : > { %v11269_v17 = vadd.f32 %v3265_v30, %v3177_v60  ;;  %v9666_v60 = vld [vmem:[#allocation2 + $0x454] sm:$0xf]  ;;  %v3180_v56 = vadd.f32 %v3179_v21, %v3091_v40  ;;  %4738 = vst [vmem:[#allocation2 + $0x478] sm:$0xf] %v4706_v22  ;;  %v8325_v21 = vld [vmem:[#allocation2 + $0x408] sm:$0xf] }
 0x288   : > { %v8366_v55 = vor.u32 %v9666_v60, %v8363_v1  ;;  %4737 = vst [vmem:[#allocation2 + $0x454] sm:$0xf] %v4705_v12  ;;  %v8326_v40 = vor.u32 %v9661_v49, %v8325_v21 }
 0x289   : > { %3218 = vmatmul.bf16.gmra.mxu1 %v8286_v52 }
 0x28a   : > { %v3431_v0 = vpop.f32.mrf.mxu0 }
 0x28b   : > { %3307 = vmatmul.bf16.gmra.mxu2 %v8290_v11  ;;  %v11274_v48 = vadd.f32 %v3431_v0, %v11203_v38  ;;  %v8225_v0 = vld [vmem:[#allocation2 + $0x338] sm:$0xf]  ;;  %v11291_v59 = vpop.f32.mrf.mxu3 }
 0x28c   : > { %3406 = vmatmul.bf16.gmra.mxu3 %v8366_v55  ;;  %v8355_v55 = vld [vmem:[#allocation2 + $0x46c] sm:$0xf0] }
 0x28d   : > { %3470 = vmatmul.bf16.gmra.mxu0 %v8190_v46 }
 0x28e   : > { %v3268_v38 = vpop.f32.mrf.mxu2  ;;  %v3181_v26 = vpop.f32.mrf.mxu1 }
 0x28f   : > { %v3269_v6 = vadd.f32 %v3268_v38, %v3180_v56  ;;  %v3182_v8 = vadd.f32 %v3181_v26, %v3093_v20  ;;  %v3549_v38 = vld [vmem:[%s13193_s9 + $0x58] sm:$0xff]  ;;  %v9665_v26 = vld [vmem:[#allocation2 + $0x44c] sm:$0xf] }
 0x290   : > { %3558 = vmatpush.msrb.mxu1 %v3549_v38  ;;  %3688 = vmatpush.msrb.mxu2 %v3549_v38 }
 0x291   : > { %v11281_v3 = vadd.f32 %v11243_v9, %v3269_v6  ;;  %v9635_v9 = vld [vmem:[#allocation2 + $0x358] sm:$0xf0] }
 0x292   : > { %v3433_v52 = vpop.f32.mrf.mxu0  ;;  %v8226_v42 = vor.u32 %v9635_v9, %v8225_v0  ;;  %3559 = vmatpush.msrb.mxu1 %v3548_v23  ;;  %3689 = vmatpush.msrb.mxu2 %v3548_v23 }
 0x293   : > { %v11287_v30 = vadd.f32 %v3433_v52, %v11216_v61  ;;  %v3367_v1 = vpop.f32.mrf.mxu3 }
 0x296   : > { %v3270_v11 = vpop.f32.mrf.mxu2  ;;  %v3184_v46 = vpop.f32.mrf.mxu1 }
 0x297   : > { %v11289_v39 = vadd.f32 %v3270_v11, %v3182_v8  ;;  %v3185_v61 = vadd.f32 %v3184_v46, %v10891_v15 }
 0x299   : > { %3223 = vmatmul.bf16.gmra.mxu1 %v8322_v62 }
 0x29a   : > { %v3436_v41 = vpop.f32.mrf.mxu0 }
 0x29b   : > { %3312 = vmatmul.bf16.gmra.mxu2 %v8326_v40  ;;  %v11294_v43 = vadd.f32 %v3436_v41, %v11232_v35  ;;  %v8358_v35 = vor.u32 %v9665_v26, %v8355_v55  ;;  %v11309_v49 = vpop.f32.mrf.mxu3 }
 0x29d   : > { %13282 = vst [vmem:[#allocation10_spill] sm:$0xff] %v11294_v43  ;;  %3475 = vmatmul.bf16.gmra.mxu0 %v8226_v42 }
 0x29e   : > { %v3273_v60 = vpop.f32.mrf.mxu2  ;;  %v3186_v12 = vpop.f32.mrf.mxu1 }
 0x29f   : > { %v3274_v22 = vadd.f32 %v3273_v60, %v3185_v61  ;;  %v3187_v56 = vadd.f32 %v3186_v12, %v10908_v31  ;;  %v9644_v31 = vld [vmem:[#allocation2 + $0x3a0] sm:$0xf0]  ;;  %v8297_v60 = vld [vmem:[#allocation2 + $0x3c8] sm:$0xf]  ;;  %v9653_v12 = vld [vmem:[#allocation2 + $0x3e8] sm:$0xf0] }
 0x2a0   : > { %v8262_v52 = vor.u32 %v9644_v31, %v8261_v24 }
 0x2a1   : > { %v11298_v20 = vadd.f32 %v3362_v28, %v3274_v22 }
 0x2a2   : > { %v3438_v6 = vpop.f32.mrf.mxu0 }
 0x2a3   : > { %v11304_v15 = vadd.f32 %v3438_v6, %v11241_v4  ;;  %v13284_v4 = vld [vmem:[#allocation35_spill] sm:$0xff]  ;;  %v7793_v6 = vld [vmem:[%s10230_s28 + $0x19a] sm:$0xff] }
 0x2a4   : > { %v1190_v24 = vpack.c.bf16 %v7793_v6, %v7793_v6 }
 0x2a5   : > { %13283 = vst [vmem:[#allocation13_spill] sm:$0xff] %v11304_v15 }
 0x2a6   : > { %v3275_v8 = vpop.f32.mrf.mxu2  ;;  %v3189_v10 = vpop.f32.mrf.mxu1  ;;  %1222 = vst [vmem:[#allocation2 + $0x458] sm:$0xf] %v1190_v24 }
 0x2a7   : > { %v11306_v28 = vadd.f32 %v3275_v8, %v3187_v56  ;;  %v3190_v11 = vadd.f32 %v3189_v10, %v13284_v4 }
 0x2a9   : > { %3228 = vmatmul.bf16.gmra.mxu1 %v8358_v35  ;;  %v7794_v35 = vld [vmem:[%s10230_s28 + $0x1a2] sm:$0xff]  ;;  %s9960_s28 = sshll.u32 %s10179_s17, 8  ;;  %s10054_s17 = scalar_lea.hbm %s13194_s10, 512 }
 0x2aa   : > { %v3441_v21 = vpop.f32.mrf.mxu0  ;;  %v1191_v31 = vpack.c.bf16 %v7794_v35, %v7794_v35  ;;  %s7531_s12 = scalar_lea.hbm %s13194_s10, %s9960_s28 }
 0x2ab   : > { %3317 = vmatmul.bf16.gmra.mxu2 %v8362_v63  ;;  %v11312_v62 = vadd.f32 %v3441_v21, %v11259_v54  ;;  %v3372_v54 = vpop.f32.mrf.mxu3  ;;  %s7534_s20 = sshll.u32 %s7531_s12, 4  ;;  %s7535_s20 = int_to_ptr.hbm [resolvable:$true] %s7534_s20 }
 0x2ac   : > { %1223 = vst [vmem:[#allocation2 + $0x47c] sm:$0xf] %v1191_v31  ;;  %s10048_s25 = sshra.s32 %s7535_s20, 4  ;;  %s10049_s25 = int_to_ptr.hbm [resolvable:$true] %s10048_s25 }
 0x2ad   : > { %3480 = vmatmul.bf16.gmra.mxu0 %v8262_v52  ;;  %s10050_s26 = scalar_lea.hbm %s10049_s25, 256  ;;  %p10055_p0 = scmp.lt.s32.totalorder %s10049_s25, %s13194_s10 }
 0x2ae   : > { %v3278_v46 = vpop.f32.mrf.mxu2  ;;  %v3191_v0 = vpop.f32.mrf.mxu1  ;;  %p10051_p11 = scmp.ne.s32.totalorder %s10049_s25, %s10050_s26  ;;  %p10056_p1 = scmp.lt.s32.totalorder %s10054_s17, %s10050_s26 }
 0x2af   : > { %v3279_v9 = vadd.f32 %v3278_v46, %v3190_v11  ;;  %v3192_v40 = vadd.f32 %v3191_v0, %v10950_v13  ;;  %v8298_v13 = vor.u32 %v9653_v12, %v8297_v60  ;;  %v8333_v11 = vld [vmem:[#allocation2 + $0x410] sm:$0xf]  ;;  %v9662_v46 = vld [vmem:[#allocation2 + $0x430] sm:$0xf0]  ;;  %v8369_v12 = vld [vmem:[#allocation2 + $0x458] sm:$0xf] }
 0x2b0   : > { %v8334_v0 = vor.u32 %v9662_v46, %v8333_v11  ;;  %p10052_p12 = pnand %p10051_p11, %p10196_p5  ;;  %p10057_p2 = por %p10056_p1, %p10055_p0 }
 0x2b1   : > { %v11316_v42 = vadd.f32 %v3367_v1, %v3279_v9  ;;  %v4769_v9 = vld [vmem:[#allocation3 + $0x19a] sm:$0xff] }
 0x2b2   : > { %v11321_v45 = vpop.f32.mrf.mxu0  ;;  %p10053_p13 = pneg %p10052_p12 }
 0x2b3   : > { %v11332_v63 = vpop.f32.mrf.mxu3 }
 0x2b4   : > { %p10058_p3 = pnand %p10057_p2, %p10053_p13 }
 0x2b6   : > { %v3280_v41 = vpop.f32.mrf.mxu2  ;;  %v3194_v61 = vpop.f32.mrf.mxu1 }
 0x2b7   : > { %v11323_v22 = vadd.f32 %v3280_v41, %v3192_v40  ;;  %v3195_v38 = vadd.f32 %v3194_v61, %v10964_v14  ;;  %v4770_v40 = vld [vmem:[#allocation3 + $0x1a2] sm:$0xff]  ;;  %v4801_v41 = vpack.c.bf16 %v4769_v9, %v4769_v9 }
 0x2b8   : > { %v4802_v61 = vpack.c.bf16 %v4770_v40, %v4770_v40  ;;  %v3545_v40 = vld [vmem:[%s13193_s9 + $0x38] sm:$0xff] }
 0x2b9   : > { %4833 = vst [vmem:[#allocation2 + $0x458] sm:$0xf] %v4801_v41 }
 0x2ba   : > { %v3446_v56 = vpop.f32.mrf.mxu0 }
 0x2bb   : > { %v11326_v1 = vadd.f32 %v3446_v56, %v11281_v3  ;;  %v3547_v3 = vld [vmem:[%s13193_s9 + $0x48] sm:$0xff]  ;;  %v3377_v23 = vpop.f32.mrf.mxu3 }
 0x2bc   : > { %3560 = vmatpush.msrb.mxu1 %v3547_v3  ;;  %3690 = vmatpush.msrb.mxu2 %v3547_v3 }
 0x2bd   : > { %3485 = vmatmul.bf16.gmra.mxu0 %v8298_v13  ;;  %v9671_v13 = vld [vmem:[#allocation2 + $0x478] sm:$0xf0] }
 0x2be   : > { %v3283_v26 = vpop.f32.mrf.mxu2  ;;  %v3196_v55 = vpop.f32.mrf.mxu1  ;;  %4834 = vst [vmem:[#allocation2 + $0x47c] sm:$0xf] %v4802_v61  ;;  %v8370_v31 = vor.u32 %v9671_v13, %v8369_v12 }
 0x2bf   : > { %v3284_v8 = vadd.f32 %v3283_v26, %v3195_v38  ;;  %v3197_v10 = vadd.f32 %v3196_v55, %v10985_v25 }
 0x2c1   : > { %v3373_v52 = vadd.f32 %v3372_v54, %v3284_v8  ;;  %v3546_v8 = vld [vmem:[%s13193_s9 + $0x40] sm:$0xff] }
 0x2c2   : > { %v11337_v21 = vpop.f32.mrf.mxu0  ;;  %3561 = vmatpush.msrb.mxu1 %v3546_v8  ;;  %3691 = vmatpush.msrb.mxu2 %v3546_v8 }
 0x2c4   : > { %3562 = vmatpush.msrb.mxu1 %v3545_v40  ;;  %3692 = vmatpush.msrb.mxu2 %v3545_v40 }
 0x2c6   : > { %v3285_v14 = vpop.f32.mrf.mxu2  ;;  %v3199_v4 = vpop.f32.mrf.mxu1 }
 0x2c7   : > { %v11339_v25 = vadd.f32 %v3285_v14, %v3197_v10  ;;  %v3200_v56 = vadd.f32 %v3199_v4, %v11000_v18 }
 0x2ca   : > { %v3451_v54 = vpop.f32.mrf.mxu0 }
 0x2cb   : > { %v11342_v60 = vadd.f32 %v3451_v54, %v11298_v20  ;;  %v11351_v20 = vpop.f32.mrf.mxu3 }
 0x2cd   : > { %3490 = vmatmul.bf16.gmra.mxu0 %v8334_v0 }
 0x2ce   : > { %v3288_v38 = vpop.f32.mrf.mxu2  ;;  %v3201_v26 = vpop.f32.mrf.mxu1 }
 0x2cf   : > { %v3289_v55 = vadd.f32 %v3288_v38, %v3200_v56  ;;  %v3202_v6 = vadd.f32 %v3201_v26, %v11021_v32 }
 0x2d1   : > { %v3378_v35 = vadd.f32 %v3377_v23, %v3289_v55  ;;  %v3543_v55 = vld [vmem:[%s13193_s9 + $0x28] sm:$0xff] }
 0x2d2   : > { %v11349_v10 = vpop.f32.mrf.mxu0 }
 0x2d3   : > { %v3382_v46 = vpop.f32.mrf.mxu3 }
 0x2d6   : > { %v3290_v24 = vpop.f32.mrf.mxu2  ;;  %v3204_v3 = vpop.f32.mrf.mxu1 }
 0x2d7   : > { %v11353_v18 = vadd.f32 %v3290_v24, %v3202_v6  ;;  %v3205_v32 = vadd.f32 %v3204_v3, %v11036_v47  ;;  %v3544_v47 = vld [vmem:[%s13193_s9 + $0x30] sm:$0xff] }
 0x2d8   : > { %3563 = vmatpush.msrb.mxu1 %v3544_v47  ;;  %3693 = vmatpush.msrb.mxu2 %v3544_v47 }
 0x2da   : > { %v3456_v14 = vpop.f32.mrf.mxu0  ;;  %3564 = vmatpush.msrb.mxu1 %v3543_v55  ;;  %3694 = vmatpush.msrb.mxu2 %v3543_v55 }
 0x2db   : > { %v11356_v4 = vadd.f32 %v3456_v14, %v11316_v42  ;;  %v11375_v13 = vpop.f32.mrf.mxu3 }
 0x2dd   : > { %3495 = vmatmul.bf16.gmra.mxu0 %v8370_v31 }
 0x2de   : > { %v3293_v11 = vpop.f32.mrf.mxu2  ;;  %v11371_v61 = vpop.f32.mrf.mxu1 }
 0x2df   : > { %v3294_v0 = vadd.f32 %v3293_v11, %v3205_v32  ;;  %v3542_v32 = vld [vmem:[%s13193_s9 + $0x20] sm:$0xff] }
 0x2e0   : > { %3565 = vmatpush.msrb.mxu1 %v3542_v32  ;;  %3695 = vmatpush.msrb.mxu2 %v3542_v32  ;;  %v3540_v32 = vld [vmem:[%s13193_s9 + $0x10] sm:$0xff] }
 0x2e1   : > { %v3383_v9 = vadd.f32 %v3382_v46, %v3294_v0 }
 0x2e2   : > { %v11362_v23 = vpop.f32.mrf.mxu0 }
 0x2e3   : > { %v11388_v8 = vpop.f32.mrf.mxu3 }
 0x2e6   : > { %v11373_v12 = vpop.f32.mrf.mxu2  ;;  %v11379_v26 = vpop.f32.mrf.mxu1 }
 0x2ea   : > { %v3461_v54 = vpop.f32.mrf.mxu0 }
 0x2eb   : > { %v11364_v41 = vadd.f32 %v3461_v54, %v3373_v52  ;;  %v11396_v14 = vpop.f32.mrf.mxu3 }
 0x2ee   : > { %v11381_v52 = vpop.f32.mrf.mxu2  ;;  %v11390_v24 = vpop.f32.mrf.mxu1 }
 0x2f2   : > { %v11369_v42 = vpop.f32.mrf.mxu0 }
 0x2f3   : > { %v11407_v40 = vpop.f32.mrf.mxu3 }
 0x2f4   : > { %13286 = vst [vmem:[#allocation12_spill] sm:$0xff] %v11407_v40 }
 0x2f6   : > { %v11392_v31 = vpop.f32.mrf.mxu2  ;;  %v11401_v11 = vpop.f32.mrf.mxu1 }
 0x2fa   : > { %v3466_v56 = vpop.f32.mrf.mxu0 }
 0x2fb   : > { %v11377_v38 = vadd.f32 %v3466_v56, %v3378_v35  ;;  %v11418_v55 = vpop.f32.mrf.mxu3 }
 0x2fc   : > { %13288 = vst [vmem:[#allocation24_spill] sm:$0xff] %v11418_v55 }
 0x2fe   : > { %v11405_v0 = vpop.f32.mrf.mxu2  ;;  %v11414_v47 = vpop.f32.mrf.mxu1 }
 0x302   : > { %v11386_v6 = vpop.f32.mrf.mxu0 }
 0x303   : > { %v11434_v55 = vpop.f32.mrf.mxu3 }
 0x306   : > { %v11416_v56 = vpop.f32.mrf.mxu2  ;;  %v11425_v19 = vpop.f32.mrf.mxu1 }
 0x30a   : > { %v3471_v35 = vpop.f32.mrf.mxu0 }
 0x30b   : > { %v11394_v3 = vadd.f32 %v3471_v35, %v3383_v9  ;;  %v3541_v9 = vld [vmem:[%s13193_s9 + $0x18] sm:$0xff] }
 0x30c   : > { %3566 = vmatpush.msrb.mxu1 %v3541_v9  ;;  %3696 = vmatpush.msrb.mxu2 %v3541_v9  ;;  %v3501_v9 = vadd.f32 %v11238_v44, %v11219_v58  ;;  %v3355_v44 = vadd.f32 %v11226_v16, %v11269_v17 }
 0x30d   : > { %13285 = vst [vmem:[#allocation22_spill] sm:$0xff] %v11394_v3 }
 0x30e   : > { %3567 = vmatpush.msrb.mxu1 %v3540_v32  ;;  %3697 = vmatpush.msrb.mxu2 %v3540_v32  ;;  %v11427_v51 = vpop.f32.mrf.mxu2  ;;  %v3502_v33 = vadd.f32 %v3501_v9, %v11248_v34  ;;  %v3221_v37 = vpop.f32.mrf.mxu1  ;;  %v11448_v34 = vadd.f32 %v11321_v45, %v3355_v44 }
 0x312   : > { %v11403_v46 = vpop.f32.mrf.mxu0 }
 0x316   : > { %v11439_v3 = vpop.f32.mrf.mxu2  ;;  %v3224_v44 = vpop.f32.mrf.mxu1 }
 0x31a   : > { %v11412_v54 = vpop.f32.mrf.mxu0 }
 0x31b   : > { %13287 = vst [vmem:[#allocation15_spill] sm:$0xff] %v11412_v54 }
 0x322   : > { %v11420_v35 = vpop.f32.mrf.mxu0 }
 0x323   : > { %13289 = vst [vmem:[#allocation14_spill] sm:$0xff] %v11420_v35  ;;  %v3503_v35 = vadd.f32 %v3502_v33, %v11265_v29  ;;  %v3539_v33 = vld [vmem:[%s13193_s9 + $0x8] sm:$0xff] }
 0x324   : > { %3568 = vmatpush.msrb.mxu1 %v3539_v33  ;;  %3698 = vmatpush.msrb.mxu2 %v3539_v33 }
 0x325   : > { %v3504_v40 = vadd.f32 %v3503_v35, %v11274_v48  ;;  %v11453_v35 = vpop.f32.mrf.mxu3 }
 0x327   : > { %v3505_v54 = vadd.f32 %v3504_v40, %v11287_v30  ;;  %v3360_v40 = vadd.f32 %v11267_v53, %v11289_v39  ;;  %v3370_v39 = vadd.f32 %v11309_v49, %v11323_v22  ;;  %v3207_v49 = vadd.f32 %v11371_v61, %v11057_v7 }
 0x328   : > { %v3212_v7 = vadd.f32 %v11390_v24, %v11093_v2  ;;  %v3217_v24 = vadd.f32 %v11414_v47, %v11129_v27  ;;  %v13292_v47 = vld [vmem:[#allocation7_spill] sm:$0xff] }
 0x329   : > { %v3506_v58 = vadd.f32 %v3505_v54, %v11294_v43  ;;  %v3365_v54 = vadd.f32 %v11291_v59, %v11306_v28  ;;  %v3313_v43 = vpop.f32.mrf.mxu2 }
 0x32a   : > { %v11431_v50 = vpop.f32.mrf.mxu0 }
 0x32b   : > { %v3507_v9 = vadd.f32 %v3506_v58, %v11304_v15  ;;  %v11460_v58 = vadd.f32 %v11337_v21, %v3360_v40  ;;  %v11469_v53 = vadd.f32 %v11349_v10, %v3365_v54  ;;  %v3226_v10 = vpop.f32.mrf.mxu1 }
 0x32d   : > { %v3508_v16 = vadd.f32 %v3507_v9, %v11312_v62  ;;  %v11474_v9 = vpop.f32.mrf.mxu3 }
 0x32f   : > { %v3509_v17 = vadd.f32 %v3508_v16, %v11448_v34  ;;  %v11478_v16 = vadd.f32 %v11362_v23, %v3370_v39  ;;  %v3210_v23 = vadd.f32 %v11379_v26, %v11072_v5 }
 0x331   : > { %v3510_v15 = vadd.f32 %v3509_v17, %v11326_v1  ;;  %v3315_v54 = vpop.f32.mrf.mxu2  ;;  %v3299_v39 = vadd.f32 %v11381_v52, %v3210_v23 }
 0x332   : > { %v11441_v32 = vpop.f32.mrf.mxu0 }
 0x333   : > { %v3511_v33 = vadd.f32 %v3510_v15, %v11460_v58  ;;  %v3375_v15 = vadd.f32 %v11332_v63, %v11339_v25  ;;  %v3296_v63 = vadd.f32 %v11373_v12, %v3207_v49  ;;  %v3388_v52 = vadd.f32 %v11388_v8, %v3299_v39 }
 0x334   : > { %v3222_v49 = vadd.f32 %v3221_v37, %v13292_v47  ;;  %v13296_v37 = vld [vmem:[#allocation32_spill] sm:$0xff] }
 0x335   : > { %v3512_v21 = vadd.f32 %v3511_v33, %v11342_v60  ;;  %v11489_v17 = vadd.f32 %v11369_v42, %v3375_v15  ;;  %v3380_v33 = vadd.f32 %v11351_v20, %v11353_v18  ;;  %v3385_v26 = vadd.f32 %v11375_v13, %v3296_v63  ;;  %v13290_v15 = vld [vmem:[#allocation22_spill] sm:$0xff] }
 0x336   : > { %v3301_v20 = vadd.f32 %v11392_v31, %v3212_v7  ;;  %v3215_v18 = vadd.f32 %v11401_v11, %v11108_v57  ;;  %v3220_v13 = vadd.f32 %v11425_v19, %v11140_v36  ;;  %v3229_v31 = vpop.f32.mrf.mxu1  ;;  %v3306_v11 = vadd.f32 %v11416_v56, %v3217_v24  ;;  %v13294_v36 = vld [vmem:[#allocation14_spill] sm:$0xff] }
 0x337   : > { %v3513_v40 = vadd.f32 %v3512_v21, %v11469_v53  ;;  %v11502_v42 = vadd.f32 %v11386_v6, %v3380_v33  ;;  %v3404_v21 = vpop.f32.mrf.mxu3  ;;  %v3311_v56 = vadd.f32 %v11439_v3, %v3222_v49  ;;  %v3225_v39 = vadd.f32 %v3224_v44, %v13296_v37 }
 0x338   : > { %v3304_v2 = vadd.f32 %v11405_v0, %v3215_v18  ;;  %v3390_v57 = vadd.f32 %v11396_v14, %v3301_v20  ;;  %v3309_v27 = vadd.f32 %v11427_v51, %v3220_v13  ;;  %v3538_v14 = vld [vmem:[%s13193_s9] sm:$0xff]  ;;  %v13295_v51 = vld [vmem:[#allocation24_spill] sm:$0xff] }
 0x339   : > { %v3514_v28 = vadd.f32 %v3513_v40, %v11356_v4  ;;  %v11515_v40 = vadd.f32 %v11403_v46, %v3385_v26  ;;  %v13293_v46 = vld [vmem:[#allocation12_spill] sm:$0xff]  ;;  %3569 = vmatpush.msrb.mxu1 %v3538_v14  ;;  %3699 = vmatpush.msrb.mxu2 %v3538_v14  ;;  %v3314_v3 = vadd.f32 %v3313_v43, %v3225_v39 }
 0x33a   : > { %v11462_v45 = vpop.f32.mrf.mxu0  ;;  %v3393_v23 = vadd.f32 %v13293_v46, %v3304_v2  ;;  %v11530_v19 = vadd.f32 %v13294_v36, %v3390_v57  ;;  %v9895_v26 = vld [vmem:[%s13189_s5 + $0x38] sm:$0xff]  ;;  %v3398_v20 = vadd.f32 %v11434_v55, %v3309_v27  ;;  %v3400_v44 = vadd.f32 %v11453_v35, %v3311_v56 }
 0x33b   : > { %v3515_v22 = vadd.f32 %v3514_v28, %v11478_v16  ;;  %v13291_v28 = vld [vmem:[#allocation15_spill] sm:$0xff]  ;;  %6311 = vmatpush.bf16.msra.mxu3 %v9895_v26  ;;  %v3403_v43 = vadd.f32 %v11474_v9, %v3314_v3 }
 0x33c   : > { %v11523_v0 = vadd.f32 %v13291_v28, %v3388_v52 }
 0x33d   : > { %v3516_v25 = vadd.f32 %v3515_v22, %v11364_v41  ;;  %v3318_v22 = vpop.f32.mrf.mxu2 }
 0x33e   : > { %v3231_v55 = vpop.f32.mrf.mxu1 }
 0x33f   : > { %v3517_v61 = vadd.f32 %v3516_v25, %v11489_v17  ;;  %v3395_v25 = vadd.f32 %v13295_v51, %v3306_v11  ;;  %v3407_v18 = vpop.f32.mrf.mxu3  ;;  %v11555_v11 = vadd.f32 %v11462_v45, %v3398_v20  ;;  %v10100_v20 = vmov 1024.0  }
 0x340   : > { %10025 = vrcp.f32 %v10100_v20 }
 0x341   : > { %v3518_v12 = vadd.f32 %v3517_v61, %v11377_v38  ;;  %v11540_v61 = vadd.f32 %v11431_v50, %v3393_v23  ;;  %v11549_v24 = vadd.f32 %v11441_v32, %v3395_v25 }
 0x342   : > { %v11480_v59 = vpop.f32.mrf.mxu0 }
 0x343   : > { %v3519_v6 = vadd.f32 %v3518_v12, %v11502_v42  ;;  %v13297_v12 = vld [vmem:[#allocation9_spill] sm:$0xff]  ;;  %v11560_v32 = vadd.f32 %v11480_v59, %v3400_v44 }
 0x344   : > { %v3227_v52 = vadd.f32 %v3226_v10, %v13297_v12 }
 0x345   : > { %v3520_v8 = vadd.f32 %v3519_v6, %v13290_v15  ;;  %v13298_v6 = vld [vmem:[#allocation18_spill] sm:$0xff]  ;;  %v3320_v28 = vpop.f32.mrf.mxu2 }
 0x346   : > { %v3316_v50 = vadd.f32 %v3315_v54, %v3227_v52  ;;  %v3230_v13 = vadd.f32 %v3229_v31, %v13298_v6  ;;  %v13299_v54 = vld [vmem:[#allocation8_spill] sm:$0xff] }
 0x347   : > { %v3521_v33 = vadd.f32 %v3520_v8, %v11515_v40  ;;  %v3232_v47 = vadd.f32 %v3231_v55, %v13299_v54 }
 0x348   : > { %v3319_v10 = vadd.f32 %v3318_v22, %v3230_v13  ;;  %v3405_v35 = vadd.f32 %v3404_v21, %v3316_v50  ;;  %v3409_v22 = vpop.f32.mrf.mxu3 }
 0x349   : > { %v3522_v7 = vadd.f32 %v3521_v33, %v11523_v0  ;;  %v3321_v46 = vadd.f32 %v3320_v28, %v3232_v47 }
 0x34a   : > { %v3491_v5 = vpop.f32.mrf.mxu0  ;;  %v3408_v45 = vadd.f32 %v3407_v18, %v3319_v10  ;;  %v10026_v18 = vpop.eup %10025 }
 0x34b   : > { %v3523_v2 = vadd.f32 %v3522_v7, %v11530_v19  ;;  %v11564_v49 = vadd.f32 %v3491_v5, %v3403_v43  ;;  %v3410_v36 = vadd.f32 %v3409_v22, %v3321_v46  ;;  %v3575_v3 = vmul.f32 1024.0, %v10026_v18  ;;  %v13302_v43 = vld [vmem:[#allocation11_spill] sm:$0xff] }
 0x34c   : > { %vm3579_vm0 = vweird.f32 %v10026_v18 }
 0x34d   : > { %v3524_v57 = vadd.f32 %v3523_v2, %v11540_v61  ;;  %v3576_v12 = vsub.f32 1.0, %v3575_v3 }
 0x34f   : > { %v3525_v8 = vadd.f32 %v3524_v57, %v11549_v24  ;;  %v3577_v52 = vmul.f32 %v10026_v18, %v3576_v12  ;;  %v13301_v57 = vld [vmem:[#allocation34_spill] sm:$0xff] }
 0x351   : > { %v3526_v31 = vadd.f32 %v3525_v8, %v11555_v11  ;;  %v3578_v2 = vadd.f32 %v10026_v18, %v3577_v52  ;;  %v13303_v8 = vld [vmem:[#allocation20_spill] sm:$0xff] }
 0x352   : > { %v3493_v63 = vpop.f32.mrf.mxu0 }
 0x353   : > { %v3527_v23 = vadd.f32 %v3526_v31, %v11560_v32  ;;  %v11567_v9 = vadd.f32 %v3493_v63, %v3405_v35  ;;  %v11577_v50 = vsel %vm3579_vm0, %v10026_v18, %v3578_v2 }
 0x354   : > { %13300 = vst [vmem:[#allocation26_spill] sm:$0xff] %v11577_v50 }
 0x355   : > { %v3528_v33 = vadd.f32 %v3527_v23, %v11564_v49 }
 0x357   : > { %v3529_v21 = vadd.f32 %v3528_v33, %v11567_v9  ;;  %v13304_v33 = vld [vmem:[#allocation10_spill] sm:$0xff] }
 0x35a   : > { %v3496_v27 = vpop.f32.mrf.mxu0 }
 0x35b   : > { %v11570_v59 = vadd.f32 %v3496_v27, %v3408_v45 }
 0x35d   : > { %v3530_v56 = vadd.f32 %v3529_v21, %v11570_v59  ;;  %v13305_v21 = vld [vmem:[#allocation13_spill] sm:$0xff] }
 0x362   : > { %v3498_v14 = vpop.f32.mrf.mxu0 }
 0x363   : > { %v11574_v51 = vadd.f32 %v3498_v14, %v3410_v36 }
 0x365   : > { %v3531_v5 = vadd.f32 %v3530_v56, %v11574_v51 }
 0x367   : > { %v3532_v25 = vrot.slane %v3531_v5, 4 }
 0x369   : > { %v3533_v37 = vadd.f32 %v3532_v25, %v3531_v5 }
 0x36b   : > { %v3534_v39 = vrot.slane %v3533_v37, 2 }
 0x36d   : > { %v3535_v63 = vadd.f32 %v3534_v39, %v3533_v37 }
 0x36f   : > { %v3536_v7 = vrot.slane %v3535_v63, 1 }
 0x371   : > { %v3537_v26 = vadd.f32 %v3536_v7, %v3535_v63 }
 0x373   : > { %3570 = vmatmul.f32.vlgmr.msrb.gmra.mxu1 %v3537_v26 }
 0x3f0   : > { %v3571_v44 = vpop.f32.mrf.mxu1 }
 0x3f1   : > { %v3581_v6 = vmul.f32 %v11577_v50, %v3571_v44 }
 0x3f3   : > { %v11580_v13 = vperm.slane %v3581_v6, 0 }
 0x3f5   : > { %v11584_v55 = vsub.f32 %v13301_v57, %v11580_v13  ;;  %v11588_v10 = vsub.f32 %v13302_v43, %v11580_v13  ;;  %v11592_v28 = vsub.f32 %v13303_v8, %v11580_v13  ;;  %v11600_v54 = vsub.f32 %v11265_v29, %v11580_v13 }
 0x3f6   : > { %v11604_v47 = vsub.f32 %v11274_v48, %v11580_v13  ;;  %v11610_v46 = vsub.f32 %v11287_v30, %v11580_v13  ;;  %v11616_v29 = vsub.f32 %v13304_v33, %v11580_v13  ;;  %v11622_v14 = vsub.f32 %v13305_v21, %v11580_v13 }
 0x3f7   : > { %v3615_v27 = vmul.f32 %v11584_v55, %v11584_v55  ;;  %v3616_v35 = vmul.f32 %v11588_v10, %v11588_v10  ;;  %v3617_v31 = vmul.f32 %v11592_v28, %v11592_v28  ;;  %v3618_v23 = vmul.f32 %v11600_v54, %v11600_v54 }
 0x3f8   : > { %v3619_v48 = vmul.f32 %v11604_v47, %v11604_v47  ;;  %v3620_v30 = vmul.f32 %v11610_v46, %v11610_v46  ;;  %v11628_v5 = vsub.f32 %v11312_v62, %v11580_v13  ;;  %v3621_v25 = vmul.f32 %v11616_v29, %v11616_v29 }
 0x3f9   : > { %v3647_v45 = vadd.f32 %v3616_v35, %v3615_v27  ;;  %v11634_v39 = vsub.f32 %v11448_v34, %v11580_v13  ;;  %v3622_v63 = vmul.f32 %v11622_v14, %v11622_v14  ;;  %v11640_v26 = vsub.f32 %v11326_v1, %v11580_v13 }
 0x3fa   : > { %v3623_v62 = vmul.f32 %v11628_v5, %v11628_v5  ;;  %v11646_v18 = vsub.f32 %v11460_v58, %v11580_v13  ;;  %v11652_v12 = vsub.f32 %v11342_v60, %v11580_v13  ;;  %v11658_v2 = vsub.f32 %v11469_v53, %v11580_v13 }
 0x3fb   : > { %v3648_v22 = vadd.f32 %v3647_v45, %v3617_v31  ;;  %v3624_v34 = vmul.f32 %v11634_v39, %v11634_v39  ;;  %v3625_v1 = vmul.f32 %v11640_v26, %v11640_v26  ;;  %v11664_v6 = vsub.f32 %v11356_v4, %v11580_v13 }
 0x3fc   : > { %v3626_v58 = vmul.f32 %v11646_v18, %v11646_v18  ;;  %v3627_v60 = vmul.f32 %v11652_v12, %v11652_v12  ;;  %v11670_v43 = vsub.f32 %v11478_v16, %v11580_v13  ;;  %v3628_v53 = vmul.f32 %v11658_v2, %v11658_v2 }
 0x3fd   : > { %v3649_v36 = vadd.f32 %v3648_v22, %v3618_v23  ;;  %v11676_v27 = vsub.f32 %v11364_v41, %v11580_v13  ;;  %v3629_v4 = vmul.f32 %v11664_v6, %v11664_v6  ;;  %v11682_v31 = vsub.f32 %v11489_v17, %v11580_v13 }
 0x3fe   : > { %v3630_v16 = vmul.f32 %v11670_v43, %v11670_v43  ;;  %v11688_v23 = vsub.f32 %v11377_v38, %v11580_v13  ;;  %v11694_v33 = vsub.f32 %v11502_v42, %v11580_v13 }
 0x3ff   : > { %v3650_v56 = vadd.f32 %v3649_v36, %v3619_v48  ;;  %v3631_v41 = vmul.f32 %v11676_v27, %v11676_v27  ;;  %v3632_v17 = vmul.f32 %v11682_v31, %v11682_v31  ;;  %v11700_v36 = vsub.f32 %v13290_v15, %v11580_v13 }
 0x400   : > { %v3633_v38 = vmul.f32 %v11688_v23, %v11688_v23  ;;  %v3634_v42 = vmul.f32 %v11694_v33, %v11694_v33 }
 0x401   : > { %v3651_v37 = vadd.f32 %v3650_v56, %v3620_v30  ;;  %v11706_v30 = vsub.f32 %v11515_v40, %v11580_v13  ;;  %v3635_v15 = vmul.f32 %v11700_v36, %v11700_v36 }
 0x403   : > { %v3652_v7 = vadd.f32 %v3651_v37, %v3621_v25  ;;  %v11712_v25 = vsub.f32 %v11523_v0, %v11580_v13  ;;  %v3636_v40 = vmul.f32 %v11706_v30, %v11706_v30  ;;  %v11727_v0 = vsub.f32 %v11540_v61, %v11580_v13 }
 0x404   : > { %v11742_v61 = vsub.f32 %v11555_v11, %v11580_v13  ;;  %v11757_v11 = vsub.f32 %v11564_v49, %v11580_v13  ;;  %v11772_v49 = vsub.f32 %v11570_v59, %v11580_v13 }
 0x405   : > { %v3653_v20 = vadd.f32 %v3652_v7, %v3622_v63  ;;  %v11718_v63 = vsub.f32 %v11530_v19, %v11580_v13  ;;  %v9893_v19 = vld [vmem:[%s13189_s5 + $0x28] sm:$0xff] }
 0x406   : > { %v3645_v59 = vmul.f32 %v11772_v49, %v11772_v49 }
 0x407   : > { %v3654_v3 = vadd.f32 %v3653_v20, %v3623_v62  ;;  %v9894_v62 = vld [vmem:[%s13189_s5 + $0x30] sm:$0xff]  ;;  %v3637_v20 = vmul.f32 %v11712_v25, %v11712_v25 }
 0x408   : > { %6312 = vmatpush.bf16.msra.mxu3 %v9894_v62 }
 0x409   : > { %v3655_v52 = vadd.f32 %v3654_v3, %v3624_v34  ;;  %v11736_v3 = vsub.f32 %v11549_v24, %v11580_v13  ;;  %v11751_v24 = vsub.f32 %v11560_v32, %v11580_v13  ;;  %v11766_v32 = vsub.f32 %v11567_v9, %v11580_v13 }
 0x40a   : > { %v11781_v9 = vsub.f32 %v11574_v51, %v11580_v13 }
 0x40b   : > { %v3656_v44 = vadd.f32 %v3655_v52, %v3625_v1  ;;  %v3638_v1 = vmul.f32 %v11718_v63, %v11718_v63 }
 0x40c   : > { %6313 = vmatpush.bf16.msra.mxu3 %v9893_v19 }
 0x40d   : > { %v3657_v57 = vadd.f32 %v3656_v44, %v3626_v58  ;;  %v3639_v58 = vmul.f32 %v11727_v0, %v11727_v0 }
 0x40f   : > { %v3658_v8 = vadd.f32 %v3657_v57, %v3627_v60  ;;  %v9892_v60 = vld [vmem:[%s13189_s5 + $0x20] sm:$0xff]  ;;  %v3640_v57 = vmul.f32 %v11736_v3, %v11736_v3 }
 0x410   : > { %6314 = vmatpush.bf16.msra.mxu3 %v9892_v60 }
 0x411   : > { %v3659_v35 = vadd.f32 %v3658_v8, %v3628_v53  ;;  %v3641_v8 = vmul.f32 %v11742_v61, %v11742_v61 }
 0x413   : > { %v3660_v45 = vadd.f32 %v3659_v35, %v3629_v4  ;;  %v9891_v35 = vld [vmem:[%s13189_s5 + $0x18] sm:$0xff] }
 0x414   : > { %6315 = vmatpush.bf16.msra.mxu3 %v9891_v35 }
 0x415   : > { %v3661_v22 = vadd.f32 %v3660_v45, %v3630_v16  ;;  %v3642_v16 = vmul.f32 %v11751_v24, %v11751_v24 }
 0x417   : > { %v3662_v48 = vadd.f32 %v3661_v22, %v3631_v41  ;;  %v3643_v41 = vmul.f32 %v11757_v11, %v11757_v11 }
 0x419   : > { %v3663_v21 = vadd.f32 %v3662_v48, %v3632_v17  ;;  %v9890_v17 = vld [vmem:[%s13189_s5 + $0x10] sm:$0xff]  ;;  %v3644_v48 = vmul.f32 %v11766_v32, %v11766_v32 }
 0x41a   : > { %6316 = vmatpush.bf16.msra.mxu3 %v9890_v17  ;;  %v9901_v17 = vld [vmem:[%s13189_s5 + $0x68] sm:$0xff] }
 0x41b   : > { %v3664_v56 = vadd.f32 %v3663_v21, %v3633_v38 }
 0x41d   : > { %v3665_v37 = vadd.f32 %v3664_v56, %v3634_v42  ;;  %v9889_v42 = vld [vmem:[%s13189_s5 + $0x8] sm:$0xff]  ;;  %v3646_v56 = vmul.f32 %v11781_v9, %v11781_v9 }
 0x41e   : > { %6317 = vmatpush.bf16.msra.mxu3 %v9889_v42 }
 0x41f   : > { %v3666_v7 = vadd.f32 %v3665_v37, %v3635_v15 }
 0x421   : > { %v3667_v34 = vadd.f32 %v3666_v7, %v3636_v40 }
 0x423   : > { %v3668_v52 = vadd.f32 %v3667_v34, %v3637_v20  ;;  %v9911_v34 = vld [vmem:[%s13189_s5 + $0xb8] sm:$0xff] }
 0x424   : > { %6489 = vmatpush.bf16.msra.mxu2 %v9911_v34 }
 0x425   : > { %v3669_v44 = vadd.f32 %v3668_v52, %v3638_v1 }
 0x427   : > { %v3670_v53 = vadd.f32 %v3669_v44, %v3639_v58 }
 0x429   : > { %v3671_v4 = vadd.f32 %v3670_v53, %v3640_v57 }
 0x42b   : > { %v3672_v45 = vadd.f32 %v3671_v4, %v3641_v8  ;;  %v9903_v4 = vld [vmem:[%s13189_s5 + $0x78] sm:$0xff] }
 0x42c   : > { %6400 = vmatpush.bf16.msra.mxu1 %v9903_v4 }
 0x42d   : > { %v3673_v22 = vadd.f32 %v3672_v45, %v3642_v16  ;;  %v3716_v16 = vld [vmem:[%s13187_s3] sm:$0x1]  ;;  %v9902_v45 = vld [vmem:[%s13189_s5 + $0x70] sm:$0xff] }
 0x42f   : > { %v3674_v38 = vadd.f32 %v3673_v22, %v3643_v41  ;;  %v9910_v22 = vld [vmem:[%s13189_s5 + $0xb0] sm:$0xff] }
 0x430   : > { %6401 = vmatpush.bf16.msra.mxu1 %v9902_v45  ;;  %6490 = vmatpush.bf16.msra.mxu2 %v9910_v22 }
 0x431   : > { %v3675_v21 = vadd.f32 %v3674_v38, %v3644_v48  ;;  %v9909_v38 = vld [vmem:[%s13189_s5 + $0xa8] sm:$0xff] }
 0x433   : > { %v3676_v15 = vadd.f32 %v3675_v21, %v3645_v59  ;;  %v9900_v59 = vld [vmem:[%s13189_s5 + $0x60] sm:$0xff] }
 0x434   : > { %6402 = vmatpush.bf16.msra.mxu1 %v9901_v17  ;;  %6491 = vmatpush.bf16.msra.mxu2 %v9909_v38 }
 0x435   : > { %v3677_v37 = vadd.f32 %v3676_v15, %v3646_v56 }
 0x437   : > { %v3678_v51 = vrot.slane %v3677_v37, 4 }
 0x438   : > { %6403 = vmatpush.bf16.msra.mxu1 %v9900_v59 }
 0x439   : > { %v3679_v13 = vadd.f32 %v3678_v51, %v3677_v37  ;;  %v11824_v37 = vld [vmem:[%s13188_s4] ss:$0 sm:$0xff] }
 0x43b   : > { %v3680_v40 = vrot.slane %v3679_v13, 2 }
 0x43d   : > { %v3681_v7 = vadd.f32 %v3680_v40, %v3679_v13 }
 0x43f   : > { %v3682_v62 = vrot.slane %v3681_v7, 1 }
 0x441   : > { %v3683_v20 = vadd.f32 %v3682_v62, %v3681_v7  ;;  %v9908_v62 = vld [vmem:[%s13189_s5 + $0xa0] sm:$0xff] }
 0x442   : > { %6492 = vmatpush.bf16.msra.mxu2 %v9908_v62 }
 0x443   : > { %3700 = vmatmul.f32.vlgmr.msrb.gmra.mxu2 %v3683_v20 }
 0x4c6   : > { %v3701_v19 = vpop.f32.mrf.mxu2 }
 0x4c7   : > { %v3704_v1 = vmul.f32 %v3701_v19, %v11577_v50 }
 0x4c9   : > { %v3705_v52 = vadd.f32 1e-05, %v3704_v1 }
 0x4cb   : > { %10027 = vrsqrt.f32 %v3705_v52  ;;  %vm3712_vm2 = vweird.f32 %v3705_v52 }
 0x4d1   : > { %v10028_v58 = vpop.eup %10027 }
 0x4d2   : > { %v3707_v44 = vmul.f32 %v10028_v58, %v3705_v52  ;;  %vm3713_vm1 = vweird.f32 %v10028_v58 }
 0x4d3   : > { %vm3714_vm3 = vmor %vm3712_vm2, %vm3713_vm1 }
 0x4d4   : > { %v3708_v60 = vmul.f32 %v10028_v58, %v3707_v44 }
 0x4d6   : > { %v3709_v57 = vmul.f32 0.5, %v3708_v60 }
 0x4d8   : > { %v3710_v53 = vsub.f32 1.5, %v3709_v57 }
 0x4da   : > { %v3711_v8 = vmul.f32 %v10028_v58, %v3710_v53 }
 0x4dc   : > { %v3715_v35 = vsel %vm3714_vm3, %v10028_v58, %v3711_v8 }
 0x4dd   : > { %v3717_v41 = vmul.f32 %v3716_v16, %v3715_v35 }
 0x4df   : > { %v3718_v48 = vperm.slane %v3717_v41, 0 }
 0x4e1   : > { %v3719_v21 = vmul.f32 %v3718_v48, %v11584_v55  ;;  %v3720_v42 = vmul.f32 %v3718_v48, %v11588_v10  ;;  %v3721_v56 = vmul.f32 %v3718_v48, %v11592_v28  ;;  %v3722_v15 = vmul.f32 %v3718_v48, %v11600_v54 }
 0x4e2   : > { %v3723_v51 = vmul.f32 %v3718_v48, %v11604_v47  ;;  %v3724_v13 = vmul.f32 %v3718_v48, %v11610_v46  ;;  %v3725_v40 = vmul.f32 %v3718_v48, %v11616_v29  ;;  %v3726_v55 = vmul.f32 %v3718_v48, %v11622_v14  ;;  %v9899_v47 = vld [vmem:[%s13189_s5 + $0x58] sm:$0xff] }
 0x4e3   : > { %v3727_v10 = vmul.f32 %v3718_v48, %v11628_v5  ;;  %v3728_v28 = vmul.f32 %v3718_v48, %v11634_v39  ;;  %v3729_v54 = vmul.f32 %v3718_v48, %v11640_v26  ;;  %v3730_v7 = vmul.f32 %v3718_v48, %v11646_v18  ;;  %6404 = vmatpush.bf16.msra.mxu1 %v9899_v47 }
 0x4e4   : > { %v3731_v46 = vmul.f32 %v3718_v48, %v11652_v12  ;;  %v3732_v29 = vmul.f32 %v3718_v48, %v11658_v2  ;;  %v3733_v14 = vmul.f32 %v3718_v48, %v11664_v6  ;;  %v3734_v5 = vmul.f32 %v3718_v48, %v11670_v43 }
 0x4e5   : > { %v11845_v39 = vmul.f32 %v3718_v48, %v11676_v27  ;;  %v11848_v26 = vmul.f32 %v3718_v48, %v11682_v31  ;;  %v11851_v18 = vmul.f32 %v3718_v48, %v11688_v23  ;;  %v11854_v20 = vmul.f32 %v3718_v48, %v11694_v33 }
 0x4e6   : > { %v11857_v12 = vmul.f32 %v3718_v48, %v11700_v36  ;;  %v11860_v2 = vmul.f32 %v3718_v48, %v11706_v30  ;;  %v11863_v6 = vmul.f32 %v3718_v48, %v11712_v25  ;;  %v3755_v43 = vadd.f32 %v11824_v37, %v3719_v21 }
 0x4e7   : > { %v11867_v27 = vmul.f32 %v3718_v48, %v11718_v63  ;;  %v11870_v31 = vmul.f32 %v3718_v48, %v11727_v0  ;;  %v11873_v23 = vmul.f32 %v3718_v48, %v11736_v3  ;;  %v3756_v33 = vadd.f32 %v11824_v37, %v3720_v42 }
 0x4e8   : > { %v11877_v36 = vmul.f32 %v3718_v48, %v11742_v61  ;;  %v11880_v30 = vmul.f32 %v3718_v48, %v11751_v24  ;;  %v11883_v25 = vmul.f32 %v3718_v48, %v11757_v11  ;;  %v3757_v63 = vadd.f32 %v11824_v37, %v3721_v56 }
 0x4e9   : > { %v11887_v34 = vmul.f32 %v3718_v48, %v11766_v32  ;;  %v11890_v0 = vmul.f32 %v3718_v48, %v11772_v49  ;;  %v11893_v3 = vmul.f32 %v3718_v48, %v11781_v9  ;;  %v3758_v61 = vadd.f32 %v11824_v37, %v3722_v15 }
 0x4ea   : > { %v3759_v19 = vadd.f32 %v11824_v37, %v3723_v51  ;;  %v3760_v24 = vadd.f32 %v11824_v37, %v3724_v13  ;;  %v3761_v11 = vadd.f32 %v11824_v37, %v3725_v40  ;;  %v3819_v1 = vmul.f32 0.2, %v3755_v43 }
 0x4eb   : > { %v3762_v52 = vadd.f32 %v11824_v37, %v3726_v55  ;;  %v3763_v32 = vadd.f32 %v11824_v37, %v3727_v10  ;;  %vm3787_vm4 = vcmp.ge.f32.partialorder %v3755_v43, 0.0  ;;  %v3820_v58 = vmul.f32 0.2, %v3756_v33 }
 0x4ec   : > { %v3764_v49 = vadd.f32 %v11824_v37, %v3728_v28  ;;  %v11903_v9 = vadd.f32 %v11824_v37, %v3729_v54  ;;  %vm3788_vm5 = vcmp.ge.f32.partialorder %v3756_v33, 0.0  ;;  %v3821_v44 = vmul.f32 0.2, %v3757_v63  ;;  %v9888_v28 = vld [vmem:[%s13189_s5] sm:$0xff]  ;;  %v9907_v54 = vld [vmem:[%s13189_s5 + $0x98] sm:$0xff] }
 0x4ed   : > { %v11906_v60 = vadd.f32 %v11824_v37, %v3730_v7  ;;  %v11909_v57 = vadd.f32 %v11824_v37, %v3731_v46  ;;  %vm3789_vm6 = vcmp.ge.f32.partialorder %v3757_v63, 0.0  ;;  %v3822_v53 = vmul.f32 0.2, %v3758_v61  ;;  %v9919_v7 = vld [vmem:[%s13189_s5 + $0xf8] sm:$0xff]  ;;  %6318 = vmatpush.bf16.msra.mxu3 %v9888_v28  ;;  %6493 = vmatpush.bf16.msra.mxu2 %v9907_v54  ;;  %v9904_v28 = vld [vmem:[%s13189_s5 + $0x80] sm:$0xff] }
 0x4ee   : > { %v11912_v8 = vadd.f32 %v11824_v37, %v3732_v29  ;;  %vm3790_vm7 = vcmp.ge.f32.partialorder %v3758_v61, 0.0  ;;  %v3823_v4 = vmul.f32 0.2, %v3759_v19  ;;  %v11914_v35 = vsel %vm3787_vm4, %v3755_v43, %v3819_v1  ;;  %6578 = vmatpush.bf16.msrb.mxu0 %v9919_v7  ;;  %v9918_v1 = vld [vmem:[%s13189_s5 + $0xf0] sm:$0xff]  ;;  %v8669_v54 = vld [vmem:[#allocation2 + $0x8] sm:$0xf] }
 0x4ef   : > { %v11917_v16 = vadd.f32 %v11824_v37, %v3733_v14  ;;  %vm3791_vm8 = vcmp.ge.f32.partialorder %v3759_v19, 0.0  ;;  %v3824_v45 = vmul.f32 0.2, %v3760_v24  ;;  %v11919_v41 = vsel %vm3788_vm5, %v3756_v33, %v3820_v58  ;;  %3938 = vst [vmem:[#allocation3 + $0x19] sm:$0xff] %v11914_v35  ;;  %v9898_v14 = vld [vmem:[%s13189_s5 + $0x50] sm:$0xff] }
 0x4f0   : > { %v11922_v22 = vadd.f32 %v11824_v37, %v3734_v5  ;;  %vm3792_vm9 = vcmp.ge.f32.partialorder %v3760_v24, 0.0  ;;  %v3825_v17 = vmul.f32 0.2, %v3761_v11  ;;  %v11924_v48 = vsel %vm3789_vm6, %v3757_v63, %v3821_v44  ;;  %3939 = vst [vmem:[#allocation3 + $0x21] sm:$0xff] %v11919_v41  ;;  %v8661_v5 = vld [vmem:[#allocation2] sm:$0xf]  ;;  %6405 = vmatpush.bf16.msra.mxu1 %v9898_v14 }
 0x4f1   : > { %vm3793_vm10 = vcmp.ge.f32.partialorder %v3761_v11, 0.0  ;;  %vm3794_vm11 = vcmp.ge.f32.partialorder %v3762_v52, 0.0  ;;  %v3826_v38 = vmul.f32 0.2, %v3762_v52  ;;  %v11926_v59 = vsel %vm3790_vm7, %v3758_v61, %v3822_v53  ;;  %3940 = vst [vmem:[#allocation3 + $0x31] sm:$0xff] %v11924_v48  ;;  %v9906_v63 = vld [vmem:[%s13189_s5 + $0x90] sm:$0xff] }
 0x4f2   : > { %vm3795_vm12 = vcmp.ge.f32.partialorder %v3763_v32, 0.0  ;;  %vm3796_vm13 = vcmp.ge.f32.partialorder %v3764_v49, 0.0  ;;  %v3827_v21 = vmul.f32 0.2, %v3763_v32  ;;  %v11929_v42 = vsel %vm3791_vm8, %v3759_v19, %v3823_v4  ;;  %3941 = vst [vmem:[#allocation3 + $0x39] sm:$0xff] %v11926_v59  ;;  %6494 = vmatpush.bf16.msra.mxu2 %v9906_v63  ;;  %6579 = vmatpush.bf16.msrb.mxu0 %v9918_v1 }
 0x4f3   : > { %vm3797_vm14 = vcmp.ge.f32.partialorder %v11903_v9, 0.0  ;;  %v3828_v56 = vmul.f32 0.2, %v3764_v49  ;;  %v3829_v15 = vmul.f32 0.2, %v11903_v9  ;;  %v11935_v51 = vsel %vm3792_vm9, %v3760_v24, %v3824_v45  ;;  %3942 = vst [vmem:[#allocation3 + $0x49] sm:$0xff] %v11929_v42 }
 0x4f4   : > { %v11940_v13 = vadd.f32 %v11824_v37, %v11845_v39  ;;  %v11944_v40 = vadd.f32 %v11824_v37, %v11848_v26  ;;  %v3830_v55 = vmul.f32 0.2, %v11906_v60  ;;  %v11948_v10 = vsel %vm3793_vm10, %v3761_v11, %v3825_v17  ;;  %v9748_v39 = vld [vmem:[#allocation2 + $0x20] sm:$0xf0]  ;;  %3943 = vst [vmem:[#allocation3 + $0x51] sm:$0xff] %v11935_v51 }
 0x4f5   : > { %v11962_v62 = vadd.f32 %v11824_v37, %v11851_v18  ;;  %v11966_v47 = vadd.f32 %v11824_v37, %v11854_v20  ;;  %v11970_v46 = vadd.f32 %v11824_v37, %v11857_v12  ;;  %v11973_v29 = vsel %vm3794_vm11, %v3762_v52, %v3826_v38  ;;  %3944 = vst [vmem:[#allocation3 + $0x61] sm:$0xff] %v11948_v10  ;;  %v9896_v17 = vld [vmem:[%s13189_s5 + $0x40] sm:$0xff]  ;;  %v9749_v7 = vld [vmem:[#allocation2 + $0x28] sm:$0xf0] }
 0x4f6   : > { %v11981_v26 = vadd.f32 %v11824_v37, %v11860_v2  ;;  %vm3798_vm15 = vcmp.ge.f32.partialorder %v11906_v60, 0.0  ;;  %v3831_v18 = vmul.f32 0.2, %v11909_v57  ;;  %v11986_v20 = vsel %vm3795_vm12, %v3763_v32, %v3827_v21  ;;  %3945 = vst [vmem:[#allocation3 + $0x69] sm:$0xff] %v11973_v29  ;;  %v9744_v38 = vld [vmem:[#allocation2 + $0x4] sm:$0xf] }
 0x4f7   : > { %vm3799_vm0 = vcmp.ge.f32.partialorder %v11909_v57, 0.0  ;;  %vm3800_vm1 = vcmp.ge.f32.partialorder %v11912_v8, 0.0  ;;  %v3832_v12 = vmul.f32 0.2, %v11912_v8  ;;  %v11993_v43 = vsel %vm3796_vm13, %v3764_v49, %v3828_v56  ;;  %3946 = vst [vmem:[#allocation3 + $0x79] sm:$0xff] %v11986_v20 }
 0x4f8   : > { %vm3801_vm2 = vcmp.ge.f32.partialorder %v11917_v16, 0.0  ;;  %v3833_v2 = vmul.f32 0.2, %v11917_v16  ;;  %v12001_v33 = vsel %vm3797_vm14, %v11903_v9, %v3829_v15  ;;  %v8662_v61 = vor.u32 %v9748_v39, %v8661_v5  ;;  %3947 = vst [vmem:[#allocation3 + $0x81] sm:$0xff] %v11993_v43  ;;  %v9916_v5 = vld [vmem:[%s13189_s5 + $0xe0] sm:$0xff] }
 0x4f9   : > { %v12009_v19 = vadd.f32 %v11824_v37, %v11863_v6  ;;  %vm3802_vm3 = vcmp.ge.f32.partialorder %v11922_v22, 0.0  ;;  %v3834_v24 = vmul.f32 0.2, %v11922_v22  ;;  %v12016_v11 = vsel %vm3798_vm15, %v11906_v60, %v3830_v55  ;;  %v9897_v6 = vld [vmem:[%s13189_s5 + $0x48] sm:$0xff]  ;;  %3948 = vst [vmem:[#allocation3 + $0x91] sm:$0xff] %v12001_v33 }
 0x4fa   : > { %vm3803_vm4 = vcmp.ge.f32.partialorder %v11940_v13, 0.0  ;;  %vm3804_vm5 = vcmp.ge.f32.partialorder %v11944_v40, 0.0  ;;  %v3835_v52 = vmul.f32 0.2, %v11940_v13  ;;  %v12031_v32 = vsel %vm3799_vm0, %v11909_v57, %v3831_v18  ;;  %6319 = vmatmul.bf16.vlgmr.msra.gmra.mxu3 %v8662_v61  ;;  %3949 = vst [vmem:[#allocation3 + $0x99] sm:$0xff] %v12016_v11  ;;  %6406 = vmatpush.bf16.msra.mxu1 %v9897_v6 }
 0x4fb   : > { %vm3805_vm6 = vcmp.ge.f32.partialorder %v11962_v62, 0.0  ;;  %v3836_v58 = vmul.f32 0.2, %v11944_v40  ;;  %v3837_v49 = vmul.f32 0.2, %v11962_v62  ;;  %v12040_v9 = vsel %vm3800_vm1, %v11912_v8, %v3832_v12  ;;  %v9905_v8 = vld [vmem:[%s13189_s5 + $0x88] sm:$0xff] }
 0x4fc   : > { %v12045_v44 = vadd.f32 %v11824_v37, %v11867_v27  ;;  %v12049_v60 = vadd.f32 %v11824_v37, %v11870_v31  ;;  %v3838_v57 = vmul.f32 0.2, %v11966_v47  ;;  %v12055_v53 = vsel %vm3801_vm2, %v11917_v16, %v3833_v2  ;;  %v9917_v27 = vld [vmem:[%s13189_s5 + $0xe8] sm:$0xff]  ;;  %v9927_v31 = vld [vmem:[%s13189_s5 + $0x138] sm:$0xff]  ;;  %3950 = vst [vmem:[#allocation3 + $0xa9] sm:$0xff] %v12031_v32  ;;  %6495 = vmatpush.bf16.msra.mxu2 %v9905_v8 }
 0x4fd   : > { %v12069_v4 = vadd.f32 %v11824_v37, %v11873_v23  ;;  %v12073_v16 = vadd.f32 %v11824_v37, %v11877_v36  ;;  %v12078_v45 = vsel %vm3802_vm3, %v11922_v22, %v3834_v24  ;;  %v8663_v23 = vld [vmem:[#allocation2 + $0x24] sm:$0xf0]  ;;  %vm3806_vm7 = vcmp.ge.f32.partialorder %v11966_v47, 0.0  ;;  %3951 = vst [vmem:[#allocation3 + $0xb1] sm:$0xff] %v12040_v9  ;;  %6667 = vmatpush.bf16.msrb.mxu3 %v9927_v31  ;;  %v9915_v24 = vld [vmem:[%s13189_s5 + $0xd8] sm:$0xff] }
 0x4fe   : > { %vm3807_vm8 = vcmp.ge.f32.partialorder %v11970_v46, 0.0  ;;  %v3839_v36 = vmul.f32 0.2, %v11970_v46  ;;  %v3867_v22 = vsel %vm3803_vm4, %v11940_v13, %v3835_v52  ;;  %vm3808_vm9 = vcmp.ge.f32.partialorder %v11981_v26, 0.0  ;;  %3952 = vst [vmem:[#allocation3 + $0xc1] sm:$0xff] %v12055_v53  ;;  %6580 = vmatpush.bf16.msrb.mxu0 %v9917_v27  ;;  %6407 = vmatpush.bf16.msra.mxu1 %v9896_v17  ;;  %v4259_v27 = vld [vmem:[#allocation3 + $0x20] sm:$0xff] }
 0x4ff   : > { %v3840_v21 = vmul.f32 0.2, %v11981_v26  ;;  %v3841_v56 = vmul.f32 0.2, %v12009_v19  ;;  %v3868_v15 = vsel %vm3804_vm5, %v11944_v40, %v3836_v58  ;;  %v3782_v55 = vadd.f32 %v11824_v37, %v11880_v30  ;;  %3953 = vst [vmem:[#allocation3 + $0xc9] sm:$0xff] %v12078_v45  ;;  %v9913_v17 = vld [vmem:[%s13189_s5 + $0xc8] sm:$0xff] }
 0x500   : > { %v3869_v13 = vsel %vm3805_vm6, %v11962_v62, %v3837_v49  ;;  %v8666_v14 = vor.u32 %v9744_v38, %v8663_v23  ;;  %v3783_v40 = vadd.f32 %v11824_v37, %v11883_v25  ;;  %vm3809_vm10 = vcmp.ge.f32.partialorder %v12009_v19, 0.0  ;;  %3954 = vst [vmem:[#allocation3 + $0xd9] sm:$0xff] %v3867_v22  ;;  %6496 = vmatpush.bf16.msra.mxu2 %v9904_v28  ;;  %v4450_v23 = vld [vmem:[#allocation3 + $0x1a] sm:$0xff]  ;;  %v4451_v22 = vld [vmem:[#allocation3 + $0x22] sm:$0xff] }
 0x501   : > { %v3842_v30 = vmul.f32 0.2, %v12045_v44  ;;  %v3870_v62 = vsel %vm3806_vm7, %v11966_v47, %v3838_v57  ;;  %v3784_v39 = vadd.f32 %v11824_v37, %v11887_v34  ;;  %vm3810_vm11 = vcmp.ge.f32.partialorder %v12045_v44, 0.0  ;;  %3955 = vst [vmem:[#allocation3 + $0xe1] sm:$0xff] %v3868_v15  ;;  %v4258_v57 = vld [vmem:[#allocation3 + $0x18] sm:$0xff] }
 0x502   : > { %v3843_v25 = vmul.f32 0.2, %v12049_v60  ;;  %v3871_v18 = vsel %vm3807_vm8, %v11970_v46, %v3839_v36  ;;  %vm3811_vm12 = vcmp.ge.f32.partialorder %v12049_v60, 0.0  ;;  %v3844_v47 = vmul.f32 0.2, %v12069_v4  ;;  %3956 = vst [vmem:[#allocation3 + $0xf1] sm:$0xff] %v3869_v13  ;;  %6408 = vmatmul.bf16.vlgmr.msra.gmra.mxu1 %v8666_v14  ;;  %6581 = vmatpush.bf16.msrb.mxu0 %v9916_v5 }
 0x503   : > { %v3872_v12 = vsel %vm3808_vm9, %v11981_v26, %v3840_v21  ;;  %v8670_v2 = vor.u32 %v9749_v7, %v8669_v54  ;;  %v3785_v34 = vadd.f32 %v11824_v37, %v11890_v0  ;;  %vm3812_vm13 = vcmp.ge.f32.partialorder %v12069_v4, 0.0  ;;  %3957 = vst [vmem:[#allocation3 + $0xf9] sm:$0xff] %v3870_v62  ;;  %v9912_v13 = vld [vmem:[%s13189_s5 + $0xc0] sm:$0xff] }
 0x504   : > { %v3845_v63 = vmul.f32 0.2, %v12073_v16  ;;  %v3873_v46 = vsel %vm3809_vm10, %v12009_v19, %v3841_v56  ;;  %v3786_v61 = vadd.f32 %v11824_v37, %v11893_v3  ;;  %vm3813_vm14 = vcmp.ge.f32.partialorder %v12073_v16, 0.0  ;;  %3958 = vst [vmem:[#allocation3 + $0x109] sm:$0xff] %v3871_v18  ;;  %v4547_v56 = vld [vmem:[#allocation3 + $0x30] sm:$0xff]  ;;  %v3976_v18 = vld [vmem:[#allocation3 + $0x48] sm:$0xff] }
 0x505   : > { %v3846_v26 = vmul.f32 0.2, %v3782_v55  ;;  %v3874_v0 = vsel %vm3810_vm11, %v12045_v44, %v3842_v30  ;;  %vm3814_vm15 = vcmp.ge.f32.partialorder %v3782_v55, 0.0  ;;  %v3847_v19 = vmul.f32 0.2, %v3783_v40  ;;  %3959 = vst [vmem:[#allocation3 + $0x111] sm:$0xff] %v3872_v12  ;;  %6497 = vmatmul.bf16.vlgmr.msra.gmra.mxu2 %v8670_v2 }
 0x506   : > { %v3875_v1 = vsel %vm3811_vm12, %v12049_v60, %v3843_v25  ;;  %vm3815_vm0 = vcmp.ge.f32.partialorder %v3783_v40, 0.0  ;;  %v3848_v37 = vmul.f32 0.2, %v3784_v39  ;;  %v3876_v3 = vsel %vm3812_vm13, %v12069_v4, %v3844_v47  ;;  %3960 = vst [vmem:[#allocation3 + $0x121] sm:$0xff] %v3873_v46  ;;  %6582 = vmatpush.bf16.msrb.mxu0 %v9915_v24  ;;  %v9914_v44 = vld [vmem:[%s13189_s5 + $0xd0] sm:$0xff] }
 0x507   : > { %vm3816_vm1 = vcmp.ge.f32.partialorder %v3784_v39, 0.0  ;;  %v3849_v6 = vmul.f32 0.2, %v3785_v34  ;;  %v3877_v52 = vsel %vm3813_vm14, %v12073_v16, %v3845_v63  ;;  %3961 = vst [vmem:[#allocation3 + $0x129] sm:$0xff] %v3874_v0  ;;  %vm3817_vm2 = vcmp.ge.f32.partialorder %v3785_v34, 0.0  ;;  %v3977_v12 = vld [vmem:[#allocation3 + $0x50] sm:$0xff] }
 0x508   : > { %v3850_v58 = vmul.f32 0.2, %v3786_v61  ;;  %v3878_v49 = vsel %vm3814_vm15, %v3782_v55, %v3846_v26  ;;  %3962 = vst [vmem:[#allocation3 + $0x139] sm:$0xff] %v3875_v1  ;;  %vm3818_vm3 = vcmp.ge.f32.partialorder %v3786_v61, 0.0  ;;  %v3879_v60 = vsel %vm3815_vm0, %v3783_v40, %v3847_v19  ;;  %v4548_v55 = vld [vmem:[#allocation3 + $0x38] sm:$0xff]  ;;  %v4168_v24 = vld [vmem:[#allocation3 + $0x4a] sm:$0xff] }
 0x509   : > { %3963 = vst [vmem:[#allocation3 + $0x141] sm:$0xff] %v3876_v3  ;;  %v3880_v8 = vsel %vm3816_vm1, %v3784_v39, %v3848_v37  ;;  %v3881_v31 = vsel %vm3817_vm2, %v3785_v34, %v3849_v6  ;;  %v4290_v16 = vpack.c.bf16 %v4258_v57, %v4258_v57  ;;  %v4291_v38 = vpack.c.bf16 %v4259_v27, %v4259_v27  ;;  %v4169_v37 = vld [vmem:[#allocation3 + $0x52] sm:$0xff] }
 0x50a   : > { %3964 = vst [vmem:[#allocation3 + $0x151] sm:$0xff] %v3877_v52  ;;  %v3882_v4 = vsel %vm3818_vm3, %v3786_v61, %v3850_v58  ;;  %6583 = vmatpush.bf16.msrb.mxu0 %v9914_v44  ;;  %v4386_v36 = vpack.c.bf16 %v11914_v35, %v11914_v35  ;;  %v4387_v21 = vpack.c.bf16 %v11919_v41, %v11919_v41  ;;  %v4739_v35 = vld [vmem:[#allocation3 + $0x32] sm:$0xff]  ;;  %v4740_v41 = vld [vmem:[#allocation3 + $0x3a] sm:$0xff]  ;;  %v3979_v44 = vld [vmem:[#allocation3 + $0x68] sm:$0xff] }
 0x50b   : > { %3965 = vst [vmem:[#allocation3 + $0x159] sm:$0xff] %v3878_v49  ;;  %v4482_v15 = vpack.c.bf16 %v4450_v23, %v4450_v23  ;;  %v4483_v28 = vpack.c.bf16 %v4451_v22, %v4451_v22  ;;  %v4579_v54 = vpack.c.bf16 %v4547_v56, %v4547_v56  ;;  %v4580_v7 = vpack.c.bf16 %v4548_v55, %v4548_v55  ;;  %v3978_v49 = vld [vmem:[#allocation3 + $0x60] sm:$0xff]  ;;  %v3980_v22 = vld [vmem:[#allocation3 + $0x78] sm:$0xff] }
 0x50c   : > { %3966 = vst [vmem:[#allocation3 + $0x169] sm:$0xff] %v3879_v60  ;;  %v4675_v14 = vpack.c.bf16 %v11924_v48, %v11924_v48  ;;  %v4676_v40 = vpack.c.bf16 %v11926_v59, %v11926_v59  ;;  %v4771_v30 = vpack.c.bf16 %v4739_v35, %v4739_v35  ;;  %v4772_v62 = vpack.c.bf16 %v4740_v41, %v4740_v41  ;;  %v9926_v48 = vld [vmem:[%s13189_s5 + $0x130] sm:$0xff] }
 0x50d   : > { %3967 = vst [vmem:[#allocation3 + $0x171] sm:$0xff] %v3880_v8  ;;  %6668 = vmatpush.bf16.msrb.mxu3 %v9926_v48  ;;  %v4008_v46 = vpack.c.bf16 %v3976_v18, %v3976_v18  ;;  %v4009_v0 = vpack.c.bf16 %v3977_v12, %v3977_v12  ;;  %v4104_v1 = vpack.c.bf16 %v11929_v42, %v11929_v42  ;;  %v4170_v8 = vld [vmem:[#allocation3 + $0x62] sm:$0xff]  ;;  %v4174_v18 = vld [vmem:[#allocation3 + $0x92] sm:$0xff]  ;;  %v4175_v12 = vld [vmem:[#allocation3 + $0x9a] sm:$0xff] }
 0x50e   : > { %3968 = vst [vmem:[#allocation3 + $0x181] sm:$0xff] %v3881_v31  ;;  %6584 = vmatpush.bf16.msrb.mxu0 %v9913_v17  ;;  %v4105_v6 = vpack.c.bf16 %v11935_v51, %v11935_v51  ;;  %v4200_v52 = vpack.c.bf16 %v4168_v24, %v4168_v24  ;;  %v4201_v58 = vpack.c.bf16 %v4169_v37, %v4169_v37  ;;  %v4171_v31 = vld [vmem:[#allocation3 + $0x6a] sm:$0xff] }
 0x50f   : > { %3969 = vst [vmem:[#allocation3 + $0x189] sm:$0xff] %v3882_v4  ;;  %v4010_v60 = vpack.c.bf16 %v3978_v49, %v3978_v49  ;;  %v4011_v42 = vpack.c.bf16 %v3979_v44, %v3979_v44  ;;  %v4106_v51 = vpack.c.bf16 %v11948_v10, %v11948_v10  ;;  %v4202_v23 = vpack.c.bf16 %v4170_v8, %v4170_v8  ;;  %v3985_v24 = vld [vmem:[#allocation3 + $0xb0] sm:$0xff] }
 0x510   : > { %4322 = vst [vmem:[#allocation2 + $0xc] sm:$0xf] %v4290_v16  ;;  %v4108_v35 = vpack.c.bf16 %v11986_v20, %v11986_v20  ;;  %v4112_v49 = vpack.c.bf16 %v12031_v32, %v12031_v32  ;;  %v4177_v44 = vld [vmem:[#allocation3 + $0xb2] sm:$0xff] }
 0x511   : > { %4323 = vst [vmem:[#allocation2 + $0x30] sm:$0xf] %v4291_v38  ;;  %v4209_v8 = vpack.c.bf16 %v4177_v44, %v4177_v44  ;;  %v4088_v44 = vld [vmem:[#allocation3 + $0x109] sm:$0xff] }
 0x512   : > { %4418 = vst [vmem:[#allocation2 + $0x10] sm:$0xf] %v4386_v36  ;;  %6585 = vmatpush.bf16.msrb.mxu0 %v9912_v13 }
 0x513   : > { %4419 = vst [vmem:[#allocation2 + $0x34] sm:$0xf] %v4387_v21 }
 0x514   : > { %4514 = vst [vmem:[#allocation2 + $0x14] sm:$0xf] %v4482_v15 }
 0x515   : > { %4515 = vst [vmem:[#allocation2 + $0x38] sm:$0xf] %v4483_v28 }
 0x516   : > { %4611 = vst [vmem:[#allocation2 + $0x18] sm:$0xf] %v4579_v54 }
 0x517   : > { %4612 = vst [vmem:[#allocation2 + $0x3c] sm:$0xf] %v4580_v7  ;;  %v9745_v5 = vld [vmem:[#allocation2 + $0xc] sm:$0xf] }
 0x518   : > { %4707 = vst [vmem:[#allocation2 + $0x1c] sm:$0xf] %v4675_v14  ;;  %v8671_v39 = vld [vmem:[#allocation2 + $0x2c] sm:$0xf0] }
 0x519   : > { %4708 = vst [vmem:[#allocation2 + $0x40] sm:$0xf] %v4676_v40  ;;  %v8674_v25 = vor.u32 %v9745_v5, %v8671_v39  ;;  %v3982_v39 = vld [vmem:[#allocation3 + $0x90] sm:$0xff] }
 0x51a   : > { %4803 = vst [vmem:[#allocation2 + $0x20] sm:$0xf] %v4771_v30 }
 0x51b   : > { %4804 = vst [vmem:[#allocation2 + $0x44] sm:$0xf] %v4772_v62  ;;  %6586 = vmatmul.bf16.vlgmr.msrb.gmra.mxu0 %v8674_v25  ;;  %v3983_v25 = vld [vmem:[#allocation3 + $0x98] sm:$0xff] }
 0x51c   : > { %4036 = vst [vmem:[#allocation2 + $0x48] sm:$0xf] %v4290_v16  ;;  %v4107_v16 = vpack.c.bf16 %v11973_v29, %v11973_v29 }
 0x51d   : > { %4037 = vst [vmem:[#allocation2 + $0x6c] sm:$0xf] %v4291_v38 }
 0x51e   : > { %4132 = vst [vmem:[#allocation2 + $0x4c] sm:$0xf] %v4386_v36  ;;  %v4203_v36 = vpack.c.bf16 %v4171_v31, %v4171_v31 }
 0x51f   : > { %4133 = vst [vmem:[#allocation2 + $0x70] sm:$0xf] %v4387_v21  ;;  %v3981_v21 = vld [vmem:[#allocation3 + $0x80] sm:$0xff] }
 0x520   : > { %4228 = vst [vmem:[#allocation2 + $0x50] sm:$0xf] %v4482_v15 }
 0x521   : > { %4229 = vst [vmem:[#allocation2 + $0x74] sm:$0xf] %v4483_v28  ;;  %v4012_v28 = vpack.c.bf16 %v3980_v22, %v3980_v22 }
 0x522   : > { %4038 = vst [vmem:[#allocation2 + $0x90] sm:$0xf] %v4579_v54 }
 0x523   : > { %v8697_v59 = vld [vmem:[#allocation2 + $0x48] sm:$0xf]  ;;  %4039 = vst [vmem:[#allocation2 + $0xb4] sm:$0xf] %v4580_v7 }
 0x524   : > { %v9757_v47 = vld [vmem:[#allocation2 + $0x68] sm:$0xf0]  ;;  %4134 = vst [vmem:[#allocation2 + $0x94] sm:$0xf] %v4675_v14  ;;  %v4173_v14 = vld [vmem:[#allocation3 + $0x82] sm:$0xff] }
 0x525   : > { %v8698_v2 = vor.u32 %v9757_v47, %v8697_v59  ;;  %v9753_v34 = vld [vmem:[#allocation2 + $0x4c] sm:$0xf]  ;;  %4135 = vst [vmem:[#allocation2 + $0xb8] sm:$0xf] %v4676_v40  ;;  %v4109_v40 = vpack.c.bf16 %v11993_v43, %v11993_v43  ;;  %v4205_v5 = vpack.c.bf16 %v4173_v14, %v4173_v14  ;;  %v4014_v59 = vpack.c.bf16 %v3982_v39, %v3982_v39 }
 0x526   : > { %v8699_v63 = vld [vmem:[#allocation2 + $0x6c] sm:$0xf0]  ;;  %4230 = vst [vmem:[#allocation2 + $0x98] sm:$0xf] %v4771_v30  ;;  %v4015_v43 = vpack.c.bf16 %v3983_v25, %v3983_v25  ;;  %v4110_v47 = vpack.c.bf16 %v12001_v33, %v12001_v33 }
 0x527   : > { %6324 = vmatmul.bf16.gmra.mxu3 %v8698_v2  ;;  %v8702_v61 = vor.u32 %v9753_v34, %v8699_v63  ;;  %v8705_v26 = vld [vmem:[#allocation2 + $0x50] sm:$0xf]  ;;  %4231 = vst [vmem:[#allocation2 + $0xbc] sm:$0xf] %v4772_v62  ;;  %v9925_v62 = vld [vmem:[%s13189_s5 + $0x128] sm:$0xff]  ;;  %v4111_v34 = vpack.c.bf16 %v12016_v11, %v12016_v11 }
 0x528   : > { %v9758_v19 = vld [vmem:[#allocation2 + $0x70] sm:$0xf0]  ;;  %4324 = vst [vmem:[#allocation2 + $0x54] sm:$0xf] %v4579_v54  ;;  %v4013_v54 = vpack.c.bf16 %v3981_v21, %v3981_v21  ;;  %6669 = vmatpush.bf16.msrb.mxu3 %v9925_v62  ;;  %v4181_v62 = vld [vmem:[#allocation3 + $0xe2] sm:$0xff] }
 0x529   : > { %6413 = vmatmul.bf16.gmra.mxu1 %v8702_v61  ;;  %v8706_v3 = vor.u32 %v9758_v19, %v8705_v26  ;;  %4325 = vst [vmem:[#allocation2 + $0x78] sm:$0xf] %v4580_v7  ;;  %v8733_v17 = vld [vmem:[#allocation2 + $0x90] sm:$0xf]  ;;  %v4172_v7 = vld [vmem:[#allocation3 + $0x7a] sm:$0xff]  ;;  %v4206_v61 = vpack.c.bf16 %v4174_v18, %v4174_v18  ;;  %v4207_v26 = vpack.c.bf16 %v4175_v12, %v4175_v12 }
 0x52a   : > { %4040 = vst [vmem:[#allocation2 + $0xd8] sm:$0xf] %v4008_v46  ;;  %v9766_v38 = vld [vmem:[#allocation2 + $0xb0] sm:$0xf0]  ;;  %v4204_v30 = vpack.c.bf16 %v4172_v7, %v4172_v7 }
 0x52b   : > { %6502 = vmatmul.bf16.gmra.mxu2 %v8706_v3  ;;  %4041 = vst [vmem:[#allocation2 + $0xfc] sm:$0xf] %v4009_v0  ;;  %v9762_v56 = vld [vmem:[#allocation2 + $0x94] sm:$0xf]  ;;  %v8734_v55 = vor.u32 %v9766_v38, %v8733_v17  ;;  %v4178_v17 = vld [vmem:[#allocation3 + $0xc2] sm:$0xff]  ;;  %v4179_v38 = vld [vmem:[#allocation3 + $0xca] sm:$0xff] }
 0x52c   : > { %4136 = vst [vmem:[#allocation2 + $0xdc] sm:$0xf] %v4104_v1  ;;  %v8735_v15 = vld [vmem:[#allocation2 + $0xb4] sm:$0xf0] }
 0x52d   : > { %4137 = vst [vmem:[#allocation2 + $0x100] sm:$0xf] %v4105_v6  ;;  %v8741_v10 = vld [vmem:[#allocation2 + $0x98] sm:$0xf]  ;;  %v8738_v29 = vor.u32 %v9762_v56, %v8735_v15  ;;  %v4210_v56 = vpack.c.bf16 %v4178_v17, %v4178_v17 }
 0x52e   : > { %4232 = vst [vmem:[#allocation2 + $0xe0] sm:$0xf] %v4200_v52  ;;  %v9767_v13 = vld [vmem:[#allocation2 + $0xb8] sm:$0xf0]  ;;  %v4017_v52 = vpack.c.bf16 %v3985_v24, %v3985_v24  ;;  %v4086_v18 = vld [vmem:[#allocation3 + $0xf1] sm:$0xff] }
 0x52f   : > { %v9754_v57 = vld [vmem:[#allocation2 + $0x54] sm:$0xf]  ;;  %4233 = vst [vmem:[#allocation2 + $0x104] sm:$0xf] %v4201_v58  ;;  %v8742_v41 = vor.u32 %v9767_v13, %v8741_v10  ;;  %v4176_v58 = vld [vmem:[#allocation3 + $0xaa] sm:$0xff]  ;;  %v3988_v10 = vld [vmem:[#allocation3 + $0xd8] sm:$0xff] }
 0x530   : > { %v8707_v27 = vld [vmem:[#allocation2 + $0x74] sm:$0xf0]  ;;  %4326 = vst [vmem:[#allocation2 + $0x9c] sm:$0xf] %v4008_v46 }
 0x531   : > { %v8710_v4 = vor.u32 %v9754_v57, %v8707_v27  ;;  %4327 = vst [vmem:[#allocation2 + $0xc0] sm:$0xf] %v4009_v0  ;;  %v8769_v63 = vld [vmem:[#allocation2 + $0xd8] sm:$0xf]  ;;  %v3984_v0 = vld [vmem:[#allocation3 + $0xa8] sm:$0xff]  ;;  %v4113_v57 = vpack.c.bf16 %v12040_v9, %v12040_v9  ;;  %v3986_v27 = vld [vmem:[#allocation3 + $0xc0] sm:$0xff]  ;;  %v4114_v9 = vpack.c.bf16 %v12055_v53, %v12055_v53 }
 0x532   : > { %4042 = vst [vmem:[#allocation2 + $0x120] sm:$0xf] %v4010_v60  ;;  %v9775_v46 = vld [vmem:[#allocation2 + $0xf8] sm:$0xf0]  ;;  %v4016_v6 = vpack.c.bf16 %v3984_v0, %v3984_v0  ;;  %v4018_v32 = vpack.c.bf16 %v3986_v27, %v3986_v27 }
 0x533   : > { %6591 = vmatmul.bf16.gmra.mxu0 %v8710_v4  ;;  %4043 = vst [vmem:[#allocation2 + $0x144] sm:$0xf] %v4011_v42  ;;  %v9771_v19 = vld [vmem:[#allocation2 + $0xdc] sm:$0xf]  ;;  %v8770_v37 = vor.u32 %v9775_v46, %v8769_v63  ;;  %v4182_v46 = vld [vmem:[#allocation3 + $0xf2] sm:$0xff] }
 0x534   : > { %4138 = vst [vmem:[#allocation2 + $0x124] sm:$0xf] %v4106_v51  ;;  %v8771_v1 = vld [vmem:[#allocation2 + $0xfc] sm:$0xf0]  ;;  %v3987_v51 = vld [vmem:[#allocation3 + $0xc8] sm:$0xff] }
 0x535   : > { %4139 = vst [vmem:[#allocation2 + $0x148] sm:$0xf] %v4107_v16  ;;  %v8777_v33 = vld [vmem:[#allocation2 + $0xe0] sm:$0xf]  ;;  %v8774_v11 = vor.u32 %v9771_v19, %v8771_v1  ;;  %v4019_v16 = vpack.c.bf16 %v3987_v51, %v3987_v51  ;;  %v4184_v51 = vld [vmem:[#allocation3 + $0x10a] sm:$0xff] }
 0x536   : > { %4234 = vst [vmem:[#allocation2 + $0x128] sm:$0xf] %v4202_v23  ;;  %v9776_v3 = vld [vmem:[#allocation2 + $0x100] sm:$0xf0]  ;;  %v4216_v17 = vpack.c.bf16 %v4184_v51, %v4184_v51 }
 0x537   : > { %6329 = vmatmul.bf16.gmra.mxu3 %v8734_v55  ;;  %4235 = vst [vmem:[#allocation2 + $0x14c] sm:$0xf] %v4203_v36  ;;  %v9763_v20 = vld [vmem:[#allocation2 + $0x9c] sm:$0xf]  ;;  %v4115_v36 = vpack.c.bf16 %v12078_v45, %v12078_v45  ;;  %v4211_v55 = vpack.c.bf16 %v4179_v38, %v4179_v38  ;;  %v4085_v45 = vld [vmem:[#allocation3 + $0xe1] sm:$0xff] }
 0x538   : > { %4328 = vst [vmem:[#allocation2 + $0xe4] sm:$0xf] %v4010_v60  ;;  %v8743_v48 = vld [vmem:[#allocation2 + $0xbc] sm:$0xf0]  ;;  %v8778_v60 = vor.u32 %v9776_v3, %v8777_v33  ;;  %v4117_v39 = vpack.c.bf16 %v4085_v45, %v4085_v45 }
 0x539   : > { %6418 = vmatmul.bf16.gmra.mxu1 %v8738_v29  ;;  %4329 = vst [vmem:[#allocation2 + $0x108] sm:$0xf] %v4011_v42  ;;  %v8746_v2 = vor.u32 %v9763_v20, %v8743_v48  ;;  %v4208_v42 = vpack.c.bf16 %v4176_v58, %v4176_v58  ;;  %v8805_v22 = vld [vmem:[#allocation2 + $0x120] sm:$0xf]  ;;  %v4213_v48 = vpack.c.bf16 %v4181_v62, %v4181_v62 }
 0x53a   : > { %4044 = vst [vmem:[#allocation2 + $0x168] sm:$0xf] %v4012_v28  ;;  %v9784_v21 = vld [vmem:[#allocation2 + $0x140] sm:$0xf0] }
 0x53b   : > { %6507 = vmatmul.bf16.gmra.mxu2 %v8742_v41  ;;  %4045 = vst [vmem:[#allocation2 + $0x18c] sm:$0xf] %v4013_v54  ;;  %v9780_v15 = vld [vmem:[#allocation2 + $0x124] sm:$0xf]  ;;  %v8806_v29 = vor.u32 %v9784_v21, %v8805_v22 }
 0x53c   : > { %4140 = vst [vmem:[#allocation2 + $0x16c] sm:$0xf] %v4108_v35  ;;  %v8807_v13 = vld [vmem:[#allocation2 + $0x144] sm:$0xf0]  ;;  %v4020_v35 = vpack.c.bf16 %v3988_v10, %v3988_v10  ;;  %v9924_v20 = vld [vmem:[%s13189_s5 + $0x120] sm:$0xff] }
 0x53d   : > { %4141 = vst [vmem:[#allocation2 + $0x190] sm:$0xf] %v4109_v40  ;;  %v8813_v53 = vld [vmem:[#allocation2 + $0x128] sm:$0xf]  ;;  %v8810_v14 = vor.u32 %v9780_v15, %v8807_v13  ;;  %v4180_v40 = vld [vmem:[#allocation3 + $0xda] sm:$0xff]  ;;  %6670 = vmatpush.bf16.msrb.mxu3 %v9924_v20 }
 0x53e   : > { %4236 = vst [vmem:[#allocation2 + $0x170] sm:$0xf] %v4204_v30  ;;  %v9785_v7 = vld [vmem:[#allocation2 + $0x148] sm:$0xf0]  ;;  %v4212_v25 = vpack.c.bf16 %v4180_v40, %v4180_v40  ;;  %v3994_v38 = vld [vmem:[#allocation3 + $0x120] sm:$0xff] }
 0x53f   : > { %4237 = vst [vmem:[#allocation2 + $0x194] sm:$0xf] %v4205_v5  ;;  %v9772_v31 = vld [vmem:[#allocation2 + $0xe4] sm:$0xf]  ;;  %v8814_v5 = vor.u32 %v9785_v7, %v8813_v53  ;;  %v4091_v15 = vld [vmem:[#allocation3 + $0x129] sm:$0xff] }
 0x540   : > { %4330 = vst [vmem:[#allocation2 + $0x12c] sm:$0xf] %v4012_v28  ;;  %v8779_v4 = vld [vmem:[#allocation2 + $0x104] sm:$0xf0]  ;;  %v3989_v28 = vld [vmem:[#allocation3 + $0xe0] sm:$0xff]  ;;  %v4123_v53 = vpack.c.bf16 %v4091_v15, %v4091_v15 }
 0x541   : > { %4331 = vst [vmem:[#allocation2 + $0x150] sm:$0xf] %v4013_v54  ;;  %v8782_v23 = vor.u32 %v9772_v31, %v8779_v4  ;;  %v4084_v54 = vld [vmem:[#allocation3 + $0xd9] sm:$0xff]  ;;  %v4021_v41 = vpack.c.bf16 %v3989_v28, %v3989_v28  ;;  %v8841_v19 = vld [vmem:[#allocation2 + $0x168] sm:$0xf]  ;;  %v4120_v31 = vpack.c.bf16 %v4088_v44, %v4088_v44 }
 0x542   : > { %4046 = vst [vmem:[#allocation2 + $0x1b0] sm:$0xf] %v4014_v59  ;;  %v4116_v30 = vpack.c.bf16 %v4084_v54, %v4084_v54  ;;  %v9793_v1 = vld [vmem:[#allocation2 + $0x188] sm:$0xf0]  ;;  %v4185_v4 = vld [vmem:[#allocation3 + $0x112] sm:$0xff]  ;;  %v4090_v22 = vld [vmem:[#allocation3 + $0x121] sm:$0xff] }
 0x543   : > { %6596 = vmatmul.bf16.gmra.mxu0 %v8746_v2  ;;  %4047 = vst [vmem:[#allocation2 + $0x1d4] sm:$0xf] %v4015_v43  ;;  %v9789_v33 = vld [vmem:[#allocation2 + $0x16c] sm:$0xf]  ;;  %v8842_v58 = vor.u32 %v9793_v1, %v8841_v19  ;;  %v4186_v10 = vld [vmem:[#allocation3 + $0x122] sm:$0xff]  ;;  %v4122_v13 = vpack.c.bf16 %v4090_v22, %v4090_v22 }
 0x544   : > { %4142 = vst [vmem:[#allocation2 + $0x1b4] sm:$0xf] %v4110_v47  ;;  %v4087_v47 = vld [vmem:[#allocation3 + $0xf9] sm:$0xff]  ;;  %v4187_v28 = vld [vmem:[#allocation3 + $0x12a] sm:$0xff] }
 0x545   : > { %4143 = vst [vmem:[#allocation2 + $0x1d8] sm:$0xf] %v4111_v34  ;;  %v4119_v24 = vpack.c.bf16 %v4087_v47, %v4087_v47 }
 0x546   : > { %4238 = vst [vmem:[#allocation2 + $0x1b8] sm:$0xf] %v4206_v61  ;;  %v4118_v61 = vpack.c.bf16 %v4086_v18, %v4086_v18  ;;  %v4188_v18 = vld [vmem:[#allocation3 + $0x13a] sm:$0xff] }
 0x547   : > { %6334 = vmatmul.bf16.gmra.mxu3 %v8770_v37  ;;  %4239 = vst [vmem:[#allocation2 + $0x1dc] sm:$0xf] %v4207_v26  ;;  %v9781_v12 = vld [vmem:[#allocation2 + $0x12c] sm:$0xf]  ;;  %v4183_v26 = vld [vmem:[#allocation3 + $0xfa] sm:$0xff]  ;;  %v4214_v37 = vpack.c.bf16 %v4182_v46, %v4182_v46  ;;  %v4220_v46 = vpack.c.bf16 %v4188_v18, %v4188_v18 }
 0x548   : > { %4332 = vst [vmem:[#allocation2 + $0x174] sm:$0xf] %v4014_v59  ;;  %v3990_v59 = vld [vmem:[#allocation3 + $0xf0] sm:$0xff]  ;;  %v4215_v3 = vpack.c.bf16 %v4183_v26, %v4183_v26 }
 0x549   : > { %6423 = vmatmul.bf16.gmra.mxu1 %v8774_v11  ;;  %4333 = vst [vmem:[#allocation2 + $0x198] sm:$0xf] %v4015_v43  ;;  %v3991_v43 = vld [vmem:[#allocation3 + $0xf8] sm:$0xff]  ;;  %v8815_v2 = vld [vmem:[#allocation2 + $0x14c] sm:$0xf0]  ;;  %v4022_v34 = vpack.c.bf16 %v3990_v59, %v3990_v59 }
 0x54a   : > { %4048 = vst [vmem:[#allocation2 + $0x1f8] sm:$0xf] %v4016_v6  ;;  %v4023_v63 = vpack.c.bf16 %v3991_v43, %v3991_v43  ;;  %v8818_v0 = vor.u32 %v9781_v12, %v8815_v2  ;;  %v8843_v11 = vld [vmem:[#allocation2 + $0x18c] sm:$0xf0]  ;;  %v9802_v7 = vld [vmem:[#allocation2 + $0x1d0] sm:$0xf0] }
 0x54b   : > { %6512 = vmatmul.bf16.gmra.mxu2 %v8778_v60  ;;  %4049 = vst [vmem:[#allocation2 + $0x21c] sm:$0xf] %v4017_v52  ;;  %v9794_v60 = vld [vmem:[#allocation2 + $0x190] sm:$0xf0]  ;;  %v8877_v54 = vld [vmem:[#allocation2 + $0x1b0] sm:$0xf] }
 0x54c   : > { %4144 = vst [vmem:[#allocation2 + $0x1fc] sm:$0xf] %v4112_v49  ;;  %v8849_v49 = vld [vmem:[#allocation2 + $0x170] sm:$0xf]  ;;  %v9798_v45 = vld [vmem:[#allocation2 + $0x1b4] sm:$0xf]  ;;  %v8878_v62 = vor.u32 %v9802_v7, %v8877_v54 }
 0x54d   : > { %4145 = vst [vmem:[#allocation2 + $0x220] sm:$0xf] %v4113_v57  ;;  %v8879_v40 = vld [vmem:[#allocation2 + $0x1d4] sm:$0xf0]  ;;  %v4189_v12 = vld [vmem:[#allocation3 + $0x142] sm:$0xff] }
 0x54e   : > { %4240 = vst [vmem:[#allocation2 + $0x200] sm:$0xf] %v4208_v42  ;;  %v4089_v42 = vld [vmem:[#allocation3 + $0x111] sm:$0xff]  ;;  %v8882_v59 = vor.u32 %v9798_v45, %v8879_v40  ;;  %v4221_v26 = vpack.c.bf16 %v4189_v12, %v4189_v12  ;;  %v4549_v12 = vld [vmem:[#allocation3 + $0x48] sm:$0xff] }
 0x54f   : > { %4241 = vst [vmem:[#allocation2 + $0x224] sm:$0xf] %v4209_v8  ;;  %v8846_v8 = vor.u32 %v9789_v33, %v8843_v11  ;;  %v4095_v11 = vld [vmem:[#allocation3 + $0x159] sm:$0xff] }
 0x550   : > { %4334 = vst [vmem:[#allocation2 + $0x1bc] sm:$0xf] %v4016_v6  ;;  %v3992_v6 = vld [vmem:[#allocation3 + $0x108] sm:$0xff]  ;;  %v8851_v21 = vld [vmem:[#allocation2 + $0x194] sm:$0xf0] }
 0x551   : > { %4335 = vst [vmem:[#allocation2 + $0x1e0] sm:$0xf] %v4017_v52  ;;  %v3993_v52 = vld [vmem:[#allocation3 + $0x110] sm:$0xff]  ;;  %v4024_v57 = vpack.c.bf16 %v3992_v6, %v3992_v6 }
 0x552   : > { %4050 = vst [vmem:[#allocation2 + $0x240] sm:$0xf] %v4018_v32  ;;  %v4025_v27 = vpack.c.bf16 %v3993_v52, %v3993_v52  ;;  %v9811_v51 = vld [vmem:[#allocation2 + $0x218] sm:$0xf0] }
 0x553   : > { %6601 = vmatmul.bf16.gmra.mxu0 %v8782_v23  ;;  %4051 = vst [vmem:[#allocation2 + $0x264] sm:$0xf] %v4019_v16  ;;  %v3995_v23 = vld [vmem:[#allocation3 + $0x128] sm:$0xff] }
 0x554   : > { %4146 = vst [vmem:[#allocation2 + $0x244] sm:$0xf] %v4114_v9  ;;  %v4217_v9 = vpack.c.bf16 %v4185_v4, %v4185_v4  ;;  %v9807_v4 = vld [vmem:[#allocation2 + $0x1fc] sm:$0xf] }
 0x555   : > { %4147 = vst [vmem:[#allocation2 + $0x268] sm:$0xf] %v4115_v36  ;;  %v9790_v36 = vld [vmem:[#allocation2 + $0x174] sm:$0xf] }
 0x556   : > { %4242 = vst [vmem:[#allocation2 + $0x248] sm:$0xf] %v4210_v56  ;;  %v4026_v56 = vpack.c.bf16 %v3994_v38, %v3994_v38  ;;  %v9812_v22 = vld [vmem:[#allocation2 + $0x220] sm:$0xf0] }
 0x557   : > { %6339 = vmatmul.bf16.gmra.mxu3 %v8806_v29  ;;  %4243 = vst [vmem:[#allocation2 + $0x26c] sm:$0xf] %v4211_v55  ;;  %v4027_v55 = vpack.c.bf16 %v3995_v23, %v3995_v23  ;;  %v8854_v29 = vor.u32 %v9790_v36, %v8851_v21  ;;  %v9799_v19 = vld [vmem:[#allocation2 + $0x1bc] sm:$0xf]  ;;  %v8921_v23 = vld [vmem:[#allocation2 + $0x200] sm:$0xf] }
 0x558   : > { %4336 = vst [vmem:[#allocation2 + $0x204] sm:$0xf] %v4018_v32  ;;  %v8850_v32 = vor.u32 %v9794_v60, %v8849_v49  ;;  %v8887_v33 = vld [vmem:[#allocation2 + $0x1dc] sm:$0xf0]  ;;  %v4096_v36 = vld [vmem:[#allocation3 + $0x169] sm:$0xff] }
 0x559   : > { %6428 = vmatmul.bf16.gmra.mxu1 %v8810_v14  ;;  %4337 = vst [vmem:[#allocation2 + $0x228] sm:$0xf] %v4019_v16  ;;  %v4121_v16 = vpack.c.bf16 %v4089_v42, %v4089_v42  ;;  %v4219_v14 = vpack.c.bf16 %v4187_v28, %v4187_v28  ;;  %v4191_v60 = vld [vmem:[#allocation3 + $0x15a] sm:$0xff]  ;;  %v4193_v28 = vld [vmem:[#allocation3 + $0x172] sm:$0xff] }
 0x55a   : > { %4052 = vst [vmem:[#allocation2 + $0x288] sm:$0xf] %v4020_v35  ;;  %v4225_v45 = vpack.c.bf16 %v4193_v28, %v4193_v28 }
 0x55b   : > { %6517 = vmatmul.bf16.gmra.mxu2 %v8814_v5  ;;  %4053 = vst [vmem:[#allocation2 + $0x2ac] sm:$0xf] %v4021_v41  ;;  %v8885_v5 = vld [vmem:[#allocation2 + $0x1b8] sm:$0xf] }
 0x55c   : > { %4148 = vst [vmem:[#allocation2 + $0x28c] sm:$0xf] %v4116_v30  ;;  %v3997_v30 = vld [vmem:[#allocation3 + $0x140] sm:$0xff] }
 0x55d   : > { %4149 = vst [vmem:[#allocation2 + $0x2b0] sm:$0xf] %v4117_v39  ;;  %v4092_v39 = vld [vmem:[#allocation3 + $0x139] sm:$0xff]  ;;  %v4029_v43 = vpack.c.bf16 %v3997_v30, %v3997_v30  ;;  %v4356_v30 = vld [vmem:[#allocation3 + $0x31] sm:$0xff] }
 0x55e   : > { %4244 = vst [vmem:[#allocation2 + $0x290] sm:$0xf] %v4212_v25  ;;  %v9803_v25 = vld [vmem:[#allocation2 + $0x1d8] sm:$0xf0]  ;;  %v4124_v47 = vpack.c.bf16 %v4092_v39, %v4092_v39 }
 0x55f   : > { %4245 = vst [vmem:[#allocation2 + $0x2b4] sm:$0xf] %v4213_v48  ;;  %v4093_v48 = vld [vmem:[#allocation3 + $0x141] sm:$0xff]  ;;  %v8886_v2 = vor.u32 %v9803_v25, %v8885_v5  ;;  %v4357_v39 = vld [vmem:[#allocation3 + $0x39] sm:$0xff] }
 0x560   : > { %4338 = vst [vmem:[#allocation2 + $0x24c] sm:$0xf] %v4020_v35  ;;  %v4218_v35 = vpack.c.bf16 %v4186_v10, %v4186_v10  ;;  %v4192_v10 = vld [vmem:[#allocation3 + $0x16a] sm:$0xff]  ;;  %v9808_v40 = vld [vmem:[#allocation2 + $0x204] sm:$0xf] }
 0x561   : > { %4339 = vst [vmem:[#allocation2 + $0x270] sm:$0xf] %v4021_v41  ;;  %v3996_v41 = vld [vmem:[#allocation3 + $0x138] sm:$0xff] }
 0x562   : > { %4054 = vst [vmem:[#allocation2 + $0x2d0] sm:$0xf] %v4022_v34  ;;  %v4028_v20 = vpack.c.bf16 %v3996_v41, %v3996_v41  ;;  %v4289_v41 = vld [vmem:[#allocation3 + $0x188] sm:$0xff] }
 0x563   : > { %6606 = vmatmul.bf16.gmra.mxu0 %v8818_v0  ;;  %4055 = vst [vmem:[#allocation2 + $0x2f4] sm:$0xf] %v4023_v63  ;;  %v3998_v0 = vld [vmem:[#allocation3 + $0x150] sm:$0xff]  ;;  %v4321_v25 = vpack.c.bf16 %v4289_v41, %v4289_v41  ;;  %v4362_v41 = vld [vmem:[#allocation3 + $0x79] sm:$0xff] }
 0x564   : > { %4150 = vst [vmem:[#allocation2 + $0x2d4] sm:$0xf] %v4118_v61  ;;  %v9923_v61 = vld [vmem:[%s13189_s5 + $0x118] sm:$0xff]  ;;  %v4030_v6 = vpack.c.bf16 %v3998_v0, %v3998_v0  ;;  %v4358_v0 = vld [vmem:[#allocation3 + $0x49] sm:$0xff] }
 0x565   : > { %4151 = vst [vmem:[#allocation2 + $0x2f8] sm:$0xf] %v4119_v24  ;;  %v3999_v24 = vld [vmem:[#allocation3 + $0x158] sm:$0xff]  ;;  %6671 = vmatpush.bf16.msrb.mxu3 %v9923_v61  ;;  %v9816_v61 = vld [vmem:[#allocation2 + $0x244] sm:$0xf] }
 0x566   : > { %4246 = vst [vmem:[#allocation2 + $0x2d8] sm:$0xf] %v4214_v37  ;;  %v4094_v37 = vld [vmem:[#allocation3 + $0x151] sm:$0xff]  ;;  %v4031_v52 = vpack.c.bf16 %v3999_v24, %v3999_v24  ;;  %v8951_v24 = vld [vmem:[#allocation2 + $0x264] sm:$0xf0] }
 0x567   : > { %6344 = vmatmul.bf16.gmra.mxu3 %v8842_v58  ;;  %4247 = vst [vmem:[#allocation2 + $0x2fc] sm:$0xf] %v4215_v3  ;;  %v4190_v58 = vld [vmem:[#allocation3 + $0x152] sm:$0xff]  ;;  %v4126_v44 = vpack.c.bf16 %v4094_v37, %v4094_v37 }
 0x568   : > { %4340 = vst [vmem:[#allocation2 + $0x294] sm:$0xf] %v4022_v34  ;;  %v4125_v34 = vpack.c.bf16 %v4093_v48, %v4093_v48  ;;  %v4388_v48 = vpack.c.bf16 %v4356_v30, %v4356_v30  ;;  %v4363_v30 = vld [vmem:[#allocation3 + $0x81] sm:$0xff] }
 0x569   : > { %6433 = vmatmul.bf16.gmra.mxu1 %v8846_v8  ;;  %4341 = vst [vmem:[#allocation2 + $0x2b8] sm:$0xf] %v4023_v63  ;;  %v12208_v63 = vld [vmem:[%s13190_s6] ss:$0 sm:$0xff]  ;;  %v4127_v8 = vpack.c.bf16 %v4095_v11, %v4095_v11  ;;  %v9821_v11 = vld [vmem:[#allocation2 + $0x268] sm:$0xf0] }
 0x56a   : > { %4056 = vst [vmem:[#allocation2 + $0x318] sm:$0xf] %v4024_v57 }
 0x56b   : > { %6522 = vmatmul.bf16.gmra.mxu2 %v8850_v32  ;;  %4057 = vst [vmem:[#allocation2 + $0x33c] sm:$0xf] %v4025_v27  ;;  %v4223_v32 = vpack.c.bf16 %v4191_v60, %v4191_v60  ;;  %v4551_v60 = vld [vmem:[#allocation3 + $0x60] sm:$0xff] }
 0x56c   : > { %4152 = vst [vmem:[#allocation2 + $0x31c] sm:$0xf] %v4120_v31  ;;  %v4222_v31 = vpack.c.bf16 %v4190_v58, %v4190_v58  ;;  %v4455_v58 = vld [vmem:[#allocation3 + $0x52] sm:$0xff] }
 0x56d   : > { %4153 = vst [vmem:[#allocation2 + $0x340] sm:$0xf] %v4121_v16  ;;  %v4000_v16 = vld [vmem:[#allocation3 + $0x168] sm:$0xff] }
 0x56e   : > { %4248 = vst [vmem:[#allocation2 + $0x320] sm:$0xf] %v4216_v17  ;;  %v8915_v17 = vld [vmem:[#allocation2 + $0x21c] sm:$0xf0]  ;;  %v4032_v21 = vpack.c.bf16 %v4000_v16, %v4000_v16 }
 0x56f   : > { %4249 = vst [vmem:[#allocation2 + $0x344] sm:$0xf] %v4217_v9  ;;  %v4001_v9 = vld [vmem:[#allocation3 + $0x170] sm:$0xff]  ;;  %v8918_v15 = vor.u32 %v9807_v4, %v8915_v17  ;;  %v4583_v4 = vpack.c.bf16 %v4551_v60, %v4551_v60  ;;  %v4360_v17 = vld [vmem:[#allocation3 + $0x61] sm:$0xff] }
 0x570   : > { %4342 = vst [vmem:[#allocation2 + $0x2dc] sm:$0xf] %v4024_v57  ;;  %v8890_v57 = vor.u32 %v9799_v19, %v8887_v33  ;;  %v4581_v19 = vpack.c.bf16 %v4549_v12, %v4549_v12  ;;  %v8957_v33 = vld [vmem:[#allocation2 + $0x248] sm:$0xf]  ;;  %v4395_v12 = vpack.c.bf16 %v4363_v30, %v4363_v30  ;;  %v4461_v60 = vld [vmem:[#allocation3 + $0x9a] sm:$0xff] }
 0x571   : > { %4343 = vst [vmem:[#allocation2 + $0x300] sm:$0xf] %v4025_v27  ;;  %v8913_v27 = vld [vmem:[#allocation2 + $0x1f8] sm:$0xf] }
 0x572   : > { %4058 = vst [vmem:[#allocation2 + $0x360] sm:$0xf] %v4026_v56  ;;  %v8914_v38 = vor.u32 %v9811_v51, %v8913_v27  ;;  %v8958_v27 = vor.u32 %v9821_v11, %v8957_v33  ;;  %v4365_v33 = vld [vmem:[#allocation3 + $0x99] sm:$0xff] }
 0x573   : > { %6611 = vmatmul.bf16.gmra.mxu0 %v8854_v29  ;;  %4059 = vst [vmem:[#allocation2 + $0x384] sm:$0xf] %v4027_v55  ;;  %v8922_v29 = vor.u32 %v9812_v22, %v8921_v23  ;;  %v9817_v23 = vld [vmem:[#allocation2 + $0x24c] sm:$0xf]  ;;  %v8959_v22 = vld [vmem:[#allocation2 + $0x26c] sm:$0xf0] }
 0x574   : > { %4154 = vst [vmem:[#allocation2 + $0x364] sm:$0xf] %v4122_v13  ;;  %v4128_v13 = vpack.c.bf16 %v4096_v36, %v4096_v36  ;;  %v4456_v36 = vld [vmem:[#allocation3 + $0x62] sm:$0xff]  ;;  %v8962_v28 = vor.u32 %v9817_v23, %v8959_v22  ;;  %v4460_v11 = vld [vmem:[#allocation3 + $0x92] sm:$0xff] }
 0x575   : > { %4155 = vst [vmem:[#allocation2 + $0x388] sm:$0xf] %v4123_v53  ;;  %v9021_v23 = vld [vmem:[#allocation2 + $0x2d0] sm:$0xf] }
 0x576   : > { %4250 = vst [vmem:[#allocation2 + $0x368] sm:$0xf] %v4218_v35  ;;  %v4224_v35 = vpack.c.bf16 %v4192_v10, %v4192_v10  ;;  %v4488_v10 = vpack.c.bf16 %v4456_v36, %v4456_v36  ;;  %v9838_v36 = vld [vmem:[#allocation2 + $0x2f0] sm:$0xf0] }
 0x577   : > { %6349 = vmatmul.bf16.gmra.mxu3 %v8878_v62  ;;  %4251 = vst [vmem:[#allocation2 + $0x38c] sm:$0xf] %v4219_v14  ;;  %v4288_v14 = vld [vmem:[#allocation3 + $0x180] sm:$0xff]  ;;  %v8923_v62 = vld [vmem:[#allocation2 + $0x224] sm:$0xf0] }
 0x578   : > { %4344 = vst [vmem:[#allocation2 + $0x324] sm:$0xf] %v4026_v56  ;;  %v4097_v56 = vld [vmem:[#allocation3 + $0x171] sm:$0xff]  ;;  %v4320_v5 = vpack.c.bf16 %v4288_v14, %v4288_v14  ;;  %v8926_v18 = vor.u32 %v9808_v40, %v8923_v62 }
 0x579   : > { %6438 = vmatmul.bf16.gmra.mxu1 %v8882_v59  ;;  %4345 = vst [vmem:[#allocation2 + $0x348] sm:$0xf] %v4027_v55  ;;  %v4033_v55 = vpack.c.bf16 %v4001_v9, %v4001_v9  ;;  %v4129_v54 = vpack.c.bf16 %v4097_v56, %v4097_v56  ;;  %v4453_v59 = vld [vmem:[#allocation3 + $0x3a] sm:$0xff]  ;;  %v4457_v56 = vld [vmem:[#allocation3 + $0x6a] sm:$0xff] }
 0x57a   : > { %4060 = vst [vmem:[#allocation2 + $0x3a8] sm:$0xf] %v4028_v20  ;;  %v8987_v40 = vld [vmem:[#allocation2 + $0x2ac] sm:$0xf0] }
 0x57b   : > { %6527 = vmatmul.bf16.gmra.mxu2 %v8886_v2  ;;  %4061 = vst [vmem:[#allocation2 + $0x3cc] sm:$0xf] %v4029_v43  ;;  %v9820_v2 = vld [vmem:[#allocation2 + $0x260] sm:$0xf0] }
 0x57c   : > { %4156 = vst [vmem:[#allocation2 + $0x3ac] sm:$0xf] %v4124_v47  ;;  %v4389_v47 = vpack.c.bf16 %v4357_v39, %v4357_v39  ;;  %v8993_v39 = vld [vmem:[#allocation2 + $0x290] sm:$0xf] }
 0x57d   : > { %v6320_v1 = vpop.f32.mrf.mxu3  ;;  %4157 = vst [vmem:[#allocation2 + $0x3d0] sm:$0xf] %v4125_v34 }
 0x57e   : > { %v6321_v3 = vadd.f32 %v12208_v63, %v6320_v1  ;;  %4252 = vst [vmem:[#allocation2 + $0x3b0] sm:$0xf] %v4220_v46  ;;  %v4550_v46 = vld [vmem:[#allocation3 + $0x50] sm:$0xff] }
 0x57f   : > { %4253 = vst [vmem:[#allocation2 + $0x3d4] sm:$0xf] %v4221_v26  ;;  %v6409_v49 = vpop.f32.mrf.mxu1  ;;  %v4485_v26 = vpack.c.bf16 %v4453_v59, %v4453_v59  ;;  %v4359_v1 = vld [vmem:[#allocation3 + $0x51] sm:$0xff] }
 0x580   : > { %4346 = vst [vmem:[#allocation2 + $0x36c] sm:$0xf] %v4028_v20  ;;  %v6410_v42 = vadd.f32 %v6409_v49, %v6321_v3  ;;  %v4452_v20 = vld [vmem:[#allocation3 + $0x32] sm:$0xff]  ;;  %v4582_v3 = vpack.c.bf16 %v4550_v46, %v4550_v46  ;;  %v8954_v49 = vor.u32 %v9816_v61, %v8951_v24 }
 0x581   : > { %4347 = vst [vmem:[#allocation2 + $0x390] sm:$0xf] %v4029_v43  ;;  %v8949_v43 = vld [vmem:[#allocation2 + $0x240] sm:$0xf]  ;;  %v4484_v34 = vpack.c.bf16 %v4452_v20, %v4452_v20  ;;  %v4556_v46 = vld [vmem:[#allocation3 + $0x98] sm:$0xff] }
 0x582   : > { %4062 = vst [vmem:[#allocation2 + $0x3f0] sm:$0xf] %v4030_v6  ;;  %v8950_v37 = vor.u32 %v9820_v2, %v8949_v43  ;;  %v4394_v43 = vpack.c.bf16 %v4362_v41, %v4362_v41  ;;  %v4555_v2 = vld [vmem:[#allocation3 + $0x90] sm:$0xff] }
 0x583   : > { %6616 = vmatmul.bf16.gmra.mxu0 %v8890_v57  ;;  %4063 = vst [vmem:[#allocation2 + $0x414] sm:$0xf] %v4031_v52  ;;  %v4587_v24 = vpack.c.bf16 %v4555_v2, %v4555_v2 }
 0x584   : > { %4158 = vst [vmem:[#allocation2 + $0x3f4] sm:$0xf] %v4126_v44  ;;  %v4391_v44 = vpack.c.bf16 %v4359_v1, %v4359_v1  ;;  %v4588_v1 = vpack.c.bf16 %v4556_v46, %v4556_v46 }
 0x585   : > { %4159 = vst [vmem:[#allocation2 + $0x418] sm:$0xf] %v4127_v8  ;;  %v4552_v8 = vld [vmem:[#allocation3 + $0x68] sm:$0xff] }
 0x586   : > { %4254 = vst [vmem:[#allocation2 + $0x3f8] sm:$0xf] %v4222_v31  ;;  %v4487_v31 = vpack.c.bf16 %v4455_v58, %v4455_v58  ;;  %v4584_v16 = vpack.c.bf16 %v4552_v8, %v4552_v8  ;;  %v4557_v8 = vld [vmem:[#allocation3 + $0xa8] sm:$0xff] }
 0x587   : > { %6354 = vmatmul.bf16.gmra.mxu3 %v8914_v38  ;;  %4255 = vst [vmem:[#allocation2 + $0x41c] sm:$0xf] %v4223_v32  ;;  %v9922_v32 = vld [vmem:[%s13189_s5 + $0x110] sm:$0xff]  ;;  %v12219_v9 = vpop.f32.mrf.mxu1  ;;  %v4589_v22 = vpack.c.bf16 %v4557_v8, %v4557_v8 }
 0x588   : > { %4348 = vst [vmem:[#allocation2 + $0x3b4] sm:$0xf] %v4030_v6  ;;  %v6498_v53 = vpop.f32.mrf.mxu2  ;;  %v4454_v6 = vld [vmem:[#allocation3 + $0x4a] sm:$0xff]  ;;  %6672 = vmatpush.bf16.msrb.mxu3 %v9922_v32 }
 0x589   : > { %6443 = vmatmul.bf16.gmra.mxu1 %v8918_v15  ;;  %4349 = vst [vmem:[#allocation2 + $0x3d8] sm:$0xf] %v4031_v52  ;;  %v6499_v7 = vadd.f32 %v6498_v53, %v6410_v42  ;;  %v4390_v52 = vpack.c.bf16 %v4358_v0, %v4358_v0  ;;  %v4486_v42 = vpack.c.bf16 %v4454_v6, %v4454_v6  ;;  %v4361_v38 = vld [vmem:[#allocation3 + $0x69] sm:$0xff]  ;;  %v12221_v53 = vpop.f32.mrf.mxu3  ;;  %v9826_v6 = vld [vmem:[#allocation2 + $0x294] sm:$0xf] }
 0x58a   : > { %4064 = vst [vmem:[#allocation2 + $0x438] sm:$0xf] %v4032_v21  ;;  %v4393_v15 = vpack.c.bf16 %v4361_v38, %v4361_v38 }
 0x58b   : > { %6532 = vmatmul.bf16.gmra.mxu2 %v8922_v29  ;;  %4065 = vst [vmem:[#allocation2 + $0x45c] sm:$0xf] %v4033_v55  ;;  %v4489_v29 = vpack.c.bf16 %v4457_v56, %v4457_v56  ;;  %v9834_v56 = vld [vmem:[#allocation2 + $0x2d4] sm:$0xf] }
 0x58c   : > { %4160 = vst [vmem:[#allocation2 + $0x43c] sm:$0xf] %v4128_v13  ;;  %v4554_v13 = vld [vmem:[#allocation3 + $0x80] sm:$0xff] }
 0x58d   : > { %4161 = vst [vmem:[#allocation2 + $0x460] sm:$0xf] %v4129_v54  ;;  %v8985_v54 = vld [vmem:[#allocation2 + $0x288] sm:$0xf]  ;;  %v4586_v14 = vpack.c.bf16 %v4554_v13, %v4554_v13  ;;  %v4367_v13 = vld [vmem:[#allocation3 + $0xb1] sm:$0xff] }
 0x58e   : > { %4256 = vst [vmem:[#allocation2 + $0x440] sm:$0xf] %v4224_v35 }
 0x58f   : > { %4257 = vst [vmem:[#allocation2 + $0x464] sm:$0xf] %v4225_v45  ;;  %v9825_v45 = vld [vmem:[#allocation2 + $0x28c] sm:$0xf] }
 0x590   : > { %4350 = vst [vmem:[#allocation2 + $0x3fc] sm:$0xf] %v4032_v21  ;;  %v4392_v21 = vpack.c.bf16 %v4360_v17, %v4360_v17  ;;  %v12223_v62 = vpop.f32.mrf.mxu2  ;;  %v4493_v17 = vpack.c.bf16 %v4461_v60, %v4461_v60 }
 0x591   : > { %4351 = vst [vmem:[#allocation2 + $0x420] sm:$0xf] %v4033_v55  ;;  %v4553_v55 = vld [vmem:[#allocation3 + $0x78] sm:$0xff] }
 0x592   : > { %4352 = vst [vmem:[#allocation2 + $0x444] sm:$0xf] %v4320_v5  ;;  %v4585_v35 = vpack.c.bf16 %v4553_v55, %v4553_v55  ;;  %v4366_v55 = vld [vmem:[#allocation3 + $0xa9] sm:$0xff] }
 0x593   : > { %6621 = vmatmul.bf16.gmra.mxu0 %v8926_v18  ;;  %4353 = vst [vmem:[#allocation2 + $0x468] sm:$0xf] %v4321_v25  ;;  %v4458_v25 = vld [vmem:[#allocation3 + $0x7a] sm:$0xff]  ;;  %v4459_v18 = vld [vmem:[#allocation3 + $0x82] sm:$0xff]  ;;  %v4398_v41 = vpack.c.bf16 %v4366_v55, %v4366_v55 }
 0x594   : > { %4420 = vst [vmem:[#allocation2 + $0x58] sm:$0xf] %v4388_v48  ;;  %v9830_v48 = vld [vmem:[#allocation2 + $0x2b0] sm:$0xf0] }
 0x595   : > { %4421 = vst [vmem:[#allocation2 + $0x7c] sm:$0xf] %v4389_v47  ;;  %v8990_v47 = vor.u32 %v9825_v45, %v8987_v40  ;;  %v8994_v61 = vor.u32 %v9830_v48, %v8993_v39  ;;  %v4463_v40 = vld [vmem:[#allocation3 + $0xb2] sm:$0xff]  ;;  %v4399_v39 = vpack.c.bf16 %v4367_v13, %v4367_v13  ;;  %v9065_v13 = vld [vmem:[#allocation2 + $0x320] sm:$0xf] }
 0x596   : > { %4516 = vst [vmem:[#allocation2 + $0x5c] sm:$0xf] %v4484_v34  ;;  %v4490_v34 = vpack.c.bf16 %v4458_v25, %v4458_v25  ;;  %v4559_v25 = vld [vmem:[#allocation3 + $0xc0] sm:$0xff] }
 0x597   : > { %6359 = vmatmul.bf16.gmra.mxu3 %v8950_v37  ;;  %4517 = vst [vmem:[#allocation2 + $0x80] sm:$0xf] %v4485_v26  ;;  %v4491_v26 = vpack.c.bf16 %v4459_v18, %v4459_v18  ;;  %v4364_v37 = vld [vmem:[#allocation3 + $0x91] sm:$0xff] }
 0x598   : > { %v6587_v57 = vpop.f32.mrf.mxu0  ;;  %4613 = vst [vmem:[#allocation2 + $0x60] sm:$0xf] %v4581_v19 }
 0x599   : > { %6448 = vmatmul.bf16.gmra.mxu1 %v8954_v49  ;;  %v12214_v51 = vadd.f32 %v6587_v57, %v6499_v7  ;;  %4614 = vst [vmem:[#allocation2 + $0x84] sm:$0xf] %v4582_v3  ;;  %v9829_v7 = vld [vmem:[#allocation2 + $0x2a8] sm:$0xf0]  ;;  %v8995_v49 = vld [vmem:[#allocation2 + $0x2b4] sm:$0xf0] }
 0x59a   : > { %4422 = vst [vmem:[#allocation2 + $0xa0] sm:$0xf] %v4390_v52  ;;  %v8986_v5 = vor.u32 %v9829_v7, %v8985_v54  ;;  %v9029_v54 = vld [vmem:[#allocation2 + $0x2d8] sm:$0xf]  ;;  %v4462_v7 = vld [vmem:[#allocation3 + $0xaa] sm:$0xff] }
 0x59b   : > { %6537 = vmatmul.bf16.gmra.mxu2 %v8958_v27  ;;  %4423 = vst [vmem:[#allocation2 + $0xc4] sm:$0xf] %v4391_v44  ;;  %v4494_v48 = vpack.c.bf16 %v4462_v7, %v4462_v7  ;;  %v9848_v7 = vld [vmem:[#allocation2 + $0x340] sm:$0xf0] }
 0x59c   : > { %4518 = vst [vmem:[#allocation2 + $0xa4] sm:$0xf] %v4486_v42  ;;  %v4397_v42 = vpack.c.bf16 %v4365_v33, %v4365_v33 }
 0x59d   : > { %4519 = vst [vmem:[#allocation2 + $0xc8] sm:$0xf] %v4487_v31  ;;  %v4492_v31 = vpack.c.bf16 %v4460_v11, %v4460_v11 }
 0x59e   : > { %4615 = vst [vmem:[#allocation2 + $0xa8] sm:$0xf] %v4583_v4  ;;  %v4558_v4 = vld [vmem:[#allocation3 + $0xb0] sm:$0xff] }
 0x59f   : > { %4616 = vst [vmem:[#allocation2 + $0xcc] sm:$0xf] %v4584_v16  ;;  %v8998_v16 = vor.u32 %v9826_v6, %v8995_v49  ;;  %v9031_v6 = vld [vmem:[#allocation2 + $0x2fc] sm:$0xf0] }
 0x5a0   : > { %4709 = vst [vmem:[#allocation2 + $0x64] sm:$0xf] %v4390_v52  ;;  %v12225_v59 = vpop.f32.mrf.mxu0 }
 0x5a1   : > { %4710 = vst [vmem:[#allocation2 + $0x88] sm:$0xf] %v4391_v44  ;;  %v4396_v44 = vpack.c.bf16 %v4364_v37, %v4364_v37  ;;  %v4464_v37 = vld [vmem:[#allocation3 + $0xc2] sm:$0xff] }
 0x5a2   : > { %4424 = vst [vmem:[#allocation2 + $0xe8] sm:$0xf] %v4392_v21 }
 0x5a3   : > { %6626 = vmatmul.bf16.gmra.mxu0 %v8962_v28  ;;  %4425 = vst [vmem:[#allocation2 + $0x10c] sm:$0xf] %v4393_v15 }
 0x5a4   : > { %4520 = vst [vmem:[#allocation2 + $0xec] sm:$0xf] %v4488_v10  ;;  %v9023_v10 = vld [vmem:[#allocation2 + $0x2f4] sm:$0xf0] }
 0x5a5   : > { %4521 = vst [vmem:[#allocation2 + $0x110] sm:$0xf] %v4489_v29  ;;  %v9022_v29 = vor.u32 %v9838_v36, %v9021_v23  ;;  %v9843_v36 = vld [vmem:[#allocation2 + $0x31c] sm:$0xf] }
 0x5a6   : > { %v6414_v20 = vpop.f32.mrf.mxu1  ;;  %4617 = vst [vmem:[#allocation2 + $0xf0] sm:$0xf] %v4585_v35 }
 0x5a7   : > { %6364 = vmatmul.bf16.gmra.mxu3 %v8986_v5  ;;  %4618 = vst [vmem:[#allocation2 + $0x114] sm:$0xf] %v4586_v14  ;;  %v9839_v14 = vld [vmem:[#allocation2 + $0x2f8] sm:$0xf0]  ;;  %v9026_v5 = vor.u32 %v9834_v56, %v9023_v10  ;;  %v9059_v56 = vld [vmem:[#allocation2 + $0x33c] sm:$0xf0] }
 0x5a8   : > { %4711 = vst [vmem:[#allocation2 + $0xac] sm:$0xf] %v4392_v21  ;;  %v9030_v18 = vor.u32 %v9839_v14, %v9029_v54 }
 0x5a9   : > { %6453 = vmatmul.bf16.gmra.mxu1 %v8990_v47  ;;  %4712 = vst [vmem:[#allocation2 + $0xd0] sm:$0xf] %v4393_v15  ;;  %v4590_v15 = vpack.c.bf16 %v4558_v4, %v4558_v4 }
 0x5aa   : > { %v6325_v0 = vpop.f32.mrf.mxu3  ;;  %4426 = vst [vmem:[#allocation2 + $0x130] sm:$0xf] %v4394_v43 }
 0x5ab   : > { %6542 = vmatmul.bf16.gmra.mxu2 %v8994_v61  ;;  %v6326_v19 = vadd.f32 %v12208_v63, %v6325_v0  ;;  %4427 = vst [vmem:[#allocation2 + $0x154] sm:$0xf] %v4395_v12  ;;  %v9921_v61 = vld [vmem:[%s13189_s5 + $0x108] sm:$0xff] }
 0x5ac   : > { %4522 = vst [vmem:[#allocation2 + $0x134] sm:$0xf] %v4490_v34  ;;  %v4591_v34 = vpack.c.bf16 %v4559_v25, %v4559_v25  ;;  %v4368_v0 = vld [vmem:[#allocation3 + $0xc1] sm:$0xff]  ;;  %6673 = vmatpush.bf16.msrb.mxu3 %v9921_v61  ;;  %v4564_v25 = vld [vmem:[#allocation3 + $0xf8] sm:$0xff] }
 0x5ad   : > { %v6415_v3 = vadd.f32 %v6414_v20, %v6326_v19  ;;  %4523 = vst [vmem:[#allocation2 + $0x158] sm:$0xf] %v4491_v26  ;;  %v4400_v11 = vpack.c.bf16 %v4368_v0, %v4368_v0  ;;  %v4373_v61 = vld [vmem:[#allocation3 + $0xf9] sm:$0xff]  ;;  %v9844_v0 = vld [vmem:[#allocation2 + $0x324] sm:$0xf] }
 0x5ae   : > { %v6503_v52 = vpop.f32.mrf.mxu2  ;;  %v6416_v58 = vpop.f32.mrf.mxu1  ;;  %4619 = vst [vmem:[#allocation2 + $0x138] sm:$0xf] %v4587_v24  ;;  %v4369_v24 = vld [vmem:[#allocation3 + $0xc9] sm:$0xff] }
 0x5af   : > { %v6504_v57 = vadd.f32 %v6503_v52, %v6415_v3  ;;  %4620 = vst [vmem:[#allocation2 + $0x15c] sm:$0xf] %v4588_v1  ;;  %v9835_v1 = vld [vmem:[#allocation2 + $0x2dc] sm:$0xf]  ;;  %v4465_v52 = vld [vmem:[#allocation3 + $0xca] sm:$0xff]  ;;  %v4401_v49 = vpack.c.bf16 %v4369_v24, %v4369_v24  ;;  %v4468_v24 = vld [vmem:[#allocation3 + $0xf2] sm:$0xff] }
 0x5b0   : > { %v6592_v27 = vpop.f32.mrf.mxu0  ;;  %4713 = vst [vmem:[#allocation2 + $0xf4] sm:$0xf] %v4394_v43  ;;  %v4560_v43 = vld [vmem:[#allocation3 + $0xc8] sm:$0xff] }
 0x5b1   : > { %v12228_v32 = vadd.f32 %v6592_v27, %v6504_v57  ;;  %4714 = vst [vmem:[#allocation2 + $0x118] sm:$0xf] %v4395_v12  ;;  %v4495_v12 = vpack.c.bf16 %v4463_v40, %v4463_v40  ;;  %v4592_v26 = vpack.c.bf16 %v4560_v43, %v4560_v43  ;;  %v4496_v57 = vpack.c.bf16 %v4464_v37, %v4464_v37  ;;  %v9067_v37 = vld [vmem:[#allocation2 + $0x344] sm:$0xf0] }
 0x5b2   : > { %v6327_v38 = vpop.f32.mrf.mxu3  ;;  %4428 = vst [vmem:[#allocation2 + $0x178] sm:$0xf] %v4396_v44  ;;  %v9034_v27 = vor.u32 %v9835_v1, %v9031_v6 }
 0x5b3   : > { %v6328_v21 = vadd.f32 %v12208_v63, %v6327_v38  ;;  %6631 = vmatmul.bf16.gmra.mxu0 %v8998_v16  ;;  %4429 = vst [vmem:[#allocation2 + $0x19c] sm:$0xf] %v4397_v42  ;;  %v9057_v16 = vld [vmem:[#allocation2 + $0x318] sm:$0xf] }
 0x5b4   : > { %4524 = vst [vmem:[#allocation2 + $0x17c] sm:$0xf] %v4492_v31  ;;  %v4497_v31 = vpack.c.bf16 %v4465_v52, %v4465_v52  ;;  %v4565_v52 = vld [vmem:[#allocation3 + $0x108] sm:$0xff] }
 0x5b5   : > { %v6417_v28 = vadd.f32 %v6416_v58, %v6328_v21  ;;  %4525 = vst [vmem:[#allocation2 + $0x1a0] sm:$0xf] %v4493_v17  ;;  %v9847_v17 = vld [vmem:[#allocation2 + $0x338] sm:$0xf0] }
 0x5b6   : > { %v6505_v35 = vpop.f32.mrf.mxu2  ;;  %v6419_v45 = vpop.f32.mrf.mxu1  ;;  %4621 = vst [vmem:[#allocation2 + $0x180] sm:$0xf] %v4589_v22  ;;  %v4370_v21 = vld [vmem:[#allocation3 + $0xd9] sm:$0xff]  ;;  %v9058_v10 = vor.u32 %v9847_v17, %v9057_v16  ;;  %v4597_v16 = vpack.c.bf16 %v4565_v52, %v4565_v52  ;;  %v9942_v52 = vld [vmem:[%s13189_s5 + $0x1b0] sm:$0xff] }
 0x5b7   : > { %v6506_v30 = vadd.f32 %v6505_v35, %v6417_v28  ;;  %6369 = vmatmul.bf16.gmra.mxu3 %v9022_v29  ;;  %4622 = vst [vmem:[#allocation2 + $0x1a4] sm:$0xf] %v4590_v15  ;;  %v4371_v15 = vld [vmem:[#allocation3 + $0xe1] sm:$0xff]  ;;  %v4402_v35 = vpack.c.bf16 %v4370_v21, %v4370_v21  ;;  %v4375_v21 = vld [vmem:[#allocation3 + $0x111] sm:$0xff] }
 0x5b8   : > { %v6594_v20 = vpop.f32.mrf.mxu0  ;;  %4715 = vst [vmem:[#allocation2 + $0x13c] sm:$0xf] %v4396_v44  ;;  %v4561_v44 = vld [vmem:[#allocation3 + $0xd8] sm:$0xff]  ;;  %v4403_v40 = vpack.c.bf16 %v4371_v15, %v4371_v15 }
 0x5b9   : > { %6458 = vmatmul.bf16.gmra.mxu1 %v9026_v5  ;;  %v12231_v47 = vadd.f32 %v6594_v20, %v6506_v30  ;;  %4716 = vst [vmem:[#allocation2 + $0x160] sm:$0xf] %v4397_v42  ;;  %v4562_v42 = vld [vmem:[#allocation3 + $0xe0] sm:$0xff]  ;;  %v4593_v38 = vpack.c.bf16 %v4561_v44, %v4561_v44  ;;  %v4563_v30 = vld [vmem:[#allocation3 + $0xf0] sm:$0xff]  ;;  %v9066_v20 = vor.u32 %v9848_v7, %v9065_v13 }
 0x5ba   : > { %v6330_v2 = vpop.f32.mrf.mxu3  ;;  %4430 = vst [vmem:[#allocation2 + $0x1c0] sm:$0xf] %v4398_v41  ;;  %v4594_v22 = vpack.c.bf16 %v4562_v42, %v4562_v42  ;;  %v4466_v28 = vld [vmem:[#allocation3 + $0xda] sm:$0xff]  ;;  %v4566_v44 = vld [vmem:[#allocation3 + $0x110] sm:$0xff] }
 0x5bb   : > { %6547 = vmatmul.bf16.gmra.mxu2 %v9030_v18  ;;  %v6331_v46 = vadd.f32 %v12208_v63, %v6330_v2  ;;  %4431 = vst [vmem:[#allocation2 + $0x1e4] sm:$0xf] %v4399_v39  ;;  %v4471_v7 = vld [vmem:[#allocation3 + $0x112] sm:$0xff] }
 0x5bc   : > { %4526 = vst [vmem:[#allocation2 + $0x1c4] sm:$0xf] %v4494_v48 }
 0x5bd   : > { %v6420_v19 = vadd.f32 %v6419_v45, %v6331_v46  ;;  %4527 = vst [vmem:[#allocation2 + $0x1e8] sm:$0xf] %v4495_v12  ;;  %v4467_v45 = vld [vmem:[#allocation3 + $0xe2] sm:$0xff]  ;;  %v4595_v12 = vpack.c.bf16 %v4563_v30, %v4563_v30  ;;  %v4372_v46 = vld [vmem:[#allocation3 + $0xf1] sm:$0xff] }
 0x5be   : > { %v6508_v33 = vpop.f32.mrf.mxu2  ;;  %v6421_v3 = vpop.f32.mrf.mxu1  ;;  %4623 = vst [vmem:[#allocation2 + $0x1c8] sm:$0xf] %v4591_v34  ;;  %v4499_v43 = vpack.c.bf16 %v4467_v45, %v4467_v45  ;;  %v4596_v34 = vpack.c.bf16 %v4564_v25, %v4564_v25 }
 0x5bf   : > { %v6509_v58 = vadd.f32 %v6508_v33, %v6420_v19  ;;  %4624 = vst [vmem:[#allocation2 + $0x1ec] sm:$0xf] %v4592_v26  ;;  %v4404_v33 = vpack.c.bf16 %v4372_v46, %v4372_v46  ;;  %v9943_v46 = vld [vmem:[%s13189_s5 + $0x1b8] sm:$0xff] }
 0x5c0   : > { %v6597_v60 = vpop.f32.mrf.mxu0  ;;  %4717 = vst [vmem:[#allocation2 + $0x184] sm:$0xf] %v4398_v41  ;;  %v9062_v41 = vor.u32 %v9843_v36, %v9059_v56  ;;  %v4374_v36 = vld [vmem:[#allocation3 + $0x109] sm:$0xff]  ;;  %6845 = vmatpush.bf16.msrb.mxu2 %v9943_v46 }
 0x5c1   : > { %v12237_v8 = vadd.f32 %v6597_v60, %v6509_v58  ;;  %4718 = vst [vmem:[#allocation2 + $0x1a8] sm:$0xf] %v4399_v39  ;;  %v4498_v39 = vpack.c.bf16 %v4466_v28, %v4466_v28 }
 0x5c2   : > { %v6332_v4 = vpop.f32.mrf.mxu3  ;;  %4432 = vst [vmem:[#allocation2 + $0x208] sm:$0xf] %v4400_v11 }
 0x5c3   : > { %v6333_v23 = vadd.f32 %v12208_v63, %v6332_v4  ;;  %6636 = vmatmul.bf16.gmra.mxu0 %v9034_v27  ;;  %4433 = vst [vmem:[#allocation2 + $0x22c] sm:$0xf] %v4401_v49  ;;  %v9856_v4 = vld [vmem:[#allocation2 + $0x380] sm:$0xf0] }
 0x5c4   : > { %4528 = vst [vmem:[#allocation2 + $0x20c] sm:$0xf] %v4496_v57  ;;  %v9070_v57 = vor.u32 %v9844_v0, %v9067_v37  ;;  %6846 = vmatpush.bf16.msrb.mxu2 %v9942_v52 }
 0x5c5   : > { %v6422_v55 = vadd.f32 %v6421_v3, %v6333_v23  ;;  %4529 = vst [vmem:[#allocation2 + $0x230] sm:$0xf] %v4497_v31  ;;  %v4469_v3 = vld [vmem:[#allocation3 + $0xfa] sm:$0xff]  ;;  %v4598_v23 = vpack.c.bf16 %v4566_v44, %v4566_v44 }
 0x5c6   : > { %v6510_v29 = vpop.f32.mrf.mxu2  ;;  %v6424_v54 = vpop.f32.mrf.mxu1  ;;  %4625 = vst [vmem:[#allocation2 + $0x210] sm:$0xf] %v4593_v38  ;;  %v4501_v42 = vpack.c.bf16 %v4469_v3, %v4469_v3  ;;  %v9093_v31 = vld [vmem:[#allocation2 + $0x360] sm:$0xf]  ;;  %v9852_v38 = vld [vmem:[#allocation2 + $0x364] sm:$0xf] }
 0x5c7   : > { %v6511_v14 = vadd.f32 %v6510_v29, %v6422_v55  ;;  %6374 = vmatmul.bf16.gmra.mxu3 %v9058_v10  ;;  %4626 = vst [vmem:[#allocation2 + $0x234] sm:$0xf] %v4594_v22  ;;  %v9095_v22 = vld [vmem:[#allocation2 + $0x384] sm:$0xf0]  ;;  %v9094_v15 = vor.u32 %v9856_v4, %v9093_v31  ;;  %v9857_v29 = vld [vmem:[#allocation2 + $0x388] sm:$0xf0] }
 0x5c8   : > { %v6599_v5 = vpop.f32.mrf.mxu0  ;;  %4719 = vst [vmem:[#allocation2 + $0x1cc] sm:$0xf] %v4400_v11  ;;  %v4405_v11 = vpack.c.bf16 %v4373_v61, %v4373_v61  ;;  %v9101_v55 = vld [vmem:[#allocation2 + $0x368] sm:$0xf]  ;;  %v9098_v45 = vor.u32 %v9852_v38, %v9095_v22  ;;  %v4570_v38 = vld [vmem:[#allocation3 + $0x140] sm:$0xff] }
 0x5c9   : > { %6463 = vmatmul.bf16.gmra.mxu1 %v9062_v41  ;;  %v12240_v48 = vadd.f32 %v6599_v5, %v6511_v14  ;;  %4720 = vst [vmem:[#allocation2 + $0x1f0] sm:$0xf] %v4401_v49  ;;  %v4500_v49 = vpack.c.bf16 %v4468_v24, %v4468_v24  ;;  %v4470_v10 = vld [vmem:[#allocation3 + $0x10a] sm:$0xff]  ;;  %v4407_v14 = vpack.c.bf16 %v4375_v21, %v4375_v21  ;;  %v4567_v41 = vld [vmem:[#allocation3 + $0x120] sm:$0xff] }
 0x5ca   : > { %v6335_v18 = vpop.f32.mrf.mxu3  ;;  %4434 = vst [vmem:[#allocation2 + $0x250] sm:$0xf] %v4402_v35  ;;  %v4502_v30 = vpack.c.bf16 %v4470_v10, %v4470_v10  ;;  %v4568_v5 = vld [vmem:[#allocation3 + $0x128] sm:$0xff]  ;;  %v9131_v10 = vld [vmem:[#allocation2 + $0x3cc] sm:$0xf0] }
 0x5cb   : > { %6552 = vmatmul.bf16.gmra.mxu2 %v9066_v20  ;;  %v6336_v2 = vadd.f32 %v12208_v63, %v6335_v18  ;;  %4435 = vst [vmem:[#allocation2 + $0x274] sm:$0xf] %v4403_v40  ;;  %v4503_v20 = vpack.c.bf16 %v4471_v7, %v4471_v7  ;;  %v4599_v18 = vpack.c.bf16 %v4567_v41, %v4567_v41  ;;  %v9853_v24 = vld [vmem:[#allocation2 + $0x36c] sm:$0xf]  ;;  %v4472_v3 = vld [vmem:[#allocation3 + $0x122] sm:$0xff] }
 0x5cc   : > { %4530 = vst [vmem:[#allocation2 + $0x254] sm:$0xf] %v4498_v39  ;;  %v9102_v39 = vor.u32 %v9857_v29, %v9101_v55  ;;  %v4600_v61 = vpack.c.bf16 %v4568_v5, %v4568_v5  ;;  %v9129_v31 = vld [vmem:[#allocation2 + $0x3a8] sm:$0xf]  ;;  %v9137_v7 = vld [vmem:[#allocation2 + $0x3b0] sm:$0xf] }
 0x5cd   : > { %v6425_v26 = vadd.f32 %v6424_v54, %v6336_v2  ;;  %4531 = vst [vmem:[#allocation2 + $0x278] sm:$0xf] %v4499_v43  ;;  %v4406_v54 = vpack.c.bf16 %v4374_v36, %v4374_v36  ;;  %v9920_v2 = vld [vmem:[%s13189_s5 + $0x100] sm:$0xff]  ;;  %v9865_v36 = vld [vmem:[#allocation2 + $0x3c8] sm:$0xf0] }
 0x5ce   : > { %v6513_v19 = vpop.f32.mrf.mxu2  ;;  %v6426_v1 = vpop.f32.mrf.mxu1  ;;  %4627 = vst [vmem:[#allocation2 + $0x258] sm:$0xf] %v4595_v12  ;;  %6674 = vmatpush.bf16.msrb.mxu3 %v9920_v2  ;;  %v9941_v22 = vld [vmem:[%s13189_s5 + $0x1a8] sm:$0xff] }
 0x5cf   : > { %v6514_v6 = vadd.f32 %v6513_v19, %v6425_v26  ;;  %4628 = vst [vmem:[#allocation2 + $0x27c] sm:$0xf] %v4596_v34  ;;  %v9935_v34 = vld [vmem:[%s13189_s5 + $0x178] sm:$0xff]  ;;  %v4376_v26 = vld [vmem:[#allocation3 + $0x121] sm:$0xff]  ;;  %v4377_v19 = vld [vmem:[#allocation3 + $0x129] sm:$0xff]  ;;  %6847 = vmatpush.bf16.msrb.mxu2 %v9941_v22 }
 0x5d0   : > { %v6602_v58 = vpop.f32.mrf.mxu0  ;;  %4721 = vst [vmem:[#allocation2 + $0x214] sm:$0xf] %v4402_v35  ;;  %6756 = vmatpush.bf16.msrb.mxu1 %v9935_v34  ;;  %v4571_v34 = vld [vmem:[#allocation3 + $0x150] sm:$0xff] }
 0x5d1   : > { %v12243_v60 = vadd.f32 %v6602_v58, %v6514_v6  ;;  %4722 = vst [vmem:[#allocation2 + $0x238] sm:$0xf] %v4403_v40  ;;  %v4408_v58 = vpack.c.bf16 %v4376_v26, %v4376_v26 }
 0x5d2   : > { %v6337_v27 = vpop.f32.mrf.mxu3  ;;  %4436 = vst [vmem:[#allocation2 + $0x298] sm:$0xf] %v4404_v33 }
 0x5d3   : > { %v6338_v17 = vadd.f32 %v12208_v63, %v6337_v27  ;;  %6641 = vmatmul.bf16.gmra.mxu0 %v9070_v57  ;;  %4437 = vst [vmem:[#allocation2 + $0x2bc] sm:$0xf] %v4405_v11  ;;  %v4409_v57 = vpack.c.bf16 %v4377_v19, %v4377_v19 }
 0x5d4   : > { %4532 = vst [vmem:[#allocation2 + $0x29c] sm:$0xf] %v4500_v49  ;;  %v4473_v49 = vld [vmem:[#allocation3 + $0x12a] sm:$0xff] }
 0x5d5   : > { %v6427_v56 = vadd.f32 %v6426_v1, %v6338_v17  ;;  %4533 = vst [vmem:[#allocation2 + $0x2c0] sm:$0xf] %v4501_v42  ;;  %v4569_v42 = vld [vmem:[#allocation3 + $0x138] sm:$0xff]  ;;  %v4504_v17 = vpack.c.bf16 %v4472_v3, %v4472_v3  ;;  %v4505_v21 = vpack.c.bf16 %v4473_v49, %v4473_v49 }
 0x5d6   : > { %v6515_v13 = vpop.f32.mrf.mxu2  ;;  %v6429_v28 = vpop.f32.mrf.mxu1  ;;  %4629 = vst [vmem:[#allocation2 + $0x2a0] sm:$0xf] %v4597_v16  ;;  %v9933_v16 = vld [vmem:[%s13189_s5 + $0x168] sm:$0xff]  ;;  %v4601_v55 = vpack.c.bf16 %v4569_v42, %v4569_v42  ;;  %v9951_v3 = vld [vmem:[%s13189_s5 + $0x1f8] sm:$0xff] }
 0x5d7   : > { %v6516_v35 = vadd.f32 %v6515_v13, %v6427_v56  ;;  %6379 = vmatmul.bf16.gmra.mxu3 %v9094_v15  ;;  %4630 = vst [vmem:[#allocation2 + $0x2c4] sm:$0xf] %v4598_v23  ;;  %v9861_v15 = vld [vmem:[#allocation2 + $0x3ac] sm:$0xf]  ;;  %v4602_v13 = vpack.c.bf16 %v4570_v38, %v4570_v38  ;;  %6934 = vmatpush.bf16.msra.mxu0 %v9951_v3  ;;  %v4381_v42 = vld [vmem:[#allocation3 + $0x159] sm:$0xff]  ;;  %v9950_v38 = vld [vmem:[%s13189_s5 + $0x1f0] sm:$0xff] }
 0x5d8   : > { %v6604_v40 = vpop.f32.mrf.mxu0  ;;  %4723 = vst [vmem:[#allocation2 + $0x25c] sm:$0xf] %v4404_v33  ;;  %v9103_v33 = vld [vmem:[#allocation2 + $0x38c] sm:$0xf0]  ;;  %v9134_v5 = vor.u32 %v9861_v15, %v9131_v10  ;;  %v9874_v15 = vld [vmem:[#allocation2 + $0x410] sm:$0xf0] }
 0x5d9   : > { %6468 = vmatmul.bf16.gmra.mxu1 %v9098_v45  ;;  %v12246_v25 = vadd.f32 %v6604_v40, %v6516_v35  ;;  %4724 = vst [vmem:[#allocation2 + $0x280] sm:$0xf] %v4405_v11  ;;  %v9934_v11 = vld [vmem:[%s13189_s5 + $0x170] sm:$0xff]  ;;  %v9106_v4 = vor.u32 %v9853_v24, %v9103_v33  ;;  %v4379_v35 = vld [vmem:[#allocation3 + $0x141] sm:$0xff]  ;;  %v9939_v33 = vld [vmem:[%s13189_s5 + $0x198] sm:$0xff] }
 0x5da   : > { %v6340_v43 = vpop.f32.mrf.mxu3  ;;  %4438 = vst [vmem:[#allocation2 + $0x2e0] sm:$0xf] %v4406_v54  ;;  %6757 = vmatpush.bf16.msrb.mxu1 %v9934_v11  ;;  %v4474_v40 = vld [vmem:[#allocation3 + $0x13a] sm:$0xff]  ;;  %v4411_v2 = vpack.c.bf16 %v4379_v35, %v4379_v35  ;;  %v9949_v10 = vld [vmem:[%s13189_s5 + $0x1e8] sm:$0xff] }
 0x5db   : > { %6557 = vmatmul.bf16.gmra.mxu2 %v9102_v39  ;;  %v6341_v12 = vadd.f32 %v12208_v63, %v6340_v43  ;;  %4439 = vst [vmem:[#allocation2 + $0x304] sm:$0xf] %v4407_v14  ;;  %v9932_v39 = vld [vmem:[%s13189_s5 + $0x160] sm:$0xff]  ;;  %v12281_v26 = vpack.c.bf16 %v4474_v40, %v4474_v40  ;;  %6935 = vmatpush.bf16.msra.mxu0 %v9950_v38  ;;  %v9959_v38 = vld [vmem:[%s13189_s5 + $0x238] sm:$0xff] }
 0x5dc   : > { %4534 = vst [vmem:[#allocation2 + $0x2e4] sm:$0xf] %v4502_v30  ;;  %v9928_v3 = vld [vmem:[%s13189_s5 + $0x140] sm:$0xff]  ;;  %7023 = vmatpush.bf16.msra.mxu3 %v9959_v38 }
 0x5dd   : > { %v6430_v0 = vadd.f32 %v6429_v28, %v6341_v12  ;;  %4535 = vst [vmem:[#allocation2 + $0x308] sm:$0xf] %v4503_v20  ;;  %v4378_v28 = vld [vmem:[#allocation3 + $0x139] sm:$0xff] }
 0x5de   : > { %v6518_v1 = vpop.f32.mrf.mxu2  ;;  %v6431_v37 = vpop.f32.mrf.mxu1  ;;  %4631 = vst [vmem:[#allocation2 + $0x2e8] sm:$0xf] %v4599_v18  ;;  %6758 = vmatpush.bf16.msrb.mxu1 %v9933_v16  ;;  %v9940_v20 = vld [vmem:[%s13189_s5 + $0x1a0] sm:$0xff]  ;;  %v4410_v43 = vpack.c.bf16 %v4378_v28, %v4378_v28  ;;  %v9930_v16 = vld [vmem:[%s13189_s5 + $0x150] sm:$0xff]  ;;  %v4573_v28 = vld [vmem:[#allocation3 + $0x168] sm:$0xff] }
 0x5df   : > { %v6519_v6 = vadd.f32 %v6518_v1, %v6430_v0  ;;  %4632 = vst [vmem:[#allocation2 + $0x30c] sm:$0xf] %v4600_v61  ;;  %v4475_v18 = vld [vmem:[#allocation3 + $0x142] sm:$0xff]  ;;  %v4572_v0 = vld [vmem:[#allocation3 + $0x158] sm:$0xff]  ;;  %6848 = vmatpush.bf16.msrb.mxu2 %v9940_v20  ;;  %6936 = vmatpush.bf16.msra.mxu0 %v9949_v10 }
 0x5e0   : > { %v6607_v44 = vpop.f32.mrf.mxu0  ;;  %4725 = vst [vmem:[#allocation2 + $0x2a4] sm:$0xf] %v4406_v54  ;;  %v9130_v54 = vor.u32 %v9865_v36, %v9129_v31  ;;  %v12283_v19 = vpack.c.bf16 %v4475_v18, %v4475_v18  ;;  %v4604_v11 = vpack.c.bf16 %v4572_v0, %v4572_v0  ;;  %v4476_v31 = vld [vmem:[#allocation3 + $0x152] sm:$0xff]  ;;  %v4384_v10 = vld [vmem:[#allocation3 + $0x181] sm:$0xff] }
 0x5e1   : > { %v12264_v27 = vadd.f32 %v6607_v44, %v6519_v6  ;;  %4726 = vst [vmem:[#allocation2 + $0x2c8] sm:$0xf] %v4407_v14  ;;  %v9866_v14 = vld [vmem:[#allocation2 + $0x3d0] sm:$0xf0]  ;;  %v4603_v6 = vpack.c.bf16 %v4571_v34, %v4571_v34  ;;  %v9165_v36 = vld [vmem:[#allocation2 + $0x3f0] sm:$0xf]  ;;  %v12317_v35 = vpack.c.bf16 %v4476_v31, %v4476_v31 }
 0x5e2   : > { %v6342_v23 = vpop.f32.mrf.mxu3  ;;  %4440 = vst [vmem:[#allocation2 + $0x328] sm:$0xf] %v4408_v58  ;;  %v9138_v46 = vor.u32 %v9866_v14, %v9137_v7  ;;  %6759 = vmatpush.bf16.msrb.mxu1 %v9932_v39  ;;  %v9937_v7 = vld [vmem:[%s13189_s5 + $0x188] sm:$0xff]  ;;  %v4605_v39 = vpack.c.bf16 %v4573_v28, %v4573_v28  ;;  %v9173_v18 = vld [vmem:[#allocation2 + $0x3f8] sm:$0xf] }
 0x5e3   : > { %v6343_v56 = vadd.f32 %v12208_v63, %v6342_v23  ;;  %6646 = vmatmul.bf16.gmra.mxu0 %v9106_v4  ;;  %4441 = vst [vmem:[#allocation2 + $0x34c] sm:$0xf] %v4409_v57  ;;  %6849 = vmatpush.bf16.msrb.mxu2 %v9939_v33  ;;  %v4382_v34 = vld [vmem:[#allocation3 + $0x169] sm:$0xff] }
 0x5e4   : > { %4536 = vst [vmem:[#allocation2 + $0x32c] sm:$0xf] %v4504_v17  ;;  %v9938_v17 = vld [vmem:[%s13189_s5 + $0x190] sm:$0xff] }
 0x5e5   : > { %v6432_v29 = vadd.f32 %v6431_v37, %v6343_v56  ;;  %4537 = vst [vmem:[#allocation2 + $0x350] sm:$0xf] %v4505_v21  ;;  %v9931_v37 = vld [vmem:[%s13189_s5 + $0x158] sm:$0xff] }
 0x5e6   : > { %v6520_v45 = vpop.f32.mrf.mxu2  ;;  %v6434_v41 = vpop.f32.mrf.mxu1  ;;  %4633 = vst [vmem:[#allocation2 + $0x330] sm:$0xf] %v4601_v55  ;;  %6760 = vmatpush.bf16.msrb.mxu1 %v9931_v37  ;;  %v4477_v21 = vld [vmem:[#allocation3 + $0x15a] sm:$0xff] }
 0x5e7   : > { %v6521_v30 = vadd.f32 %v6520_v45, %v6432_v29  ;;  %6384 = vmatmul.bf16.gmra.mxu3 %v9130_v54  ;;  %4634 = vst [vmem:[#allocation2 + $0x354] sm:$0xf] %v4602_v13  ;;  %v4413_v13 = vpack.c.bf16 %v4381_v42, %v4381_v42  ;;  %6850 = vmatpush.bf16.msrb.mxu2 %v9938_v17  ;;  %v9929_v54 = vld [vmem:[%s13189_s5 + $0x148] sm:$0xff]  ;;  %v4574_v45 = vld [vmem:[#allocation3 + $0x170] sm:$0xff]  ;;  %v4575_v42 = vld [vmem:[#allocation3 + $0x180] sm:$0xff] }
 0x5e8   : > { %v6609_v12 = vpop.f32.mrf.mxu0  ;;  %4727 = vst [vmem:[#allocation2 + $0x2ec] sm:$0xf] %v4408_v58  ;;  %v9862_v58 = vld [vmem:[#allocation2 + $0x3b4] sm:$0xf]  ;;  %v12325_v40 = vpack.c.bf16 %v4477_v21, %v4477_v21  ;;  %v4607_v21 = vpack.c.bf16 %v4575_v42, %v4575_v42 }
 0x5e9   : > { %6473 = vmatmul.bf16.gmra.mxu1 %v9134_v5  ;;  %v12279_v61 = vadd.f32 %v6609_v12, %v6521_v30  ;;  %4728 = vst [vmem:[#allocation2 + $0x310] sm:$0xf] %v4409_v57  ;;  %v9139_v57 = vld [vmem:[#allocation2 + $0x3d4] sm:$0xf0]  ;;  %v9870_v30 = vld [vmem:[#allocation2 + $0x3f4] sm:$0xf]  ;;  %v4606_v12 = vpack.c.bf16 %v4574_v45, %v4574_v45 }
 0x5ea   : > { %v6345_v24 = vpop.f32.mrf.mxu3  ;;  %4442 = vst [vmem:[#allocation2 + $0x370] sm:$0xf] %v4410_v43  ;;  %v9142_v55 = vor.u32 %v9862_v58, %v9139_v57  ;;  %6761 = vmatpush.bf16.msrb.mxu1 %v9930_v16  ;;  %v9167_v5 = vld [vmem:[#allocation2 + $0x414] sm:$0xf0]  ;;  %v4414_v58 = vpack.c.bf16 %v4382_v34, %v4382_v34  ;;  %v4576_v16 = vld [vmem:[#allocation3 + $0x188] sm:$0xff] }
 0x5eb   : > { %6562 = vmatmul.bf16.gmra.mxu2 %v9138_v46  ;;  %v6346_v1 = vadd.f32 %v12208_v63, %v6345_v24  ;;  %4443 = vst [vmem:[#allocation2 + $0x394] sm:$0xf] %v4411_v2  ;;  %v4380_v63 = vld [vmem:[#allocation3 + $0x151] sm:$0xff]  ;;  %v9875_v24 = vld [vmem:[#allocation2 + $0x418] sm:$0xf0]  ;;  %v9170_v33 = vor.u32 %v9870_v30, %v9167_v5  ;;  %v4416_v5 = vpack.c.bf16 %v4384_v10, %v4384_v10  ;;  %v4746_v10 = vld [vmem:[#allocation3 + $0x82] sm:$0xff] }
 0x5ec   : > { %4538 = vst [vmem:[#allocation2 + $0x374] sm:$0xf] %v12281_v26  ;;  %v4412_v22 = vpack.c.bf16 %v4380_v63, %v4380_v63  ;;  %6851 = vmatpush.bf16.msrb.mxu2 %v9937_v7  ;;  %v4479_v63 = vld [vmem:[#allocation3 + $0x172] sm:$0xff]  ;;  %v4385_v7 = vld [vmem:[#allocation3 + $0x189] sm:$0xff] }
 0x5ed   : > { %v6435_v52 = vadd.f32 %v6434_v41, %v6346_v1  ;;  %4539 = vst [vmem:[#allocation2 + $0x398] sm:$0xf] %v12283_v19  ;;  %v12322_v41 = vld [vmem:[%s13190_s6] ss:$0 sm:$0xff]  ;;  %v4478_v1 = vld [vmem:[#allocation3 + $0x16a] sm:$0xff] }
 0x5ee   : > { %v6523_v49 = vpop.f32.mrf.mxu2  ;;  %v6436_v44 = vpop.f32.mrf.mxu1  ;;  %4635 = vst [vmem:[#allocation2 + $0x378] sm:$0xf] %v4603_v6  ;;  %6762 = vmatpush.bf16.msrb.mxu1 %v9929_v54  ;;  %v9936_v6 = vld [vmem:[%s13189_s5 + $0x180] sm:$0xff] }
 0x5ef   : > { %v6524_v4 = vadd.f32 %v6523_v49, %v6435_v52  ;;  %4636 = vst [vmem:[#allocation2 + $0x39c] sm:$0xf] %v4604_v11  ;;  %v9948_v11 = vld [vmem:[%s13189_s5 + $0x1e0] sm:$0xff]  ;;  %v9174_v49 = vor.u32 %v9875_v24, %v9173_v18  ;;  %v9945_v18 = vld [vmem:[%s13189_s5 + $0x1c8] sm:$0xff] }
 0x5f0   : > { %v6612_v23 = vpop.f32.mrf.mxu0  ;;  %4729 = vst [vmem:[#allocation2 + $0x334] sm:$0xf] %v4410_v43  ;;  %v9166_v43 = vor.u32 %v9874_v15, %v9165_v36  ;;  %6937 = vmatpush.bf16.msra.mxu0 %v9948_v11  ;;  %6852 = vmatpush.bf16.msrb.mxu2 %v9936_v6  ;;  %v12349_v36 = vpack.c.bf16 %v4479_v63, %v4479_v63  ;;  %v9871_v15 = vld [vmem:[#allocation2 + $0x3fc] sm:$0xf]  ;;  %v9175_v54 = vld [vmem:[#allocation2 + $0x41c] sm:$0xf0] }
 0x5f1   : > { %v12306_v56 = vadd.f32 %v6612_v23, %v6524_v4  ;;  %4730 = vst [vmem:[#allocation2 + $0x358] sm:$0xf] %v4411_v2  ;;  %v4383_v2 = vld [vmem:[#allocation3 + $0x171] sm:$0xff]  ;;  %v12340_v4 = vpack.c.bf16 %v4478_v1, %v4478_v1  ;;  %v9879_v1 = vld [vmem:[#allocation2 + $0x43c] sm:$0xf] }
 0x5f2   : > { %v6347_v29 = vpop.f32.mrf.mxu3  ;;  %4444 = vst [vmem:[#allocation2 + $0x3b8] sm:$0xf] %v4412_v22  ;;  %v4415_v57 = vpack.c.bf16 %v4383_v2, %v4383_v2  ;;  %6763 = vmatpush.bf16.msrb.mxu1 %v9928_v3  ;;  %v9947_v23 = vld [vmem:[%s13189_s5 + $0x1d8] sm:$0xff]  ;;  %v9203_v3 = vld [vmem:[#allocation2 + $0x45c] sm:$0xf0] }
 0x5f3   : > { %v6348_v14 = vadd.f32 %v12322_v41, %v6347_v29  ;;  %6651 = vmatmul.bf16.gmra.mxu0 %v9142_v55  ;;  %4445 = vst [vmem:[#allocation2 + $0x3dc] sm:$0xf] %v4413_v13  ;;  %v4608_v55 = vpack.c.bf16 %v4576_v16, %v4576_v16  ;;  %v4742_v6 = vld [vmem:[#allocation3 + $0x52] sm:$0xff]  ;;  %v9209_v63 = vld [vmem:[#allocation2 + $0x440] sm:$0xf]  ;;  %v9206_v38 = vor.u32 %v9879_v1, %v9203_v3 }
 0x5f4   : > { %4540 = vst [vmem:[#allocation2 + $0x3bc] sm:$0xf] %v12317_v35  ;;  %6938 = vmatpush.bf16.msra.mxu0 %v9947_v23  ;;  %v9944_v23 = vld [vmem:[%s13189_s5 + $0x1c0] sm:$0xff] }
 0x5f5   : > { %v6437_v20 = vadd.f32 %v6436_v44, %v6348_v14  ;;  %4541 = vst [vmem:[#allocation2 + $0x3e0] sm:$0xf] %v12325_v40  ;;  %v4480_v14 = vld [vmem:[#allocation3 + $0x182] sm:$0xff] }
 0x5f6   : > { %v6525_v46 = vpop.f32.mrf.mxu2  ;;  %v6439_v0 = vpop.f32.mrf.mxu1  ;;  %4637 = vst [vmem:[#allocation2 + $0x3c0] sm:$0xf] %v4605_v39  ;;  %v4481_v39 = vld [vmem:[#allocation3 + $0x18a] sm:$0xff]  ;;  %v12361_v24 = vpack.c.bf16 %v4480_v14, %v4480_v14  ;;  %v4748_v14 = vld [vmem:[#allocation3 + $0x9a] sm:$0xff] }
 0x5f7   : > { %v6526_v37 = vadd.f32 %v6525_v46, %v6437_v20  ;;  %6389 = vmatmul.bf16.gmra.mxu3 %v9166_v43  ;;  %4638 = vst [vmem:[#allocation2 + $0x3e4] sm:$0xf] %v4606_v12  ;;  %v9178_v43 = vor.u32 %v9871_v15, %v9175_v54  ;;  %v4417_v12 = vpack.c.bf16 %v4385_v7, %v4385_v7  ;;  %v9201_v46 = vld [vmem:[#allocation2 + $0x438] sm:$0xf] }
 0x5f8   : > { %v6614_v52 = vpop.f32.mrf.mxu0  ;;  %4731 = vst [vmem:[#allocation2 + $0x37c] sm:$0xf] %v4412_v22  ;;  %v4747_v7 = vld [vmem:[#allocation3 + $0x92] sm:$0xff] }
 0x5f9   : > { %6478 = vmatmul.bf16.gmra.mxu1 %v9170_v33  ;;  %v12338_v44 = vadd.f32 %v6614_v52, %v6526_v37  ;;  %4732 = vst [vmem:[#allocation2 + $0x3a0] sm:$0xf] %v4413_v13  ;;  %v9946_v13 = vld [vmem:[%s13189_s5 + $0x1d0] sm:$0xff]  ;;  %v12364_v37 = vpack.c.bf16 %v4481_v39, %v4481_v39  ;;  %v4778_v39 = vpack.c.bf16 %v4746_v10, %v4746_v10 }
 0x5fa   : > { %v6350_v31 = vpop.f32.mrf.mxu3  ;;  %4446 = vst [vmem:[#allocation2 + $0x400] sm:$0xf] %v4414_v58  ;;  %6939 = vmatpush.bf16.msra.mxu0 %v9946_v13  ;;  %v4741_v33 = vld [vmem:[#allocation3 + $0x4a] sm:$0xff]  ;;  %v9746_v10 = vld [vmem:[#allocation2 + $0x14] sm:$0xf] }
 0x5fb   : > { %6567 = vmatmul.bf16.gmra.mxu2 %v9174_v49  ;;  %v6351_v17 = vadd.f32 %v12322_v41, %v6350_v31  ;;  %4447 = vst [vmem:[#allocation2 + $0x424] sm:$0xf] %v4415_v57  ;;  %v4743_v49 = vld [vmem:[#allocation3 + $0x62] sm:$0xff]  ;;  %v4773_v16 = vpack.c.bf16 %v4741_v33, %v4741_v33 }
 0x5fc   : > { %4542 = vst [vmem:[#allocation2 + $0x404] sm:$0xf] %v12340_v4  ;;  %v9884_v31 = vld [vmem:[#allocation2 + $0x460] sm:$0xf0]  ;;  %v9211_v33 = vld [vmem:[#allocation2 + $0x464] sm:$0xf0] }
 0x5fd   : > { %v6440_v22 = vadd.f32 %v6439_v0, %v6351_v17  ;;  %4543 = vst [vmem:[#allocation2 + $0x428] sm:$0xf] %v12349_v36  ;;  %v9883_v0 = vld [vmem:[#allocation2 + $0x458] sm:$0xf0]  ;;  %v4744_v17 = vld [vmem:[#allocation3 + $0x6a] sm:$0xff] }
 0x5fe   : > { %v6528_v28 = vpop.f32.mrf.mxu2  ;;  %v6441_v29 = vpop.f32.mrf.mxu1  ;;  %4639 = vst [vmem:[#allocation2 + $0x408] sm:$0xf] %v4607_v21  ;;  %v9202_v52 = vor.u32 %v9883_v0, %v9201_v46  ;;  %6940 = vmatpush.bf16.msra.mxu0 %v9945_v18  ;;  %v4774_v21 = vpack.c.bf16 %v4742_v6, %v4742_v6  ;;  %v4776_v54 = vpack.c.bf16 %v4744_v17, %v4744_v17  ;;  %v4750_v18 = vld [vmem:[#allocation3 + $0xb2] sm:$0xff]  ;;  %v9880_v46 = vld [vmem:[#allocation2 + $0x444] sm:$0xf]  ;;  %v4752_v6 = vld [vmem:[#allocation3 + $0xca] sm:$0xff] }
 0x5ff   : > { %v6529_v45 = vadd.f32 %v6528_v28, %v6440_v22  ;;  %4640 = vst [vmem:[#allocation2 + $0x42c] sm:$0xf] %v4608_v55  ;;  %v4745_v22 = vld [vmem:[#allocation3 + $0x7a] sm:$0xff]  ;;  %v4775_v55 = vpack.c.bf16 %v4743_v49, %v4743_v49  ;;  %v9210_v28 = vor.u32 %v9884_v31, %v9209_v63  ;;  %v4780_v0 = vpack.c.bf16 %v4748_v14, %v4748_v14  ;;  %v4754_v31 = vld [vmem:[#allocation3 + $0xe2] sm:$0xff]  ;;  %v8677_v17 = vld [vmem:[#allocation2 + $0x10] sm:$0xf] }
 0x600   : > { %v6617_v30 = vpop.f32.mrf.mxu0  ;;  %4733 = vst [vmem:[#allocation2 + $0x3c4] sm:$0xf] %v4414_v58  ;;  %v4777_v13 = vpack.c.bf16 %v4745_v22, %v4745_v22  ;;  %v4753_v63 = vld [vmem:[#allocation3 + $0xda] sm:$0xff] }
 0x601   : > { %v12356_v20 = vadd.f32 %v6617_v30, %v6529_v45  ;;  %4734 = vst [vmem:[#allocation2 + $0x3e8] sm:$0xf] %v4415_v57  ;;  %v4785_v22 = vpack.c.bf16 %v4753_v63, %v4753_v63 }
 0x602   : > { %v6352_v34 = vpop.f32.mrf.mxu3  ;;  %4448 = vst [vmem:[#allocation2 + $0x448] sm:$0xf] %v4416_v5  ;;  %6941 = vmatpush.bf16.msra.mxu0 %v9944_v23 }
 0x603   : > { %v6353_v2 = vadd.f32 %v12322_v41, %v6352_v34  ;;  %6656 = vmatmul.bf16.gmra.mxu0 %v9178_v43  ;;  %4449 = vst [vmem:[#allocation2 + $0x46c] sm:$0xf] %v4417_v12  ;;  %v4779_v43 = vpack.c.bf16 %v4747_v7, %v4747_v7  ;;  %v8679_v7 = vld [vmem:[#allocation2 + $0x34] sm:$0xf0] }
 0x604   : > { %4544 = vst [vmem:[#allocation2 + $0x44c] sm:$0xf] %v12361_v24 }
 0x605   : > { %v6442_v11 = vadd.f32 %v6441_v29, %v6353_v2  ;;  %4545 = vst [vmem:[#allocation2 + $0x470] sm:$0xf] %v12364_v37 }
 0x606   : > { %v6530_v58 = vpop.f32.mrf.mxu2  ;;  %v6444_v42 = vpop.f32.mrf.mxu1  ;;  %4735 = vst [vmem:[#allocation2 + $0x40c] sm:$0xf] %v4416_v5  ;;  %v4749_v5 = vld [vmem:[#allocation3 + $0xaa] sm:$0xff] }
 0x607   : > { %v6531_v57 = vadd.f32 %v6530_v58, %v6442_v11  ;;  %6394 = vmatmul.bf16.gmra.mxu3 %v9202_v52  ;;  %4736 = vst [vmem:[#allocation2 + $0x430] sm:$0xf] %v4417_v12  ;;  %v4751_v12 = vld [vmem:[#allocation3 + $0xc2] sm:$0xff]  ;;  %v4781_v3 = vpack.c.bf16 %v4749_v5, %v4749_v5  ;;  %v4782_v52 = vpack.c.bf16 %v4750_v18, %v4750_v18 }
 0x608   : > { %v6619_v15 = vpop.f32.mrf.mxu0  ;;  %4805 = vst [vmem:[#allocation2 + $0x68] sm:$0xf] %v4773_v16  ;;  %v4783_v58 = vpack.c.bf16 %v4751_v12, %v4751_v12  ;;  %v4760_v12 = vld [vmem:[#allocation3 + $0x12a] sm:$0xff] }
 0x609   : > { %6483 = vmatmul.bf16.gmra.mxu1 %v9206_v38  ;;  %v12371_v29 = vadd.f32 %v6619_v15, %v6531_v57  ;;  %4806 = vst [vmem:[#allocation2 + $0x8c] sm:$0xf] %v4774_v21  ;;  %v4784_v57 = vpack.c.bf16 %v4752_v6, %v4752_v6  ;;  %v4755_v38 = vld [vmem:[#allocation3 + $0xf2] sm:$0xff]  ;;  %v4756_v15 = vld [vmem:[#allocation3 + $0xfa] sm:$0xff]  ;;  %v4792_v63 = vpack.c.bf16 %v4760_v12, %v4760_v12  ;;  %v8723_v12 = vld [vmem:[#allocation2 + $0x84] sm:$0xf0] }
 0x60a   : > { %v6355_v45 = vpop.f32.mrf.mxu3  ;;  %4807 = vst [vmem:[#allocation2 + $0xb0] sm:$0xf] %v4775_v55  ;;  %v9750_v21 = vld [vmem:[#allocation2 + $0x30] sm:$0xf0]  ;;  %v4788_v5 = vpack.c.bf16 %v4756_v15, %v4756_v15 }
 0x60b   : > { %6572 = vmatmul.bf16.gmra.mxu2 %v9210_v28  ;;  %v6356_v30 = vadd.f32 %v12322_v41, %v6355_v45  ;;  %4808 = vst [vmem:[#allocation2 + $0xd4] sm:$0xf] %v4776_v54  ;;  %v4786_v28 = vpack.c.bf16 %v4754_v31, %v4754_v31  ;;  %v4757_v54 = vld [vmem:[#allocation3 + $0x10a] sm:$0xff]  ;;  %v4787_v45 = vpack.c.bf16 %v4755_v38, %v4755_v38  ;;  %v9747_v38 = vld [vmem:[#allocation2 + $0x1c] sm:$0xf] }
 0x60c   : > { %4809 = vst [vmem:[#allocation2 + $0xf8] sm:$0xf] %v4777_v13  ;;  %v4758_v13 = vld [vmem:[#allocation3 + $0x112] sm:$0xff] }
 0x60d   : > { %v6445_v34 = vadd.f32 %v6444_v42, %v6356_v30  ;;  %4810 = vst [vmem:[#allocation2 + $0x11c] sm:$0xf] %v4778_v39  ;;  %v9214_v42 = vor.u32 %v9880_v46, %v9211_v33  ;;  %v8678_v30 = vor.u32 %v9750_v21, %v8677_v17  ;;  %v8685_v39 = vld [vmem:[#allocation2 + $0x18] sm:$0xf]  ;;  %v9751_v46 = vld [vmem:[#allocation2 + $0x38] sm:$0xf0]  ;;  %v8682_v33 = vor.u32 %v9746_v10, %v8679_v7 }
 0x60e   : > { %v6533_v2 = vpop.f32.mrf.mxu2  ;;  %v6446_v1 = vpop.f32.mrf.mxu1  ;;  %4811 = vst [vmem:[#allocation2 + $0x140] sm:$0xf] %v4779_v43  ;;  %v4759_v43 = vld [vmem:[#allocation3 + $0x122] sm:$0xff]  ;;  %v9958_v31 = vld [vmem:[%s13189_s5 + $0x230] sm:$0xff] }
 0x60f   : > { %v6534_v11 = vadd.f32 %v6533_v2, %v6445_v34  ;;  %4812 = vst [vmem:[#allocation2 + $0x164] sm:$0xf] %v4780_v0  ;;  %v4789_v0 = vpack.c.bf16 %v4757_v54, %v4757_v54  ;;  %7024 = vmatpush.bf16.msra.mxu3 %v9958_v31  ;;  %v9759_v54 = vld [vmem:[#allocation2 + $0x78] sm:$0xf0]  ;;  %v8751_v31 = vld [vmem:[#allocation2 + $0xc4] sm:$0xf0] }
 0x610   : > { %v6622_v49 = vpop.f32.mrf.mxu0  ;;  %4813 = vst [vmem:[#allocation2 + $0x188] sm:$0xf] %v4781_v3  ;;  %v4790_v3 = vpack.c.bf16 %v4758_v13, %v4758_v13 }
 0x611   : > { %v12374_v16 = vadd.f32 %v6622_v49, %v6534_v11  ;;  %4814 = vst [vmem:[#allocation2 + $0x1ac] sm:$0xf] %v4782_v52  ;;  %v4791_v11 = vpack.c.bf16 %v4759_v43, %v4759_v43 }
 0x612   : > { %v6357_v23 = vpop.f32.mrf.mxu3  ;;  %4815 = vst [vmem:[#allocation2 + $0x1d0] sm:$0xf] %v4783_v58 }
 0x613   : > { %v6358_v55 = vadd.f32 %v12322_v41, %v6357_v23  ;;  %6661 = vmatmul.bf16.gmra.mxu0 %v9214_v42  ;;  %4816 = vst [vmem:[#allocation2 + $0x1f4] sm:$0xf] %v4784_v57  ;;  %v8687_v23 = vld [vmem:[#allocation2 + $0x3c] sm:$0xf0] }
 0x614   : > { %4817 = vst [vmem:[#allocation2 + $0x218] sm:$0xf] %v4785_v22 }
 0x615   : > { %v6447_v14 = vadd.f32 %v6446_v1, %v6358_v55  ;;  %4818 = vst [vmem:[#allocation2 + $0x23c] sm:$0xf] %v4786_v28  ;;  %v8686_v1 = vor.u32 %v9751_v46, %v8685_v39  ;;  %v8690_v55 = vor.u32 %v9747_v38, %v8687_v23  ;;  %v8713_v28 = vld [vmem:[#allocation2 + $0x58] sm:$0xf]  ;;  %v8757_v23 = vld [vmem:[#allocation2 + $0xa8] sm:$0xf] }
 0x616   : > { %v6535_v18 = vpop.f32.mrf.mxu2  ;;  %v6449_v34 = vpop.f32.mrf.mxu1  ;;  %4819 = vst [vmem:[#allocation2 + $0x260] sm:$0xf] %v4787_v45  ;;  %v8714_v45 = vor.u32 %v9759_v54, %v8713_v28 }
 0x617   : > { %v6536_v2 = vadd.f32 %v6535_v18, %v6447_v14  ;;  %6675 = vmatmul.bf16.vlgmr.msrb.gmra.mxu3 %v8678_v30  ;;  %4820 = vst [vmem:[#allocation2 + $0x284] sm:$0xf] %v4788_v5  ;;  %v8721_v14 = vld [vmem:[#allocation2 + $0x60] sm:$0xf]  ;;  %v9760_v30 = vld [vmem:[#allocation2 + $0x80] sm:$0xf0] }
 0x618   : > { %v6624_v6 = vpop.f32.mrf.mxu0  ;;  %4821 = vst [vmem:[#allocation2 + $0x2a8] sm:$0xf] %v4789_v0  ;;  %v8722_v43 = vor.u32 %v9760_v30, %v8721_v14  ;;  %v8759_v14 = vld [vmem:[#allocation2 + $0xcc] sm:$0xf0] }
 0x619   : > { %6764 = vmatmul.bf16.vlgmr.msrb.gmra.mxu1 %v8682_v33  ;;  %v12377_v52 = vadd.f32 %v6624_v6, %v6536_v2  ;;  %4822 = vst [vmem:[#allocation2 + $0x2cc] sm:$0xf] %v4790_v3 }
 0x61a   : > { %v6360_v49 = vpop.f32.mrf.mxu3  ;;  %4823 = vst [vmem:[#allocation2 + $0x2f0] sm:$0xf] %v4791_v11 }
 0x61b   : > { %6853 = vmatmul.bf16.vlgmr.msrb.gmra.mxu2 %v8686_v1  ;;  %v6361_v58 = vadd.f32 %v12322_v41, %v6360_v49  ;;  %4824 = vst [vmem:[#allocation2 + $0x314] sm:$0xf] %v4792_v63  ;;  %v8749_v1 = vld [vmem:[#allocation2 + $0xa0] sm:$0xf]  ;;  %v9768_v63 = vld [vmem:[#allocation2 + $0xc0] sm:$0xf0] }
 0x61c   : > { %4825 = vst [vmem:[#allocation2 + $0x338] sm:$0xf] %v12281_v26  ;;  %v9755_v26 = vld [vmem:[#allocation2 + $0x5c] sm:$0xf] }
 0x61d   : > { %v6450_v42 = vadd.f32 %v6449_v34, %v6361_v58  ;;  %4826 = vst [vmem:[#allocation2 + $0x35c] sm:$0xf] %v12283_v19  ;;  %v8715_v19 = vld [vmem:[#allocation2 + $0x7c] sm:$0xf0]  ;;  %v9764_v58 = vld [vmem:[#allocation2 + $0xa4] sm:$0xf] }
 0x61e   : > { %v6538_v17 = vpop.f32.mrf.mxu2  ;;  %v6451_v57 = vpop.f32.mrf.mxu1  ;;  %4827 = vst [vmem:[#allocation2 + $0x380] sm:$0xf] %v12317_v35 }
 0x61f   : > { %v6539_v21 = vadd.f32 %v6538_v17, %v6450_v42  ;;  %4828 = vst [vmem:[#allocation2 + $0x3a4] sm:$0xf] %v12325_v40  ;;  %v8750_v17 = vor.u32 %v9768_v63, %v8749_v1 }
 0x620   : > { %v6627_v22 = vpop.f32.mrf.mxu0  ;;  %4829 = vst [vmem:[#allocation2 + $0x3c8] sm:$0xf] %v12340_v4  ;;  %v8718_v4 = vor.u32 %v9755_v26, %v8715_v19  ;;  %v9957_v19 = vld [vmem:[%s13189_s5 + $0x228] sm:$0xff] }
 0x621   : > { %v12386_v15 = vadd.f32 %v6627_v22, %v6539_v21  ;;  %4830 = vst [vmem:[#allocation2 + $0x3ec] sm:$0xf] %v12349_v36  ;;  %v9769_v21 = vld [vmem:[#allocation2 + $0xc8] sm:$0xf0]  ;;  %7025 = vmatpush.bf16.msra.mxu3 %v9957_v19  ;;  %v8821_v19 = vld [vmem:[#allocation2 + $0x130] sm:$0xf] }
 0x622   : > { %v6362_v10 = vpop.f32.mrf.mxu3  ;;  %4831 = vst [vmem:[#allocation2 + $0x410] sm:$0xf] %v12361_v24  ;;  %v8758_v28 = vor.u32 %v9769_v21, %v8757_v23  ;;  %v9774_v21 = vld [vmem:[#allocation2 + $0xf4] sm:$0xf] }
 0x623   : > { %v6363_v7 = vadd.f32 %v12322_v41, %v6362_v10  ;;  %6942 = vmatmul.bf16.vlgmr.msra.gmra.mxu0 %v8690_v55  ;;  %4832 = vst [vmem:[#allocation2 + $0x434] sm:$0xf] %v12364_v37  ;;  %v9756_v37 = vld [vmem:[#allocation2 + $0x64] sm:$0xf]  ;;  %v8754_v55 = vor.u32 %v9764_v58, %v8751_v31 }
 0x624   : > { %v8726_v6 = vor.u32 %v9756_v37, %v8723_v12 }
 0x625   : > { %v6452_v35 = vadd.f32 %v6451_v57, %v6363_v7 }
 0x626   : > { %v6540_v13 = vpop.f32.mrf.mxu2  ;;  %v6454_v40 = vpop.f32.mrf.mxu1 }
 0x627   : > { %v6541_v39 = vadd.f32 %v6540_v13, %v6452_v35  ;;  %6680 = vmatmul.bf16.gmra.mxu3 %v8714_v45 }
 0x628   : > { %v6629_v5 = vpop.f32.mrf.mxu0 }
 0x629   : > { %6769 = vmatmul.bf16.gmra.mxu1 %v8718_v4  ;;  %v12394_v18 = vadd.f32 %v6629_v5, %v6541_v39 }
 0x62a   : > { %v6365_v36 = vpop.f32.mrf.mxu3 }
 0x62b   : > { %6858 = vmatmul.bf16.gmra.mxu2 %v8722_v43  ;;  %v6366_v24 = vadd.f32 %v12322_v41, %v6365_v36  ;;  %v8785_v36 = vld [vmem:[#allocation2 + $0xe8] sm:$0xf] }
 0x62d   : > { %v6455_v34 = vadd.f32 %v6454_v40, %v6366_v24  ;;  %v9765_v40 = vld [vmem:[#allocation2 + $0xac] sm:$0xf] }
 0x62e   : > { %v6543_v46 = vpop.f32.mrf.mxu2  ;;  %v6456_v0 = vpop.f32.mrf.mxu1  ;;  %v8762_v5 = vor.u32 %v9765_v40, %v8759_v14  ;;  %v9777_v24 = vld [vmem:[#allocation2 + $0x108] sm:$0xf0]  ;;  %v8823_v40 = vld [vmem:[#allocation2 + $0x154] sm:$0xf0] }
 0x62f   : > { %v6544_v2 = vadd.f32 %v6543_v46, %v6455_v34  ;;  %v9773_v46 = vld [vmem:[#allocation2 + $0xec] sm:$0xf]  ;;  %v8786_v12 = vor.u32 %v9777_v24, %v8785_v36  ;;  %v9787_v36 = vld [vmem:[#allocation2 + $0x158] sm:$0xf0] }
 0x630   : > { %v6632_v33 = vpop.f32.mrf.mxu0 }
 0x631   : > { %v12397_v3 = vadd.f32 %v6632_v33, %v6544_v2 }
 0x632   : > { %v6367_v11 = vpop.f32.mrf.mxu3 }
 0x633   : > { %v6368_v49 = vadd.f32 %v12322_v41, %v6367_v11  ;;  %6947 = vmatmul.bf16.gmra.mxu0 %v8726_v6  ;;  %v8793_v6 = vld [vmem:[#allocation2 + $0xf0] sm:$0xf]  ;;  %v9778_v11 = vld [vmem:[#allocation2 + $0x110] sm:$0xf0] }
 0x634   : > { %v8794_v58 = vor.u32 %v9778_v11, %v8793_v6 }
 0x635   : > { %v6457_v42 = vadd.f32 %v6456_v0, %v6368_v49  ;;  %v8787_v0 = vld [vmem:[#allocation2 + $0x10c] sm:$0xf0] }
 0x636   : > { %v6545_v57 = vpop.f32.mrf.mxu2  ;;  %v6459_v38 = vpop.f32.mrf.mxu1  ;;  %v8790_v63 = vor.u32 %v9773_v46, %v8787_v0 }
 0x637   : > { %v6546_v22 = vadd.f32 %v6545_v57, %v6457_v42  ;;  %6685 = vmatmul.bf16.gmra.mxu3 %v8750_v17 }
 0x638   : > { %v6634_v10 = vpop.f32.mrf.mxu0 }
 0x639   : > { %6774 = vmatmul.bf16.gmra.mxu1 %v8754_v55  ;;  %v12400_v54 = vadd.f32 %v6634_v10, %v6546_v22  ;;  %v8795_v22 = vld [vmem:[#allocation2 + $0x114] sm:$0xf0] }
 0x63a   : > { %v6370_v7 = vpop.f32.mrf.mxu3 }
 0x63b   : > { %6863 = vmatmul.bf16.gmra.mxu2 %v8758_v28  ;;  %v6371_v26 = vadd.f32 %v12322_v41, %v6370_v7  ;;  %v8798_v7 = vor.u32 %v9774_v21, %v8795_v22  ;;  %v9795_v21 = vld [vmem:[#allocation2 + $0x198] sm:$0xf0] }
 0x63d   : > { %v6460_v35 = vadd.f32 %v6459_v38, %v6371_v26 }
 0x63e   : > { %v6548_v45 = vpop.f32.mrf.mxu2  ;;  %v6461_v13 = vpop.f32.mrf.mxu1 }
 0x63f   : > { %v6549_v30 = vadd.f32 %v6548_v45, %v6460_v35  ;;  %v9786_v35 = vld [vmem:[#allocation2 + $0x150] sm:$0xf0] }
 0x640   : > { %v6637_v39 = vpop.f32.mrf.mxu0 }
 0x641   : > { %v12406_v4 = vadd.f32 %v6637_v39, %v6549_v30  ;;  %v8822_v30 = vor.u32 %v9786_v35, %v8821_v19 }
 0x642   : > { %v6372_v43 = vpop.f32.mrf.mxu3 }
 0x643   : > { %v6373_v34 = vadd.f32 %v12322_v41, %v6372_v43  ;;  %6952 = vmatmul.bf16.gmra.mxu0 %v8762_v5  ;;  %v8829_v43 = vld [vmem:[#allocation2 + $0x138] sm:$0xf] }
 0x644   : > { %v8830_v0 = vor.u32 %v9787_v36, %v8829_v43 }
 0x645   : > { %v6462_v37 = vadd.f32 %v6461_v13, %v6373_v34  ;;  %v9782_v13 = vld [vmem:[#allocation2 + $0x134] sm:$0xf] }
 0x646   : > { %v6550_v2 = vpop.f32.mrf.mxu2  ;;  %v6464_v33 = vpop.f32.mrf.mxu1  ;;  %v8826_v34 = vor.u32 %v9782_v13, %v8823_v40  ;;  %v9796_v13 = vld [vmem:[#allocation2 + $0x1a0] sm:$0xf0] }
 0x647   : > { %v6551_v1 = vadd.f32 %v6550_v2, %v6462_v37  ;;  %6690 = vmatmul.bf16.gmra.mxu3 %v8786_v12 }
 0x648   : > { %v6639_v49 = vpop.f32.mrf.mxu0 }
 0x649   : > { %6779 = vmatmul.bf16.gmra.mxu1 %v8790_v63  ;;  %v12409_v31 = vadd.f32 %v6639_v49, %v6551_v1  ;;  %v9783_v63 = vld [vmem:[#allocation2 + $0x13c] sm:$0xf]  ;;  %v8831_v49 = vld [vmem:[#allocation2 + $0x15c] sm:$0xf0] }
 0x64a   : > { %v6375_v42 = vpop.f32.mrf.mxu3 }
 0x64b   : > { %6868 = vmatmul.bf16.gmra.mxu2 %v8794_v58  ;;  %v6376_v17 = vadd.f32 %v12322_v41, %v6375_v42 }
 0x64d   : > { %v6465_v57 = vadd.f32 %v6464_v33, %v6376_v17  ;;  %v9956_v33 = vld [vmem:[%s13189_s5 + $0x220] sm:$0xff] }
 0x64e   : > { %v6553_v38 = vpop.f32.mrf.mxu2  ;;  %v6466_v23 = vpop.f32.mrf.mxu1  ;;  %7026 = vmatpush.bf16.msra.mxu3 %v9956_v33 }
 0x64f   : > { %v6554_v55 = vadd.f32 %v6553_v38, %v6465_v57  ;;  %v8834_v57 = vor.u32 %v9783_v63, %v8831_v49  ;;  %v8893_v63 = vld [vmem:[#allocation2 + $0x1c0] sm:$0xf]  ;;  %v9804_v49 = vld [vmem:[#allocation2 + $0x1e0] sm:$0xf0] }
 0x650   : > { %v6642_v10 = vpop.f32.mrf.mxu0 }
 0x651   : > { %v12412_v28 = vadd.f32 %v6642_v10, %v6554_v55  ;;  %v9791_v55 = vld [vmem:[#allocation2 + $0x17c] sm:$0xf]  ;;  %v8859_v10 = vld [vmem:[#allocation2 + $0x19c] sm:$0xf0] }
 0x652   : > { %v6377_v26 = vpop.f32.mrf.mxu3 }
 0x653   : > { %v6378_v45 = vadd.f32 %v12322_v41, %v6377_v26  ;;  %6957 = vmatmul.bf16.gmra.mxu0 %v8798_v7 }
 0x655   : > { %v6467_v14 = vadd.f32 %v6466_v23, %v6378_v45  ;;  %v8857_v23 = vld [vmem:[#allocation2 + $0x178] sm:$0xf]  ;;  %v8865_v45 = vld [vmem:[#allocation2 + $0x180] sm:$0xf] }
 0x656   : > { %v6555_v39 = vpop.f32.mrf.mxu2  ;;  %v6469_v5 = vpop.f32.mrf.mxu1  ;;  %v8858_v26 = vor.u32 %v9795_v21, %v8857_v23  ;;  %v8894_v23 = vor.u32 %v9804_v49, %v8893_v63  ;;  %v9809_v63 = vld [vmem:[#allocation2 + $0x20c] sm:$0xf]  ;;  %v8931_v49 = vld [vmem:[#allocation2 + $0x22c] sm:$0xf0] }
 0x657   : > { %v6556_v24 = vadd.f32 %v6555_v39, %v6467_v14  ;;  %6695 = vmatmul.bf16.gmra.mxu3 %v8822_v30  ;;  %v8862_v14 = vor.u32 %v9791_v55, %v8859_v10  ;;  %v8866_v39 = vor.u32 %v9796_v13, %v8865_v45  ;;  %v8901_v55 = vld [vmem:[#allocation2 + $0x1c8] sm:$0xf]  ;;  %v9805_v10 = vld [vmem:[#allocation2 + $0x1e8] sm:$0xf0] }
 0x658   : > { %v6644_v46 = vpop.f32.mrf.mxu0 }
 0x659   : > { %6784 = vmatmul.bf16.gmra.mxu1 %v8826_v34  ;;  %v12415_v37 = vadd.f32 %v6644_v46, %v6556_v24 }
 0x65a   : > { %v6380_v12 = vpop.f32.mrf.mxu3 }
 0x65b   : > { %6873 = vmatmul.bf16.gmra.mxu2 %v8830_v0  ;;  %v6381_v2 = vadd.f32 %v12322_v41, %v6380_v12  ;;  %v9792_v0 = vld [vmem:[#allocation2 + $0x184] sm:$0xf]  ;;  %v8867_v12 = vld [vmem:[#allocation2 + $0x1a4] sm:$0xf0] }
 0x65d   : > { %v6470_v6 = vadd.f32 %v6469_v5, %v6381_v2 }
 0x65e   : > { %v6558_v11 = vpop.f32.mrf.mxu2  ;;  %v6471_v1 = vpop.f32.mrf.mxu1 }
 0x65f   : > { %v6559_v58 = vadd.f32 %v6558_v11, %v6470_v6  ;;  %v8870_v11 = vor.u32 %v9792_v0, %v8867_v12 }
 0x660   : > { %v6647_v42 = vpop.f32.mrf.mxu0 }
 0x661   : > { %v12421_v17 = vadd.f32 %v6647_v42, %v6559_v58  ;;  %v9800_v42 = vld [vmem:[#allocation2 + $0x1c4] sm:$0xf] }
 0x662   : > { %v6382_v38 = vpop.f32.mrf.mxu3 }
 0x663   : > { %v6383_v22 = vadd.f32 %v12322_v41, %v6382_v38  ;;  %6962 = vmatmul.bf16.gmra.mxu0 %v8834_v57  ;;  %v8895_v57 = vld [vmem:[#allocation2 + $0x1e4] sm:$0xf0] }
 0x665   : > { %v6472_v7 = vadd.f32 %v6471_v1, %v6383_v22 }
 0x666   : > { %v6560_v19 = vpop.f32.mrf.mxu2  ;;  %v6474_v35 = vpop.f32.mrf.mxu1 }
 0x667   : > { %v6561_v40 = vadd.f32 %v6560_v19, %v6472_v7  ;;  %6700 = vmatmul.bf16.gmra.mxu3 %v8858_v26  ;;  %v8898_v26 = vor.u32 %v9800_v42, %v8895_v57 }
 0x668   : > { %v6649_v30 = vpop.f32.mrf.mxu0 }
 0x669   : > { %6789 = vmatmul.bf16.gmra.mxu1 %v8862_v14  ;;  %v12424_v5 = vadd.f32 %v6649_v30, %v6561_v40  ;;  %v9955_v14 = vld [vmem:[%s13189_s5 + $0x218] sm:$0xff] }
 0x66a   : > { %v6385_v43 = vpop.f32.mrf.mxu3  ;;  %7027 = vmatpush.bf16.msra.mxu3 %v9955_v14 }
 0x66b   : > { %6878 = vmatmul.bf16.gmra.mxu2 %v8866_v39  ;;  %v6386_v36 = vadd.f32 %v12322_v41, %v6385_v43 }
 0x66d   : > { %v6475_v24 = vadd.f32 %v6474_v35, %v6386_v36  ;;  %v8902_v35 = vor.u32 %v9805_v10, %v8901_v55  ;;  %v9801_v36 = vld [vmem:[#allocation2 + $0x1cc] sm:$0xf]  ;;  %v8934_v55 = vor.u32 %v9809_v63, %v8931_v49 }
 0x66e   : > { %v6563_v34 = vpop.f32.mrf.mxu2  ;;  %v6476_v46 = vpop.f32.mrf.mxu1 }
 0x66f   : > { %v6564_v2 = vadd.f32 %v6563_v34, %v6475_v24  ;;  %v8903_v24 = vld [vmem:[#allocation2 + $0x1ec] sm:$0xf0] }
 0x670   : > { %v6652_v33 = vpop.f32.mrf.mxu0  ;;  %v8906_v12 = vor.u32 %v9801_v36, %v8903_v24 }
 0x671   : > { %v12427_v6 = vadd.f32 %v6652_v33, %v6564_v2  ;;  %v8929_v33 = vld [vmem:[#allocation2 + $0x208] sm:$0xf] }
 0x672   : > { %v6387_v1 = vpop.f32.mrf.mxu3 }
 0x673   : > { %v6388_v58 = vadd.f32 %v12322_v41, %v6387_v1  ;;  %6967 = vmatmul.bf16.gmra.mxu0 %v8870_v11  ;;  %v9813_v11 = vld [vmem:[#allocation2 + $0x228] sm:$0xf0] }
 0x674   : > { %v8930_v42 = vor.u32 %v9813_v11, %v8929_v33  ;;  %v9818_v11 = vld [vmem:[#allocation2 + $0x254] sm:$0xf] }
 0x675   : > { %v6477_v38 = vadd.f32 %v6476_v46, %v6388_v58 }
 0x676   : > { %v6565_v21 = vpop.f32.mrf.mxu2  ;;  %v6479_v22 = vpop.f32.mrf.mxu1 }
 0x677   : > { %v6566_v7 = vadd.f32 %v6565_v21, %v6477_v38  ;;  %6705 = vmatmul.bf16.gmra.mxu3 %v8894_v23  ;;  %v8937_v23 = vld [vmem:[#allocation2 + $0x210] sm:$0xf]  ;;  %v9814_v21 = vld [vmem:[#allocation2 + $0x230] sm:$0xf0] }
 0x678   : > { %v6654_v19 = vpop.f32.mrf.mxu0 }
 0x679   : > { %6794 = vmatmul.bf16.gmra.mxu1 %v8898_v26  ;;  %v12430_v45 = vadd.f32 %v6654_v19, %v6566_v7  ;;  %v8938_v7 = vor.u32 %v9814_v21, %v8937_v23  ;;  %v6323_v23 = vadd.f32 %v12322_v41, %v12221_v53 }
 0x67a   : > { %v6390_v13 = vpop.f32.mrf.mxu3 }
 0x67b   : > { %6883 = vmatmul.bf16.gmra.mxu2 %v8902_v35  ;;  %v6391_v40 = vadd.f32 %v12322_v41, %v6390_v13 }
 0x67d   : > { %v6480_v30 = vadd.f32 %v6479_v22, %v6391_v40 }
 0x67e   : > { %v6568_v39 = vpop.f32.mrf.mxu2  ;;  %v6481_v43 = vpop.f32.mrf.mxu1 }
 0x67f   : > { %v6569_v34 = vadd.f32 %v6568_v39, %v6480_v30  ;;  %v9810_v30 = vld [vmem:[#allocation2 + $0x214] sm:$0xf]  ;;  %v8939_v39 = vld [vmem:[#allocation2 + $0x234] sm:$0xf0] }
 0x680   : > { %v6657_v46 = vpop.f32.mrf.mxu0 }
 0x681   : > { %v12436_v0 = vadd.f32 %v6657_v46, %v6569_v34  ;;  %v8942_v34 = vor.u32 %v9810_v30, %v8939_v39  ;;  %v9819_v30 = vld [vmem:[#allocation2 + $0x25c] sm:$0xf]  ;;  %v8975_v39 = vld [vmem:[#allocation2 + $0x27c] sm:$0xf0] }
 0x682   : > { %v6392_v2 = vpop.f32.mrf.mxu3 }
 0x683   : > { %v6393_v1 = vadd.f32 %v12322_v41, %v6392_v2  ;;  %6972 = vmatmul.bf16.gmra.mxu0 %v8906_v12  ;;  %v8965_v12 = vld [vmem:[#allocation2 + $0x250] sm:$0xf]  ;;  %v9822_v2 = vld [vmem:[#allocation2 + $0x270] sm:$0xf0] }
 0x684   : > { %v8966_v49 = vor.u32 %v9822_v2, %v8965_v12  ;;  %v8978_v12 = vor.u32 %v9819_v30, %v8975_v39  ;;  %v9001_v2 = vld [vmem:[#allocation2 + $0x298] sm:$0xf] }
 0x685   : > { %v6482_v58 = vadd.f32 %v6481_v43, %v6393_v1  ;;  %v8967_v1 = vld [vmem:[#allocation2 + $0x274] sm:$0xf0] }
 0x686   : > { %v6570_v57 = vpop.f32.mrf.mxu2  ;;  %v6484_v38 = vpop.f32.mrf.mxu1 }
 0x687   : > { %v6571_v22 = vadd.f32 %v6570_v57, %v6482_v58  ;;  %6710 = vmatmul.bf16.gmra.mxu3 %v8930_v42  ;;  %v8973_v57 = vld [vmem:[#allocation2 + $0x258] sm:$0xf] }
 0x688   : > { %v6659_v10 = vpop.f32.mrf.mxu0 }
 0x689   : > { %6799 = vmatmul.bf16.gmra.mxu1 %v8934_v55  ;;  %v12439_v26 = vadd.f32 %v6659_v10, %v6571_v22  ;;  %v8970_v22 = vor.u32 %v9818_v11, %v8967_v1  ;;  %v9827_v1 = vld [vmem:[#allocation2 + $0x29c] sm:$0xf] }
 0x68a   : > { %v6395_v19 = vpop.f32.mrf.mxu3 }
 0x68b   : > { %6888 = vmatmul.bf16.gmra.mxu2 %v8938_v7  ;;  %v6396_v35 = vadd.f32 %v12322_v41, %v6395_v19 }
 0x68d   : > { %v6485_v13 = vadd.f32 %v6484_v38, %v6396_v35  ;;  %v9823_v38 = vld [vmem:[#allocation2 + $0x278] sm:$0xf0]  ;;  %v6412_v35 = vadd.f32 %v12219_v9, %v6323_v23 }
 0x68e   : > { %v6573_v40 = vpop.f32.mrf.mxu2  ;;  %v6486_v14 = vpop.f32.mrf.mxu1  ;;  %v8974_v10 = vor.u32 %v9823_v38, %v8973_v57  ;;  %v9009_v38 = vld [vmem:[#allocation2 + $0x2a0] sm:$0xf] }
 0x68f   : > { %v6574_v43 = vadd.f32 %v6573_v40, %v6485_v13  ;;  %v9954_v40 = vld [vmem:[%s13189_s5 + $0x210] sm:$0xff] }
 0x690   : > { %v6662_v36 = vpop.f32.mrf.mxu0  ;;  %7028 = vmatpush.bf16.msra.mxu3 %v9954_v40 }
 0x691   : > { %v12442_v24 = vadd.f32 %v6662_v36, %v6574_v43  ;;  %v6501_v43 = vadd.f32 %v12223_v62, %v6412_v35  ;;  %v9832_v62 = vld [vmem:[#allocation2 + $0x2c0] sm:$0xf0] }
 0x692   : > { %v6397_v46 = vpop.f32.mrf.mxu3 }
 0x693   : > { %v6398_v33 = vadd.f32 %v12322_v41, %v6397_v46  ;;  %6977 = vmatmul.bf16.gmra.mxu0 %v8942_v34  ;;  %v6590_v46 = vadd.f32 %v12225_v59, %v6501_v43 }
 0x695   : > { %v6487_v63 = vadd.f32 %v6486_v14, %v6398_v33  ;;  %v9831_v33 = vld [vmem:[#allocation2 + $0x2b8] sm:$0xf0] }
 0x696   : > { %v6575_v58 = vpop.f32.mrf.mxu2  ;;  %v6765_v42 = vpop.f32.mrf.mxu1 }
 0x697   : > { %v6576_v21 = vadd.f32 %v6575_v58, %v6487_v63  ;;  %6715 = vmatmul.bf16.gmra.mxu3 %v8966_v49  ;;  %v9003_v63 = vld [vmem:[#allocation2 + $0x2bc] sm:$0xf0]  ;;  %v9002_v58 = vor.u32 %v9831_v33, %v9001_v2  ;;  %v9039_v2 = vld [vmem:[#allocation2 + $0x304] sm:$0xf0] }
 0x698   : > { %v6664_v55 = vpop.f32.mrf.mxu0 }
 0x699   : > { %6804 = vmatmul.bf16.gmra.mxu1 %v8970_v22  ;;  %v12447_v7 = vadd.f32 %v6664_v55, %v6576_v21  ;;  %v9006_v21 = vor.u32 %v9827_v1, %v9003_v63  ;;  %v9010_v22 = vor.u32 %v9832_v62, %v9009_v38  ;;  %v9045_v63 = vld [vmem:[#allocation2 + $0x2e8] sm:$0xf] }
 0x69a   : > { %v6676_v19 = vpop.f32.mrf.mxu3 }
 0x69b   : > { %6893 = vmatmul.bf16.gmra.mxu2 %v8974_v10  ;;  %v6677_v13 = vadd.f32 %v6676_v19, %v12214_v51 }
 0x69d   : > { %v6766_v14 = vadd.f32 %v6765_v42, %v6677_v13 }
 0x69e   : > { %v6854_v53 = vpop.f32.mrf.mxu2  ;;  %v6767_v41 = vpop.f32.mrf.mxu1 }
 0x69f   : > { %v6855_v36 = vadd.f32 %v6854_v53, %v6766_v14  ;;  %v9828_v14 = vld [vmem:[#allocation2 + $0x2a4] sm:$0xf]  ;;  %v9011_v53 = vld [vmem:[#allocation2 + $0x2c4] sm:$0xf0] }
 0x6a0   : > { %v6943_v34 = vpop.f32.mrf.mxu0  ;;  %v9014_v43 = vor.u32 %v9828_v14, %v9011_v53 }
 0x6a1   : > { %v12456_v9 = vadd.f32 %v6943_v34, %v6855_v36  ;;  %v9037_v34 = vld [vmem:[#allocation2 + $0x2e0] sm:$0xf] }
 0x6a2   : > { %v6678_v51 = vpop.f32.mrf.mxu3 }
 0x6a3   : > { %v6679_v11 = vadd.f32 %v6678_v51, %v6590_v46  ;;  %6982 = vmatmul.bf16.gmra.mxu0 %v8978_v12  ;;  %v9840_v46 = vld [vmem:[#allocation2 + $0x300] sm:$0xf0] }
 0x6a4   : > { %v9836_v51 = vld [vmem:[#allocation2 + $0x2e4] sm:$0xf] }
 0x6a5   : > { %v6768_v49 = vadd.f32 %v6767_v41, %v6679_v11 }
 0x6a6   : > { %v6856_v42 = vpop.f32.mrf.mxu2  ;;  %v6770_v57 = vpop.f32.mrf.mxu1 }
 0x6a7   : > { %v6857_v23 = vadd.f32 %v6856_v42, %v6768_v49  ;;  %6720 = vmatmul.bf16.gmra.mxu3 %v9002_v58  ;;  %v9841_v49 = vld [vmem:[#allocation2 + $0x308] sm:$0xf0]  ;;  %v9042_v42 = vor.u32 %v9836_v51, %v9039_v2 }
 0x6a8   : > { %v6945_v59 = vpop.f32.mrf.mxu0  ;;  %v9046_v38 = vor.u32 %v9841_v49, %v9045_v63 }
 0x6a9   : > { %6809 = vmatmul.bf16.gmra.mxu1 %v9006_v21  ;;  %v12458_v55 = vadd.f32 %v6945_v59, %v6857_v23  ;;  %v9953_v21 = vld [vmem:[%s13189_s5 + $0x208] sm:$0xff] }
 0x6aa   : > { %v6681_v10 = vpop.f32.mrf.mxu3  ;;  %7029 = vmatpush.bf16.msra.mxu3 %v9953_v21  ;;  %v9083_v21 = vld [vmem:[#allocation2 + $0x354] sm:$0xf0] }
 0x6ab   : > { %6898 = vmatmul.bf16.gmra.mxu2 %v9010_v22  ;;  %v6682_v19 = vadd.f32 %v6681_v10, %v12228_v32  ;;  %v9038_v32 = vor.u32 %v9840_v46, %v9037_v34  ;;  %v9075_v34 = vld [vmem:[#allocation2 + $0x34c] sm:$0xf0] }
 0x6ad   : > { %v6771_v35 = vadd.f32 %v6770_v57, %v6682_v19  ;;  %v9837_v19 = vld [vmem:[#allocation2 + $0x2ec] sm:$0xf] }
 0x6ae   : > { %v6859_v13 = vpop.f32.mrf.mxu2  ;;  %v6772_v40 = vpop.f32.mrf.mxu1 }
 0x6af   : > { %v6860_v41 = vadd.f32 %v6859_v13, %v6771_v35  ;;  %v9047_v35 = vld [vmem:[#allocation2 + $0x30c] sm:$0xf0] }
 0x6b0   : > { %v6948_v30 = vpop.f32.mrf.mxu0  ;;  %v9050_v53 = vor.u32 %v9837_v19, %v9047_v35 }
 0x6b1   : > { %v12461_v39 = vadd.f32 %v6948_v30, %v6860_v41  ;;  %v9073_v30 = vld [vmem:[#allocation2 + $0x328] sm:$0xf] }
 0x6b2   : > { %v6683_v36 = vpop.f32.mrf.mxu3 }
 0x6b3   : > { %v6684_v12 = vadd.f32 %v6683_v36, %v12231_v47  ;;  %6987 = vmatmul.bf16.gmra.mxu0 %v9014_v43  ;;  %v9849_v43 = vld [vmem:[#allocation2 + $0x348] sm:$0xf0] }
 0x6b4   : > { %v9845_v36 = vld [vmem:[#allocation2 + $0x32c] sm:$0xf] }
 0x6b5   : > { %v6773_v33 = vadd.f32 %v6772_v40, %v6684_v12  ;;  %v9074_v12 = vor.u32 %v9849_v43, %v9073_v30  ;;  %v9111_v30 = vld [vmem:[#allocation2 + $0x394] sm:$0xf0] }
 0x6b6   : > { %v6861_v11 = vpop.f32.mrf.mxu2  ;;  %v6775_v1 = vpop.f32.mrf.mxu1 }
 0x6b7   : > { %v6862_v58 = vadd.f32 %v6861_v11, %v6773_v33  ;;  %6725 = vmatmul.bf16.gmra.mxu3 %v9038_v32  ;;  %v9081_v33 = vld [vmem:[#allocation2 + $0x330] sm:$0xf]  ;;  %v9850_v32 = vld [vmem:[#allocation2 + $0x350] sm:$0xf0] }
 0x6b8   : > { %v6950_v57 = vpop.f32.mrf.mxu0  ;;  %v9082_v49 = vor.u32 %v9850_v32, %v9081_v33 }
 0x6b9   : > { %6814 = vmatmul.bf16.gmra.mxu1 %v9042_v42  ;;  %v12464_v62 = vadd.f32 %v6950_v57, %v6862_v58 }
 0x6ba   : > { %v6686_v23 = vpop.f32.mrf.mxu3 }
 0x6bb   : > { %6903 = vmatmul.bf16.gmra.mxu2 %v9046_v38  ;;  %v6687_v47 = vadd.f32 %v6686_v23, %v12237_v8 }
 0x6bd   : > { %v6776_v59 = vadd.f32 %v6775_v1, %v6687_v47  ;;  %v9078_v1 = vor.u32 %v9845_v36, %v9075_v34  ;;  %v9846_v47 = vld [vmem:[#allocation2 + $0x334] sm:$0xf]  ;;  %v9117_v34 = vld [vmem:[#allocation2 + $0x378] sm:$0xf] }
 0x6be   : > { %v6864_v22 = vpop.f32.mrf.mxu2  ;;  %v6777_v10 = vpop.f32.mrf.mxu1  ;;  %v9086_v19 = vor.u32 %v9846_v47, %v9083_v21 }
 0x6bf   : > { %v6865_v13 = vadd.f32 %v6864_v22, %v6776_v59 }
 0x6c0   : > { %v6953_v40 = vpop.f32.mrf.mxu0 }
 0x6c1   : > { %v12470_v14 = vadd.f32 %v6953_v40, %v6865_v13  ;;  %v9109_v13 = vld [vmem:[#allocation2 + $0x370] sm:$0xf]  ;;  %v9858_v40 = vld [vmem:[#allocation2 + $0x390] sm:$0xf0] }
 0x6c2   : > { %v6688_v41 = vpop.f32.mrf.mxu3 }
 0x6c3   : > { %v6689_v8 = vadd.f32 %v6688_v41, %v12240_v48  ;;  %6992 = vmatmul.bf16.gmra.mxu0 %v9050_v53  ;;  %v9854_v41 = vld [vmem:[#allocation2 + $0x374] sm:$0xf] }
 0x6c5   : > { %v6778_v46 = vadd.f32 %v6777_v10, %v6689_v8 }
 0x6c6   : > { %v6866_v51 = vpop.f32.mrf.mxu2  ;;  %v6780_v2 = vpop.f32.mrf.mxu1 }
 0x6c7   : > { %v6867_v11 = vadd.f32 %v6866_v51, %v6778_v46  ;;  %6730 = vmatmul.bf16.gmra.mxu3 %v9074_v12  ;;  %v9859_v46 = vld [vmem:[#allocation2 + $0x398] sm:$0xf0]  ;;  %v9114_v51 = vor.u32 %v9854_v41, %v9111_v30 }
 0x6c8   : > { %v6955_v63 = vpop.f32.mrf.mxu0  ;;  %v9118_v33 = vor.u32 %v9859_v46, %v9117_v34 }
 0x6c9   : > { %6819 = vmatmul.bf16.gmra.mxu1 %v9078_v1  ;;  %v12473_v58 = vadd.f32 %v6955_v63, %v6867_v11  ;;  %v9952_v1 = vld [vmem:[%s13189_s5 + $0x200] sm:$0xff] }
 0x6ca   : > { %v6691_v42 = vpop.f32.mrf.mxu3  ;;  %7030 = vmatpush.bf16.msra.mxu3 %v9952_v1  ;;  %v9155_v1 = vld [vmem:[#allocation2 + $0x3e4] sm:$0xf0] }
 0x6cb   : > { %6908 = vmatmul.bf16.gmra.mxu2 %v9082_v49  ;;  %v6692_v48 = vadd.f32 %v6691_v42, %v12243_v60  ;;  %v9110_v60 = vor.u32 %v9858_v40, %v9109_v13  ;;  %v9147_v13 = vld [vmem:[#allocation2 + $0x3dc] sm:$0xf0] }
 0x6cd   : > { %v6781_v57 = vadd.f32 %v6780_v2, %v6692_v48  ;;  %v9855_v48 = vld [vmem:[#allocation2 + $0x37c] sm:$0xf] }
 0x6ce   : > { %v6869_v38 = vpop.f32.mrf.mxu2  ;;  %v6782_v23 = vpop.f32.mrf.mxu1 }
 0x6cf   : > { %v6870_v59 = vadd.f32 %v6869_v38, %v6781_v57  ;;  %v9119_v57 = vld [vmem:[#allocation2 + $0x39c] sm:$0xf0] }
 0x6d0   : > { %v6958_v22 = vpop.f32.mrf.mxu0  ;;  %v9122_v21 = vor.u32 %v9855_v48, %v9119_v57 }
 0x6d1   : > { %v12476_v10 = vadd.f32 %v6958_v22, %v6870_v59  ;;  %v9145_v22 = vld [vmem:[#allocation2 + $0x3b8] sm:$0xf] }
 0x6d2   : > { %v6693_v35 = vpop.f32.mrf.mxu3 }
 0x6d3   : > { %v6694_v53 = vadd.f32 %v6693_v35, %v12246_v25  ;;  %6997 = vmatmul.bf16.gmra.mxu0 %v9086_v19  ;;  %v9867_v19 = vld [vmem:[#allocation2 + $0x3d8] sm:$0xf0] }
 0x6d4   : > { %v9863_v35 = vld [vmem:[#allocation2 + $0x3bc] sm:$0xf] }
 0x6d5   : > { %v6783_v43 = vadd.f32 %v6782_v23, %v6694_v53  ;;  %v9146_v53 = vor.u32 %v9867_v19, %v9145_v22  ;;  %v9183_v22 = vld [vmem:[#allocation2 + $0x424] sm:$0xf0] }
 0x6d6   : > { %v6871_v8 = vpop.f32.mrf.mxu2  ;;  %v6785_v36 = vpop.f32.mrf.mxu1 }
 0x6d7   : > { %v6872_v12 = vadd.f32 %v6871_v8, %v6783_v43  ;;  %6735 = vmatmul.bf16.gmra.mxu3 %v9110_v60  ;;  %v9153_v43 = vld [vmem:[#allocation2 + $0x3c0] sm:$0xf]  ;;  %v9868_v60 = vld [vmem:[#allocation2 + $0x3e0] sm:$0xf0] }
 0x6d8   : > { %v6960_v2 = vpop.f32.mrf.mxu0  ;;  %v9154_v46 = vor.u32 %v9868_v60, %v9153_v43 }
 0x6d9   : > { %6824 = vmatmul.bf16.gmra.mxu1 %v9114_v51  ;;  %v12479_v32 = vadd.f32 %v6960_v2, %v6872_v12 }
 0x6da   : > { %v6696_v11 = vpop.f32.mrf.mxu3 }
 0x6db   : > { %6913 = vmatmul.bf16.gmra.mxu2 %v9118_v33  ;;  %v6697_v25 = vadd.f32 %v6696_v11, %v12264_v27 }
 0x6dd   : > { %v6786_v63 = vadd.f32 %v6785_v36, %v6697_v25  ;;  %v9150_v36 = vor.u32 %v9863_v35, %v9147_v13  ;;  %v9864_v25 = vld [vmem:[#allocation2 + $0x3c4] sm:$0xf]  ;;  %v9189_v13 = vld [vmem:[#allocation2 + $0x408] sm:$0xf] }
 0x6de   : > { %v6874_v49 = vpop.f32.mrf.mxu2  ;;  %v6787_v42 = vpop.f32.mrf.mxu1  ;;  %v9158_v48 = vor.u32 %v9864_v25, %v9155_v1 }
 0x6df   : > { %v6875_v38 = vadd.f32 %v6874_v49, %v6786_v63 }
 0x6e0   : > { %v6963_v23 = vpop.f32.mrf.mxu0 }
 0x6e1   : > { %v12485_v47 = vadd.f32 %v6963_v23, %v6875_v38  ;;  %v9181_v38 = vld [vmem:[#allocation2 + $0x400] sm:$0xf]  ;;  %v9876_v23 = vld [vmem:[#allocation2 + $0x420] sm:$0xf0] }
 0x6e2   : > { %v6698_v59 = vpop.f32.mrf.mxu3 }
 0x6e3   : > { %v6699_v27 = vadd.f32 %v6698_v59, %v12279_v61  ;;  %7002 = vmatmul.bf16.gmra.mxu0 %v9122_v21  ;;  %v9872_v59 = vld [vmem:[#allocation2 + $0x404] sm:$0xf] }
 0x6e5   : > { %v6788_v40 = vadd.f32 %v6787_v42, %v6699_v27 }
 0x6e6   : > { %v6876_v41 = vpop.f32.mrf.mxu2  ;;  %v6790_v30 = vpop.f32.mrf.mxu1 }
 0x6e7   : > { %v6877_v8 = vadd.f32 %v6876_v41, %v6788_v40  ;;  %6740 = vmatmul.bf16.gmra.mxu3 %v9146_v53  ;;  %v9877_v40 = vld [vmem:[#allocation2 + $0x428] sm:$0xf0]  ;;  %v9186_v41 = vor.u32 %v9872_v59, %v9183_v22 }
 0x6e8   : > { %v6965_v34 = vpop.f32.mrf.mxu0  ;;  %v9190_v43 = vor.u32 %v9877_v40, %v9189_v13 }
 0x6e9   : > { %6829 = vmatmul.bf16.gmra.mxu1 %v9150_v36  ;;  %v12488_v12 = vadd.f32 %v6965_v34, %v6877_v8 }
 0x6ea   : > { %v6701_v51 = vpop.f32.mrf.mxu3 }
 0x6eb   : > { %6918 = vmatmul.bf16.gmra.mxu2 %v9154_v46  ;;  %v6702_v61 = vadd.f32 %v6701_v51, %v12306_v56  ;;  %v9182_v56 = vor.u32 %v9876_v23, %v9181_v38  ;;  %v9873_v51 = vld [vmem:[#allocation2 + $0x40c] sm:$0xf]  ;;  %v9219_v38 = vld [vmem:[#allocation2 + $0x46c] sm:$0xf0] }
 0x6ec   : > { %v9225_v23 = vld [vmem:[#allocation2 + $0x450] sm:$0xf] }
 0x6ed   : > { %v6791_v2 = vadd.f32 %v6790_v30, %v6702_v61  ;;  %v9191_v61 = vld [vmem:[#allocation2 + $0x42c] sm:$0xf0] }
 0x6ee   : > { %v6879_v33 = vpop.f32.mrf.mxu2  ;;  %v6792_v11 = vpop.f32.mrf.mxu1  ;;  %v9194_v25 = vor.u32 %v9873_v51, %v9191_v61 }
 0x6ef   : > { %v6880_v63 = vadd.f32 %v6879_v33, %v6791_v2 }
 0x6f0   : > { %v6968_v49 = vpop.f32.mrf.mxu0 }
 0x6f1   : > { %v12491_v42 = vadd.f32 %v6968_v49, %v6880_v63  ;;  %v9217_v63 = vld [vmem:[#allocation2 + $0x448] sm:$0xf]  ;;  %v9885_v49 = vld [vmem:[#allocation2 + $0x468] sm:$0xf0] }
 0x6f2   : > { %v6703_v57 = vpop.f32.mrf.mxu3  ;;  %v9218_v59 = vor.u32 %v9885_v49, %v9217_v63 }
 0x6f3   : > { %v6704_v21 = vadd.f32 %v6703_v57, %v12338_v44  ;;  %7007 = vmatmul.bf16.gmra.mxu0 %v9158_v48  ;;  %v9881_v57 = vld [vmem:[#allocation2 + $0x44c] sm:$0xf] }
 0x6f5   : > { %v6793_v19 = vadd.f32 %v6792_v11, %v6704_v21 }
 0x6f6   : > { %v6881_v27 = vpop.f32.mrf.mxu2  ;;  %v6795_v35 = vpop.f32.mrf.mxu1 }
 0x6f7   : > { %v6882_v53 = vadd.f32 %v6881_v27, %v6793_v19  ;;  %6745 = vmatmul.bf16.gmra.mxu3 %v9182_v56  ;;  %v9222_v27 = vor.u32 %v9881_v57, %v9219_v38 }
 0x6f8   : > { %v6970_v30 = vpop.f32.mrf.mxu0 }
 0x6f9   : > { %6834 = vmatmul.bf16.gmra.mxu1 %v9186_v41  ;;  %v12494_v60 = vadd.f32 %v6970_v30, %v6882_v53  ;;  %v9882_v41 = vld [vmem:[#allocation2 + $0x454] sm:$0xf]  ;;  %v9227_v30 = vld [vmem:[#allocation2 + $0x474] sm:$0xf0] }
 0x6fa   : > { %v6706_v8 = vpop.f32.mrf.mxu3 }
 0x6fb   : > { %6923 = vmatmul.bf16.gmra.mxu2 %v9190_v43  ;;  %v6707_v44 = vadd.f32 %v6706_v8, %v12356_v20  ;;  %v9886_v20 = vld [vmem:[#allocation2 + $0x470] sm:$0xf0] }
 0x6fd   : > { %v6796_v36 = vadd.f32 %v6795_v35, %v6707_v44  ;;  %v9226_v35 = vor.u32 %v9886_v20, %v9225_v23 }
 0x6fe   : > { %v6884_v34 = vpop.f32.mrf.mxu2  ;;  %v6797_v46 = vpop.f32.mrf.mxu1 }
 0x6ff   : > { %v6885_v2 = vadd.f32 %v6884_v34, %v6796_v36  ;;  %v9230_v34 = vor.u32 %v9882_v41, %v9227_v30 }
 0x700   : > { %v6973_v33 = vpop.f32.mrf.mxu0 }
 0x701   : > { %v12497_v11 = vadd.f32 %v6973_v33, %v6885_v2  ;;  %v8693_v2 = vld [vmem:[#allocation2 + $0x20] sm:$0xf]  ;;  %v9752_v33 = vld [vmem:[#allocation2 + $0x40] sm:$0xf0] }
 0x702   : > { %v6708_v1 = vpop.f32.mrf.mxu3  ;;  %v8694_v63 = vor.u32 %v9752_v33, %v8693_v2 }
 0x703   : > { %v6709_v48 = vadd.f32 %v6708_v1, %v12371_v29  ;;  %7012 = vmatmul.bf16.gmra.mxu0 %v9194_v25 }
 0x705   : > { %v6798_v21 = vadd.f32 %v6797_v46, %v6709_v48 }
 0x706   : > { %v6886_v22 = vpop.f32.mrf.mxu2  ;;  %v6800_v19 = vpop.f32.mrf.mxu1 }
 0x707   : > { %v6887_v56 = vadd.f32 %v6886_v22, %v6798_v21  ;;  %6750 = vmatmul.bf16.gmra.mxu3 %v9218_v59 }
 0x708   : > { %v6975_v13 = vpop.f32.mrf.mxu0 }
 0x709   : > { %6839 = vmatmul.bf16.gmra.mxu1 %v9222_v27  ;;  %v12500_v40 = vadd.f32 %v6975_v13, %v6887_v56  ;;  %v9761_v13 = vld [vmem:[#allocation2 + $0x88] sm:$0xf0] }
 0x70a   : > { %v6711_v53 = vpop.f32.mrf.mxu3 }
 0x70b   : > { %v6712_v29 = vadd.f32 %v6711_v53, %v12374_v16  ;;  %6928 = vmatmul.bf16.gmra.mxu2 %v9226_v35  ;;  %v8729_v35 = vld [vmem:[#allocation2 + $0x68] sm:$0xf] }
 0x70c   : > { %v8730_v41 = vor.u32 %v9761_v13, %v8729_v35 }
 0x70d   : > { %v6801_v43 = vadd.f32 %v6800_v19, %v6712_v29 }
 0x70e   : > { %v6889_v8 = vpop.f32.mrf.mxu2  ;;  %v6802_v44 = vpop.f32.mrf.mxu1 }
 0x70f   : > { %v6890_v36 = vadd.f32 %v6889_v8, %v6801_v43 }
 0x710   : > { %v6978_v46 = vpop.f32.mrf.mxu0 }
 0x711   : > { %v12503_v51 = vadd.f32 %v6978_v46, %v6890_v36 }
 0x712   : > { %v6713_v61 = vpop.f32.mrf.mxu3 }
 0x713   : > { %v6714_v25 = vadd.f32 %v6713_v61, %v12377_v52  ;;  %7017 = vmatmul.bf16.gmra.mxu0 %v9230_v34 }
 0x715   : > { %v6803_v1 = vadd.f32 %v6802_v44, %v6714_v25 }
 0x716   : > { %v6891_v16 = vpop.f32.mrf.mxu2  ;;  %v6805_v49 = vpop.f32.mrf.mxu1 }
 0x717   : > { %v6892_v48 = vadd.f32 %v6891_v16, %v6803_v1  ;;  %7031 = vmatmul.bf16.vlgmr.msra.gmra.mxu3 %v8694_v63  ;;  %v8765_v63 = vld [vmem:[#allocation2 + $0xb0] sm:$0xf]  ;;  %v9770_v16 = vld [vmem:[#allocation2 + $0xd0] sm:$0xf0] }
 0x718   : > { %v6980_v57 = vpop.f32.mrf.mxu0 }
 0x719   : > { %v12506_v38 = vadd.f32 %v6980_v57, %v6892_v48  ;;  %v8766_v57 = vor.u32 %v9770_v16, %v8765_v63 }
 0x71a   : > { %v6716_v23 = vpop.f32.mrf.mxu3 }
 0x71b   : > { %v6717_v20 = vadd.f32 %v6716_v23, %v12386_v15 }
 0x71d   : > { %v6806_v21 = vadd.f32 %v6805_v49, %v6717_v20 }
 0x71e   : > { %v6894_v59 = vpop.f32.mrf.mxu2  ;;  %v6807_v22 = vpop.f32.mrf.mxu1 }
 0x71f   : > { %v6895_v19 = vadd.f32 %v6894_v59, %v6806_v21 }
 0x720   : > { %v6983_v56 = vpop.f32.mrf.mxu0 }
 0x721   : > { %v12509_v27 = vadd.f32 %v6983_v56, %v6895_v19 }
 0x722   : > { %v6718_v52 = vpop.f32.mrf.mxu3 }
 0x723   : > { %v6719_v53 = vadd.f32 %v6718_v52, %v12394_v18 }
 0x725   : > { %v6808_v29 = vadd.f32 %v6807_v22, %v6719_v53 }
 0x726   : > { %v6896_v30 = vpop.f32.mrf.mxu2  ;;  %v6810_v8 = vpop.f32.mrf.mxu1 }
 0x727   : > { %v6897_v43 = vadd.f32 %v6896_v30, %v6808_v29  ;;  %7036 = vmatmul.bf16.gmra.mxu3 %v8730_v41  ;;  %v9779_v41 = vld [vmem:[#allocation2 + $0x118] sm:$0xf0] }
 0x728   : > { %v6985_v44 = vpop.f32.mrf.mxu0 }
 0x729   : > { %v12512_v15 = vadd.f32 %v6985_v44, %v6897_v43 }
 0x72a   : > { %v6721_v36 = vpop.f32.mrf.mxu3 }
 0x72b   : > { %v6722_v34 = vadd.f32 %v6721_v36, %v12397_v3  ;;  %v8837_v36 = vld [vmem:[#allocation2 + $0x140] sm:$0xf] }
 0x72d   : > { %v6811_v46 = vadd.f32 %v6810_v8, %v6722_v34  ;;  %v9788_v34 = vld [vmem:[#allocation2 + $0x160] sm:$0xf0] }
 0x72e   : > { %v6899_v61 = vpop.f32.mrf.mxu2  ;;  %v6812_v1 = vpop.f32.mrf.mxu1 }
 0x72f   : > { %v6900_v2 = vadd.f32 %v6899_v61, %v6811_v46  ;;  %v8838_v61 = vor.u32 %v9788_v34, %v8837_v36  ;;  %v7162_v34 = vld [vmem:[%s13193_s9 + $0x68] sm:$0xff] }
 0x730   : > { %v6988_v33 = vpop.f32.mrf.mxu0 }
 0x731   : > { %v12515_v25 = vadd.f32 %v6988_v33, %v6900_v2 }
 0x732   : > { %v6723_v18 = vpop.f32.mrf.mxu3 }
 0x733   : > { %v6724_v49 = vadd.f32 %v6723_v18, %v12400_v54  ;;  %v8801_v54 = vld [vmem:[#allocation2 + $0xf8] sm:$0xf]  ;;  %v9797_v18 = vld [vmem:[#allocation2 + $0x1a8] sm:$0xf0] }
 0x734   : > { %v8802_v43 = vor.u32 %v9779_v41, %v8801_v54  ;;  %v7163_v54 = vld [vmem:[%s13193_s9 + $0x70] sm:$0xff] }
 0x735   : > { %v6813_v48 = vadd.f32 %v6812_v1, %v6724_v49  ;;  %v8873_v1 = vld [vmem:[#allocation2 + $0x188] sm:$0xf] }
 0x736   : > { %v6901_v23 = vpop.f32.mrf.mxu2  ;;  %v6815_v19 = vpop.f32.mrf.mxu1 }
 0x737   : > { %v6902_v20 = vadd.f32 %v6901_v23, %v6813_v48  ;;  %7041 = vmatmul.bf16.gmra.mxu3 %v8766_v57  ;;  %v8909_v48 = vld [vmem:[#allocation2 + $0x1d0] sm:$0xf]  ;;  %v9806_v57 = vld [vmem:[#allocation2 + $0x1f0] sm:$0xf0] }
 0x738   : > { %v6990_v21 = vpop.f32.mrf.mxu0 }
 0x739   : > { %v12518_v59 = vadd.f32 %v6990_v21, %v6902_v20 }
 0x73a   : > { %v6726_v3 = vpop.f32.mrf.mxu3 }
 0x73b   : > { %v6727_v22 = vadd.f32 %v6726_v3, %v12406_v4  ;;  %v8945_v3 = vld [vmem:[#allocation2 + $0x218] sm:$0xf] }
 0x73d   : > { %v6816_v56 = vadd.f32 %v6815_v19, %v6727_v22  ;;  %v9815_v22 = vld [vmem:[#allocation2 + $0x238] sm:$0xf0] }
 0x73e   : > { %v6904_v52 = vpop.f32.mrf.mxu2 }
 0x73f   : > { %v6905_v35 = vadd.f32 %v6904_v52, %v6816_v56  ;;  %v7164_v56 = vld [vmem:[%s13193_s9 + $0x78] sm:$0xff] }
 0x740   : > { %v6993_v13 = vpop.f32.mrf.mxu0  ;;  %7165 = vmatpush.msra.mxu1 %v7164_v56  ;;  %7288 = vmatpush.msra.mxu2 %v7164_v56 }
 0x741   : > { %v12521_v53 = vadd.f32 %v6993_v13, %v6905_v35  ;;  %v8981_v35 = vld [vmem:[#allocation2 + $0x260] sm:$0xf]  ;;  %v9824_v13 = vld [vmem:[#allocation2 + $0x280] sm:$0xf0] }
 0x742   : > { %v6728_v29 = vpop.f32.mrf.mxu3  ;;  %7166 = vmatpush.msra.mxu1 %v7163_v54  ;;  %7289 = vmatpush.msra.mxu2 %v7163_v54 }
 0x743   : > { %v12524_v30 = vadd.f32 %v6728_v29, %v12409_v31 }
 0x744   : > { %7167 = vmatpush.msra.mxu1 %v7162_v34  ;;  %7290 = vmatpush.msra.mxu2 %v7162_v34 }
 0x747   : > { %7046 = vmatmul.bf16.gmra.mxu3 %v8802_v43 }
 0x74a   : > { %v6731_v8 = vpop.f32.mrf.mxu3 }
 0x74b   : > { %v12527_v44 = vadd.f32 %v6731_v8, %v12412_v28  ;;  %v8874_v28 = vor.u32 %v9797_v18, %v8873_v1  ;;  %v9017_v8 = vld [vmem:[#allocation2 + $0x2a8] sm:$0xf]  ;;  %v9842_v1 = vld [vmem:[#allocation2 + $0x310] sm:$0xf0] }
 0x752   : > { %v6733_v4 = vpop.f32.mrf.mxu3 }
 0x753   : > { %v12530_v46 = vadd.f32 %v6733_v4, %v12415_v37  ;;  %v9833_v4 = vld [vmem:[#allocation2 + $0x2c8] sm:$0xf0] }
 0x757   : > { %7051 = vmatmul.bf16.gmra.mxu3 %v8838_v61 }
 0x75a   : > { %v6736_v2 = vpop.f32.mrf.mxu3 }
 0x75b   : > { %v12533_v33 = vadd.f32 %v6736_v2, %v12421_v17  ;;  %v8910_v17 = vor.u32 %v9806_v57, %v8909_v48  ;;  %v9089_v48 = vld [vmem:[#allocation2 + $0x338] sm:$0xf]  ;;  %v9851_v57 = vld [vmem:[#allocation2 + $0x358] sm:$0xf0] }
 0x762   : > { %v6738_v31 = vpop.f32.mrf.mxu3 }
 0x763   : > { %v12536_v63 = vadd.f32 %v6738_v31, %v12424_v5  ;;  %v9053_v31 = vld [vmem:[#allocation2 + $0x2f0] sm:$0xf] }
 0x767   : > { %7056 = vmatmul.bf16.gmra.mxu3 %v8874_v28  ;;  %v7161_v28 = vld [vmem:[%s13193_s9 + $0x60] sm:$0xff] }
 0x768   : > { %7168 = vmatpush.msra.mxu1 %v7161_v28  ;;  %7291 = vmatpush.msra.mxu2 %v7161_v28 }
 0x76a   : > { %v6741_v16 = vpop.f32.mrf.mxu3 }
 0x76b   : > { %v12539_v49 = vadd.f32 %v6741_v16, %v12427_v6  ;;  %v8946_v6 = vor.u32 %v9815_v22, %v8945_v3  ;;  %v9125_v22 = vld [vmem:[#allocation2 + $0x380] sm:$0xf] }
 0x772   : > { %v6743_v37 = vpop.f32.mrf.mxu3 }
 0x773   : > { %v12542_v23 = vadd.f32 %v6743_v37, %v12430_v45 }
 0x777   : > { %7061 = vmatmul.bf16.gmra.mxu3 %v8910_v17 }
 0x77a   : > { %v6746_v20 = vpop.f32.mrf.mxu3 }
 0x77b   : > { %v12545_v21 = vadd.f32 %v6746_v20, %v12436_v0  ;;  %v7160_v20 = vld [vmem:[%s13193_s9 + $0x58] sm:$0xff] }
 0x77c   : > { %7169 = vmatpush.msra.mxu1 %v7160_v20  ;;  %7292 = vmatpush.msra.mxu2 %v7160_v20 }
 0x782   : > { %v6748_v5 = vpop.f32.mrf.mxu3 }
 0x783   : > { %v12548_v19 = vadd.f32 %v6748_v5, %v12439_v26  ;;  %v8982_v26 = vor.u32 %v9824_v13, %v8981_v35  ;;  %v9161_v13 = vld [vmem:[#allocation2 + $0x3c8] sm:$0xf] }
 0x787   : > { %7066 = vmatmul.bf16.gmra.mxu3 %v8946_v6  ;;  %v9860_v6 = vld [vmem:[#allocation2 + $0x3a0] sm:$0xf0] }
 0x78a   : > { %v6751_v45 = vpop.f32.mrf.mxu3 }
 0x78b   : > { %v12554_v52 = vadd.f32 %v6751_v45, %v12442_v24  ;;  %v7159_v45 = vld [vmem:[%s13193_s9 + $0x50] sm:$0xff] }
 0x78c   : > { %7170 = vmatpush.msra.mxu1 %v7159_v45  ;;  %7293 = vmatpush.msra.mxu2 %v7159_v45 }
 0x792   : > { %v6753_v0 = vpop.f32.mrf.mxu3 }
 0x793   : > { %v12557_v29 = vadd.f32 %v6753_v0, %v12447_v7  ;;  %v9018_v7 = vor.u32 %v9833_v4, %v9017_v8  ;;  %v9197_v4 = vld [vmem:[#allocation2 + $0x410] sm:$0xf] }
 0x797   : > { %7071 = vmatmul.bf16.gmra.mxu3 %v8982_v26  ;;  %v9869_v26 = vld [vmem:[#allocation2 + $0x3e8] sm:$0xf0] }
 0x79a   : > { %v7032_v41 = vpop.f32.mrf.mxu3 }
 0x79b   : > { %v12563_v43 = vadd.f32 %v7032_v41, %v12456_v9  ;;  %v7158_v41 = vld [vmem:[%s13193_s9 + $0x48] sm:$0xff] }
 0x79c   : > { %7171 = vmatpush.msra.mxu1 %v7158_v41  ;;  %7294 = vmatpush.msra.mxu2 %v7158_v41 }
 0x79d   : > { %13306 = vst [vmem:[#allocation16_spill] sm:$0xff] %v12563_v43 }
 0x7a2   : > { %v7034_v24 = vpop.f32.mrf.mxu3 }
 0x7a3   : > { %v12566_v36 = vadd.f32 %v7034_v24, %v12458_v55  ;;  %v9054_v55 = vor.u32 %v9842_v1, %v9053_v31  ;;  %v9887_v1 = vld [vmem:[#allocation2 + $0x478] sm:$0xf0] }
 0x7a5   : > { %13307 = vst [vmem:[#allocation17_spill] sm:$0xff] %v12566_v36 }
 0x7a7   : > { %7076 = vmatmul.bf16.gmra.mxu3 %v9018_v7  ;;  %v9878_v7 = vld [vmem:[#allocation2 + $0x430] sm:$0xf0] }
 0x7aa   : > { %v7037_v61 = vpop.f32.mrf.mxu3 }
 0x7ab   : > { %v12572_v2 = vadd.f32 %v7037_v61, %v12461_v39  ;;  %v7157_v61 = vld [vmem:[%s13193_s9 + $0x40] sm:$0xff] }
 0x7ac   : > { %7172 = vmatpush.msra.mxu1 %v7157_v61  ;;  %7295 = vmatpush.msra.mxu2 %v7157_v61 }
 0x7ad   : > { %13308 = vst [vmem:[#allocation19_spill] sm:$0xff] %v12572_v2 }
 0x7b2   : > { %v7039_v9 = vpop.f32.mrf.mxu3 }
 0x7b3   : > { %v12575_v18 = vadd.f32 %v7039_v9, %v12464_v62  ;;  %v9090_v62 = vor.u32 %v9851_v57, %v9089_v48 }
 0x7b5   : > { %13309 = vst [vmem:[#allocation21_spill] sm:$0xff] %v12575_v18 }
 0x7b7   : > { %7081 = vmatmul.bf16.gmra.mxu3 %v9054_v55 }
 0x7ba   : > { %v7042_v16 = vpop.f32.mrf.mxu3 }
 0x7bb   : > { %v12581_v37 = vadd.f32 %v7042_v16, %v12470_v14  ;;  %v7156_v16 = vld [vmem:[%s13193_s9 + $0x38] sm:$0xff] }
 0x7bc   : > { %7173 = vmatpush.msra.mxu1 %v7156_v16  ;;  %7296 = vmatpush.msra.mxu2 %v7156_v16 }
 0x7bd   : > { %13310 = vst [vmem:[#allocation23_spill] sm:$0xff] %v12581_v37 }
 0x7c2   : > { %v7044_v39 = vpop.f32.mrf.mxu3 }
 0x7c3   : > { %v12584_v17 = vadd.f32 %v7044_v39, %v12473_v58  ;;  %v9126_v58 = vor.u32 %v9860_v6, %v9125_v22  ;;  %v12645_v22 = vpop.f32.mrf.mxu2  ;;  %v12647_v6 = vpop.f32.mrf.mxu0 }
 0x7c5   : > { %13311 = vst [vmem:[#allocation25_spill] sm:$0xff] %v12584_v17 }
 0x7c7   : > { %7086 = vmatmul.bf16.gmra.mxu3 %v9090_v62 }
 0x7ca   : > { %v7047_v5 = vpop.f32.mrf.mxu3 }
 0x7cb   : > { %v12590_v3 = vadd.f32 %v7047_v5, %v12476_v10 }
 0x7cd   : > { %13312 = vst [vmem:[#allocation27_spill] sm:$0xff] %v12590_v3 }
 0x7d2   : > { %v7049_v14 = vpop.f32.mrf.mxu3 }
 0x7d3   : > { %v12593_v56 = vadd.f32 %v7049_v14, %v12479_v32  ;;  %v9162_v32 = vor.u32 %v9869_v26, %v9161_v13  ;;  %v12657_v13 = vpop.f32.mrf.mxu0  ;;  %v7153_v26 = vld [vmem:[%s13193_s9 + $0x20] sm:$0xff] }
 0x7d5   : > { %13313 = vst [vmem:[#allocation28_spill] sm:$0xff] %v12593_v56 }
 0x7d7   : > { %7091 = vmatmul.bf16.gmra.mxu3 %v9126_v58 }
 0x7da   : > { %v7052_v0 = vpop.f32.mrf.mxu3 }
 0x7db   : > { %v12599_v35 = vadd.f32 %v7052_v0, %v12485_v47 }
 0x7e2   : > { %v7054_v10 = vpop.f32.mrf.mxu3 }
 0x7e3   : > { %v12602_v54 = vadd.f32 %v7054_v10, %v12488_v12  ;;  %v9198_v12 = vor.u32 %v9878_v7, %v9197_v4  ;;  %v7152_v7 = vld [vmem:[%s13193_s9 + $0x18] sm:$0xff] }
 0x7e7   : > { %7096 = vmatmul.bf16.gmra.mxu3 %v9162_v32 }
 0x7ea   : > { %v7057_v24 = vpop.f32.mrf.mxu3 }
 0x7eb   : > { %v12608_v8 = vadd.f32 %v7057_v24, %v12491_v42  ;;  %v9233_v42 = vld [vmem:[#allocation2 + $0x458] sm:$0xf] }
 0x7ed   : > { %13314 = vst [vmem:[#allocation29_spill] sm:$0xff] %v12608_v8 }
 0x7f2   : > { %v7059_v47 = vpop.f32.mrf.mxu3 }
 0x7f3   : > { %v12611_v34 = vadd.f32 %v7059_v47, %v12494_v60  ;;  %v9234_v60 = vor.u32 %v9887_v1, %v9233_v42  ;;  %v12665_v47 = vpop.f32.mrf.mxu0 }
 0x7f5   : > { %13315 = vst [vmem:[#allocation30_spill] sm:$0xff] %v12611_v34 }
 0x7f7   : > { %7101 = vmatmul.bf16.gmra.mxu3 %v9198_v12 }
 0x7fa   : > { %v7062_v9 = vpop.f32.mrf.mxu3 }
 0x7fb   : > { %v12617_v31 = vadd.f32 %v7062_v9, %v12497_v11  ;;  %v12672_v61 = vpop.f32.mrf.mxu0 }
 0x7fd   : > { %13316 = vst [vmem:[#allocation31_spill] sm:$0xff] %v12617_v31 }
 0x802   : > { %v7064_v55 = vpop.f32.mrf.mxu3 }
 0x803   : > { %v12620_v28 = vadd.f32 %v7064_v55, %v12500_v40  ;;  %v7155_v40 = vld [vmem:[%s13193_s9 + $0x30] sm:$0xff] }
 0x804   : > { %7174 = vmatpush.msra.mxu1 %v7155_v40  ;;  %7297 = vmatpush.msra.mxu2 %v7155_v40 }
 0x805   : > { %13317 = vst [vmem:[#allocation33_spill] sm:$0xff] %v12620_v28 }
 0x807   : > { %7106 = vmatmul.bf16.gmra.mxu3 %v9234_v60  ;;  %v7151_v60 = vld [vmem:[%s13193_s9 + $0x10] sm:$0xff] }
 0x80a   : > { %v7067_v39 = vpop.f32.mrf.mxu3 }
 0x80b   : > { %v12626_v48 = vadd.f32 %v7067_v39, %v12503_v51  ;;  %v7154_v51 = vld [vmem:[%s13193_s9 + $0x28] sm:$0xff]  ;;  %v7112_v39 = vadd.f32 %v12566_v36, %v12563_v43 }
 0x80c   : > { %7175 = vmatpush.msra.mxu1 %v7154_v51  ;;  %7298 = vmatpush.msra.mxu2 %v7154_v51 }
 0x80e   : > { %7176 = vmatpush.msra.mxu1 %v7153_v26  ;;  %7299 = vmatpush.msra.mxu2 %v7153_v26 }
 0x810   : > { %7177 = vmatpush.msra.mxu1 %v7152_v7  ;;  %7300 = vmatpush.msra.mxu2 %v7152_v7 }
 0x812   : > { %v7069_v11 = vpop.f32.mrf.mxu3  ;;  %7178 = vmatpush.msra.mxu1 %v7151_v60  ;;  %7301 = vmatpush.msra.mxu2 %v7151_v60 }
 0x813   : > { %v12629_v57 = vadd.f32 %v7069_v11, %v12506_v38  ;;  %v12643_v38 = vpop.f32.mrf.mxu1 }
 0x81a   : > { %v7072_v62 = vpop.f32.mrf.mxu3 }
 0x81b   : > { %v12635_v20 = vadd.f32 %v7072_v62, %v12509_v27  ;;  %v6820_v45 = vpop.f32.mrf.mxu1  ;;  %v7113_v62 = vadd.f32 %v7112_v39, %v12572_v2  ;;  %v7150_v39 = vld [vmem:[%s13193_s9 + $0x8] sm:$0xff] }
 0x81c   : > { %7179 = vmatpush.msra.mxu1 %v7150_v39  ;;  %7302 = vmatpush.msra.mxu2 %v7150_v39 }
 0x81d   : > { %v7114_v51 = vadd.f32 %v7113_v62, %v12575_v18 }
 0x822   : > { %v7074_v5 = vpop.f32.mrf.mxu3 }
 0x823   : > { %v12638_v14 = vadd.f32 %v7074_v5, %v12512_v15  ;;  %v12652_v15 = vpop.f32.mrf.mxu2  ;;  %v6822_v32 = vpop.f32.mrf.mxu1 }
 0x82a   : > { %v7077_v58 = vpop.f32.mrf.mxu3 }
 0x82b   : > { %v12650_v27 = vadd.f32 %v7077_v58, %v12515_v25  ;;  %v6911_v24 = vpop.f32.mrf.mxu2  ;;  %v7115_v58 = vadd.f32 %v7114_v51, %v12581_v37 }
 0x832   : > { %v7079_v0 = vpop.f32.mrf.mxu3 }
 0x833   : > { %v12655_v10 = vadd.f32 %v7079_v0, %v12518_v59  ;;  %v6825_v59 = vpop.f32.mrf.mxu1  ;;  %v6914_v12 = vpop.f32.mrf.mxu2  ;;  %v7116_v0 = vadd.f32 %v7115_v58, %v12584_v17 }
 0x835   : > { %v7117_v7 = vadd.f32 %v7116_v0, %v12590_v3 }
 0x837   : > { %v7118_v36 = vadd.f32 %v7117_v7, %v12593_v56 }
 0x839   : > { %v7119_v62 = vadd.f32 %v7118_v36, %v12599_v35  ;;  %v6818_v36 = vadd.f32 %v12643_v38, %v12524_v30 }
 0x83a   : > { %v7082_v41 = vpop.f32.mrf.mxu3 }
 0x83b   : > { %v12663_v25 = vadd.f32 %v7082_v41, %v12521_v53  ;;  %v6827_v42 = vpop.f32.mrf.mxu1  ;;  %v6916_v1 = vpop.f32.mrf.mxu2  ;;  %v7120_v51 = vadd.f32 %v7119_v62, %v12602_v54 }
 0x83c   : > { %v12674_v53 = vpop.f32.mrf.mxu0 }
 0x83d   : > { %v7121_v17 = vadd.f32 %v7120_v51, %v12608_v8  ;;  %v6821_v51 = vadd.f32 %v6820_v45, %v12527_v44  ;;  %v6828_v45 = vadd.f32 %v6827_v42, %v12536_v63 }
 0x83f   : > { %v7122_v0 = vadd.f32 %v7121_v17, %v12611_v34  ;;  %v6823_v17 = vadd.f32 %v6822_v32, %v12530_v46 }
 0x841   : > { %v7123_v7 = vadd.f32 %v7122_v0, %v12617_v31  ;;  %v6907_v0 = vadd.f32 %v12645_v22, %v6818_v36  ;;  %v6912_v44 = vadd.f32 %v6911_v24, %v6823_v17 }
 0x842   : > { %v12667_v4 = vpop.f32.mrf.mxu3 }
 0x843   : > { %v6830_v16 = vpop.f32.mrf.mxu1  ;;  %v12685_v40 = vpop.f32.mrf.mxu2  ;;  %v7124_v18 = vadd.f32 %v7123_v7, %v12620_v28  ;;  %v6996_v30 = vadd.f32 %v12647_v6, %v6907_v0 }
 0x844   : > { %v12688_v5 = vpop.f32.mrf.mxu0 }
 0x845   : > { %v7125_v50 = vadd.f32 %v7124_v18, %v12626_v48  ;;  %v6910_v18 = vadd.f32 %v12652_v15, %v6821_v51  ;;  %v12723_v32 = vadd.f32 %v12667_v4, %v6996_v30  ;;  %v6831_v15 = vadd.f32 %v6830_v16, %v12539_v49 }
 0x847   : > { %v7126_v39 = vadd.f32 %v7125_v50, %v12629_v57  ;;  %v6826_v50 = vadd.f32 %v6825_v59, %v12533_v33  ;;  %v6999_v46 = vadd.f32 %v12657_v13, %v6910_v18  ;;  %v6917_v59 = vadd.f32 %v6916_v1, %v6828_v45 }
 0x849   : > { %v7127_v8 = vadd.f32 %v7126_v39, %v12635_v20  ;;  %v6915_v36 = vadd.f32 %v6914_v12, %v6826_v50  ;;  %v7006_v49 = vadd.f32 %v12674_v53, %v6917_v59 }
 0x84a   : > { %v7087_v9 = vpop.f32.mrf.mxu3 }
 0x84b   : > { %v6832_v26 = vpop.f32.mrf.mxu1  ;;  %v6921_v60 = vpop.f32.mrf.mxu2  ;;  %v7128_v7 = vadd.f32 %v7127_v8, %v12638_v14  ;;  %v7001_v8 = vadd.f32 %v12665_v47, %v6912_v44  ;;  %v12728_v33 = vadd.f32 %v7087_v9, %v6999_v46  ;;  %v7004_v13 = vadd.f32 %v12672_v61, %v6915_v36  ;;  %v7149_v47 = vld [vmem:[%s13193_s9] sm:$0xff] }
 0x84c   : > { %v7010_v2 = vpop.f32.mrf.mxu0  ;;  %v6833_v24 = vadd.f32 %v6832_v26, %v12542_v23  ;;  %7180 = vmatpush.msra.mxu1 %v7149_v47  ;;  %7303 = vmatpush.msra.mxu2 %v7149_v47  ;;  %v6920_v23 = vadd.f32 %v12685_v40, %v6831_v15 }
 0x84d   : > { %v7129_v38 = vadd.f32 %v7128_v7, %v12650_v27 }
 0x84e   : > { %v7009_v51 = vadd.f32 %v12688_v5, %v6920_v23  ;;  %v13320_v23 = vld [vmem:[#allocation17_spill] sm:$0xff] }
 0x84f   : > { %v7130_v22 = vadd.f32 %v7129_v38, %v12655_v10 }
 0x851   : > { %v7131_v6 = vadd.f32 %v7130_v22, %v12663_v25 }
 0x852   : > { %v12676_v55 = vpop.f32.mrf.mxu3 }
 0x853   : > { %v6835_v37 = vpop.f32.mrf.mxu1  ;;  %v6924_v3 = vpop.f32.mrf.mxu2  ;;  %v7132_v42 = vadd.f32 %v7131_v6, %v12723_v32  ;;  %v12734_v4 = vadd.f32 %v12676_v55, %v7001_v8  ;;  %v6922_v55 = vadd.f32 %v6921_v60, %v6833_v24 }
 0x854   : > { %v7013_v56 = vpop.f32.mrf.mxu0  ;;  %v6836_v1 = vadd.f32 %v6835_v37, %v12545_v21 }
 0x855   : > { %v7133_v61 = vadd.f32 %v7132_v42, %v12728_v33  ;;  %v7011_v0 = vadd.f32 %v7010_v2, %v6922_v55  ;;  %v13318_v42 = vld [vmem:[#allocation26_spill] sm:$0xff] }
 0x856   : > { %v6925_v40 = vadd.f32 %v6924_v3, %v6836_v1 }
 0x857   : > { %v7134_v53 = vadd.f32 %v7133_v61, %v12734_v4  ;;  %v13321_v61 = vld [vmem:[#allocation19_spill] sm:$0xff] }
 0x858   : > { %v7014_v60 = vadd.f32 %v7013_v56, %v6925_v40 }
 0x85a   : > { %v12683_v11 = vpop.f32.mrf.mxu3 }
 0x85b   : > { %v6837_v62 = vpop.f32.mrf.mxu1  ;;  %v6926_v31 = vpop.f32.mrf.mxu2  ;;  %v12744_v16 = vadd.f32 %v12683_v11, %v7004_v13 }
 0x85c   : > { %v7015_v28 = vpop.f32.mrf.mxu0  ;;  %v6838_v26 = vadd.f32 %v6837_v62, %v12548_v19 }
 0x85d   : > { %v7135_v37 = vadd.f32 %v7134_v53, %v12744_v16 }
 0x85e   : > { %v6927_v11 = vadd.f32 %v6926_v31, %v6838_v26 }
 0x860   : > { %v7016_v18 = vadd.f32 %v7015_v28, %v6927_v11  ;;  %v13324_v11 = vld [vmem:[#allocation25_spill] sm:$0xff] }
 0x862   : > { %v12693_v41 = vpop.f32.mrf.mxu3 }
 0x863   : > { %v6840_v63 = vpop.f32.mrf.mxu1  ;;  %v6929_v12 = vpop.f32.mrf.mxu2  ;;  %v12750_v17 = vadd.f32 %v12693_v41, %v7006_v49 }
 0x864   : > { %v7018_v39 = vpop.f32.mrf.mxu0  ;;  %v6841_v21 = vadd.f32 %v6840_v63, %v12554_v52 }
 0x865   : > { %v7136_v19 = vadd.f32 %v7135_v37, %v12750_v17 }
 0x866   : > { %v6930_v50 = vadd.f32 %v6929_v12, %v6841_v21  ;;  %v13319_v12 = vld [vmem:[#allocation16_spill] sm:$0xff] }
 0x868   : > { %v7019_v38 = vadd.f32 %v7018_v39, %v6930_v50 }
 0x86a   : > { %v7097_v58 = vpop.f32.mrf.mxu3 }
 0x86b   : > { %v12754_v7 = vadd.f32 %v7097_v58, %v7009_v51  ;;  %v6842_v5 = vpop.f32.mrf.mxu1  ;;  %v6931_v52 = vpop.f32.mrf.mxu2  ;;  %v13322_v51 = vld [vmem:[#allocation21_spill] sm:$0xff] }
 0x86c   : > { %v6843_v41 = vadd.f32 %v6842_v5, %v12557_v29  ;;  %v7020_v56 = vpop.f32.mrf.mxu0 }
 0x86d   : > { %v7137_v2 = vadd.f32 %v7136_v19, %v12754_v7 }
 0x86e   : > { %v6932_v44 = vadd.f32 %v6931_v52, %v6843_v41 }
 0x870   : > { %v7021_v28 = vadd.f32 %v7020_v56, %v6932_v44 }
 0x872   : > { %v7099_v43 = vpop.f32.mrf.mxu3 }
 0x873   : > { %v12757_v62 = vadd.f32 %v7099_v43, %v7011_v0  ;;  %v13323_v0 = vld [vmem:[#allocation23_spill] sm:$0xff] }
 0x875   : > { %v7138_v58 = vadd.f32 %v7137_v2, %v12757_v62  ;;  %v13326_v2 = vld [vmem:[#allocation28_spill] sm:$0xff] }
 0x87a   : > { %v7102_v34 = vpop.f32.mrf.mxu3 }
 0x87b   : > { %v12761_v3 = vadd.f32 %v7102_v34, %v7014_v60 }
 0x87d   : > { %v7139_v43 = vadd.f32 %v7138_v58, %v12761_v3 }
 0x882   : > { %v7104_v9 = vpop.f32.mrf.mxu3 }
 0x883   : > { %v12764_v31 = vadd.f32 %v7104_v9, %v7016_v18  ;;  %v13325_v18 = vld [vmem:[#allocation27_spill] sm:$0xff] }
 0x885   : > { %v7140_v46 = vadd.f32 %v7139_v43, %v12764_v31 }
 0x88a   : > { %v7107_v30 = vpop.f32.mrf.mxu3 }
 0x88b   : > { %v12767_v45 = vadd.f32 %v7107_v30, %v7019_v38 }
 0x88d   : > { %v7141_v22 = vadd.f32 %v7140_v46, %v12767_v45 }
 0x892   : > { %v7109_v29 = vpop.f32.mrf.mxu3 }
 0x893   : > { %v12771_v34 = vadd.f32 %v7109_v29, %v7021_v28 }
 0x895   : > { %v7142_v8 = vadd.f32 %v7141_v22, %v12771_v34  ;;  %v13327_v22 = vld [vmem:[#allocation29_spill] sm:$0xff] }
 0x897   : > { %v7143_v36 = vrot.slane %v7142_v8, 4 }
 0x899   : > { %v7144_v15 = vadd.f32 %v7143_v36, %v7142_v8 }
 0x89b   : > { %v7145_v6 = vrot.slane %v7144_v15, 2 }
 0x89d   : > { %v7146_v59 = vadd.f32 %v7145_v6, %v7144_v15  ;;  %v13328_v15 = vld [vmem:[#allocation30_spill] sm:$0xff] }
 0x89f   : > { %v7147_v24 = vrot.slane %v7146_v59, 1 }
 0x8a1   : > { %v7148_v63 = vadd.f32 %v7147_v24, %v7146_v59  ;;  %v13329_v24 = vld [vmem:[#allocation31_spill] sm:$0xff] }
 0x8a3   : > { %7181 = vmatmul.f32.vlgmr.msra.gmra.mxu1 %v7148_v63 }
 0x920   : > { %v7182_v13 = vpop.f32.mrf.mxu1 }
 0x921   : > { %v7185_v47 = vmul.f32 %v7182_v13, %v13318_v42 }
 0x923   : > { %v12775_v49 = vperm.slane %v7185_v47, 0 }
 0x925   : > { %v12779_v9 = vsub.f32 %v13319_v12, %v12775_v49  ;;  %v12783_v1 = vsub.f32 %v13320_v23, %v12775_v49  ;;  %v12787_v55 = vsub.f32 %v13321_v61, %v12775_v49  ;;  %v12795_v53 = vsub.f32 %v13322_v51, %v12775_v49  ;;  %v13330_v12 = vld [vmem:[#allocation33_spill] sm:$0xff] }
 0x926   : > { %v12799_v40 = vsub.f32 %v13323_v0, %v12775_v49  ;;  %v12805_v60 = vsub.f32 %v13324_v11, %v12775_v49  ;;  %v12811_v30 = vsub.f32 %v13325_v18, %v12775_v49  ;;  %v12817_v52 = vsub.f32 %v13326_v2, %v12775_v49 }
 0x927   : > { %v7219_v26 = vmul.f32 %v12779_v9, %v12779_v9  ;;  %v7220_v39 = vmul.f32 %v12783_v1, %v12783_v1  ;;  %v7221_v21 = vmul.f32 %v12787_v55, %v12787_v55  ;;  %v7222_v19 = vmul.f32 %v12795_v53, %v12795_v53 }
 0x928   : > { %v7223_v50 = vmul.f32 %v12799_v40, %v12799_v40  ;;  %v7224_v38 = vmul.f32 %v12805_v60, %v12805_v60  ;;  %v12823_v56 = vsub.f32 %v12599_v35, %v12775_v49  ;;  %v7225_v44 = vmul.f32 %v12811_v30, %v12811_v30 }
 0x929   : > { %v7251_v37 = vadd.f32 %v7220_v39, %v7219_v26  ;;  %v12829_v28 = vsub.f32 %v12602_v54, %v12775_v49  ;;  %v7226_v46 = vmul.f32 %v12817_v52, %v12817_v52  ;;  %v12835_v8 = vsub.f32 %v13327_v22, %v12775_v49 }
 0x92a   : > { %v7227_v35 = vmul.f32 %v12823_v56, %v12823_v56  ;;  %v12841_v6 = vsub.f32 %v13328_v15, %v12775_v49  ;;  %v12847_v63 = vsub.f32 %v13329_v24, %v12775_v49  ;;  %v12853_v23 = vsub.f32 %v13330_v12, %v12775_v49 }
 0x92b   : > { %v7252_v5 = vadd.f32 %v7251_v37, %v7221_v21  ;;  %v7228_v54 = vmul.f32 %v12829_v28, %v12829_v28  ;;  %v7229_v13 = vmul.f32 %v12835_v8, %v12835_v8  ;;  %v12859_v39 = vsub.f32 %v12626_v48, %v12775_v49 }
 0x92c   : > { %v7230_v61 = vmul.f32 %v12841_v6, %v12841_v6  ;;  %v7231_v51 = vmul.f32 %v12847_v63, %v12847_v63  ;;  %v12865_v21 = vsub.f32 %v12629_v57, %v12775_v49  ;;  %v7232_v37 = vmul.f32 %v12853_v23, %v12853_v23 }
 0x92d   : > { %v7253_v41 = vadd.f32 %v7252_v5, %v7222_v19  ;;  %v12871_v19 = vsub.f32 %v12635_v20, %v12775_v49  ;;  %v7233_v48 = vmul.f32 %v12859_v39, %v12859_v39  ;;  %v12877_v18 = vsub.f32 %v12638_v14, %v12775_v49 }
 0x92e   : > { %v7234_v57 = vmul.f32 %v12865_v21, %v12865_v21  ;;  %v12907_v22 = vsub.f32 %v12728_v33, %v12775_v49  ;;  %v12925_v24 = vsub.f32 %v12750_v17, %v12775_v49 }
 0x92f   : > { %v7254_v58 = vadd.f32 %v7253_v41, %v7223_v50  ;;  %v12883_v41 = vsub.f32 %v12650_v27, %v12775_v49  ;;  %v7235_v20 = vmul.f32 %v12871_v19, %v12871_v19  ;;  %v7236_v14 = vmul.f32 %v12877_v18, %v12877_v18 }
 0x930   : > { %v7241_v33 = vmul.f32 %v12907_v22, %v12907_v22  ;;  %v7244_v17 = vmul.f32 %v12925_v24, %v12925_v24 }
 0x931   : > { %v7255_v43 = vadd.f32 %v7254_v58, %v7224_v38  ;;  %v12889_v38 = vsub.f32 %v12655_v10, %v12775_v49  ;;  %v7237_v27 = vmul.f32 %v12883_v41, %v12883_v41 }
 0x933   : > { %v7256_v29 = vadd.f32 %v7255_v43, %v7225_v44  ;;  %v12895_v44 = vsub.f32 %v12663_v25, %v12775_v49  ;;  %v7238_v10 = vmul.f32 %v12889_v38, %v12889_v38 }
 0x935   : > { %v7257_v36 = vadd.f32 %v7256_v29, %v7226_v46  ;;  %v12901_v46 = vsub.f32 %v12723_v32, %v12775_v49  ;;  %v7239_v25 = vmul.f32 %v12895_v44, %v12895_v44 }
 0x937   : > { %v7258_v59 = vadd.f32 %v7257_v36, %v7227_v35  ;;  %v12913_v36 = vsub.f32 %v12734_v4, %v12775_v49  ;;  %v7240_v32 = vmul.f32 %v12901_v46, %v12901_v46 }
 0x939   : > { %v7259_v47 = vadd.f32 %v7258_v59, %v7228_v54  ;;  %v12919_v54 = vsub.f32 %v12744_v16, %v12775_v49  ;;  %v7242_v4 = vmul.f32 %v12913_v36, %v12913_v36 }
 0x93b   : > { %v7260_v26 = vadd.f32 %v7259_v47, %v7229_v13  ;;  %v12931_v47 = vsub.f32 %v12754_v7, %v12775_v49  ;;  %v7243_v16 = vmul.f32 %v12919_v54, %v12919_v54 }
 0x93d   : > { %v7261_v0 = vadd.f32 %v7260_v26, %v7230_v61  ;;  %v12937_v61 = vsub.f32 %v12757_v62, %v12775_v49  ;;  %v7245_v7 = vmul.f32 %v12931_v47, %v12931_v47 }
 0x93f   : > { %v7262_v11 = vadd.f32 %v7261_v0, %v7231_v51  ;;  %v12943_v51 = vsub.f32 %v12761_v3, %v12775_v49  ;;  %v7246_v62 = vmul.f32 %v12937_v61, %v12937_v61 }
 0x941   : > { %v7263_v5 = vadd.f32 %v7262_v11, %v7232_v37  ;;  %v12949_v37 = vsub.f32 %v12764_v31, %v12775_v49  ;;  %v7247_v3 = vmul.f32 %v12943_v51, %v12943_v51 }
 0x943   : > { %v7264_v50 = vadd.f32 %v7263_v5, %v7233_v48  ;;  %v12955_v48 = vsub.f32 %v12767_v45, %v12775_v49  ;;  %v7248_v31 = vmul.f32 %v12949_v37, %v12949_v37 }
 0x945   : > { %v7265_v2 = vadd.f32 %v7264_v50, %v7234_v57  ;;  %v12961_v57 = vsub.f32 %v12771_v34, %v12775_v49 }
 0x947   : > { %v7266_v58 = vadd.f32 %v7265_v2, %v7235_v20  ;;  %v7249_v20 = vmul.f32 %v12955_v48, %v12955_v48  ;;  %v7250_v45 = vmul.f32 %v12961_v57, %v12961_v57 }
 0x949   : > { %v7267_v43 = vadd.f32 %v7266_v58, %v7236_v14 }
 0x94b   : > { %v7268_v29 = vadd.f32 %v7267_v43, %v7237_v27 }
 0x94d   : > { %v7269_v35 = vadd.f32 %v7268_v29, %v7238_v10 }
 0x94f   : > { %v7270_v15 = vadd.f32 %v7269_v35, %v7239_v25 }
 0x951   : > { %v7271_v59 = vadd.f32 %v7270_v15, %v7240_v32 }
 0x953   : > { %v7272_v13 = vadd.f32 %v7271_v59, %v7241_v33 }
 0x955   : > { %v7273_v12 = vadd.f32 %v7272_v13, %v7242_v4 }
 0x957   : > { %v7274_v26 = vadd.f32 %v7273_v12, %v7243_v16 }
 0x959   : > { %v7275_v0 = vadd.f32 %v7274_v26, %v7244_v17  ;;  %v7320_v17 = vld [vmem:[%s13191_s7] sm:$0x1] }
 0x95b   : > { %v7276_v11 = vadd.f32 %v7275_v0, %v7245_v7  ;;  %v12976_v7 = vld [vmem:[%s13192_s8] ss:$0 sm:$0xff] }
 0x95d   : > { %v7277_v5 = vadd.f32 %v7276_v11, %v7246_v62 }
 0x95f   : > { %v7278_v50 = vadd.f32 %v7277_v5, %v7247_v3 }
 0x961   : > { %v7279_v2 = vadd.f32 %v7278_v50, %v7248_v31 }
 0x963   : > { %v7280_v14 = vadd.f32 %v7279_v2, %v7249_v20 }
 0x965   : > { %v7281_v58 = vadd.f32 %v7280_v14, %v7250_v45 }
 0x967   : > { %v7282_v27 = vrot.slane %v7281_v58, 4 }
 0x969   : > { %v7283_v43 = vadd.f32 %v7282_v27, %v7281_v58 }
 0x96b   : > { %v7284_v10 = vrot.slane %v7283_v43, 2 }
 0x96d   : > { %v7285_v29 = vadd.f32 %v7284_v10, %v7283_v43 }
 0x96f   : > { %v7286_v25 = vrot.slane %v7285_v29, 1 }
 0x971   : > { %v7287_v34 = vadd.f32 %v7286_v25, %v7285_v29 }
 0x973   : > { %7304 = vmatmul.f32.vlgmr.msra.gmra.mxu2 %v7287_v34 }
 0x9f6   : > { %v7305_v49 = vpop.f32.mrf.mxu2 }
 0x9f7   : > { %v7308_v35 = vmul.f32 %v7305_v49, %v13318_v42 }
 0x9f9   : > { %v7309_v32 = vadd.f32 1e-05, %v7308_v35 }
 0x9fb   : > { %10029 = vrsqrt.f32 %v7309_v32  ;;  %vm7316_vm5 = vweird.f32 %v7309_v32 }
 0xa01   : > { %v10030_v15 = vpop.eup %10029 }
 0xa02   : > { %v7311_v33 = vmul.f32 %v10030_v15, %v7309_v32  ;;  %vm7317_vm4 = vweird.f32 %v10030_v15 }
 0xa03   : > { %vm7318_vm6 = vmor %vm7316_vm5, %vm7317_vm4 }
 0xa04   : > { %v7312_v59 = vmul.f32 %v10030_v15, %v7311_v33 }
 0xa06   : > { %v7313_v4 = vmul.f32 0.5, %v7312_v59 }
 0xa08   : > { %v7314_v13 = vsub.f32 1.5, %v7313_v4 }
 0xa0a   : > { %v7315_v16 = vmul.f32 %v10030_v15, %v7314_v13 }
 0xa0c   : > { %v7319_v12 = vsel %vm7318_vm6, %v10030_v15, %v7315_v16 }
 0xa0d   : > { %v7321_v26 = vmul.f32 %v7320_v17, %v7319_v12 }
 0xa0f   : > { %v7322_v42 = vperm.slane %v7321_v26, 0 }
 0xa11   : > { %v7323_v0 = vmul.f32 %v7322_v42, %v12779_v9  ;;  %v7324_v62 = vmul.f32 %v7322_v42, %v12783_v1  ;;  %v7325_v11 = vmul.f32 %v7322_v42, %v12787_v55  ;;  %v7326_v3 = vmul.f32 %v7322_v42, %v12795_v53 }
 0xa12   : > { %v7327_v5 = vmul.f32 %v7322_v42, %v12799_v40  ;;  %v7328_v31 = vmul.f32 %v7322_v42, %v12805_v60  ;;  %v7329_v20 = vmul.f32 %v7322_v42, %v12811_v30  ;;  %v7330_v2 = vmul.f32 %v7322_v42, %v12817_v52 }
 0xa13   : > { %v7359_v50 = vadd.f32 %v12976_v7, %v7323_v0  ;;  %v7331_v45 = vmul.f32 %v7322_v42, %v12823_v56  ;;  %v7332_v9 = vmul.f32 %v7322_v42, %v12829_v28  ;;  %v7333_v1 = vmul.f32 %v7322_v42, %v12835_v8 }
 0xa14   : > { %v7334_v55 = vmul.f32 %v7322_v42, %v12841_v6  ;;  %v7335_v53 = vmul.f32 %v7322_v42, %v12847_v63  ;;  %v7336_v40 = vmul.f32 %v7322_v42, %v12853_v23  ;;  %v7337_v60 = vmul.f32 %v7322_v42, %v12859_v39 }
 0xa15   : > { %v12998_v30 = vmul.f32 %v7322_v42, %v12865_v21  ;;  %v13001_v52 = vmul.f32 %v7322_v42, %v12871_v19  ;;  %v13004_v56 = vmul.f32 %v7322_v42, %v12877_v18  ;;  %v13007_v28 = vmul.f32 %v7322_v42, %v12883_v41 }
 0xa16   : > { %v13010_v8 = vmul.f32 %v7322_v42, %v12889_v38  ;;  %v7360_v6 = vadd.f32 %v12976_v7, %v7324_v62  ;;  %vm7391_vm7 = vcmp.ge.f32.partialorder %v7359_v50, 0.0  ;;  %v13014_v63 = vmul.f32 %v7322_v42, %v12895_v44 }
 0xa17   : > { %v13017_v23 = vmul.f32 %v7322_v42, %v12901_v46  ;;  %v7361_v39 = vadd.f32 %v12976_v7, %v7325_v11  ;;  %v7423_v21 = vmul.f32 0.2, %v7359_v50  ;;  %v13021_v19 = vmul.f32 %v7322_v42, %v12907_v22 }
 0xa18   : > { %v13024_v18 = vmul.f32 %v7322_v42, %v12913_v36  ;;  %v13027_v41 = vmul.f32 %v7322_v42, %v12919_v54  ;;  %v7362_v38 = vadd.f32 %v12976_v7, %v7326_v3  ;;  %v13031_v44 = vmul.f32 %v7322_v42, %v12925_v24 }
 0xa19   : > { %v13034_v46 = vmul.f32 %v7322_v42, %v12931_v47  ;;  %v7363_v14 = vadd.f32 %v12976_v7, %v7327_v5  ;;  %v7455_v58 = vsel %vm7391_vm7, %v7359_v50, %v7423_v21  ;;  %v13038_v22 = vmul.f32 %v7322_v42, %v12937_v61 }
 0xa1a   : > { %v13041_v36 = vmul.f32 %v7322_v42, %v12943_v51  ;;  %v7364_v54 = vadd.f32 %v12976_v7, %v7328_v31  ;;  %v7424_v27 = vmul.f32 0.2, %v7360_v6  ;;  %7487 = vst [vmem:[%s13044_s30] sm:$0xff] %v7455_v58  ;;  %v13048_v24 = vmul.f32 %v7322_v42, %v12949_v37 }
 0xa1b   : > { %v7365_v47 = vadd.f32 %v12976_v7, %v7329_v20  ;;  %vm7392_vm8 = vcmp.ge.f32.partialorder %v7360_v6, 0.0  ;;  %v7425_v43 = vmul.f32 0.2, %v7361_v39  ;;  %v13052_v61 = vmul.f32 %v7322_v42, %v12955_v48 }
 0xa1c   : > { %v7366_v51 = vadd.f32 %v12976_v7, %v7330_v2  ;;  %vm7393_vm9 = vcmp.ge.f32.partialorder %v7361_v39, 0.0  ;;  %v7426_v10 = vmul.f32 0.2, %v7362_v38  ;;  %v13056_v29 = vmul.f32 %v7322_v42, %v12961_v57 }
 0xa1d   : > { %v7367_v25 = vadd.f32 %v12976_v7, %v7331_v45  ;;  %vm7394_vm10 = vcmp.ge.f32.partialorder %v7362_v38, 0.0  ;;  %v7427_v34 = vmul.f32 0.2, %v7363_v14  ;;  %v7368_v37 = vadd.f32 %v12976_v7, %v7332_v9 }
 0xa1e   : > { %vm7395_vm11 = vcmp.ge.f32.partialorder %v7363_v14, 0.0  ;;  %v7428_v49 = vmul.f32 0.2, %v7364_v54  ;;  %v7456_v35 = vsel %vm7392_vm8, %v7360_v6, %v7424_v27  ;;  %v7369_v48 = vadd.f32 %v12976_v7, %v7333_v1 }
 0xa1f   : > { %vm7396_vm12 = vcmp.ge.f32.partialorder %v7364_v54, 0.0  ;;  %v7429_v32 = vmul.f32 0.2, %v7365_v47  ;;  %v7457_v15 = vsel %vm7393_vm9, %v7361_v39, %v7425_v43  ;;  %v7370_v33 = vadd.f32 %v12976_v7, %v7334_v55  ;;  %7488 = vst [vmem:[%s13044_s30 + $0x8] sm:$0xff] %v7456_v35 }
 0xa20   : > { %vm7397_vm13 = vcmp.ge.f32.partialorder %v7365_v47, 0.0  ;;  %v7430_v57 = vmul.f32 0.2, %v7366_v51  ;;  %v7458_v59 = vsel %vm7394_vm10, %v7362_v38, %v7426_v10  ;;  %v7371_v4 = vadd.f32 %v12976_v7, %v7335_v53  ;;  %7489 = vst [vmem:[%s13044_s30 + $0x10] sm:$0xff] %v7457_v15 }
 0xa21   : > { %vm7398_vm14 = vcmp.ge.f32.partialorder %v7366_v51, 0.0  ;;  %v7431_v13 = vmul.f32 0.2, %v7367_v25  ;;  %v7459_v16 = vsel %vm7395_vm11, %v7363_v14, %v7427_v34  ;;  %v7372_v12 = vadd.f32 %v12976_v7, %v7336_v40  ;;  %7490 = vst [vmem:[%s13044_s30 + $0x18] sm:$0xff] %v7458_v59 }
 0xa22   : > { %vm7399_vm15 = vcmp.ge.f32.partialorder %v7367_v25, 0.0  ;;  %v7432_v17 = vmul.f32 0.2, %v7368_v37  ;;  %v7460_v26 = vsel %vm7396_vm12, %v7364_v54, %v7428_v49  ;;  %v7373_v42 = vadd.f32 %v12976_v7, %v7337_v60  ;;  %7491 = vst [vmem:[%s13044_s30 + $0x20] sm:$0xff] %v7459_v16 }
 0xa23   : > { %vm7400_vm0 = vcmp.ge.f32.partialorder %v7368_v37, 0.0  ;;  %v7433_v0 = vmul.f32 0.2, %v7369_v48  ;;  %v7461_v62 = vsel %vm7397_vm13, %v7365_v47, %v7429_v32  ;;  %v7374_v11 = vadd.f32 %v12976_v7, %v12998_v30  ;;  %7492 = vst [vmem:[%s13044_s30 + $0x28] sm:$0xff] %v7460_v26 }
 0xa24   : > { %vm7401_vm1 = vcmp.ge.f32.partialorder %v7369_v48, 0.0  ;;  %v7434_v3 = vmul.f32 0.2, %v7370_v33  ;;  %v7462_v5 = vsel %vm7398_vm14, %v7366_v51, %v7430_v57  ;;  %v7375_v31 = vadd.f32 %v12976_v7, %v13001_v52  ;;  %7493 = vst [vmem:[%s13044_s30 + $0x30] sm:$0xff] %v7461_v62 }
 0xa25   : > { %vm7402_vm2 = vcmp.ge.f32.partialorder %v7370_v33, 0.0  ;;  %v7435_v50 = vmul.f32 0.2, %v7371_v4  ;;  %v7463_v20 = vsel %vm7399_vm15, %v7367_v25, %v7431_v13  ;;  %v7376_v2 = vadd.f32 %v12976_v7, %v13004_v56  ;;  %7494 = vst [vmem:[%s13044_s30 + $0x38] sm:$0xff] %v7462_v5 }
 0xa26   : > { %vm7403_vm3 = vcmp.ge.f32.partialorder %v7371_v4, 0.0  ;;  %v7436_v45 = vmul.f32 0.2, %v7372_v12  ;;  %v7464_v9 = vsel %vm7400_vm0, %v7368_v37, %v7432_v17  ;;  %v7377_v1 = vadd.f32 %v12976_v7, %v13007_v28  ;;  %7495 = vst [vmem:[%s13044_s30 + $0x40] sm:$0xff] %v7463_v20 }
 0xa27   : > { %vm7404_vm4 = vcmp.ge.f32.partialorder %v7372_v12, 0.0  ;;  %v7437_v55 = vmul.f32 0.2, %v7373_v42  ;;  %v7465_v53 = vsel %vm7401_vm1, %v7369_v48, %v7433_v0  ;;  %v7378_v40 = vadd.f32 %v12976_v7, %v13010_v8  ;;  %7496 = vst [vmem:[%s13044_s30 + $0x48] sm:$0xff] %v7464_v9 }
 0xa28   : > { %vm7405_vm5 = vcmp.ge.f32.partialorder %v7373_v42, 0.0  ;;  %v7438_v60 = vmul.f32 0.2, %v7374_v11  ;;  %v7466_v30 = vsel %vm7402_vm2, %v7370_v33, %v7434_v3  ;;  %v7379_v52 = vadd.f32 %v12976_v7, %v13014_v63  ;;  %7497 = vst [vmem:[%s13044_s30 + $0x50] sm:$0xff] %v7465_v53 }
 0xa29   : > { %vm7406_vm6 = vcmp.ge.f32.partialorder %v7374_v11, 0.0  ;;  %v7439_v56 = vmul.f32 0.2, %v7375_v31  ;;  %v7467_v28 = vsel %vm7403_vm3, %v7371_v4, %v7435_v50  ;;  %v7380_v6 = vadd.f32 %v12976_v7, %v13017_v23  ;;  %7498 = vst [vmem:[%s13044_s30 + $0x58] sm:$0xff] %v7466_v30 }
 0xa2a   : > { %vm7407_vm7 = vcmp.ge.f32.partialorder %v7375_v31, 0.0  ;;  %v7440_v8 = vmul.f32 0.2, %v7376_v2  ;;  %v7468_v39 = vsel %vm7404_vm4, %v7372_v12, %v7436_v45  ;;  %v7381_v21 = vadd.f32 %v12976_v7, %v13021_v19  ;;  %7499 = vst [vmem:[%s13044_s30 + $0x60] sm:$0xff] %v7467_v28 }
 0xa2b   : > { %vm7408_vm8 = vcmp.ge.f32.partialorder %v7376_v2, 0.0  ;;  %v7441_v63 = vmul.f32 0.2, %v7377_v1  ;;  %v7469_v38 = vsel %vm7405_vm5, %v7373_v42, %v7437_v55  ;;  %v7382_v14 = vadd.f32 %v12976_v7, %v13024_v18  ;;  %7500 = vst [vmem:[%s13044_s30 + $0x68] sm:$0xff] %v7468_v39 }
 0xa2c   : > { %vm7409_vm9 = vcmp.ge.f32.partialorder %v7377_v1, 0.0  ;;  %v7442_v23 = vmul.f32 0.2, %v7378_v40  ;;  %v7470_v58 = vsel %vm7406_vm6, %v7374_v11, %v7438_v60  ;;  %v7383_v54 = vadd.f32 %v12976_v7, %v13027_v41  ;;  %7501 = vst [vmem:[%s13044_s30 + $0x70] sm:$0xff] %v7469_v38 }
 0xa2d   : > { %vm7410_vm10 = vcmp.ge.f32.partialorder %v7378_v40, 0.0  ;;  %v7443_v19 = vmul.f32 0.2, %v7379_v52  ;;  %v7471_v27 = vsel %vm7407_vm7, %v7375_v31, %v7439_v56  ;;  %v7384_v47 = vadd.f32 %v12976_v7, %v13031_v44  ;;  %7502 = vst [vmem:[%s13044_s30 + $0x78] sm:$0xff] %v7470_v58 }
 0xa2e   : > { %vm7411_vm11 = vcmp.ge.f32.partialorder %v7379_v52, 0.0  ;;  %v7444_v18 = vmul.f32 0.2, %v7380_v6  ;;  %v7472_v43 = vsel %vm7408_vm8, %v7376_v2, %v7440_v8  ;;  %v7385_v51 = vadd.f32 %v12976_v7, %v13034_v46  ;;  %7503 = vst [vmem:[%s13044_s30 + $0x80] sm:$0xff] %v7471_v27 }
 0xa2f   : > { %vm7412_vm12 = vcmp.ge.f32.partialorder %v7380_v6, 0.0  ;;  %v7445_v41 = vmul.f32 0.2, %v7381_v21  ;;  %v7473_v10 = vsel %vm7409_vm9, %v7377_v1, %v7441_v63  ;;  %v7386_v25 = vadd.f32 %v12976_v7, %v13038_v22  ;;  %7504 = vst [vmem:[%s13044_s30 + $0x88] sm:$0xff] %v7472_v43 }
 0xa30   : > { %vm7413_vm13 = vcmp.ge.f32.partialorder %v7381_v21, 0.0  ;;  %v7446_v44 = vmul.f32 0.2, %v7382_v14  ;;  %v7474_v34 = vsel %vm7410_vm10, %v7378_v40, %v7442_v23  ;;  %v7387_v37 = vadd.f32 %v12976_v7, %v13041_v36  ;;  %7505 = vst [vmem:[%s13044_s30 + $0x90] sm:$0xff] %v7473_v10 }
 0xa31   : > { %vm7414_vm14 = vcmp.ge.f32.partialorder %v7382_v14, 0.0  ;;  %v7447_v46 = vmul.f32 0.2, %v7383_v54  ;;  %v7475_v49 = vsel %vm7411_vm11, %v7379_v52, %v7443_v19  ;;  %v7388_v35 = vadd.f32 %v12976_v7, %v13048_v24  ;;  %7506 = vst [vmem:[%s13044_s30 + $0x98] sm:$0xff] %v7474_v34 }
 0xa32   : > { %vm7415_vm15 = vcmp.ge.f32.partialorder %v7383_v54, 0.0  ;;  %v7448_v22 = vmul.f32 0.2, %v7384_v47  ;;  %v7476_v48 = vsel %vm7412_vm12, %v7380_v6, %v7444_v18  ;;  %v7389_v32 = vadd.f32 %v12976_v7, %v13052_v61  ;;  %7507 = vst [vmem:[%s13044_s30 + $0xa0] sm:$0xff] %v7475_v49 }
 0xa33   : > { %vm7416_vm0 = vcmp.ge.f32.partialorder %v7384_v47, 0.0  ;;  %v7449_v36 = vmul.f32 0.2, %v7385_v51  ;;  %v7477_v15 = vsel %vm7413_vm13, %v7381_v21, %v7445_v41  ;;  %v7390_v33 = vadd.f32 %v12976_v7, %v13056_v29  ;;  %7508 = vst [vmem:[%s13044_s30 + $0xa8] sm:$0xff] %v7476_v48 }
 0xa34   : > { %vm7417_vm1 = vcmp.ge.f32.partialorder %v7385_v51, 0.0  ;;  %v7450_v24 = vmul.f32 0.2, %v7386_v25  ;;  %v7478_v57 = vsel %vm7414_vm14, %v7382_v14, %v7446_v44  ;;  %vm7418_vm2 = vcmp.ge.f32.partialorder %v7386_v25, 0.0  ;;  %7509 = vst [vmem:[%s13044_s30 + $0xb0] sm:$0xff] %v7477_v15 }
 0xa35   : > { %v7451_v59 = vmul.f32 0.2, %v7387_v37  ;;  %v7479_v61 = vsel %vm7415_vm15, %v7383_v54, %v7447_v46  ;;  %vm7419_vm3 = vcmp.ge.f32.partialorder %v7387_v37, 0.0  ;;  %v7452_v4 = vmul.f32 0.2, %v7388_v35  ;;  %7510 = vst [vmem:[%s13044_s30 + $0xb8] sm:$0xff] %v7478_v57 }
 0xa36   : > { %v7480_v13 = vsel %vm7416_vm0, %v7384_v47, %v7448_v22  ;;  %vm7420_vm4 = vcmp.ge.f32.partialorder %v7388_v35, 0.0  ;;  %v7453_v7 = vmul.f32 0.2, %v7389_v32  ;;  %v7481_v29 = vsel %vm7417_vm1, %v7385_v51, %v7449_v36  ;;  %7511 = vst [vmem:[%s13044_s30 + $0xc0] sm:$0xff] %v7479_v61 }
 0xa37   : > { %vm7421_vm5 = vcmp.ge.f32.partialorder %v7389_v32, 0.0  ;;  %v7454_v16 = vmul.f32 0.2, %v7390_v33  ;;  %v7482_v12 = vsel %vm7418_vm2, %v7386_v25, %v7450_v24  ;;  %vm7422_vm6 = vcmp.ge.f32.partialorder %v7390_v33, 0.0  ;;  %7512 = vst [vmem:[%s13044_s30 + $0xc8] sm:$0xff] %v7480_v13 }
 0xa38   : > { %v7483_v17 = vsel %vm7419_vm3, %v7387_v37, %v7451_v59  ;;  %v7484_v26 = vsel %vm7420_vm4, %v7388_v35, %v7452_v4  ;;  %7513 = vst [vmem:[%s13044_s30 + $0xd0] sm:$0xff] %v7481_v29  ;;  %v7485_v42 = vsel %vm7421_vm5, %v7389_v32, %v7453_v7 }
 0xa39   : > { %7514 = vst [vmem:[%s13044_s30 + $0xd8] sm:$0xff] %v7482_v12  ;;  %v7486_v0 = vsel %vm7422_vm6, %v7390_v33, %v7454_v16 }
 0xa3a   : > { %7515 = vst [vmem:[%s13044_s30 + $0xe0] sm:$0xff] %v7483_v17 }
 0xa3b   : > { %7516 = vst [vmem:[%s13044_s30 + $0xe8] sm:$0xff] %v7484_v26 }
 0xa3c   : > { %7517 = vst [vmem:[%s13044_s30 + $0xf0] sm:$0xff] %v7485_v42 }
 0xa3d   : > { %7518 = vst [vmem:[%s13044_s30 + $0xf8] sm:$0xff] %v7486_v0 }
 0xa3e   : > { %10061 = shalt.err (!%p10058_p3)
}
 0xa3f   : > { %s10101_s27 = smov 128   ;;  %s10102_s30 = smov 8  }
 0xa40   : > { %9978 = dma.vmem_to_hbm [thread:$0]  (%p10196_p5), %s7533_s18, 4096, %s7535_s20, %s7520_s21, %s10101_s27, %s10101_s27, %s10102_s30  }
 0xa41 PF: > { %p9984_p4 = scmp.ge.s32.totalorder %s10096_s16, 2  ;;  %s7549_s29 = sand.u32 1, %s10084_s13  }
 0xa42   : > { %s7550_s28 = scalar_lea.sflag [#allocation5], %s7549_s29 }
 0xa43   : > { %p9981_p7 = pnand %p9984_p4, %p10200_p6 }
 0xa45   : > { %p9982_p8 = pneg %p9981_p7 }
 0xa47   : > { %10079 = dma.done.wait (%p9982_p8), %s7550_s28, 4096  }
 0xa48   : > { %10081 = vsyncadd (%p9982_p8), %s7550_s28, 4294963200  ;;  %p20_p9 = scmp.ge.s32.totalorder %s10183_s19, 4   ;;  %s13331_s13 = smov %s10088_s14 }
 0xa49   : > { %s13332_s14 = smov %s10092_s15  ;;  %s13333_s15 = smov %s10194_s22 }
 0xa4a   : > { %s13334_s16 = smov %s10183_s19  ;;  %22 = sbr.rel (!%p20_p9) target bundleno = 3 (0x3), region = 99 }
 0xa4f   :  { %7556 = vsyncpa [#allocation5], 1 }
 0xa50   :  { %7558 = vsyncpa [#allocation5 + $0x1], 1 }

</bundles_post_ra>
